<compile_context>
chip_gen: v5e
topology: v5e:2x2
jax: 0.10.0
libtpu: 0.0.40
codegen_flags: <defaults>
</compile_context>

<pallas_src>
import functools

import jax
import jax.numpy as jnp
from jax.experimental import pallas as pl
from jax.experimental.pallas import tpu as pltpu

GN_EPS = 1e-6
LN_EPS = 1e-5
NUM_GROUPS = 32
NUM_HEADS = 8

_NN = (((1,), (0,)), ((), ()))   # A @ B
_NT = (((1,), (1,)), ((), ()))   # A @ B.T (contract last dims, no transpose op)


def _mx(a, b):
    """MXU matmul A @ B: bf16 operands (native MXU dtype), f32 accumulation."""
    return jax.lax.dot_general(a.astype(jnp.bfloat16), b.astype(jnp.bfloat16),
                               _NN, preferred_element_type=jnp.float32)


def _mx_t(a, b):
    """MXU matmul A @ B.T: bf16 operands, f32 accumulation."""
    return jax.lax.dot_general(a.astype(jnp.bfloat16), b.astype(jnp.bfloat16),
                               _NT, preferred_element_type=jnp.float32)


def _f32dot(a, b):
    return jnp.dot(a, b, preferred_element_type=jnp.float32)


def _gelu_tanh(x):
    # tanh-approximate GELU: tanh runs on the EUP (separate VLIW slot), ~1e-3 abs err.
    c = 0.7978845608028654  # sqrt(2/pi)
    return 0.5 * x * (1.0 + jnp.tanh(c * (x + 0.044715 * x * x * x)))


def _layernorm(x, g, b):
    mean = jnp.mean(x, axis=-1, keepdims=True)
    var = jnp.mean((x - mean) ** 2, axis=-1, keepdims=True)
    return (x - mean) * jax.lax.rsqrt(var + LN_EPS) * g + b


# ------------------------------------------------------------- fused kernel

def _fused_kernel(x_ref, enc_ref, memb_ref, membT_ref, gn_g_ref, gn_b_ref,
                  pin_w_ref, pin_b_ref, pout_w_ref, pout_b_ref,
                  qmask_ref, hsel_ref, wkv_all_ref,
                  ln1_g_ref, ln1_b_ref, wqkv1_ref, wo1_ref, bo1_ref,
                  ln2_g_ref, ln2_b_ref, wq2_ref, wo2_ref, bo2_ref,
                  ln3_g_ref, ln3_b_ref, ffw1_ref, ffb1_ref, ffw2_ref, ffb2_ref,
                  o_ref, kv_scr, *, n_layers, t_self, num_heads):
    """Grid point = (batch b, layer l).  o_ref carries the hidden state across l."""
    l = pl.program_id(1)
    c = x_ref.shape[-1]

    # ---- layer-0 prologue: GroupNorm(32) + proj_in, and the hoisted cross-attn K|V ---
    @pl.when(l == 0)
    def _():
        x = x_ref[...]                                            # (T, C) f32
        gs = c // memb_ref.shape[-1]
        inv_cnt = 1.0 / float(t_self * gs)
        # centered two-pass group stats (no E[x^2]-E[x]^2 cancellation), f32 throughout
        mean_g = _f32dot(jnp.sum(x, axis=0, keepdims=True), memb_ref[...]) * inv_cnt
        mean_c = _f32dot(mean_g, membT_ref[...])                  # (1, C)
        d = x - mean_c
        var_g = _f32dot(jnp.sum(d * d, axis=0, keepdims=True), memb_ref[...]) * inv_cnt
        rstd_c = jax.lax.rsqrt(_f32dot(var_g, membT_ref[...]) + GN_EPS)
        xn = d * (rstd_c * gn_g_ref[...]) + gn_b_ref[...]
        o_ref[...] = _mx(xn, pin_w_ref[...]) + pin_b_ref[...]     # proj_in (1x1 conv)

        # layer-invariant cross-attention K|V: ONE fused matmul for all layers
        kv_all = _f32dot(jnp.zeros((), jnp.float32), jnp.zeros((), jnp.float32)) * 0.0 \
            if False else _mx(enc_ref[...], wkv_all_ref[...])     # (Tk, L*2C) f32
        for li in range(n_layers):
            kv_scr[li] = kv_all[:, li * 2 * c:(li + 1) * 2 * c]   # static lane slices

    # ---- multi-head attention, heads tiled along sublanes (exact per-head softmax) ---
    def mha(q, k, v):
        # q: (T, C) with the 1/sqrt(hd) scale folded into Wq; k, v: (Tk, C)
        qm = jnp.tile(q, (num_heads, 1)) * qmask_ref[...]         # (H*T, C), head-masked
        s = _mx_t(qm, k)                                          # (H*T, Tk) per-head
        p = jnp.exp(s - jnp.max(s, axis=-1, keepdims=True))       # exact per-head max
        p = p * pl.reciprocal(jnp.sum(p, axis=-1, keepdims=True), approx=True)  # >= 1
        o2 = _mx(p, v)                                            # (H*T, C)
        hsel = hsel_ref[...]                                      # (H, C) head->channel
        out = o2[0:t_self] * hsel[0:1]
        for hh in range(1, num_heads):
            out = out + o2[hh * t_self:(hh + 1) * t_self] * hsel[hh:hh + 1]
        return out                                                # (T, C)

    h = o_ref[...]                                                # hidden state (carried)

    # self-attention (fused QKV weight (C, 3C)) + residual
    xn1 = _layernorm(h, ln1_g_ref[0], ln1_b_ref[0])
    qkv = _mx(xn1, wqkv1_ref[0])                                  # (T, 3C)
    att = mha(qkv[:, :c], qkv[:, c:2 * c], qkv[:, 2 * c:])
    h = h + _mx(att, wo1_ref[0]) + bo1_ref[0]                     # dropout p=0 -> identity

    # cross-attention (K|V precomputed at l == 0) + residual
    xn2 = _layernorm(h, ln2_g_ref[0], ln2_b_ref[0])
    kv = kv_scr[l]                                                # (Tk, 2C)
    att = mha(_mx(xn2, wq2_ref[0]), kv[:, :c], kv[:, c:])
    h = h + _mx(att, wo2_ref[0]) + bo2_ref[0]

    # GEGLU feed-forward + residual
    xn3 = _layernorm(h, ln3_g_ref[0], ln3_b_ref[0])
    proj = _mx(xn3, ffw1_ref[0]) + ffb1_ref[0]                    # (T, 8C)
    dh = proj.shape[-1] // 2                                      # 4C: lane-tile aligned
    h = h + _mx(proj[:, :dh] * _gelu_tanh(proj[:, dh:]), ffw2_ref[0]) + ffb2_ref[0]

    # ---- write back: hidden state, or (at the last layer) proj_out + outer residual --
    @pl.when(l != n_layers - 1)
    def _():
        o_ref[...] = h

    @pl.when(l == n_layers - 1)
    def _():
        o_ref[...] = _mx(h, pout_w_ref[...]) + pout_b_ref[...] + x_ref[...]


# ------------------------------------------------------------- model wrapper

def transformer2d_forward(params, x_nchw, enc):
    B, C, H, W = x_nchw.shape
    T = H * W
    Tk, E = enc.shape[1], enc.shape[2]
    L = len(params["blocks"])
    hd = C // NUM_HEADS
    scale = hd ** -0.5
    f32, bf16 = jnp.float32, jnp.bfloat16

    x2 = jnp.transpose(x_nchw, (0, 2, 3, 1)).reshape(B * T, C)
    enc2 = enc.reshape(B * Tk, E)

    # ---- host-side packing: fuse QKV / all-layer K|V, fold attn scale into Wq,
    #      stack per-layer weights (leading L axis) and cast weights to bf16.
    blocks = params["blocks"]
    stack_w = lambda fn: jnp.stack([fn(bl) for bl in blocks], axis=0).astype(bf16)
    stack_v = lambda key: jnp.stack([bl[key] for bl in blocks], axis=0)          # f32

    wqkv1 = stack_w(lambda bl: jnp.concatenate(
        [bl["a1_wq"] * scale, bl["a1_wk"], bl["a1_wv"]], axis=1))                # (L, C, 3C)
    wq2 = stack_w(lambda bl: bl["a2_wq"] * scale)                                # (L, C, C)
    wo1 = stack_w(lambda bl: bl["a1_wo"])
    wo2 = stack_w(lambda bl: bl["a2_wo"])
    ffw1 = stack_w(lambda bl: bl["ff_w1"])                                       # (L, C, 8C)
    ffw2 = stack_w(lambda bl: bl["ff_w2"])                                       # (L, 4C, C)
    wkv_all = jnp.concatenate(
        [jnp.concatenate([bl["a2_wk"], bl["a2_wv"]], axis=1) for bl in blocks],
        axis=1).astype(bf16)                                                     # (E, L*2C)

    ln1_g, ln1_b = stack_v("ln1_g"), stack_v("ln1_b")
    ln2_g, ln2_b = stack_v("ln2_g"), stack_v("ln2_b")
    ln3_g, ln3_b = stack_v("ln3_g"), stack_v("ln3_b")
    bo1, bo2 = stack_v("a1_bo"), stack_v("a2_bo")
    ffb1, ffb2 = stack_v("ff_b1"), stack_v("ff_b2")

    pin_w = params["proj_in_w"].astype(bf16)
    pout_w = params["proj_out_w"].astype(bf16)

    # ---- constant 0/1 masks: head <-> channel maps and group-membership matrix
    chan_head = jnp.arange(C) // hd
    hsel = (jnp.arange(NUM_HEADS)[:, None] == chan_head[None, :]).astype(f32)          # (H, C)
    qmask = (jnp.arange(NUM_HEADS * T)[:, None] // T == chan_head[None, :]).astype(f32)  # (H*T, C)
    memb = (jnp.arange(C)[:, None] // (C // NUM_GROUPS) ==
            jnp.arange(NUM_GROUPS)[None, :]).astype(f32)                                # (C, G)
    membT = memb.T

    operands = (x2, enc2, memb, membT,
                params["gn_g"], params["gn_b"], pin_w, params["proj_in_b"],
                pout_w, params["proj_out_b"], qmask, hsel, wkv_all,
                ln1_g, ln1_b, wqkv1, wo1, bo1,
                ln2_g, ln2_b, wq2, wo2, bo2,
                ln3_g, ln3_b, ffw1, ffb1, ffw2, ffb2)

    const2d = lambda b, l: (0, 0)
    batch2d = lambda b, l: (b, 0)
    layer3d = lambda b, l: (l, 0, 0)
    in_specs = [
        pl.BlockSpec((T, C), batch2d),                   # x
        pl.BlockSpec((Tk, E), batch2d),                  # enc
        pl.BlockSpec((C, NUM_GROUPS), const2d),          # memb
        pl.BlockSpec((NUM_GROUPS, C), const2d),          # membT
        pl.BlockSpec((1, C), const2d),                   # gn_g
        pl.BlockSpec((1, C), const2d),                   # gn_b
        pl.BlockSpec((C, C), const2d),                   # proj_in_w
        pl.BlockSpec((1, C), const2d),                   # proj_in_b
        pl.BlockSpec((C, C), const2d),                   # proj_out_w
        pl.BlockSpec((1, C), const2d),                   # proj_out_b
        pl.BlockSpec((NUM_HEADS * T, C), const2d),       # qmask
        pl.BlockSpec((NUM_HEADS, C), const2d),           # hsel
        pl.BlockSpec((E, 2 * C * L), const2d),           # wkv_all (all layers, fused)
        pl.BlockSpec((1, 1, C), layer3d),                # ln1_g
        pl.BlockSpec((1, 1, C), layer3d),                # ln1_b
        pl.BlockSpec((1, C, 3 * C), layer3d),            # wqkv1
        pl.BlockSpec((1, C, C), layer3d),                # wo1
        pl.BlockSpec((1, 1, C), layer3d),                # bo1
        pl.BlockSpec((1, 1, C), layer3d),                # ln2_g
        pl.BlockSpec((1, 1, C), layer3d),                # ln2_b
        pl.BlockSpec((1, C, C), layer3d),                # wq2
        pl.BlockSpec((1, C, C), layer3d),                # wo2
        pl.BlockSpec((1, 1, C), layer3d),                # bo2
        pl.BlockSpec((1, 1, C), layer3d),                # ln3_g
        pl.BlockSpec((1, 1, C), layer3d),                # ln3_b
        pl.BlockSpec((1, C, 8 * C), layer3d),            # ffw1
        pl.BlockSpec((1, 1, 8 * C), layer3d),            # ffb1
        pl.BlockSpec((1, 4 * C, C), layer3d),            # ffw2
        pl.BlockSpec((1, 1, C), layer3d),                # ffb2
    ]

    # advisory cost estimate for XLA scheduling around the custom call
    mm = lambda m, k, n: 2 * m * k * n
    flops_layer = (mm(T, C, 3 * C)
                   + mm(NUM_HEADS * T, C, T) + mm(NUM_HEADS * T, T, C) + mm(T, C, C)
                   + mm(T, C, C) + mm(NUM_HEADS * T, C, Tk) + mm(NUM_HEADS * T, Tk, C)
                   + mm(T, C, C) + mm(T, C, 8 * C) + mm(T, 4 * C, C))
    flops = B * (2 * mm(T, C, C) + mm(Tk, E, 2 * C * L) + L * flops_layer)
    transc = B * L * (NUM_HEADS * T * (T + Tk) + T * 4 * C)
    bytes_accessed = sum(int(a.size) * int(a.dtype.itemsize) for a in operands) \
        + B * T * C * 4

    kernel = functools.partial(_fused_kernel, n_layers=L, t_self=T, num_heads=NUM_HEADS)
    out2 = pl.pallas_call(
        kernel,
        out_shape=jax.ShapeDtypeStruct((B * T, C), jnp.float32),
        grid_spec=pltpu.PrefetchScalarGridSpec(
            num_scalar_prefetch=0,
            grid=(B, L),
            in_specs=in_specs,
            out_specs=pl.BlockSpec((T, C), batch2d),
            scratch_shapes=[pltpu.VMEM((L, Tk, 2 * C), jnp.float32)]),
        compiler_params=pltpu.CompilerParams(
            dimension_semantics=("parallel", "arbitrary"),
            vmem_limit_bytes=32 * 1024 * 1024),
        cost_estimate=pl.CostEstimate(flops=int(flops), transcendentals=int(transc),
                                      bytes_accessed=int(bytes_accessed)),
    )(*operands)
    return jnp.transpose(out2.reshape(B, H, W, C), (0, 3, 1, 2))


# ------------------------------------------------------------- params / ref

def init_params(key, channels, n_layers, cross_dim=768):
    keys = iter(jax.random.split(key, 512))

    def w(din, dout, scale=0.05):
        return scale * jax.random.normal(next(keys), (din, dout), jnp.float32)

    def vec(d, base=0.0, scale=0.02):
        return base + scale * jax.random.normal(next(keys), (1, d), jnp.float32)

    params = {
        "gn_g": vec(channels, 1.0), "gn_b": vec(channels),
        "proj_in_w": w(channels, channels), "proj_in_b": vec(channels),
        "proj_out_w": w(channels, channels), "proj_out_b": vec(channels),
        "blocks": [],
    }
    for _ in range(n_layers):
        params["blocks"].append({
            "ln1_g": vec(channels, 1.0), "ln1_b": vec(channels),
            "a1_wq": w(channels, channels), "a1_wk": w(channels, channels),
            "a1_wv": w(channels, channels), "a1_wo": w(channels, channels),
            "a1_bo": vec(channels),
            "ln2_g": vec(channels, 1.0), "ln2_b": vec(channels),
            "a2_wq": w(channels, channels), "a2_wk": w(cross_dim, channels),
            "a2_wv": w(cross_dim, channels), "a2_wo": w(channels, channels),
            "a2_bo": vec(channels),
            "ln3_g": vec(channels, 1.0), "ln3_b": vec(channels),
            "ff_w1": w(channels, 8 * channels), "ff_b1": vec(8 * channels),
            "ff_w2": w(4 * channels, channels), "ff_b2": vec(channels),
        })
    return params


def _ref_attn(x, ctx, wq, wk, wv, wo, bo):
    hi = jax.lax.Precision.HIGHEST
    B, T, C = x.shape
    hd = C // NUM_HEADS
    scale = hd ** -0.5
    q = jnp.einsum("btc,cd->btd", x, wq, precision=hi)
    k = jnp.einsum("bsc,cd->bsd", ctx, wk, precision=hi)
    v = jnp.einsum("bsc,cd->bsd", ctx, wv, precision=hi)
    q = q.reshape(B, T, NUM_HEADS, hd).transpose(0, 2, 1, 3)
    k = k.reshape(B, -1, NUM_HEADS, hd).transpose(0, 2, 1, 3)
    v = v.reshape(B, -1, NUM_HEADS, hd).transpose(0, 2, 1, 3)
    s = jnp.einsum("bhtd,bhsd->bhts", q, k, precision=hi) * scale
    p = jax.nn.softmax(s, axis=-1)
    o = jnp.einsum("bhts,bhsd->bhtd", p, v, precision=hi)
    o = o.transpose(0, 2, 1, 3).reshape(B, T, C)
    return jnp.einsum("btc,cd->btd", o, wo, precision=hi) + bo[0]


def reference_forward(params, x_nchw, enc):
    hi = jax.lax.Precision.HIGHEST
    B, C, H, W = x_nchw.shape
    x = jnp.transpose(x_nchw, (0, 2, 3, 1)).reshape(B, H * W, C)
    res = x
    gs = C // NUM_GROUPS
    xg = x.reshape(B, H * W, NUM_GROUPS, gs)
    mean = xg.mean(axis=(1, 3), keepdims=True)
    var = ((xg - mean) ** 2).mean(axis=(1, 3), keepdims=True)
    xn = ((xg - mean) / jnp.sqrt(var + GN_EPS)).reshape(B, H * W, C)
    xn = xn * params["gn_g"][0] + params["gn_b"][0]
    h = jnp.einsum("btc,cd->btd", xn, params["proj_in_w"], precision=hi) + params["proj_in_b"][0]
    for blk in params["blocks"]:
        xn1 = _layernorm(h, blk["ln1_g"][0], blk["ln1_b"][0])
        h = h + _ref_attn(xn1, xn1, blk["a1_wq"], blk["a1_wk"], blk["a1_wv"],
                          blk["a1_wo"], blk["a1_bo"])
        xn2 = _layernorm(h, blk["ln2_g"][0], blk["ln2_b"][0])
        h = h + _ref_attn(xn2, enc, blk["a2_wq"], blk["a2_wk"], blk["a2_wv"],
                          blk["a2_wo"], blk["a2_bo"])
        xn3 = _layernorm(h, blk["ln3_g"][0], blk["ln3_b"][0])
        proj = jnp.einsum("btc,cd->btd", xn3, blk["ff_w1"], precision=hi) + blk["ff_b1"][0]
        d = proj.shape[-1] // 2
        ff = proj[..., :d] * jax.nn.gelu(proj[..., d:], approximate=False)
        h = h + jnp.einsum("btc,cd->btd", ff, blk["ff_w2"], precision=hi) + blk["ff_b2"][0]
    out = jnp.einsum("btc,cd->btd", h, params["proj_out_w"], precision=hi) + params["proj_out_b"][0]
    out = out + res
    return jnp.transpose(out.reshape(B, H, W, C), (0, 3, 1, 2))


# ---------------------------------------------------------------------- main

if __name__ == "__main__":
    key = jax.random.PRNGKey(0)
    k_x, k_e, k_p = jax.random.split(key, 3)

    # in_channels == out_channels (required by the final residual add), divisible by 32
    # for GroupNorm; num_heads=8 -> head_dim = 64/8 = 8.
    B, C, H, W = 2, 64, 8, 8
    n_layers = 2
    enc_len, cross_dim = 8, 768

    x = jax.random.normal(k_x, (B, C, H, W), jnp.float32)          # NCHW like PyTorch
    enc = jax.random.normal(k_e, (B, enc_len, cross_dim), jnp.float32)
    params = init_params(k_p, C, n_layers, cross_dim)

    out = jax.block_until_ready(transformer2d_forward(params, x, enc))
    ref = jax.block_until_ready(reference_forward(params, x, enc))

    assert out.shape == (B, C, H, W), out.shape
    err = float(jnp.max(jnp.abs(out - ref)))
    assert err < 1e-2, f"max abs error too large: {err}"
    print("KERNEL_OK")
</pallas_src>

<mosaic_0001>
module attributes {stable_mosaic.version = 11 : i64} {
  func.func @_fused_kernel(%arg0: i32, %arg1: i32, %arg2: memref<64x64xf32, #tpu.memory_space<vmem>>, %arg3: memref<8x768xf32, #tpu.memory_space<vmem>>, %arg4: memref<64x32xf32, #tpu.memory_space<vmem>>, %arg5: memref<32x64xf32, #tpu.memory_space<vmem>>, %arg6: memref<1x64xf32, #tpu.memory_space<vmem>>, %arg7: memref<1x64xf32, #tpu.memory_space<vmem>>, %arg8: memref<64x64xbf16, #tpu.memory_space<vmem>>, %arg9: memref<1x64xf32, #tpu.memory_space<vmem>>, %arg10: memref<64x64xbf16, #tpu.memory_space<vmem>>, %arg11: memref<1x64xf32, #tpu.memory_space<vmem>>, %arg12: memref<512x64xf32, #tpu.memory_space<vmem>>, %arg13: memref<8x64xf32, #tpu.memory_space<vmem>>, %arg14: memref<768x256xbf16, #tpu.memory_space<vmem>>, %arg15: memref<1x1x64xf32, #tpu.memory_space<vmem>>, %arg16: memref<1x1x64xf32, #tpu.memory_space<vmem>>, %arg17: memref<1x64x192xbf16, #tpu.memory_space<vmem>>, %arg18: memref<1x64x64xbf16, #tpu.memory_space<vmem>>, %arg19: memref<1x1x64xf32, #tpu.memory_space<vmem>>, %arg20: memref<1x1x64xf32, #tpu.memory_space<vmem>>, %arg21: memref<1x1x64xf32, #tpu.memory_space<vmem>>, %arg22: memref<1x64x64xbf16, #tpu.memory_space<vmem>>, %arg23: memref<1x64x64xbf16, #tpu.memory_space<vmem>>, %arg24: memref<1x1x64xf32, #tpu.memory_space<vmem>>, %arg25: memref<1x1x64xf32, #tpu.memory_space<vmem>>, %arg26: memref<1x1x64xf32, #tpu.memory_space<vmem>>, %arg27: memref<1x64x512xbf16, #tpu.memory_space<vmem>>, %arg28: memref<1x1x512xf32, #tpu.memory_space<vmem>>, %arg29: memref<1x256x64xbf16, #tpu.memory_space<vmem>>, %arg30: memref<1x1x64xf32, #tpu.memory_space<vmem>>, %arg31: memref<64x64xf32, #tpu.memory_space<vmem>>, %arg32: memref<2x8x128xf32, #tpu.memory_space<vmem>>) attributes {dimension_semantics = [#tpu.dimension_semantics<parallel>, #tpu.dimension_semantics<arbitrary>], iteration_bounds = array<i64: 2, 2>, scalar_prefetch = 0 : i64, scratch_operands = 1 : i64, tpu.core_type = #tpu.core_type<tc>, window_params = [{transform_indices = @transform_0, window_bounds = array<i64: 64, 64>}, {transform_indices = @transform_1, window_bounds = array<i64: 8, 768>}, {pipeline_mode = #tpu.pipeline_mode<synchronous>, transform_indices = @transform_2, window_bounds = array<i64: 64, 32>}, {pipeline_mode = #tpu.pipeline_mode<synchronous>, transform_indices = @transform_3, window_bounds = array<i64: 32, 64>}, {pipeline_mode = #tpu.pipeline_mode<synchronous>, transform_indices = @transform_4, window_bounds = array<i64: 1, 64>}, {pipeline_mode = #tpu.pipeline_mode<synchronous>, transform_indices = @transform_5, window_bounds = array<i64: 1, 64>}, {pipeline_mode = #tpu.pipeline_mode<synchronous>, transform_indices = @transform_6, window_bounds = array<i64: 64, 64>}, {pipeline_mode = #tpu.pipeline_mode<synchronous>, transform_indices = @transform_7, window_bounds = array<i64: 1, 64>}, {pipeline_mode = #tpu.pipeline_mode<synchronous>, transform_indices = @transform_8, window_bounds = array<i64: 64, 64>}, {pipeline_mode = #tpu.pipeline_mode<synchronous>, transform_indices = @transform_9, window_bounds = array<i64: 1, 64>}, {pipeline_mode = #tpu.pipeline_mode<synchronous>, transform_indices = @transform_10, window_bounds = array<i64: 512, 64>}, {pipeline_mode = #tpu.pipeline_mode<synchronous>, transform_indices = @transform_11, window_bounds = array<i64: 8, 64>}, {pipeline_mode = #tpu.pipeline_mode<synchronous>, transform_indices = @transform_12, window_bounds = array<i64: 768, 256>}, {transform_indices = @transform_13, window_bounds = array<i64: 1, 1, 64>}, {transform_indices = @transform_14, window_bounds = array<i64: 1, 1, 64>}, {transform_indices = @transform_15, window_bounds = array<i64: 1, 64, 192>}, {transform_indices = @transform_16, window_bounds = array<i64: 1, 64, 64>}, {transform_indices = @transform_17, window_bounds = array<i64: 1, 1, 64>}, {transform_indices = @transform_18, window_bounds = array<i64: 1, 1, 64>}, {transform_indices = @transform_19, window_bounds = array<i64: 1, 1, 64>}, {transform_indices = @transform_20, window_bounds = array<i64: 1, 64, 64>}, {transform_indices = @transform_21, window_bounds = array<i64: 1, 64, 64>}, {transform_indices = @transform_22, window_bounds = array<i64: 1, 1, 64>}, {transform_indices = @transform_23, window_bounds = array<i64: 1, 1, 64>}, {transform_indices = @transform_24, window_bounds = array<i64: 1, 1, 64>}, {transform_indices = @transform_25, window_bounds = array<i64: 1, 64, 512>}, {transform_indices = @transform_26, window_bounds = array<i64: 1, 1, 512>}, {transform_indices = @transform_27, window_bounds = array<i64: 1, 256, 64>}, {transform_indices = @transform_28, window_bounds = array<i64: 1, 1, 64>}, {transform_indices = @transform_29, window_bounds = array<i64: 64, 64>}]} {
    %c0_i32 = arith.constant 0 : i32
    %0 = arith.cmpi eq, %arg1, %c0_i32 : i32
    %1 = arith.extui %0 : i1 to i32
    %c0_i32_0 = arith.constant 0 : i32
    %2 = arith.cmpi ne, %1, %c0_i32_0 : i32
    scf.if %2 {
      %c0_95 = arith.constant 0 : index
      %c0_96 = arith.constant 0 : index
      %273 = vector.load %arg2[%c0_95, %c0_96] : memref<64x64xf32, #tpu.memory_space<vmem>>, vector<64x64xf32>
      %cst_97 = arith.constant dense<0.000000e+00> : vector<64xf32>
      %274 = vector.multi_reduction <add>, %273, %cst_97 [0] : vector<64x64xf32> to vector<64xf32>
      %275 = vector.shape_cast %274 : vector<64xf32> to vector<1x64xf32>
      %c0_98 = arith.constant 0 : index
      %c0_99 = arith.constant 0 : index
      %276 = vector.load %arg4[%c0_98, %c0_99] : memref<64x32xf32, #tpu.memory_space<vmem>>, vector<64x32xf32>
      %cst_100 = arith.constant dense<0.000000e+00> : vector<1x32xf32>
      %277 = tpu.matmul %275, %276, %cst_100 {dimension_numbers = #tpu.dot_dimension_numbers<[1], [0], [0], [1], [0, 0, 1, 1], [], []>} : vector<1x64xf32>, vector<64x32xf32>, vector<1x32xf32> -> vector<1x32xf32>
      %cst_101 = arith.constant 7.812500e-03 : f32
      %278 = vector.broadcast %cst_101 : f32 to vector<1x32xf32>
      %279 = arith.mulf %277, %278 : vector<1x32xf32>
      %c0_102 = arith.constant 0 : index
      %c0_103 = arith.constant 0 : index
      %280 = vector.load %arg5[%c0_102, %c0_103] : memref<32x64xf32, #tpu.memory_space<vmem>>, vector<32x64xf32>
      %cst_104 = arith.constant dense<0.000000e+00> : vector<1x64xf32>
      %281 = tpu.matmul %279, %280, %cst_104 {dimension_numbers = #tpu.dot_dimension_numbers<[1], [0], [0], [1], [0, 0, 1, 1], [], []>} : vector<1x32xf32>, vector<32x64xf32>, vector<1x64xf32> -> vector<1x64xf32>
      %282 = vector.broadcast %281 : vector<1x64xf32> to vector<64x64xf32>
      %283 = arith.subf %273, %282 : vector<64x64xf32>
      %284 = arith.mulf %283, %283 : vector<64x64xf32>
      %cst_105 = arith.constant dense<0.000000e+00> : vector<64xf32>
      %285 = vector.multi_reduction <add>, %284, %cst_105 [0] : vector<64x64xf32> to vector<64xf32>
      %286 = vector.shape_cast %285 : vector<64xf32> to vector<1x64xf32>
      %c0_106 = arith.constant 0 : index
      %c0_107 = arith.constant 0 : index
      %287 = vector.load %arg4[%c0_106, %c0_107] : memref<64x32xf32, #tpu.memory_space<vmem>>, vector<64x32xf32>
      %cst_108 = arith.constant dense<0.000000e+00> : vector<1x32xf32>
      %288 = tpu.matmul %286, %287, %cst_108 {dimension_numbers = #tpu.dot_dimension_numbers<[1], [0], [0], [1], [0, 0, 1, 1], [], []>} : vector<1x64xf32>, vector<64x32xf32>, vector<1x32xf32> -> vector<1x32xf32>
      %cst_109 = arith.constant 7.812500e-03 : f32
      %289 = vector.broadcast %cst_109 : f32 to vector<1x32xf32>
      %290 = arith.mulf %288, %289 : vector<1x32xf32>
      %c0_110 = arith.constant 0 : index
      %c0_111 = arith.constant 0 : index
      %291 = vector.load %arg5[%c0_110, %c0_111] : memref<32x64xf32, #tpu.memory_space<vmem>>, vector<32x64xf32>
      %cst_112 = arith.constant dense<0.000000e+00> : vector<1x64xf32>
      %292 = tpu.matmul %290, %291, %cst_112 {dimension_numbers = #tpu.dot_dimension_numbers<[1], [0], [0], [1], [0, 0, 1, 1], [], []>} : vector<1x32xf32>, vector<32x64xf32>, vector<1x64xf32> -> vector<1x64xf32>
      %cst_113 = arith.constant 9.99999997E-7 : f32
      %293 = vector.broadcast %cst_113 : f32 to vector<1x64xf32>
      %294 = arith.addf %292, %293 : vector<1x64xf32>
      %295 = math.rsqrt %294 : vector<1x64xf32>
      %c0_114 = arith.constant 0 : index
      %c0_115 = arith.constant 0 : index
      %296 = vector.load %arg6[%c0_114, %c0_115] : memref<1x64xf32, #tpu.memory_space<vmem>>, vector<1x64xf32>
      %297 = arith.mulf %295, %296 : vector<1x64xf32>
      %298 = vector.broadcast %297 : vector<1x64xf32> to vector<64x64xf32>
      %299 = arith.mulf %283, %298 : vector<64x64xf32>
      %c0_116 = arith.constant 0 : index
      %c0_117 = arith.constant 0 : index
      %300 = vector.load %arg7[%c0_116, %c0_117] : memref<1x64xf32, #tpu.memory_space<vmem>>, vector<1x64xf32>
      %301 = vector.broadcast %300 : vector<1x64xf32> to vector<64x64xf32>
      %302 = arith.addf %299, %301 : vector<64x64xf32>
      %c0_118 = arith.constant 0 : index
      %c0_119 = arith.constant 0 : index
      %303 = vector.load %arg8[%c0_118, %c0_119] : memref<64x64xbf16, #tpu.memory_space<vmem>>, vector<64x64xbf16>
      %304 = arith.truncf %302 : vector<64x64xf32> to vector<64x64xbf16>
      %cst_120 = arith.constant dense<0.000000e+00> : vector<64x64xf32>
      %305 = tpu.matmul %304, %303, %cst_120 {dimension_numbers = #tpu.dot_dimension_numbers<[1], [0], [0], [1], [0, 0, 1, 1], [], []>} : vector<64x64xbf16>, vector<64x64xbf16>, vector<64x64xf32> -> vector<64x64xf32>
      %c0_121 = arith.constant 0 : index
      %c0_122 = arith.constant 0 : index
      %306 = vector.load %arg9[%c0_121, %c0_122] : memref<1x64xf32, #tpu.memory_space<vmem>>, vector<1x64xf32>
      %307 = vector.broadcast %306 : vector<1x64xf32> to vector<64x64xf32>
      %308 = arith.addf %305, %307 : vector<64x64xf32>
      %c0_123 = arith.constant 0 : index
      %c0_124 = arith.constant 0 : index
      %309 = vector.load %arg31[%c0_123, %c0_124] : memref<64x64xf32, #tpu.memory_space<vmem>>, vector<64x64xf32>
      tpu.vector_store %arg31[%c0_123, %c0_124], %308 {strides = array<i32>} : memref<64x64xf32, #tpu.memory_space<vmem>>, vector<64x64xf32>,
      %c0_125 = arith.constant 0 : index
      %c0_126 = arith.constant 0 : index
      %310 = vector.load %arg3[%c0_125, %c0_126] : memref<8x768xf32, #tpu.memory_space<vmem>>, vector<8x768xf32>
      %c0_127 = arith.constant 0 : index
      %c0_128 = arith.constant 0 : index
      %311 = vector.load %arg14[%c0_127, %c0_128] : memref<768x256xbf16, #tpu.memory_space<vmem>>, vector<768x256xbf16>
      %312 = arith.truncf %310 : vector<8x768xf32> to vector<8x768xbf16>
      %cst_129 = arith.constant dense<0.000000e+00> : vector<8x256xf32>
      %313 = tpu.matmul %312, %311, %cst_129 {dimension_numbers = #tpu.dot_dimension_numbers<[1], [0], [0], [1], [0, 0, 1, 1], [], []>} : vector<8x768xbf16>, vector<768x256xbf16>, vector<8x256xf32> -> vector<8x256xf32>
      %314 = vector.extract_strided_slice %313 {offsets = [0, 0], sizes = [8, 128], strides = [1, 1]} : vector<8x256xf32> to vector<8x128xf32>
      %c0_130 = arith.constant 0 : index
      %c0_131 = arith.constant 0 : index
      %c0_132 = arith.constant 0 : index
      %315 = vector.load %arg32[%c0_130, %c0_131, %c0_132] : memref<2x8x128xf32, #tpu.memory_space<vmem>>, vector<1x8x128xf32>
      %316 = vector.shape_cast %315 : vector<1x8x128xf32> to vector<8x128xf32>
      %317 = vector.shape_cast %314 : vector<8x128xf32> to vector<1x8x128xf32>
      tpu.vector_store %arg32[%c0_130, %c0_131, %c0_132], %317 {strides = array<i32>} : memref<2x8x128xf32, #tpu.memory_space<vmem>>, vector<1x8x128xf32>,
      %318 = vector.extract_strided_slice %313 {offsets = [0, 128], sizes = [8, 128], strides = [1, 1]} : vector<8x256xf32> to vector<8x128xf32>
      %c1 = arith.constant 1 : index
      %c0_133 = arith.constant 0 : index
      %c0_134 = arith.constant 0 : index
      %319 = vector.load %arg32[%c1, %c0_133, %c0_134] : memref<2x8x128xf32, #tpu.memory_space<vmem>>, vector<1x8x128xf32>
      %320 = vector.shape_cast %319 : vector<1x8x128xf32> to vector<8x128xf32>
      %321 = vector.shape_cast %318 : vector<8x128xf32> to vector<1x8x128xf32>
      tpu.vector_store %arg32[%c1, %c0_133, %c0_134], %321 {strides = array<i32>} : memref<2x8x128xf32, #tpu.memory_space<vmem>>, vector<1x8x128xf32>,
    } else {
    }
    %c0 = arith.constant 0 : index
    %c0_1 = arith.constant 0 : index
    %3 = vector.load %arg31[%c0, %c0_1] : memref<64x64xf32, #tpu.memory_space<vmem>>, vector<64x64xf32>
    %c0_2 = arith.constant 0 : index
    %c0_3 = arith.constant 0 : index
    %c0_4 = arith.constant 0 : index
    %4 = vector.load %arg15[%c0_2, %c0_3, %c0_4] : memref<1x1x64xf32, #tpu.memory_space<vmem>>, vector<1x1x64xf32>
    %5 = vector.shape_cast %4 : vector<1x1x64xf32> to vector<1x64xf32>
    %c0_5 = arith.constant 0 : index
    %c0_6 = arith.constant 0 : index
    %c0_7 = arith.constant 0 : index
    %6 = vector.load %arg16[%c0_5, %c0_6, %c0_7] : memref<1x1x64xf32, #tpu.memory_space<vmem>>, vector<1x1x64xf32>
    %7 = vector.shape_cast %6 : vector<1x1x64xf32> to vector<1x64xf32>
    %cst = arith.constant dense<0.000000e+00> : vector<64xf32>
    %8 = vector.multi_reduction <add>, %3, %cst [1] : vector<64x64xf32> to vector<64xf32>
    %9 = vector.shape_cast %8 : vector<64xf32> to vector<64x1xf32>
    %cst_8 = arith.constant 6.400000e+01 : f32
    %10 = vector.broadcast %cst_8 : f32 to vector<64x1xf32>
    %11 = arith.divf %9, %10 : vector<64x1xf32>
    %12 = vector.broadcast %11 : vector<64x1xf32> to vector<64x64xf32>
    %13 = arith.subf %3, %12 : vector<64x64xf32>
    %14 = arith.mulf %13, %13 : vector<64x64xf32>
    %cst_9 = arith.constant dense<0.000000e+00> : vector<64xf32>
    %15 = vector.multi_reduction <add>, %14, %cst_9 [1] : vector<64x64xf32> to vector<64xf32>
    %16 = vector.shape_cast %15 : vector<64xf32> to vector<64x1xf32>
    %cst_10 = arith.constant 6.400000e+01 : f32
    %17 = vector.broadcast %cst_10 : f32 to vector<64x1xf32>
    %18 = arith.divf %16, %17 : vector<64x1xf32>
    %19 = vector.broadcast %11 : vector<64x1xf32> to vector<64x64xf32>
    %20 = arith.subf %3, %19 : vector<64x64xf32>
    %cst_11 = arith.constant 9.99999974E-6 : f32
    %21 = vector.broadcast %cst_11 : f32 to vector<64x1xf32>
    %22 = arith.addf %18, %21 : vector<64x1xf32>
    %23 = math.rsqrt %22 : vector<64x1xf32>
    %24 = vector.broadcast %23 : vector<64x1xf32> to vector<64x64xf32>
    %25 = arith.mulf %20, %24 : vector<64x64xf32>
    %26 = vector.broadcast %5 : vector<1x64xf32> to vector<64x64xf32>
    %27 = arith.mulf %25, %26 : vector<64x64xf32>
    %28 = vector.broadcast %7 : vector<1x64xf32> to vector<64x64xf32>
    %29 = arith.addf %27, %28 : vector<64x64xf32>
    %c0_12 = arith.constant 0 : index
    %c0_13 = arith.constant 0 : index
    %c0_14 = arith.constant 0 : index
    %30 = vector.load %arg17[%c0_12, %c0_13, %c0_14] : memref<1x64x192xbf16, #tpu.memory_space<vmem>>, vector<1x64x192xbf16>
    %31 = vector.shape_cast %30 : vector<1x64x192xbf16> to vector<64x192xbf16>
    %32 = arith.truncf %29 : vector<64x64xf32> to vector<64x64xbf16>
    %cst_15 = arith.constant dense<0.000000e+00> : vector<64x192xf32>
    %33 = tpu.matmul %32, %31, %cst_15 {dimension_numbers = #tpu.dot_dimension_numbers<[1], [0], [0], [1], [0, 0, 1, 1], [], []>} : vector<64x64xbf16>, vector<64x192xbf16>, vector<64x192xf32> -> vector<64x192xf32>
    %34 = vector.extract_strided_slice %33 {offsets = [0, 0], sizes = [64, 64], strides = [1, 1]} : vector<64x192xf32> to vector<64x64xf32>
    %35 = vector.extract_strided_slice %33 {offsets = [0, 64], sizes = [64, 64], strides = [1, 1]} : vector<64x192xf32> to vector<64x64xf32>
    %36 = vector.extract_strided_slice %33 {offsets = [0, 128], sizes = [64, 64], strides = [1, 1]} : vector<64x192xf32> to vector<64x64xf32>
    %37 = tpu.concatenate %34, %34, %34, %34, %34, %34, %34, %34 in 0 : vector<64x64xf32>, vector<64x64xf32>, vector<64x64xf32>, vector<64x64xf32>, vector<64x64xf32>, vector<64x64xf32>, vector<64x64xf32>, vector<64x64xf32> -> vector<512x64xf32>
    %c0_16 = arith.constant 0 : index
    %c0_17 = arith.constant 0 : index
    %38 = vector.load %arg12[%c0_16, %c0_17] : memref<512x64xf32, #tpu.memory_space<vmem>>, vector<512x64xf32>
    %39 = arith.mulf %37, %38 : vector<512x64xf32>
    %40 = arith.truncf %39 : vector<512x64xf32> to vector<512x64xbf16>
    %41 = arith.truncf %35 : vector<64x64xf32> to vector<64x64xbf16>
    %cst_18 = arith.constant dense<0.000000e+00> : vector<512x64xf32>
    %42 = tpu.matmul %40, %41, %cst_18 {dimension_numbers = #tpu.dot_dimension_numbers<[1], [1], [0], [0], [0, 0, 1, 0], [], []>} : vector<512x64xbf16>, vector<64x64xbf16>, vector<512x64xf32> -> vector<512x64xf32>
    %cst_19 = arith.constant dense<0xFF800000> : vector<512xf32>
    %43 = vector.multi_reduction <maximumf>, %42, %cst_19 [1] : vector<512x64xf32> to vector<512xf32>
    %44 = vector.shape_cast %43 : vector<512xf32> to vector<512x1xf32>
    %45 = vector.broadcast %44 : vector<512x1xf32> to vector<512x64xf32>
    %46 = arith.subf %42, %45 : vector<512x64xf32>
    %47 = math.exp %46 : vector<512x64xf32>
    %cst_20 = arith.constant dense<0.000000e+00> : vector<512xf32>
    %48 = vector.multi_reduction <add>, %47, %cst_20 [1] : vector<512x64xf32> to vector<512xf32>
    %49 = vector.shape_cast %48 : vector<512xf32> to vector<512x1xf32>
    %50 = tpu.reciprocal %49 {approx = true} : vector<512x1xf32> -> vector<512x1xf32>
    %51 = vector.broadcast %50 : vector<512x1xf32> to vector<512x64xf32>
    %52 = arith.mulf %47, %51 : vector<512x64xf32>
    %53 = arith.truncf %52 : vector<512x64xf32> to vector<512x64xbf16>
    %54 = arith.truncf %36 : vector<64x64xf32> to vector<64x64xbf16>
    %cst_21 = arith.constant dense<0.000000e+00> : vector<512x64xf32>
    %55 = tpu.matmul %53, %54, %cst_21 {dimension_numbers = #tpu.dot_dimension_numbers<[1], [0], [0], [1], [0, 0, 1, 1], [], []>} : vector<512x64xbf16>, vector<64x64xbf16>, vector<512x64xf32> -> vector<512x64xf32>
    %c0_22 = arith.constant 0 : index
    %c0_23 = arith.constant 0 : index
    %56 = vector.load %arg13[%c0_22, %c0_23] : memref<8x64xf32, #tpu.memory_space<vmem>>, vector<8x64xf32>
    %57 = vector.extract_strided_slice %55 {offsets = [0, 0], sizes = [64, 64], strides = [1, 1]} : vector<512x64xf32> to vector<64x64xf32>
    %58 = vector.extract_strided_slice %56 {offsets = [0, 0], sizes = [1, 64], strides = [1, 1]} : vector<8x64xf32> to vector<1x64xf32>
    %59 = vector.broadcast %58 : vector<1x64xf32> to vector<64x64xf32>
    %60 = arith.mulf %57, %59 : vector<64x64xf32>
    %61 = vector.extract_strided_slice %55 {offsets = [64, 0], sizes = [64, 64], strides = [1, 1]} : vector<512x64xf32> to vector<64x64xf32>
    %62 = vector.extract_strided_slice %56 {offsets = [1, 0], sizes = [1, 64], strides = [1, 1]} : vector<8x64xf32> to vector<1x64xf32>
    %63 = vector.broadcast %62 : vector<1x64xf32> to vector<64x64xf32>
    %64 = arith.mulf %61, %63 : vector<64x64xf32>
    %65 = arith.addf %60, %64 : vector<64x64xf32>
    %66 = vector.extract_strided_slice %55 {offsets = [128, 0], sizes = [64, 64], strides = [1, 1]} : vector<512x64xf32> to vector<64x64xf32>
    %67 = vector.extract_strided_slice %56 {offsets = [2, 0], sizes = [1, 64], strides = [1, 1]} : vector<8x64xf32> to vector<1x64xf32>
    %68 = vector.broadcast %67 : vector<1x64xf32> to vector<64x64xf32>
    %69 = arith.mulf %66, %68 : vector<64x64xf32>
    %70 = arith.addf %65, %69 : vector<64x64xf32>
    %71 = vector.extract_strided_slice %55 {offsets = [192, 0], sizes = [64, 64], strides = [1, 1]} : vector<512x64xf32> to vector<64x64xf32>
    %72 = vector.extract_strided_slice %56 {offsets = [3, 0], sizes = [1, 64], strides = [1, 1]} : vector<8x64xf32> to vector<1x64xf32>
    %73 = vector.broadcast %72 : vector<1x64xf32> to vector<64x64xf32>
    %74 = arith.mulf %71, %73 : vector<64x64xf32>
    %75 = arith.addf %70, %74 : vector<64x64xf32>
    %76 = vector.extract_strided_slice %55 {offsets = [256, 0], sizes = [64, 64], strides = [1, 1]} : vector<512x64xf32> to vector<64x64xf32>
    %77 = vector.extract_strided_slice %56 {offsets = [4, 0], sizes = [1, 64], strides = [1, 1]} : vector<8x64xf32> to vector<1x64xf32>
    %78 = vector.broadcast %77 : vector<1x64xf32> to vector<64x64xf32>
    %79 = arith.mulf %76, %78 : vector<64x64xf32>
    %80 = arith.addf %75, %79 : vector<64x64xf32>
    %81 = vector.extract_strided_slice %55 {offsets = [320, 0], sizes = [64, 64], strides = [1, 1]} : vector<512x64xf32> to vector<64x64xf32>
    %82 = vector.extract_strided_slice %56 {offsets = [5, 0], sizes = [1, 64], strides = [1, 1]} : vector<8x64xf32> to vector<1x64xf32>
    %83 = vector.broadcast %82 : vector<1x64xf32> to vector<64x64xf32>
    %84 = arith.mulf %81, %83 : vector<64x64xf32>
    %85 = arith.addf %80, %84 : vector<64x64xf32>
    %86 = vector.extract_strided_slice %55 {offsets = [384, 0], sizes = [64, 64], strides = [1, 1]} : vector<512x64xf32> to vector<64x64xf32>
    %87 = vector.extract_strided_slice %56 {offsets = [6, 0], sizes = [1, 64], strides = [1, 1]} : vector<8x64xf32> to vector<1x64xf32>
    %88 = vector.broadcast %87 : vector<1x64xf32> to vector<64x64xf32>
    %89 = arith.mulf %86, %88 : vector<64x64xf32>
    %90 = arith.addf %85, %89 : vector<64x64xf32>
    %91 = vector.extract_strided_slice %55 {offsets = [448, 0], sizes = [64, 64], strides = [1, 1]} : vector<512x64xf32> to vector<64x64xf32>
    %92 = vector.extract_strided_slice %56 {offsets = [7, 0], sizes = [1, 64], strides = [1, 1]} : vector<8x64xf32> to vector<1x64xf32>
    %93 = vector.broadcast %92 : vector<1x64xf32> to vector<64x64xf32>
    %94 = arith.mulf %91, %93 : vector<64x64xf32>
    %95 = arith.addf %90, %94 : vector<64x64xf32>
    %c0_24 = arith.constant 0 : index
    %c0_25 = arith.constant 0 : index
    %c0_26 = arith.constant 0 : index
    %96 = vector.load %arg18[%c0_24, %c0_25, %c0_26] : memref<1x64x64xbf16, #tpu.memory_space<vmem>>, vector<1x64x64xbf16>
    %97 = vector.shape_cast %96 : vector<1x64x64xbf16> to vector<64x64xbf16>
    %98 = arith.truncf %95 : vector<64x64xf32> to vector<64x64xbf16>
    %cst_27 = arith.constant dense<0.000000e+00> : vector<64x64xf32>
    %99 = tpu.matmul %98, %97, %cst_27 {dimension_numbers = #tpu.dot_dimension_numbers<[1], [0], [0], [1], [0, 0, 1, 1], [], []>} : vector<64x64xbf16>, vector<64x64xbf16>, vector<64x64xf32> -> vector<64x64xf32>
    %100 = arith.addf %3, %99 : vector<64x64xf32>
    %c0_28 = arith.constant 0 : index
    %c0_29 = arith.constant 0 : index
    %c0_30 = arith.constant 0 : index
    %101 = vector.load %arg19[%c0_28, %c0_29, %c0_30] : memref<1x1x64xf32, #tpu.memory_space<vmem>>, vector<1x1x64xf32>
    %102 = vector.shape_cast %101 : vector<1x1x64xf32> to vector<1x64xf32>
    %103 = vector.broadcast %102 : vector<1x64xf32> to vector<64x64xf32>
    %104 = arith.addf %100, %103 : vector<64x64xf32>
    %c0_31 = arith.constant 0 : index
    %c0_32 = arith.constant 0 : index
    %c0_33 = arith.constant 0 : index
    %105 = vector.load %arg20[%c0_31, %c0_32, %c0_33] : memref<1x1x64xf32, #tpu.memory_space<vmem>>, vector<1x1x64xf32>
    %106 = vector.shape_cast %105 : vector<1x1x64xf32> to vector<1x64xf32>
    %c0_34 = arith.constant 0 : index
    %c0_35 = arith.constant 0 : index
    %c0_36 = arith.constant 0 : index
    %107 = vector.load %arg21[%c0_34, %c0_35, %c0_36] : memref<1x1x64xf32, #tpu.memory_space<vmem>>, vector<1x1x64xf32>
    %108 = vector.shape_cast %107 : vector<1x1x64xf32> to vector<1x64xf32>
    %cst_37 = arith.constant dense<0.000000e+00> : vector<64xf32>
    %109 = vector.multi_reduction <add>, %104, %cst_37 [1] : vector<64x64xf32> to vector<64xf32>
    %110 = vector.shape_cast %109 : vector<64xf32> to vector<64x1xf32>
    %cst_38 = arith.constant 6.400000e+01 : f32
    %111 = vector.broadcast %cst_38 : f32 to vector<64x1xf32>
    %112 = arith.divf %110, %111 : vector<64x1xf32>
    %113 = vector.broadcast %112 : vector<64x1xf32> to vector<64x64xf32>
    %114 = arith.subf %104, %113 : vector<64x64xf32>
    %115 = arith.mulf %114, %114 : vector<64x64xf32>
    %cst_39 = arith.constant dense<0.000000e+00> : vector<64xf32>
    %116 = vector.multi_reduction <add>, %115, %cst_39 [1] : vector<64x64xf32> to vector<64xf32>
    %117 = vector.shape_cast %116 : vector<64xf32> to vector<64x1xf32>
    %cst_40 = arith.constant 6.400000e+01 : f32
    %118 = vector.broadcast %cst_40 : f32 to vector<64x1xf32>
    %119 = arith.divf %117, %118 : vector<64x1xf32>
    %120 = vector.broadcast %112 : vector<64x1xf32> to vector<64x64xf32>
    %121 = arith.subf %104, %120 : vector<64x64xf32>
    %cst_41 = arith.constant 9.99999974E-6 : f32
    %122 = vector.broadcast %cst_41 : f32 to vector<64x1xf32>
    %123 = arith.addf %119, %122 : vector<64x1xf32>
    %124 = math.rsqrt %123 : vector<64x1xf32>
    %125 = vector.broadcast %124 : vector<64x1xf32> to vector<64x64xf32>
    %126 = arith.mulf %121, %125 : vector<64x64xf32>
    %127 = vector.broadcast %106 : vector<1x64xf32> to vector<64x64xf32>
    %128 = arith.mulf %126, %127 : vector<64x64xf32>
    %129 = vector.broadcast %108 : vector<1x64xf32> to vector<64x64xf32>
    %130 = arith.addf %128, %129 : vector<64x64xf32>
    %131 = arith.index_cast %arg1 : i32 to index
    %c0_42 = arith.constant 0 : index
    %c0_43 = arith.constant 0 : index
    %132 = vector.load %arg32[%131, %c0_42, %c0_43] : memref<2x8x128xf32, #tpu.memory_space<vmem>>, vector<1x8x128xf32>
    %133 = vector.shape_cast %132 : vector<1x8x128xf32> to vector<8x128xf32>
    %c0_44 = arith.constant 0 : index
    %c0_45 = arith.constant 0 : index
    %c0_46 = arith.constant 0 : index
    %134 = vector.load %arg22[%c0_44, %c0_45, %c0_46] : memref<1x64x64xbf16, #tpu.memory_space<vmem>>, vector<1x64x64xbf16>
    %135 = vector.shape_cast %134 : vector<1x64x64xbf16> to vector<64x64xbf16>
    %136 = arith.truncf %130 : vector<64x64xf32> to vector<64x64xbf16>
    %cst_47 = arith.constant dense<0.000000e+00> : vector<64x64xf32>
    %137 = tpu.matmul %136, %135, %cst_47 {dimension_numbers = #tpu.dot_dimension_numbers<[1], [0], [0], [1], [0, 0, 1, 1], [], []>} : vector<64x64xbf16>, vector<64x64xbf16>, vector<64x64xf32> -> vector<64x64xf32>
    %138 = vector.extract_strided_slice %133 {offsets = [0, 0], sizes = [8, 64], strides = [1, 1]} : vector<8x128xf32> to vector<8x64xf32>
    %139 = vector.extract_strided_slice %133 {offsets = [0, 64], sizes = [8, 64], strides = [1, 1]} : vector<8x128xf32> to vector<8x64xf32>
    %140 = tpu.concatenate %137, %137, %137, %137, %137, %137, %137, %137 in 0 : vector<64x64xf32>, vector<64x64xf32>, vector<64x64xf32>, vector<64x64xf32>, vector<64x64xf32>, vector<64x64xf32>, vector<64x64xf32>, vector<64x64xf32> -> vector<512x64xf32>
    %c0_48 = arith.constant 0 : index
    %c0_49 = arith.constant 0 : index
    %141 = vector.load %arg12[%c0_48, %c0_49] : memref<512x64xf32, #tpu.memory_space<vmem>>, vector<512x64xf32>
    %142 = arith.mulf %140, %141 : vector<512x64xf32>
    %143 = arith.truncf %142 : vector<512x64xf32> to vector<512x64xbf16>
    %144 = arith.truncf %138 : vector<8x64xf32> to vector<8x64xbf16>
    %cst_50 = arith.constant dense<0.000000e+00> : vector<512x8xf32>
    %145 = tpu.matmul %143, %144, %cst_50 {dimension_numbers = #tpu.dot_dimension_numbers<[1], [1], [0], [0], [0, 0, 1, 0], [], []>} : vector<512x64xbf16>, vector<8x64xbf16>, vector<512x8xf32> -> vector<512x8xf32>
    %cst_51 = arith.constant dense<0xFF800000> : vector<512xf32>
    %146 = vector.multi_reduction <maximumf>, %145, %cst_51 [1] : vector<512x8xf32> to vector<512xf32>
    %147 = vector.shape_cast %146 : vector<512xf32> to vector<512x1xf32>
    %148 = vector.broadcast %147 : vector<512x1xf32> to vector<512x8xf32>
    %149 = arith.subf %145, %148 : vector<512x8xf32>
    %150 = math.exp %149 : vector<512x8xf32>
    %cst_52 = arith.constant dense<0.000000e+00> : vector<512xf32>
    %151 = vector.multi_reduction <add>, %150, %cst_52 [1] : vector<512x8xf32> to vector<512xf32>
    %152 = vector.shape_cast %151 : vector<512xf32> to vector<512x1xf32>
    %153 = tpu.reciprocal %152 {approx = true} : vector<512x1xf32> -> vector<512x1xf32>
    %154 = vector.broadcast %153 : vector<512x1xf32> to vector<512x8xf32>
    %155 = arith.mulf %150, %154 : vector<512x8xf32>
    %156 = arith.truncf %155 : vector<512x8xf32> to vector<512x8xbf16>
    %157 = arith.truncf %139 : vector<8x64xf32> to vector<8x64xbf16>
    %cst_53 = arith.constant dense<0.000000e+00> : vector<512x64xf32>
    %158 = tpu.matmul %156, %157, %cst_53 {dimension_numbers = #tpu.dot_dimension_numbers<[1], [0], [0], [1], [0, 0, 1, 1], [], []>} : vector<512x8xbf16>, vector<8x64xbf16>, vector<512x64xf32> -> vector<512x64xf32>
    %c0_54 = arith.constant 0 : index
    %c0_55 = arith.constant 0 : index
    %159 = vector.load %arg13[%c0_54, %c0_55] : memref<8x64xf32, #tpu.memory_space<vmem>>, vector<8x64xf32>
    %160 = vector.extract_strided_slice %158 {offsets = [0, 0], sizes = [64, 64], strides = [1, 1]} : vector<512x64xf32> to vector<64x64xf32>
    %161 = vector.extract_strided_slice %159 {offsets = [0, 0], sizes = [1, 64], strides = [1, 1]} : vector<8x64xf32> to vector<1x64xf32>
    %162 = vector.broadcast %161 : vector<1x64xf32> to vector<64x64xf32>
    %163 = arith.mulf %160, %162 : vector<64x64xf32>
    %164 = vector.extract_strided_slice %158 {offsets = [64, 0], sizes = [64, 64], strides = [1, 1]} : vector<512x64xf32> to vector<64x64xf32>
    %165 = vector.extract_strided_slice %159 {offsets = [1, 0], sizes = [1, 64], strides = [1, 1]} : vector<8x64xf32> to vector<1x64xf32>
    %166 = vector.broadcast %165 : vector<1x64xf32> to vector<64x64xf32>
    %167 = arith.mulf %164, %166 : vector<64x64xf32>
    %168 = arith.addf %163, %167 : vector<64x64xf32>
    %169 = vector.extract_strided_slice %158 {offsets = [128, 0], sizes = [64, 64], strides = [1, 1]} : vector<512x64xf32> to vector<64x64xf32>
    %170 = vector.extract_strided_slice %159 {offsets = [2, 0], sizes = [1, 64], strides = [1, 1]} : vector<8x64xf32> to vector<1x64xf32>
    %171 = vector.broadcast %170 : vector<1x64xf32> to vector<64x64xf32>
    %172 = arith.mulf %169, %171 : vector<64x64xf32>
    %173 = arith.addf %168, %172 : vector<64x64xf32>
    %174 = vector.extract_strided_slice %158 {offsets = [192, 0], sizes = [64, 64], strides = [1, 1]} : vector<512x64xf32> to vector<64x64xf32>
    %175 = vector.extract_strided_slice %159 {offsets = [3, 0], sizes = [1, 64], strides = [1, 1]} : vector<8x64xf32> to vector<1x64xf32>
    %176 = vector.broadcast %175 : vector<1x64xf32> to vector<64x64xf32>
    %177 = arith.mulf %174, %176 : vector<64x64xf32>
    %178 = arith.addf %173, %177 : vector<64x64xf32>
    %179 = vector.extract_strided_slice %158 {offsets = [256, 0], sizes = [64, 64], strides = [1, 1]} : vector<512x64xf32> to vector<64x64xf32>
    %180 = vector.extract_strided_slice %159 {offsets = [4, 0], sizes = [1, 64], strides = [1, 1]} : vector<8x64xf32> to vector<1x64xf32>
    %181 = vector.broadcast %180 : vector<1x64xf32> to vector<64x64xf32>
    %182 = arith.mulf %179, %181 : vector<64x64xf32>
    %183 = arith.addf %178, %182 : vector<64x64xf32>
    %184 = vector.extract_strided_slice %158 {offsets = [320, 0], sizes = [64, 64], strides = [1, 1]} : vector<512x64xf32> to vector<64x64xf32>
    %185 = vector.extract_strided_slice %159 {offsets = [5, 0], sizes = [1, 64], strides = [1, 1]} : vector<8x64xf32> to vector<1x64xf32>
    %186 = vector.broadcast %185 : vector<1x64xf32> to vector<64x64xf32>
    %187 = arith.mulf %184, %186 : vector<64x64xf32>
    %188 = arith.addf %183, %187 : vector<64x64xf32>
    %189 = vector.extract_strided_slice %158 {offsets = [384, 0], sizes = [64, 64], strides = [1, 1]} : vector<512x64xf32> to vector<64x64xf32>
    %190 = vector.extract_strided_slice %159 {offsets = [6, 0], sizes = [1, 64], strides = [1, 1]} : vector<8x64xf32> to vector<1x64xf32>
    %191 = vector.broadcast %190 : vector<1x64xf32> to vector<64x64xf32>
    %192 = arith.mulf %189, %191 : vector<64x64xf32>
    %193 = arith.addf %188, %192 : vector<64x64xf32>
    %194 = vector.extract_strided_slice %158 {offsets = [448, 0], sizes = [64, 64], strides = [1, 1]} : vector<512x64xf32> to vector<64x64xf32>
    %195 = vector.extract_strided_slice %159 {offsets = [7, 0], sizes = [1, 64], strides = [1, 1]} : vector<8x64xf32> to vector<1x64xf32>
    %196 = vector.broadcast %195 : vector<1x64xf32> to vector<64x64xf32>
    %197 = arith.mulf %194, %196 : vector<64x64xf32>
    %198 = arith.addf %193, %197 : vector<64x64xf32>
    %c0_56 = arith.constant 0 : index
    %c0_57 = arith.constant 0 : index
    %c0_58 = arith.constant 0 : index
    %199 = vector.load %arg23[%c0_56, %c0_57, %c0_58] : memref<1x64x64xbf16, #tpu.memory_space<vmem>>, vector<1x64x64xbf16>
    %200 = vector.shape_cast %199 : vector<1x64x64xbf16> to vector<64x64xbf16>
    %201 = arith.truncf %198 : vector<64x64xf32> to vector<64x64xbf16>
    %cst_59 = arith.constant dense<0.000000e+00> : vector<64x64xf32>
    %202 = tpu.matmul %201, %200, %cst_59 {dimension_numbers = #tpu.dot_dimension_numbers<[1], [0], [0], [1], [0, 0, 1, 1], [], []>} : vector<64x64xbf16>, vector<64x64xbf16>, vector<64x64xf32> -> vector<64x64xf32>
    %203 = arith.addf %104, %202 : vector<64x64xf32>
    %c0_60 = arith.constant 0 : index
    %c0_61 = arith.constant 0 : index
    %c0_62 = arith.constant 0 : index
    %204 = vector.load %arg24[%c0_60, %c0_61, %c0_62] : memref<1x1x64xf32, #tpu.memory_space<vmem>>, vector<1x1x64xf32>
    %205 = vector.shape_cast %204 : vector<1x1x64xf32> to vector<1x64xf32>
    %206 = vector.broadcast %205 : vector<1x64xf32> to vector<64x64xf32>
    %207 = arith.addf %203, %206 : vector<64x64xf32>
    %c0_63 = arith.constant 0 : index
    %c0_64 = arith.constant 0 : index
    %c0_65 = arith.constant 0 : index
    %208 = vector.load %arg25[%c0_63, %c0_64, %c0_65] : memref<1x1x64xf32, #tpu.memory_space<vmem>>, vector<1x1x64xf32>
    %209 = vector.shape_cast %208 : vector<1x1x64xf32> to vector<1x64xf32>
    %c0_66 = arith.constant 0 : index
    %c0_67 = arith.constant 0 : index
    %c0_68 = arith.constant 0 : index
    %210 = vector.load %arg26[%c0_66, %c0_67, %c0_68] : memref<1x1x64xf32, #tpu.memory_space<vmem>>, vector<1x1x64xf32>
    %211 = vector.shape_cast %210 : vector<1x1x64xf32> to vector<1x64xf32>
    %cst_69 = arith.constant dense<0.000000e+00> : vector<64xf32>
    %212 = vector.multi_reduction <add>, %207, %cst_69 [1] : vector<64x64xf32> to vector<64xf32>
    %213 = vector.shape_cast %212 : vector<64xf32> to vector<64x1xf32>
    %cst_70 = arith.constant 6.400000e+01 : f32
    %214 = vector.broadcast %cst_70 : f32 to vector<64x1xf32>
    %215 = arith.divf %213, %214 : vector<64x1xf32>
    %216 = vector.broadcast %215 : vector<64x1xf32> to vector<64x64xf32>
    %217 = arith.subf %207, %216 : vector<64x64xf32>
    %218 = arith.mulf %217, %217 : vector<64x64xf32>
    %cst_71 = arith.constant dense<0.000000e+00> : vector<64xf32>
    %219 = vector.multi_reduction <add>, %218, %cst_71 [1] : vector<64x64xf32> to vector<64xf32>
    %220 = vector.shape_cast %219 : vector<64xf32> to vector<64x1xf32>
    %cst_72 = arith.constant 6.400000e+01 : f32
    %221 = vector.broadcast %cst_72 : f32 to vector<64x1xf32>
    %222 = arith.divf %220, %221 : vector<64x1xf32>
    %223 = vector.broadcast %215 : vector<64x1xf32> to vector<64x64xf32>
    %224 = arith.subf %207, %223 : vector<64x64xf32>
    %cst_73 = arith.constant 9.99999974E-6 : f32
    %225 = vector.broadcast %cst_73 : f32 to vector<64x1xf32>
    %226 = arith.addf %222, %225 : vector<64x1xf32>
    %227 = math.rsqrt %226 : vector<64x1xf32>
    %228 = vector.broadcast %227 : vector<64x1xf32> to vector<64x64xf32>
    %229 = arith.mulf %224, %228 : vector<64x64xf32>
    %230 = vector.broadcast %209 : vector<1x64xf32> to vector<64x64xf32>
    %231 = arith.mulf %229, %230 : vector<64x64xf32>
    %232 = vector.broadcast %211 : vector<1x64xf32> to vector<64x64xf32>
    %233 = arith.addf %231, %232 : vector<64x64xf32>
    %c0_74 = arith.constant 0 : index
    %c0_75 = arith.constant 0 : index
    %c0_76 = arith.constant 0 : index
    %234 = vector.load %arg27[%c0_74, %c0_75, %c0_76] : memref<1x64x512xbf16, #tpu.memory_space<vmem>>, vector<1x64x512xbf16>
    %235 = vector.shape_cast %234 : vector<1x64x512xbf16> to vector<64x512xbf16>
    %236 = arith.truncf %233 : vector<64x64xf32> to vector<64x64xbf16>
    %cst_77 = arith.constant dense<0.000000e+00> : vector<64x512xf32>
    %237 = tpu.matmul %236, %235, %cst_77 {dimension_numbers = #tpu.dot_dimension_numbers<[1], [0], [0], [1], [0, 0, 1, 1], [], []>} : vector<64x64xbf16>, vector<64x512xbf16>, vector<64x512xf32> -> vector<64x512xf32>
    %c0_78 = arith.constant 0 : index
    %c0_79 = arith.constant 0 : index
    %c0_80 = arith.constant 0 : index
    %238 = vector.load %arg28[%c0_78, %c0_79, %c0_80] : memref<1x1x512xf32, #tpu.memory_space<vmem>>, vector<1x1x512xf32>
    %239 = vector.shape_cast %238 : vector<1x1x512xf32> to vector<1x512xf32>
    %240 = vector.broadcast %239 : vector<1x512xf32> to vector<64x512xf32>
    %241 = arith.addf %237, %240 : vector<64x512xf32>
    %242 = vector.extract_strided_slice %241 {offsets = [0, 0], sizes = [64, 256], strides = [1, 1]} : vector<64x512xf32> to vector<64x256xf32>
    %243 = vector.extract_strided_slice %241 {offsets = [0, 256], sizes = [64, 256], strides = [1, 1]} : vector<64x512xf32> to vector<64x256xf32>
    %cst_81 = arith.constant 5.000000e-01 : f32
    %244 = vector.broadcast %cst_81 : f32 to vector<64x256xf32>
    %245 = arith.mulf %244, %243 : vector<64x256xf32>
    %cst_82 = arith.constant 4.471500e-02 : f32
    %246 = vector.broadcast %cst_82 : f32 to vector<64x256xf32>
    %247 = arith.mulf %246, %243 : vector<64x256xf32>
    %248 = arith.mulf %247, %243 : vector<64x256xf32>
    %249 = arith.mulf %248, %243 : vector<64x256xf32>
    %250 = arith.addf %243, %249 : vector<64x256xf32>
    %cst_83 = arith.constant 0.797884583 : f32
    %251 = vector.broadcast %cst_83 : f32 to vector<64x256xf32>
    %252 = arith.mulf %251, %250 : vector<64x256xf32>
    %253 = math.tanh %252 : vector<64x256xf32>
    %cst_84 = arith.constant 1.000000e+00 : f32
    %254 = vector.broadcast %cst_84 : f32 to vector<64x256xf32>
    %255 = arith.addf %254, %253 : vector<64x256xf32>
    %256 = arith.mulf %245, %255 : vector<64x256xf32>
    %257 = arith.mulf %242, %256 : vector<64x256xf32>
    %c0_85 = arith.constant 0 : index
    %c0_86 = arith.constant 0 : index
    %c0_87 = arith.constant 0 : index
    %258 = vector.load %arg29[%c0_85, %c0_86, %c0_87] : memref<1x256x64xbf16, #tpu.memory_space<vmem>>, vector<1x256x64xbf16>
    %259 = vector.shape_cast %258 : vector<1x256x64xbf16> to vector<256x64xbf16>
    %260 = arith.truncf %257 : vector<64x256xf32> to vector<64x256xbf16>
    %cst_88 = arith.constant dense<0.000000e+00> : vector<64x64xf32>
    %261 = tpu.matmul %260, %259, %cst_88 {dimension_numbers = #tpu.dot_dimension_numbers<[1], [0], [0], [1], [0, 0, 1, 1], [], []>} : vector<64x256xbf16>, vector<256x64xbf16>, vector<64x64xf32> -> vector<64x64xf32>
    %262 = arith.addf %207, %261 : vector<64x64xf32>
    %c0_89 = arith.constant 0 : index
    %c0_90 = arith.constant 0 : index
    %c0_91 = arith.constant 0 : index
    %263 = vector.load %arg30[%c0_89, %c0_90, %c0_91] : memref<1x1x64xf32, #tpu.memory_space<vmem>>, vector<1x1x64xf32>
    %264 = vector.shape_cast %263 : vector<1x1x64xf32> to vector<1x64xf32>
    %265 = vector.broadcast %264 : vector<1x64xf32> to vector<64x64xf32>
    %266 = arith.addf %262, %265 : vector<64x64xf32>
    %c1_i32 = arith.constant 1 : i32
    %267 = arith.cmpi ne, %arg1, %c1_i32 : i32
    %268 = arith.extui %267 : i1 to i32
    %c0_i32_92 = arith.constant 0 : i32
    %269 = arith.cmpi ne, %268, %c0_i32_92 : i32
    scf.if %269 {
      %c0_95 = arith.constant 0 : index
      %c0_96 = arith.constant 0 : index
      %273 = vector.load %arg31[%c0_95, %c0_96] : memref<64x64xf32, #tpu.memory_space<vmem>>, vector<64x64xf32>
      tpu.vector_store %arg31[%c0_95, %c0_96], %266 {strides = array<i32>} : memref<64x64xf32, #tpu.memory_space<vmem>>, vector<64x64xf32>,
    } else {
    }
    %c1_i32_93 = arith.constant 1 : i32
    %270 = arith.cmpi eq, %arg1, %c1_i32_93 : i32
    %271 = arith.extui %270 : i1 to i32
    %c0_i32_94 = arith.constant 0 : i32
    %272 = arith.cmpi ne, %271, %c0_i32_94 : i32
    scf.if %272 {
      %c0_95 = arith.constant 0 : index
      %c0_96 = arith.constant 0 : index
      %273 = vector.load %arg10[%c0_95, %c0_96] : memref<64x64xbf16, #tpu.memory_space<vmem>>, vector<64x64xbf16>
      %274 = arith.truncf %266 : vector<64x64xf32> to vector<64x64xbf16>
      %cst_97 = arith.constant dense<0.000000e+00> : vector<64x64xf32>
      %275 = tpu.matmul %274, %273, %cst_97 {dimension_numbers = #tpu.dot_dimension_numbers<[1], [0], [0], [1], [0, 0, 1, 1], [], []>} : vector<64x64xbf16>, vector<64x64xbf16>, vector<64x64xf32> -> vector<64x64xf32>
      %c0_98 = arith.constant 0 : index
      %c0_99 = arith.constant 0 : index
      %276 = vector.load %arg11[%c0_98, %c0_99] : memref<1x64xf32, #tpu.memory_space<vmem>>, vector<1x64xf32>
      %277 = vector.broadcast %276 : vector<1x64xf32> to vector<64x64xf32>
      %278 = arith.addf %275, %277 : vector<64x64xf32>
      %c0_100 = arith.constant 0 : index
      %c0_101 = arith.constant 0 : index
      %279 = vector.load %arg2[%c0_100, %c0_101] : memref<64x64xf32, #tpu.memory_space<vmem>>, vector<64x64xf32>
      %280 = arith.addf %278, %279 : vector<64x64xf32>
      %c0_102 = arith.constant 0 : index
      %c0_103 = arith.constant 0 : index
      %281 = vector.load %arg31[%c0_102, %c0_103] : memref<64x64xf32, #tpu.memory_space<vmem>>, vector<64x64xf32>
      tpu.vector_store %arg31[%c0_102, %c0_103], %280 {strides = array<i32>} : memref<64x64xf32, #tpu.memory_space<vmem>>, vector<64x64xf32>,
    } else {
    }
    return
  }
  func.func @transform_0(%arg0: i32, %arg1: i32) -> (i32, i32) {
    %c0_i32 = arith.constant 0 : i32
    %c0_i32_0 = arith.constant 0 : i32
    return %arg0, %c0_i32 : i32, i32
  }
  func.func @transform_1(%arg0: i32, %arg1: i32) -> (i32, i32) {
    %c0_i32 = arith.constant 0 : i32
    %c0_i32_0 = arith.constant 0 : i32
    return %arg0, %c0_i32 : i32, i32
  }
  func.func @transform_2(%arg0: i32, %arg1: i32) -> (i32, i32) {
    %c0_i32 = arith.constant 0 : i32
    %c0_i32_0 = arith.constant 0 : i32
    %c0_i32_1 = arith.constant 0 : i32
    return %c0_i32, %c0_i32_0 : i32, i32
  }
  func.func @transform_3(%arg0: i32, %arg1: i32) -> (i32, i32) {
    %c0_i32 = arith.constant 0 : i32
    %c0_i32_0 = arith.constant 0 : i32
    %c0_i32_1 = arith.constant 0 : i32
    return %c0_i32, %c0_i32_0 : i32, i32
  }
  func.func @transform_4(%arg0: i32, %arg1: i32) -> (i32, i32) {
    %c0_i32 = arith.constant 0 : i32
    %c0_i32_0 = arith.constant 0 : i32
    %c0_i32_1 = arith.constant 0 : i32
    return %c0_i32, %c0_i32_0 : i32, i32
  }
  func.func @transform_5(%arg0: i32, %arg1: i32) -> (i32, i32) {
    %c0_i32 = arith.constant 0 : i32
    %c0_i32_0 = arith.constant 0 : i32
    %c0_i32_1 = arith.constant 0 : i32
    return %c0_i32, %c0_i32_0 : i32, i32
  }
  func.func @transform_6(%arg0: i32, %arg1: i32) -> (i32, i32) {
    %c0_i32 = arith.constant 0 : i32
    %c0_i32_0 = arith.constant 0 : i32
    %c0_i32_1 = arith.constant 0 : i32
    return %c0_i32, %c0_i32_0 : i32, i32
  }
  func.func @transform_7(%arg0: i32, %arg1: i32) -> (i32, i32) {
    %c0_i32 = arith.constant 0 : i32
    %c0_i32_0 = arith.constant 0 : i32
    %c0_i32_1 = arith.constant 0 : i32
    return %c0_i32, %c0_i32_0 : i32, i32
  }
  func.func @transform_8(%arg0: i32, %arg1: i32) -> (i32, i32) {
    %c0_i32 = arith.constant 0 : i32
    %c0_i32_0 = arith.constant 0 : i32
    %c0_i32_1 = arith.constant 0 : i32
    return %c0_i32, %c0_i32_0 : i32, i32
  }
  func.func @transform_9(%arg0: i32, %arg1: i32) -> (i32, i32) {
    %c0_i32 = arith.constant 0 : i32
    %c0_i32_0 = arith.constant 0 : i32
    %c0_i32_1 = arith.constant 0 : i32
    return %c0_i32, %c0_i32_0 : i32, i32
  }
  func.func @transform_10(%arg0: i32, %arg1: i32) -> (i32, i32) {
    %c0_i32 = arith.constant 0 : i32
    %c0_i32_0 = arith.constant 0 : i32
    %c0_i32_1 = arith.constant 0 : i32
    return %c0_i32, %c0_i32_0 : i32, i32
  }
  func.func @transform_11(%arg0: i32, %arg1: i32) -> (i32, i32) {
    %c0_i32 = arith.constant 0 : i32
    %c0_i32_0 = arith.constant 0 : i32
    %c0_i32_1 = arith.constant 0 : i32
    return %c0_i32, %c0_i32_0 : i32, i32
  }
  func.func @transform_12(%arg0: i32, %arg1: i32) -> (i32, i32) {
    %c0_i32 = arith.constant 0 : i32
    %c0_i32_0 = arith.constant 0 : i32
    %c0_i32_1 = arith.constant 0 : i32
    return %c0_i32, %c0_i32_0 : i32, i32
  }
  func.func @transform_13(%arg0: i32, %arg1: i32) -> (i32, i32, i32) {
    %c0_i32 = arith.constant 0 : i32
    %c0_i32_0 = arith.constant 0 : i32
    %c0_i32_1 = arith.constant 0 : i32
    return %arg1, %c0_i32, %c0_i32_0 : i32, i32, i32
  }
  func.func @transform_14(%arg0: i32, %arg1: i32) -> (i32, i32, i32) {
    %c0_i32 = arith.constant 0 : i32
    %c0_i32_0 = arith.constant 0 : i32
    %c0_i32_1 = arith.constant 0 : i32
    return %arg1, %c0_i32, %c0_i32_0 : i32, i32, i32
  }
  func.func @transform_15(%arg0: i32, %arg1: i32) -> (i32, i32, i32) {
    %c0_i32 = arith.constant 0 : i32
    %c0_i32_0 = arith.constant 0 : i32
    %c0_i32_1 = arith.constant 0 : i32
    return %arg1, %c0_i32, %c0_i32_0 : i32, i32, i32
  }
  func.func @transform_16(%arg0: i32, %arg1: i32) -> (i32, i32, i32) {
    %c0_i32 = arith.constant 0 : i32
    %c0_i32_0 = arith.constant 0 : i32
    %c0_i32_1 = arith.constant 0 : i32
    return %arg1, %c0_i32, %c0_i32_0 : i32, i32, i32
  }
  func.func @transform_17(%arg0: i32, %arg1: i32) -> (i32, i32, i32) {
    %c0_i32 = arith.constant 0 : i32
    %c0_i32_0 = arith.constant 0 : i32
    %c0_i32_1 = arith.constant 0 : i32
    return %arg1, %c0_i32, %c0_i32_0 : i32, i32, i32
  }
  func.func @transform_18(%arg0: i32, %arg1: i32) -> (i32, i32, i32) {
    %c0_i32 = arith.constant 0 : i32
    %c0_i32_0 = arith.constant 0 : i32
    %c0_i32_1 = arith.constant 0 : i32
    return %arg1, %c0_i32, %c0_i32_0 : i32, i32, i32
  }
  func.func @transform_19(%arg0: i32, %arg1: i32) -> (i32, i32, i32) {
    %c0_i32 = arith.constant 0 : i32
    %c0_i32_0 = arith.constant 0 : i32
    %c0_i32_1 = arith.constant 0 : i32
    return %arg1, %c0_i32, %c0_i32_0 : i32, i32, i32
  }
  func.func @transform_20(%arg0: i32, %arg1: i32) -> (i32, i32, i32) {
    %c0_i32 = arith.constant 0 : i32
    %c0_i32_0 = arith.constant 0 : i32
    %c0_i32_1 = arith.constant 0 : i32
    return %arg1, %c0_i32, %c0_i32_0 : i32, i32, i32
  }
  func.func @transform_21(%arg0: i32, %arg1: i32) -> (i32, i32, i32) {
    %c0_i32 = arith.constant 0 : i32
    %c0_i32_0 = arith.constant 0 : i32
    %c0_i32_1 = arith.constant 0 : i32
    return %arg1, %c0_i32, %c0_i32_0 : i32, i32, i32
  }
  func.func @transform_22(%arg0: i32, %arg1: i32) -> (i32, i32, i32) {
    %c0_i32 = arith.constant 0 : i32
    %c0_i32_0 = arith.constant 0 : i32
    %c0_i32_1 = arith.constant 0 : i32
    return %arg1, %c0_i32, %c0_i32_0 : i32, i32, i32
  }
  func.func @transform_23(%arg0: i32, %arg1: i32) -> (i32, i32, i32) {
    %c0_i32 = arith.constant 0 : i32
    %c0_i32_0 = arith.constant 0 : i32
    %c0_i32_1 = arith.constant 0 : i32
    return %arg1, %c0_i32, %c0_i32_0 : i32, i32, i32
  }
  func.func @transform_24(%arg0: i32, %arg1: i32) -> (i32, i32, i32) {
    %c0_i32 = arith.constant 0 : i32
    %c0_i32_0 = arith.constant 0 : i32
    %c0_i32_1 = arith.constant 0 : i32
    return %arg1, %c0_i32, %c0_i32_0 : i32, i32, i32
  }
  func.func @transform_25(%arg0: i32, %arg1: i32) -> (i32, i32, i32) {
    %c0_i32 = arith.constant 0 : i32
    %c0_i32_0 = arith.constant 0 : i32
    %c0_i32_1 = arith.constant 0 : i32
    return %arg1, %c0_i32, %c0_i32_0 : i32, i32, i32
  }
  func.func @transform_26(%arg0: i32, %arg1: i32) -> (i32, i32, i32) {
    %c0_i32 = arith.constant 0 : i32
    %c0_i32_0 = arith.constant 0 : i32
    %c0_i32_1 = arith.constant 0 : i32
    return %arg1, %c0_i32, %c0_i32_0 : i32, i32, i32
  }
  func.func @transform_27(%arg0: i32, %arg1: i32) -> (i32, i32, i32) {
    %c0_i32 = arith.constant 0 : i32
    %c0_i32_0 = arith.constant 0 : i32
    %c0_i32_1 = arith.constant 0 : i32
    return %arg1, %c0_i32, %c0_i32_0 : i32, i32, i32
  }
  func.func @transform_28(%arg0: i32, %arg1: i32) -> (i32, i32, i32) {
    %c0_i32 = arith.constant 0 : i32
    %c0_i32_0 = arith.constant 0 : i32
    %c0_i32_1 = arith.constant 0 : i32
    return %arg1, %c0_i32, %c0_i32_0 : i32, i32, i32
  }
  func.func @transform_29(%arg0: i32, %arg1: i32) -> (i32, i32) {
    %c0_i32 = arith.constant 0 : i32
    %c0_i32_0 = arith.constant 0 : i32
    return %arg0, %c0_i32 : i32, i32
  }
}

</mosaic_0001>

<bundles_post_ra>
// kernel: tpu_custom_call.1
= control target key start
LH: loop header
LB: loop body
LE: loop exit
PB: predicated region body
PF: predicated region fallthrough
CT: control target
= control target key end

     0   :  { %s10304_s6 = smov 1   ;;  %s10305_s10 = smov 2   ;;  %s14179_s0 = inlined_call_operand.smem [shape: u32[30], index: -1, kind: input, shape index: {}] }
   0x1   :  { %s10354_s5 = sld [smem:[%s14179_s0]]   ;;  %s10306_s14 = smov 3  }
   0x2   :  { %s10359_s9 = sld [smem:[%s14179_s0 + %s10304_s6]]   ;;  %s10307_s18 = smov 4  }
   0x3   :  { %s10364_s13 = sld [smem:[%s14179_s0 + %s10305_s10]]   ;;  %s10308_s22 = smov 5  }
   0x4   :  { %s10369_s17 = sld [smem:[%s14179_s0 + %s10306_s14]]   ;;  %s10309_s26 = smov 6  }
   0x5   :  { %s10374_s21 = sld [smem:[%s14179_s0 + %s10307_s18]]   ;;  %s10310_s30 = smov 7  }
   0x6   :  { %s10379_s25 = sld [smem:[%s14179_s0 + %s10308_s22]]   ;;  %s10311_s4 = smov 8  }
   0x7   :  { %14234 = sst [smem:[#allocation37_spill]] %s10354_s5  ;;  %s10312_s10 = smov 9  }
   0x8   :  { %14235 = sst [smem:[#allocation38_spill]] %s10359_s9  ;;  %s10313_s15 = smov 10  }
   0x9   :  { %14236 = sst [smem:[#allocation39_spill]] %s10364_s13  ;;  %s10314_s20 = smov 11  }
   0xa   :  { %14237 = sst [smem:[#allocation40_spill]] %s10369_s17  ;;  %s10316_s1 = smov 13  }
   0xb   :  { %14238 = sst [smem:[#allocation41_spill]] %s10374_s21  ;;  %s10317_s7 = smov 14  }
   0xc   :  { %s10384_s29 = sld [smem:[%s14179_s0 + %s10309_s26]]   ;;  %s10315_s26 = smov 12  }
   0xd   :  { %s10389_s3 = sld [smem:[%s14179_s0 + %s10310_s30]]   ;;  %s10319_s22 = smov 16  }
   0xe   :  { %s10394_s8 = sld [smem:[%s14179_s0 + %s10311_s4]]   ;;  %s10320_s28 = smov 17  }
   0xf   :  { %s10399_s14 = sld [smem:[%s14179_s0 + %s10312_s10]]  }
  0x10   :  { %s10404_s19 = sld [smem:[%s14179_s0 + %s10313_s15]]   ;;  %s10318_s15 = smov 15  }
  0x11   :  { %s10409_s24 = sld [smem:[%s14179_s0 + %s10314_s20]]  }
  0x12   :  { %14239 = sst [smem:[#allocation42_spill]] %s10384_s29 }
  0x13   :  { %14240 = sst [smem:[#allocation43_spill]] %s10389_s3 }
  0x14   :  { %14241 = sst [smem:[#allocation44_spill]] %s10394_s8 }
  0x15   :  { %14242 = sst [smem:[#allocation45_spill]] %s10399_s14 }
  0x16   :  { %14243 = sst [smem:[#allocation46_spill]] %s10404_s19 }
  0x17   :  { %14244 = sst [smem:[#allocation47_spill]] %s10409_s24 }
  0x18   :  { %s10414_s30 = sld [smem:[%s14179_s0 + %s10315_s26]]  }
  0x19   :  { %s10419_s6 = sld [smem:[%s14179_s0 + %s10316_s1]]  }
  0x1a   :  { %s10424_s12 = sld [smem:[%s14179_s0 + %s10317_s7]]   ;;  %s10321_s7 = smov 18  }
  0x1b   :  { %s10429_s20 = sld [smem:[%s14179_s0 + %s10318_s15]]   ;;  %s10322_s15 = smov 19  }
  0x1c   :  { %s10434_s27 = sld [smem:[%s14179_s0 + %s10319_s22]]   ;;  %s10323_s22 = smov 20  }
  0x1d   :  { %s10439_s4 = sld [smem:[%s14179_s0 + %s10320_s28]]   ;;  %s10324_s28 = smov 21  }
  0x1e   :  { %14245 = sst [smem:[#allocation48_spill]] %s10414_s30 }
  0x1f   :  { %14246 = sst [smem:[#allocation49_spill]] %s10419_s6 }
  0x20   :  { %14247 = sst [smem:[#allocation50_spill]] %s10424_s12 }
  0x21   :  { %14248 = sst [smem:[#allocation51_spill]] %s10429_s20 }
  0x22   :  { %14249 = sst [smem:[#allocation52_spill]] %s10434_s27 }
  0x23   :  { %14250 = sst [smem:[#allocation53_spill]] %s10439_s4 }
  0x24   :  { %s10444_s24 = sld [smem:[%s14179_s0 + %s10321_s7]]   ;;  %s10325_s7 = smov 22  }
  0x25   :  { %s10449_s19 = sld [smem:[%s14179_s0 + %s10322_s15]]   ;;  %s10326_s15 = smov 23  }
  0x26   :  { %s10454_s30 = sld [smem:[%s14179_s0 + %s10323_s22]]   ;;  %s10327_s22 = smov 24  }
  0x27   :  { %s10459_s13 = sld [smem:[%s14179_s0 + %s10324_s28]]   ;;  %s10328_s28 = smov 25  }
  0x28   :  { %s10464_s4 = sld [smem:[%s14179_s0 + %s10325_s7]]   ;;  %s10329_s7 = smov 26  }
  0x29   :  { %s10469_s27 = sld [smem:[%s14179_s0 + %s10326_s15]]   ;;  %s10330_s15 = smov 27  }
  0x2a   :  { %14251 = sst [smem:[#allocation54_spill]] %s10444_s24 }
  0x2b   :  { %14252 = sst [smem:[#allocation55_spill]] %s10449_s19 }
  0x2c   :  { %14253 = sst [smem:[#allocation56_spill]] %s10454_s30 }
  0x2d   :  { %14254 = sst [smem:[#allocation57_spill]] %s10459_s13 }
  0x2e   :  { %14255 = sst [smem:[#allocation58_spill]] %s10464_s4 }
  0x2f   :  { %14256 = sst [smem:[#allocation59_spill]] %s10469_s27 }
  0x30   :  { %s10474_s20 = sld [smem:[%s14179_s0 + %s10327_s22]]   ;;  %s10331_s22 = smov 28  }
  0x31   :  { %s10479_s12 = sld [smem:[%s14179_s0 + %s10328_s28]]   ;;  %s10332_s28 = smov 29  }
  0x32   :  { %s10484_s6 = sld [smem:[%s14179_s0 + %s10329_s7]]  }
  0x33   :  { %s10489_s9 = sld [smem:[%s14179_s0 + %s10330_s15]]  }
  0x34   :  { %s10494_s5 = sld [smem:[%s14179_s0 + %s10331_s22]]  }
  0x36   :  { %14257 = sst [smem:[#allocation60_spill]] %s10474_s20 }
  0x37   :  { %14258 = sst [smem:[#allocation61_spill]] %s10479_s12 }
  0x38   :  { %14259 = sst [smem:[#allocation62_spill]] %s10484_s6 }
  0x39   :  { %14260 = sst [smem:[#allocation63_spill]] %s10489_s9 }
  0x3a   :  { %14261 = sst [smem:[#allocation64_spill]] %s10494_s5 }
  0x3b   :  { %s10499_s12 = sld [smem:[%s14179_s0 + %s10332_s28]]  }
  0x41   :  { %14262 = sst [smem:[#allocation65_spill]] %s10499_s12 }
  0x42   :  { %64 = vsyncpa [#allocation4], 0 }
  0x43   :  { %65 = vsyncpa [#allocation6], 0 }
  0x44   :  { %66 = vsyncpa [#allocation9], 0 }
  0x45   :  { %67 = vsyncpa [#allocation12], 0 }
  0x46   :  { %68 = vsyncpa [#allocation15], 0 }
  0x47   :  { %70 = vsyncpa [#allocation15 + $0x1], 0 }
  0x48   :  { %71 = vsyncpa [#allocation18], 0 }
  0x49   :  { %73 = vsyncpa [#allocation18 + $0x1], 0 }
  0x4a   :  { %74 = vsyncpa [#allocation21], 0 }
  0x4b   :  { %76 = vsyncpa [#allocation21 + $0x1], 0 }
  0x4c   :  { %77 = vsyncpa [#allocation24], 0 }
  0x4d   :  { %79 = vsyncpa [#allocation24 + $0x1], 0 }
  0x4e   :  { %80 = vsyncpa [#allocation27], 0 }
  0x4f   :  { %82 = vsyncpa [#allocation27 + $0x1], 0  ;;  %s10501_s7 = smov 0   ;;  %s10503_s10 = smov 0  }
  0x50   :  { %s10505_s0 = smov 0   ;;  %s10507_s11 = smov 0  }
  0x51   :  { %s10509_s15 = smov 0   ;;  %s10511_s16 = smov 0  }
  0x52   :  { %s10513_s18 = smov 0   ;;  %s10515_s22 = smov 0  }
  0x53 LB: > { %s14263_s20 = sld [smem:[#allocation60_spill]]  ;;  %s14184_s26 = sadd.s32 4294967295, %s10302_s22   ;;  %s10286_s11 = sphi %s10507_s11, %s14369_s11   ;;  %s10282_s0 = sphi %s10505_s0, %s14365_s0   ;;  %s10278_s10 = sphi %s10503_s10, %s14364_s10   ;;  %s10274_s7 = sphi %s10501_s7, %s14363_s7   ;;  %s10302_s22 = sphi %s10515_s22, %s88_s22   ;;  %s10298_s18 = sphi %s10513_s18, %s14368_s18   ;;  %s10294_s16 = sphi %s10511_s16, %s14370_s16   ;;  %s10290_s15 = sphi %s10509_s15, %s14366_s15  }
  0x54   : > { %s14264_s19 = sld [smem:[#allocation55_spill]]  ;;  %p7792_p0 = scmp.ge.s32.totalorder %s10302_s22, 1 }
  0x55   : > { %s14265_s17 = sld [smem:[#allocation40_spill]]  ;;  %p10548_p1 = scmp.eq.s32.totalorder %s14184_s26, 0 }
  0x56   : > { %s14266_s14 = sld [smem:[#allocation45_spill]]  ;;  %p830_p2 = scmp.lt.s32.totalorder %s10302_s22, 5 }
  0x57   : > { %s14267_s13 = sld [smem:[#allocation57_spill]]  ;;  %s10333_s2 = smov [#allocation5]  }
  0x58   : > { %s14268_s4 = sld [smem:[#allocation58_spill]]  ;;  %p10553_p3 = pnand %p7792_p0, %p830_p2 }
  0x59   : > { %s14269_s3 = sld [smem:[#allocation43_spill]]  ;;  %s861_s9 = sshll.u32 %s10333_s2, 4  ;;  %s862_s9 = int_to_ptr.vmem [resolvable:$true] %s861_s9 }
  0x5a   : > { %s14270_s30 = sld [smem:[#allocation56_spill]]  ;;  %p8872_p4 = pneg %p10553_p3 }
  0x5b   : > { %s14271_s24 = sld [smem:[#allocation54_spill]] }
  0x5c   : > { %s14272_s8 = sld [smem:[#allocation44_spill]]  ;;  %p10564_p5 = pnand %p8872_p4, %p10548_p1 }
  0x5d   : > { %s14273_s29 = sld [smem:[#allocation42_spill]] }
  0x5e   : > { %s14274_s21 = sld [smem:[#allocation41_spill]]  ;;  %p10574_p7 = pneg %p10564_p5 }
  0x5f   : > { %14275 = sst [smem:[#allocation66_spill]] %s10278_s10 }
  0x60   : > { %14276 = sst [smem:[#allocation67_spill]] %s10282_s0 }
  0x61   : > { %14277 = sst [smem:[#allocation68_spill]] %s10286_s11  ;;  %s10334_s11 = smov [#allocation8]  }
  0x62   : > { %14278 = sst [smem:[#allocation69_spill]] %s10290_s15  ;;  %s10568_s15 = sshll.u32 %s10334_s11, 4 }
  0x63   : > { %14279 = sst [smem:[#allocation70_spill]] %s10298_s18  ;;  %s882_s12 = sshll.u32 %s14273_s29, 4  ;;  %s10560_s12 = int_to_ptr.hbm [resolvable:$true] %s882_s12 }
  0x64   : > { %14280 = sst [smem:[#allocation71_spill]] %s10302_s22  ;;  %s859_s23 = sshll.u32 %s14274_s21, 4  ;;  %s10542_s23 = int_to_ptr.hbm [resolvable:$true] %s859_s23 }
  0x65   : > { %s14281_s28 = scalar_select %p10548_p1, 1, 0 }
  0x66   : > { %s14283_s1 = scalar_select %p10553_p3, 1, 0 }
  0x67   : > { %14282 = sst [smem:[#allocation72_spill]] %s14281_s28  ;;  %s9724_s2 = sshra.s32 %s10542_s23, 4  ;;  %s9725_s2 = int_to_ptr.hbm [resolvable:$true] %s9724_s2 }
  0x68   : > { %14284 = sst [smem:[#allocation73_spill]] %s14283_s1  ;;  %s9726_s5 = scalar_lea.hbm %s9725_s2, 1 }
  0x69   : > { %14286 = sst [smem:[#allocation74_spill]] %s10568_s15  ;;  %p9727_p6 = scmp.ne.s32.totalorder %s9725_s2, %s9726_s5 }
  0x6a   : > { %s9731_s6 = scalar_lea.hbm %s14274_s21, 1  ;;  %p9732_p10 = scmp.lt.s32.totalorder %s9725_s2, %s14274_s21 }
  0x6b   : > { %p9729_p8 = pnand %p10574_p7, %p9727_p6  ;;  %p9733_p11 = scmp.lt.s32.totalorder %s9731_s6, %s9726_s5 }
  0x6d   : > { %p9730_p9 = pneg %p9729_p8  ;;  %p9734_p12 = por %p9733_p11, %p9732_p10 }
  0x6f   : > { %p9735_p13 = pnand %p9734_p12, %p9730_p9 }
  0x71   : > { %9738 = shalt.err (!%p9735_p13)
}
  0x72   : > { %8878 = dma.hbm_to_vmem [thread:$0]  (!%p10564_p5), %s10542_s23, 16, %s862_s9, [#allocation6]  }
  0x73   : > { %s9754_s11 = sshra.s32 %s10560_s12, 4  ;;  %s9761_s2 = scalar_lea.hbm %s14273_s29, 32  ;;  %s9755_s11 = int_to_ptr.hbm [resolvable:$true] %s9754_s11 }
  0x74   : > { %s9756_s15 = scalar_lea.hbm %s9755_s11, 32  ;;  %p9762_p6 = scmp.lt.s32.totalorder %s9755_s11, %s14273_s29 }
  0x75   : > { %p9757_p0 = scmp.ne.s32.totalorder %s9755_s11, %s9756_s15  ;;  %p9763_p8 = scmp.lt.s32.totalorder %s9761_s2, %s9756_s15 }
  0x77   : > { %p9759_p2 = pnand %p9757_p0, %p10574_p7  ;;  %p9764_p9 = por %p9763_p8, %p9762_p6 }
  0x79   : > { %p9760_p4 = pneg %p9759_p2 }
  0x7b   : > { %p9765_p10 = pnand %p9764_p9, %p9760_p4 }
  0x7d   : > { %9768 = shalt.err (!%p9765_p10)
}
  0x7e   : > { %s14195_s5 = smov 64   ;;  %s14288_s6 = sld [smem:[#allocation74_spill]] }
  0x7f   : > { %s14197_s9 = smov 4   ;;  %s908_s11 = sshll.u32 %s14272_s8, 4  ;;  %s909_s11 = int_to_ptr.hbm [resolvable:$true] %s908_s11 }
  0x80   : > { %s10337_s15 = smov [#allocation11]   ;;  %s9784_s21 = sshra.s32 %s909_s11, 4  ;;  %s9785_s21 = int_to_ptr.hbm [resolvable:$true] %s9784_s21 }
  0x81   : > { %s910_s2 = sshll.u32 %s10337_s15, 4  ;;  %s9786_s29 = scalar_lea.hbm %s9785_s21, 32  ;;  %s911_s2 = int_to_ptr.vmem [resolvable:$true] %s910_s2 }
  0x82   : > { %p9787_p11 = scmp.ne.s32.totalorder %s9785_s21, %s9786_s29  ;;  %s9791_s27 = scalar_lea.hbm %s14272_s8, 32 }
  0x83   : > { %p9792_p0 = scmp.lt.s32.totalorder %s9785_s21, %s14272_s8  ;;  %p9793_p2 = scmp.lt.s32.totalorder %s9791_s27, %s9786_s29 }
  0x84   : > { %s14289_s23 = int_to_ptr.vmem [resolvable:$true] %s14288_s6  ;;  %p9789_p12 = pnand %p9787_p11, %p10574_p7 }
  0x85   : > { %8884 = dma.hbm_to_vmem [thread:$0]  (!%p10564_p5), %s10560_s12, 512, %s14289_s23, [#allocation9], %s14195_s5, %s14195_s5, %s14197_s9  }
  0x86   : > { %p9790_p13 = pneg %p9789_p12  ;;  %p9794_p4 = por %p9793_p2, %p9792_p0 }
  0x88   : > { %p9795_p6 = pnand %p9794_p4, %p9790_p13 }
  0x8a   : > { %9798 = shalt.err (!%p9795_p6)
}
  0x8b   : > { %8890 = dma.hbm_to_vmem [thread:$0]  (!%p10564_p5), %s909_s11, 512, %s911_s2, [#allocation12], %s14195_s5, %s14195_s5, %s14197_s9  }
  0x8c   : > { %s97_s21 = sadd.s32 1, %s10294_s16  ;;  %s100_s29 = sadd.s32 1, %s10298_s18 }
  0x8d   : > { %p98_p8 = scmp.ge.s32.totalorder %s97_s21, 2  ;;  %s520_s12 = sadd.s32 1, %s10282_s0 }
  0x8e   : > { %p527_p9 = scmp.ne.s32.totalorder %s10282_s0, %s10278_s10  ;;  %p528_p10 = scmp.eq.s32.totalorder %s10302_s22, 0 }
  0x8f   : > { %s14372_s21 = smov (%p98_p8, %s97_s21), 0  ;;  %s14374_s29 = smov (!%p98_p8, %s100_s29), %s10298_s18 }
  0x90   : > { %14290 = sst [smem:[#allocation75_spill]] %s14372_s21  ;;  %s517_s27 = ssub.s32 %s10294_s16, %s14372_s21 }
  0x91   : > { %p102_p11 = scmp.ge.s32.totalorder %s14374_s29, 2  ;;  %p518_p12 = scmp.eq.s32.totalorder %s517_s27, 0 }
  0x92   : > { %p10619_p13 = por %p528_p10, %p527_p9  ;;  %p533_p0 = scmp.ne.s32.totalorder %s10278_s10, %s10274_s7 }
  0x93   : > { %s14376_s29 = smov (%p102_p11, %s14374_s29), 0  ;;  %p8929_p4 = scmp.lt.s32.totalorder %s10302_s22, 4 }
  0x94   : > { %14292 = sst [smem:[#allocation76_spill]] %s14376_s29  ;;  %p10632_p2 = por %p10548_p1, %p533_p0 }
  0x95   : > { %s10628_s23 = scalar_select %p518_p12, %s10282_s0, %s520_s12  }
  0x96   : > { %s14294_s11 = scalar_select %p10632_p2, 1, 0 }
  0x97   : > { %14293 = sst [smem:[#allocation77_spill]] %s10628_s23  ;;  %s10638_s15 = sand.u32 1, %s10302_s22  }
  0x98   : > { %14295 = sst [smem:[#allocation74_spill]] %s14294_s11  ;;  %s10641_s2 = sand.u32 1, %s10282_s0  }
  0x99   : > { %s1002_s27 = scalar_lea.hbm %s14271_s24, %s10294_s16  ;;  %s999_s7 = scalar_lea.vmem [#allocation14], %s10641_s2 }
  0x9a   : > { %s1006_s5 = sshll.u32 %s999_s7, 4  ;;  %s1004_s12 = sshll.u32 %s1002_s27, 4  ;;  %s1007_s5 = int_to_ptr.vmem [resolvable:$true] %s1006_s5  ;;  %s1005_s12 = int_to_ptr.hbm [resolvable:$true] %s1004_s12 }
  0x9b   : > { %p10648_p6 = pnand %p8929_p4, %p10619_p13  ;;  %s7801_s8 = sshll.u32 %s10641_s2, 5 }
  0x9c   : > { %s14207_s29 = scalar_lea.sflag [#allocation15], %s10638_s15  ;;  %s9814_s21 = sshra.s32 %s1005_s12, 4  ;;  %s9815_s21 = int_to_ptr.hbm [resolvable:$true] %s9814_s21 }
  0x9d   : > { %s9816_s18 = scalar_lea.hbm %s9815_s21, 1  ;;  %p10656_p9 = pneg %p10648_p6 }
  0x9e   : > { %p9817_p8 = scmp.ne.s32.totalorder %s9815_s21, %s9816_s18  ;;  %s9821_s6 = scalar_lea.hbm %s14271_s24, 2 }
  0x9f   : > { %p9822_p12 = scmp.lt.s32.totalorder %s9815_s21, %s14271_s24  ;;  %p9823_p13 = scmp.lt.s32.totalorder %s9821_s6, %s9816_s18 }
  0xa0   : > { %p9819_p10 = pnand %p10656_p9, %p9817_p8 }
  0xa1   : > { %p9824_p0 = por %p9823_p13, %p9822_p12 }
  0xa2   : > { %p9820_p11 = pneg %p9819_p10 }
  0xa4   : > { %p9825_p4 = pnand %p9824_p0, %p9820_p11 }
  0xa6   : > { %9828 = shalt.err (!%p9825_p4)
}
  0xa7   : > { %8897 = dma.hbm_to_vmem [thread:$0]  (!%p10648_p6), %s1005_s12, 16, %s1007_s5, %s14207_s29  }
  0xa8   : > { %s8639_s27 = sshll.u32 %s10294_s16, 5  ;;  %s1034_s21 = scalar_lea.vmem [#allocation17], %s7801_s8 }
  0xa9   : > { %s1042_s18 = sshll.u32 %s1034_s21, 4  ;;  %s1039_s7 = scalar_lea.hbm %s14270_s30, %s8639_s27  ;;  %s1043_s18 = int_to_ptr.vmem [resolvable:$true] %s1042_s18 }
  0xaa   : > { %s1040_s6 = sshll.u32 %s1039_s7, 4  ;;  %s1061_s24 = scalar_lea.hbm %s14267_s13, %s8639_s27  ;;  %s1041_s6 = int_to_ptr.hbm [resolvable:$true] %s1040_s6 }
  0xab   : > { %s1031_s0 = scalar_lea.sflag [#allocation18], %s10638_s15  ;;  %s9844_s11 = sshra.s32 %s1041_s6, 4  ;;  %s9845_s11 = int_to_ptr.hbm [resolvable:$true] %s9844_s11 }
  0xac   : > { %s9846_s10 = scalar_lea.hbm %s9845_s11, 32  ;;  %s9851_s5 = scalar_lea.hbm %s14270_s30, 64 }
  0xad   : > { %p9847_p8 = scmp.ne.s32.totalorder %s9845_s11, %s9846_s10  ;;  %p9852_p12 = scmp.lt.s32.totalorder %s9845_s11, %s14270_s30 }
  0xae   : > { %p9853_p13 = scmp.lt.s32.totalorder %s9851_s5, %s9846_s10 }
  0xaf   : > { %p9849_p10 = pnand %p9847_p8, %p10656_p9 }
  0xb0   : > { %p9854_p0 = por %p9853_p13, %p9852_p12 }
  0xb1   : > { %p9850_p11 = pneg %p9849_p10 }
  0xb3   : > { %p9855_p4 = pnand %p9854_p0, %p9850_p11 }
  0xb5   : > { %9858 = shalt.err (!%p9855_p4)
}
  0xb6   : > { %s14298_s12 = smov 4   ;;  %s14299_s21 = smov 64  }
  0xb7   : > { %8903 = dma.hbm_to_vmem [thread:$0]  (!%p10648_p6), %s1041_s6, 512, %s1043_s18, %s1031_s0, %s14299_s21, %s14299_s21, %s14298_s12  }
  0xb8   : > { %s1062_s27 = sshll.u32 %s1061_s24, 4  ;;  %s1056_s10 = scalar_lea.vmem [#allocation19], %s7801_s8  ;;  %s10687_s27 = int_to_ptr.hbm [resolvable:$true] %s1062_s27 }
  0xb9   : > { %s1064_s11 = sshll.u32 %s1056_s10, 4  ;;  %s1080_s7 = scalar_lea.hbm %s14268_s4, %s10294_s16  ;;  %s10689_s11 = int_to_ptr.vmem [resolvable:$true] %s1064_s11 }
  0xba   : > { %s1077_s5 = scalar_lea.vmem [#allocation20], %s10641_s2  ;;  %s1082_s30 = sshll.u32 %s1080_s7, 4  ;;  %s1083_s30 = int_to_ptr.hbm [resolvable:$true] %s1082_s30 }
  0xbb   : > { %s1084_s29 = sshll.u32 %s1077_s5, 4  ;;  %s14213_s22 = scalar_lea.sflag [#allocation21], %s10638_s15  ;;  %s1085_s29 = int_to_ptr.vmem [resolvable:$true] %s1084_s29 }
  0xbc   : > { %s9874_s28 = sshra.s32 %s1083_s30, 4  ;;  %s9881_s8 = scalar_lea.hbm %s14268_s4, 2  ;;  %s9875_s28 = int_to_ptr.hbm [resolvable:$true] %s9874_s28 }
  0xbd   : > { %s9876_s24 = scalar_lea.hbm %s9875_s28, 1  ;;  %p9882_p12 = scmp.lt.s32.totalorder %s9875_s28, %s14268_s4 }
  0xbe   : > { %p9877_p8 = scmp.ne.s32.totalorder %s9875_s28, %s9876_s24  ;;  %p9883_p13 = scmp.lt.s32.totalorder %s9881_s8, %s9876_s24 }
  0xc0   : > { %p9879_p10 = pnand %p9877_p8, %p10656_p9  ;;  %p9884_p0 = por %p9883_p13, %p9882_p12 }
  0xc2   : > { %p9880_p11 = pneg %p9879_p10 }
  0xc4   : > { %p9885_p4 = pnand %p9884_p0, %p9880_p11 }
  0xc6   : > { %9888 = shalt.err (!%p9885_p4)
}
  0xc7   : > { %8909 = dma.hbm_to_vmem [thread:$0]  (!%p10648_p6), %s1083_s30, 16, %s1085_s29, %s14213_s22  }
  0xc8   : > { %s1114_s18 = scalar_lea.hbm %s14263_s20, %s10294_s16  ;;  %s1111_s10 = scalar_lea.vmem [#allocation23], %s10641_s2 }
  0xc9   : > { %s1116_s6 = sshll.u32 %s1114_s18, 4  ;;  %s1118_s28 = sshll.u32 %s1111_s10, 4  ;;  %s1117_s6 = int_to_ptr.hbm [resolvable:$true] %s1116_s6  ;;  %s1119_s28 = int_to_ptr.vmem [resolvable:$true] %s1118_s28 }
  0xca   : > { %s14212_s7 = scalar_lea.sflag [#allocation24], %s10638_s15  ;;  %s9904_s5 = sshra.s32 %s1117_s6, 4  ;;  %s9905_s5 = int_to_ptr.hbm [resolvable:$true] %s9904_s5 }
  0xcb   : > { %s9906_s24 = scalar_lea.hbm %s9905_s5, 1  ;;  %s9911_s8 = scalar_lea.hbm %s14263_s20, 2 }
  0xcc   : > { %p9907_p8 = scmp.ne.s32.totalorder %s9905_s5, %s9906_s24  ;;  %p9912_p12 = scmp.lt.s32.totalorder %s9905_s5, %s14263_s20 }
  0xcd   : > { %p9913_p13 = scmp.lt.s32.totalorder %s9911_s8, %s9906_s24 }
  0xce   : > { %p9909_p10 = pnand %p9907_p8, %p10656_p9 }
  0xcf   : > { %p9914_p0 = por %p9913_p13, %p9912_p12 }
  0xd0   : > { %p9910_p11 = pneg %p9909_p10 }
  0xd2   : > { %p9915_p4 = pnand %p9914_p0, %p9910_p11 }
  0xd4   : > { %9918 = shalt.err (!%p9915_p4)
}
  0xd5   : > { %8915 = dma.hbm_to_vmem [thread:$0]  (!%p10648_p6), %s1117_s6, 16, %s1119_s28, %s14212_s7  }
  0xd6   : > { %s844_s30 = sshll.u32 %s14265_s17, 4  ;;  %s10338_s29 = smov [#allocation3]   ;;  %s845_s30 = int_to_ptr.hbm [resolvable:$true] %s844_s30 }
  0xd7   : > { %s846_s18 = sshll.u32 %s10338_s29, 4  ;;  %s871_s10 = sshll.u32 %s10379_s25, 4  ;;  %s847_s18 = int_to_ptr.vmem [resolvable:$true] %s846_s18  ;;  %s872_s10 = int_to_ptr.hbm [resolvable:$true] %s871_s10 }
  0xd8   : > { %s9934_s5 = sshra.s32 %s845_s30, 4  ;;  %s9941_s8 = scalar_lea.hbm %s14265_s17, 32  ;;  %s9935_s5 = int_to_ptr.hbm [resolvable:$true] %s9934_s5 }
  0xd9   : > { %s9936_s24 = scalar_lea.hbm %s9935_s5, 32  ;;  %p9942_p12 = scmp.lt.s32.totalorder %s9935_s5, %s14265_s17 }
  0xda   : > { %p9937_p8 = scmp.ne.s32.totalorder %s9935_s5, %s9936_s24  ;;  %p9943_p13 = scmp.lt.s32.totalorder %s9941_s8, %s9936_s24 }
  0xdc   : > { %p9939_p10 = pnand %p9937_p8, %p10574_p7  ;;  %p9944_p0 = por %p9943_p13, %p9942_p12 }
  0xde   : > { %p9940_p11 = pneg %p9939_p10 }
  0xe0   : > { %p9945_p4 = pnand %p9944_p0, %p9940_p11 }
  0xe2   : > { %9948 = shalt.err (!%p9945_p4)
}
  0xe3   : > { %s10339_s6 = smov 128   ;;  %s10340_s28 = smov 8  }
  0xe4   : > { %8875 = dma.hbm_to_vmem [thread:$0]  (!%p10564_p5), %s845_s30, 512, %s847_s18, [#allocation4], %s10339_s6, %s10339_s6, %s10340_s28  }
  0xe5   : > { %s10341_s29 = smov [#allocation7]   ;;  %s897_s22 = sshll.u32 %s14269_s3, 4  ;;  %s10724_s22 = int_to_ptr.hbm [resolvable:$true] %s897_s22 }
  0xe6   : > { %s873_s7 = sshll.u32 %s10341_s29, 4  ;;  %s9964_s5 = sshra.s32 %s872_s10, 4  ;;  %s874_s7 = int_to_ptr.vmem [resolvable:$true] %s873_s7  ;;  %s9965_s5 = int_to_ptr.hbm [resolvable:$true] %s9964_s5 }
  0xe7   : > { %s9966_s24 = scalar_lea.hbm %s9965_s5, 1  ;;  %s9971_s8 = scalar_lea.hbm %s10379_s25, 1 }
  0xe8   : > { %p9967_p8 = scmp.ne.s32.totalorder %s9965_s5, %s9966_s24  ;;  %p9972_p12 = scmp.lt.s32.totalorder %s9965_s5, %s10379_s25 }
  0xe9   : > { %p9973_p13 = scmp.lt.s32.totalorder %s9971_s8, %s9966_s24 }
  0xea   : > { %p9969_p10 = pnand %p9967_p8, %p10574_p7 }
  0xeb   : > { %p9974_p0 = por %p9973_p13, %p9972_p12 }
  0xec   : > { %p9970_p11 = pneg %p9969_p10 }
  0xee   : > { %p9975_p4 = pnand %p9974_p0, %p9970_p11 }
  0xf0   : > { %9978 = shalt.err (!%p9975_p4)
}
  0xf1   : > { %8881 = dma.hbm_to_vmem [thread:$0]  (!%p10564_p5), %s872_s10, 16, %s874_s7, [#allocation6]  }
  0xf2   : > { %s923_s30 = sshll.u32 %s14266_s14, 4  ;;  %s10342_s18 = smov [#allocation10]   ;;  %s10733_s30 = int_to_ptr.hbm [resolvable:$true] %s923_s30 }
  0xf3   : > { %s899_s6 = sshll.u32 %s10342_s18, 4  ;;  %s9994_s28 = sshra.s32 %s10724_s22, 4  ;;  %s900_s6 = int_to_ptr.vmem [resolvable:$true] %s899_s6  ;;  %s9995_s28 = int_to_ptr.hbm [resolvable:$true] %s9994_s28 }
  0xf4   : > { %s9996_s29 = scalar_lea.hbm %s9995_s28, 1  ;;  %s10001_s5 = scalar_lea.hbm %s14269_s3, 1 }
  0xf5   : > { %p9997_p8 = scmp.ne.s32.totalorder %s9995_s28, %s9996_s29  ;;  %p10002_p12 = scmp.lt.s32.totalorder %s9995_s28, %s14269_s3 }
  0xf6   : > { %p10003_p13 = scmp.lt.s32.totalorder %s10001_s5, %s9996_s29 }
  0xf7   : > { %p9999_p10 = pnand %p9997_p8, %p10574_p7 }
  0xf8   : > { %p10004_p0 = por %p10003_p13, %p10002_p12 }
  0xf9   : > { %p10000_p11 = pneg %p9999_p10 }
  0xfb   : > { %p10005_p4 = pnand %p10004_p0, %p10000_p11 }
  0xfd   : > { %10008 = shalt.err (!%p10005_p4)
}
  0xfe   : > { %8887 = dma.hbm_to_vmem [thread:$0]  (!%p10564_p5), %s10724_s22, 16, %s900_s6, [#allocation9]  }
  0xff   : > { %s10343_s7 = smov [#allocation13]   ;;  %s1019_s24 = scalar_lea.hbm %s14264_s19, %s10294_s16 }
 0x100   : > { %s925_s10 = sshll.u32 %s10343_s7, 4  ;;  %s10024_s8 = sshra.s32 %s10733_s30, 4  ;;  %s926_s10 = int_to_ptr.vmem [resolvable:$true] %s925_s10  ;;  %s10025_s8 = int_to_ptr.hbm [resolvable:$true] %s10024_s8 }
 0x101   : > { %s10026_s18 = scalar_lea.hbm %s10025_s8, 1  ;;  %s10031_s28 = scalar_lea.hbm %s14266_s14, 1 }
 0x102   : > { %p10027_p8 = scmp.ne.s32.totalorder %s10025_s8, %s10026_s18  ;;  %p10032_p12 = scmp.lt.s32.totalorder %s10025_s8, %s14266_s14 }
 0x103   : > { %p10033_p13 = scmp.lt.s32.totalorder %s10031_s28, %s10026_s18 }
 0x104   : > { %p10029_p10 = pnand %p10027_p8, %p10574_p7 }
 0x105   : > { %p10034_p0 = por %p10033_p13, %p10032_p12 }
 0x106   : > { %p10030_p11 = pneg %p10029_p10 }
 0x108   : > { %p10035_p4 = pnand %p10034_p0, %p10030_p11 }
 0x10a   : > { %10038 = shalt.err (!%p10035_p4)
}
 0x10b   : > { %8893 = dma.hbm_to_vmem [thread:$0]  (!%p10564_p5), %s10733_s30, 16, %s926_s10, [#allocation12]  }
 0x10c   : > { %s1021_s22 = sshll.u32 %s1019_s24, 4  ;;  %s1016_s6 = scalar_lea.vmem [#allocation16], %s10641_s2  ;;  %s1022_s22 = int_to_ptr.hbm [resolvable:$true] %s1021_s22 }
 0x10d   : > { %s1023_s29 = sshll.u32 %s1016_s6, 4  ;;  %s10054_s1 = sshra.s32 %s1022_s22, 4  ;;  %s1024_s29 = int_to_ptr.vmem [resolvable:$true] %s1023_s29  ;;  %s10055_s1 = int_to_ptr.hbm [resolvable:$true] %s10054_s1 }
 0x10e   : > { %s10056_s5 = scalar_lea.hbm %s10055_s1, 1  ;;  %s10061_s7 = scalar_lea.hbm %s14264_s19, 2 }
 0x10f   : > { %p10057_p7 = scmp.ne.s32.totalorder %s10055_s1, %s10056_s5  ;;  %p10062_p11 = scmp.lt.s32.totalorder %s10055_s1, %s14264_s19 }
 0x110   : > { %p10063_p12 = scmp.lt.s32.totalorder %s10061_s7, %s10056_s5 }
 0x111   : > { %p10059_p8 = pnand %p10057_p7, %p10656_p9 }
 0x112   : > { %p10064_p13 = por %p10063_p12, %p10062_p11 }
 0x113   : > { %p10060_p10 = pneg %p10059_p8 }
 0x115   : > { %p10065_p0 = pnand %p10064_p13, %p10060_p10 }
 0x117   : > { %10068 = shalt.err (!%p10065_p0)
}
 0x118   : > { %s14300_s26 = scalar_lea.sflag [#allocation15], %s10638_s15  ;;  %s10084_s30 = sshra.s32 %s10687_s27, 4  ;;  %s10085_s30 = int_to_ptr.hbm [resolvable:$true] %s10084_s30 }
 0x119   : > { %8900 = dma.hbm_to_vmem [thread:$0]  (!%p10648_p6), %s1022_s22, 16, %s1024_s29, %s14300_s26  }
 0x11a   : > { %s10086_s10 = scalar_lea.hbm %s10085_s30, 32  ;;  %s10091_s24 = scalar_lea.hbm %s14267_s13, 64 }
 0x11b   : > { %p10087_p5 = scmp.ne.s32.totalorder %s10085_s30, %s10086_s10  ;;  %p10092_p8 = scmp.lt.s32.totalorder %s10085_s30, %s14267_s13 }
 0x11c   : > { %p10093_p10 = scmp.lt.s32.totalorder %s10091_s24, %s10086_s10 }
 0x11d   : > { %p10089_p4 = pnand %p10087_p5, %p10656_p9 }
 0x11e   : > { %p10094_p11 = por %p10093_p10, %p10092_p8 }
 0x11f   : > { %p10090_p7 = pneg %p10089_p4 }
 0x121   : > { %p10095_p12 = pnand %p10094_p11, %p10090_p7 }
 0x123   : > { %10098 = shalt.err (!%p10095_p12)
}
 0x124   : > { %s14301_s8 = sld [smem:[#allocation59_spill]]  ;;  %s1094_s22 = scalar_lea.vmem [#allocation22], %s10641_s2 }
 0x125   : > { %8906 = dma.hbm_to_vmem [thread:$0]  (!%p10648_p6), %s10687_s27, 512, %s10689_s11, %s1031_s0, %s14299_s21, %s14299_s21, %s14298_s12  }
 0x126   : > { %s1101_s6 = sshll.u32 %s1094_s22, 4  ;;  %s1102_s6 = int_to_ptr.vmem [resolvable:$true] %s1101_s6 }
 0x12a   : > { %s1097_s18 = scalar_lea.hbm %s14301_s8, %s10294_s16  ;;  %s10121_s5 = scalar_lea.hbm %s14301_s8, 2 }
 0x12b   : > { %s1099_s28 = sshll.u32 %s1097_s18, 4  ;;  %s1100_s28 = int_to_ptr.hbm [resolvable:$true] %s1099_s28 }
 0x12c   : > { %s10114_s29 = sshra.s32 %s1100_s28, 4  ;;  %s10115_s29 = int_to_ptr.hbm [resolvable:$true] %s10114_s29 }
 0x12d   : > { %s10116_s1 = scalar_lea.hbm %s10115_s29, 1  ;;  %p10122_p4 = scmp.lt.s32.totalorder %s10115_s29, %s14301_s8 }
 0x12e   : > { %p10117_p13 = scmp.ne.s32.totalorder %s10115_s29, %s10116_s1  ;;  %p10123_p7 = scmp.lt.s32.totalorder %s10121_s5, %s10116_s1 }
 0x130   : > { %p10119_p0 = pnand %p10117_p13, %p10656_p9  ;;  %p10124_p8 = por %p10123_p7, %p10122_p4 }
 0x132   : > { %p10120_p5 = pneg %p10119_p0 }
 0x134   : > { %p10125_p10 = pnand %p10124_p8, %p10120_p5 }
 0x136   : > { %10128 = shalt.err (!%p10125_p10)
}
 0x137   : > { %s14302_s0 = scalar_lea.sflag [#allocation21], %s10638_s15  ;;  %s14303_s12 = sld [smem:[#allocation62_spill]] }
 0x138   : > { %8912 = dma.hbm_to_vmem [thread:$0]  (!%p10648_p6), %s1100_s28, 16, %s1102_s6, %s14302_s0  }
 0x139   : > { %s7807_s21 = sshll.u32 %s10641_s2, 2  ;;  %s7808_s27 = sshll.u32 %s10294_s16, 2 }
 0x13a   : > { %s1137_s26 = scalar_lea.vmem [#allocation25], %s7807_s21 }
 0x13b   : > { %s1145_s30 = sshll.u32 %s1137_s26, 4  ;;  %s1146_s30 = int_to_ptr.vmem [resolvable:$true] %s1145_s30 }
 0x13d   : > { %s1141_s11 = scalar_lea.hbm %s14303_s12, %s7808_s27  ;;  %s10151_s18 = scalar_lea.hbm %s14303_s12, 8 }
 0x13e   : > { %s1143_s7 = sshll.u32 %s1141_s11, 4  ;;  %s1144_s7 = int_to_ptr.hbm [resolvable:$true] %s1143_s7 }
 0x13f   : > { %s10144_s10 = sshra.s32 %s1144_s7, 4  ;;  %s10145_s10 = int_to_ptr.hbm [resolvable:$true] %s10144_s10 }
 0x140   : > { %s10146_s24 = scalar_lea.hbm %s10145_s10, 4  ;;  %p10152_p0 = scmp.lt.s32.totalorder %s10145_s10, %s14303_s12 }
 0x141   : > { %p10147_p11 = scmp.ne.s32.totalorder %s10145_s10, %s10146_s24  ;;  %p10153_p5 = scmp.lt.s32.totalorder %s10151_s18, %s10146_s24 }
 0x143   : > { %p10149_p12 = pnand %p10147_p11, %p10656_p9  ;;  %p10154_p4 = por %p10153_p5, %p10152_p0 }
 0x145   : > { %p10150_p13 = pneg %p10149_p12 }
 0x147   : > { %p10155_p7 = pnand %p10154_p4, %p10150_p13 }
 0x149   : > { %10158 = shalt.err (!%p10155_p7)
}
 0x14a   : > { %s14304_s28 = scalar_lea.sflag [#allocation24], %s10638_s15  ;;  %s14305_s22 = sld [smem:[#allocation64_spill]] }
 0x14b   : > { %8918 = dma.hbm_to_vmem [thread:$0]  (!%p10648_p6), %s1144_s7, 64, %s1146_s30, %s14304_s28  }
 0x14c   : > { %s1163_s1 = scalar_lea.vmem [#allocation26], %s10641_s2  ;;  %s1161_s21 = scalar_lea.sflag [#allocation27], %s10641_s2 }
 0x14d   : > { %s1170_s5 = sshll.u32 %s1163_s1, 4  ;;  %s1171_s5 = int_to_ptr.vmem [resolvable:$true] %s1170_s5 }
 0x150   : > { %s14306_s6 = smov %s14305_s22  ;;  %s1166_s29 = scalar_lea.hbm %s14305_s22, %s10294_s16 }
 0x151   : > { %s1168_s0 = sshll.u32 %s1166_s29, 4  ;;  %s10181_s15 = scalar_lea.hbm %s14306_s6, 2  ;;  %s1169_s0 = int_to_ptr.hbm [resolvable:$true] %s1168_s0 }
 0x152   : > { %s10174_s27 = sshra.s32 %s1169_s0, 4  ;;  %s10175_s27 = int_to_ptr.hbm [resolvable:$true] %s10174_s27 }
 0x153   : > { %s10176_s11 = scalar_lea.hbm %s10175_s27, 1  ;;  %p10182_p12 = scmp.lt.s32.totalorder %s10175_s27, %s14306_s6 }
 0x154   : > { %p10177_p8 = scmp.ne.s32.totalorder %s10175_s27, %s10176_s11  ;;  %p10183_p13 = scmp.lt.s32.totalorder %s10181_s15, %s10176_s11 }
 0x156   : > { %p10179_p10 = pnand %p10177_p8, %p10656_p9  ;;  %p10184_p0 = por %p10183_p13, %p10182_p12 }
 0x158   : > { %p10180_p11 = pneg %p10179_p10 }
 0x15a   : > { %p10185_p5 = pnand %p10184_p0, %p10180_p11 }
 0x15c   : > { %10188 = shalt.err (!%p10185_p5)
}
 0x15d   : > { %8921 = dma.hbm_to_vmem [thread:$0]  (!%p10648_p6), %s1169_s0, 16, %s1171_s5, %s1161_s21  }
 0x15e   : > { %1179 = sbr.rel (%p10553_p3) target bundleno = 6204 (0x183c), region = 136 }
 0x163   : > { %10237 = dma.done.wait (%p10548_p1), [#allocation4], 512  }
 0x164   : > { %10239 = vsyncadd (%p10548_p1), [#allocation4], 4294966784 }
 0x165   : > { %10241 = dma.done.wait (%p10548_p1), [#allocation6], 32  }
 0x166   : > { %10243 = vsyncadd (%p10548_p1), [#allocation6], 4294967264 }
 0x167   : > { %10245 = dma.done.wait (%p10548_p1), [#allocation9], 528  }
 0x168   : > { %10247 = vsyncadd (%p10548_p1), [#allocation9], 4294966768 }
 0x169   : > { %10249 = dma.done.wait (%p10548_p1), [#allocation12], 528  }
 0x16a   : > { %10251 = vsyncadd (%p10548_p1), [#allocation12], 4294966768  ;;  %s14309_s9 = sld [smem:[#allocation71_spill]] }
 0x16b   : > { %s14311_s26 = sld [smem:[#allocation66_spill]] }
 0x170   : > { %s14310_s23 = sadd.s32 4294967295, %s14309_s9  }
 0x171   : > { %s1216_s10 = sand.u32 1, %s14310_s23   ;;  %s10829_s24 = sand.u32 1, %s14311_s26  }
 0x172   : > { %s1217_s18 = scalar_lea.sflag [#allocation15], %s1216_s10 }
 0x173   : > { %10253 = dma.done.wait (%p10632_p2), %s1217_s18, 32  }
 0x174   : > { %10255 = vsyncadd (%p10632_p2), %s1217_s18, 4294967264  ;;  %s7817_s22 = sshll.u32 %s10829_s24, 5  ;;  %s1235_s1 = scalar_lea.sflag [#allocation18], %s1216_s10 }
 0x175   : > { %s10838_s5 = scalar_lea.vmem [#allocation17], %s7817_s22 }
 0x176   : > { %10257 = dma.done.wait (%p10632_p2), %s1235_s1, 1024  }
 0x177   : > { %10259 = vsyncadd (%p10632_p2), %s1235_s1, 4294966272  ;;  %s10844_s0 = scalar_lea.vmem [#allocation19], %s7817_s22  ;;  %s1255_s21 = scalar_lea.sflag [#allocation21], %s1216_s10 }
 0x178   : > { %10261 = dma.done.wait (%p10632_p2), %s1255_s21, 32  }
 0x179   : > { %10263 = vsyncadd (%p10632_p2), %s1255_s21, 4294967264  ;;  %s1273_s15 = scalar_lea.sflag [#allocation24], %s1216_s10 }
 0x17a   : > { %10265 = dma.done.wait (%p10632_p2), %s1273_s15, 80  }
 0x17b   : > { %10267 = vsyncadd (%p10632_p2), %s1273_s15, 4294967216  ;;  %s7819_s2 = sshll.u32 %s10829_s24, 2  ;;  %s1292_s23 = scalar_lea.sflag [#allocation27], %s10829_s24 }
 0x17c   : > { %s10858_s9 = scalar_lea.vmem [#allocation25], %s7819_s2 }
 0x17d   : > { %10269 = dma.done.wait (%p10632_p2), %s1292_s23, 16  }
 0x17e   : > { %10271 = vsyncadd (%p10632_p2), %s1292_s23, 4294967280  ;;  %s14313_s10 = sld [smem:[#allocation69_spill]] }
 0x17f   : > { %s14314_s18 = sld [smem:[#allocation68_spill]] }
 0x180   : > { %s14315_s22 = sld [smem:[#allocation37_spill]] }
 0x181   : > { %s14316_s1 = sld [smem:[#allocation38_spill]] }
 0x182   : > { %s14317_s21 = sld [smem:[#allocation65_spill]] }
 0x183   : > { %s14318_s15 = sld [smem:[#allocation49_spill]] }
 0x184   : > { %s14319_s7 = sld [smem:[#allocation50_spill]]  ;;  %s7820_s11 = sshll.u32 %s14313_s10, 3 }
 0x185   : > { %s14320_s2 = sld [smem:[#allocation51_spill]]  ;;  %p1449_p1 = scmp.lt.s32.totalorder %s14313_s10, 1 }
 0x186   : > { %s14321_s27 = sld [smem:[#allocation52_spill]]  ;;  %p1444_p3 = scmp.lt.s32.totalorder %s7820_s11, 15 }
 0x187   : > { %s14322_s26 = sld [smem:[#allocation53_spill]]  ;;  %p1454_p6 = scmp.lt.s32.totalorder %s14314_s18, 1 }
 0x188   : > { %s14378_s10 = smov (!%p1449_p1, %s14313_s10), 1  ;;  %s14323_s30 = sld [smem:[#allocation61_spill]] }
 0x189   : > { %s14380_s11 = smov (!%p1444_p3, %s7820_s11), 15  ;;  %s14324_s23 = sld [smem:[#allocation63_spill]] }
 0x18a   : > { %s8825_s29 = smul.u32 48, %s14378_s10  ;;  %s7821_s28 = sshll.u32 %s14380_s11, 3 }
 0x18b   : > { %s10871_s3 = scalar_lea.vmem %s14315_s22, %s7821_s28  ;;  %s10880_s8 = scalar_lea.vmem %s14317_s21, %s7821_s28 }
 0x18c   : > { %s10874_s4 = scalar_lea.vmem %s14316_s1, %s8825_s29  ;;  %p7833_p2 = scmp.ne.s32.totalorder %s14314_s18, 0 }
 0x18d   : > { %s10877_s6 = scalar_select %p1454_p6, %s14314_s18, 1 }
 0x18e   : > { %s14325_s20 = sld [smem:[#allocation39_spill]] (!%p7833_p2) }
 0x18f   : > { %s1456_s12 = scalar_lea.vmem %s14318_s15, %s10877_s6  ;;  %s1459_s13 = scalar_lea.vmem %s14319_s7, %s10877_s6 }
 0x190   : > { %s8641_s14 = sshll.u32 %s10877_s6, 6  ;;  %s8642_s17 = sshll.u32 %s10877_s6, 5 }
 0x191   : > { %s10889_s10 = scalar_lea.vmem %s14320_s2, %s8641_s14  ;;  %s10892_s11 = scalar_lea.vmem %s14321_s27, %s8642_s17 }
 0x192   : > { %s1472_s29 = scalar_lea.vmem %s14322_s26, %s10877_s6  ;;  %s8643_s22 = sshll.u32 %s10877_s6, 7 }
 0x193   : > { %s10898_s1 = scalar_lea.vmem %s14323_s30, %s8643_s22  ;;  %s10901_s19 = scalar_lea.vmem %s14324_s23, %s8643_s22 }
 0x194   : > { %1493 = sbr.rel (%p7833_p2) target bundleno = 1229 (0x4cd), region = 204  ;;  %s14326_s17 = sld [smem:[#allocation48_spill]] (!%p7833_p2) }
 0x199   : > { %v1531_v0 = vld [vmem:[%s14325_s20 + $0x38] sm:$0xff]  ;;  %v1530_v1 = vld [vmem:[%s14325_s20 + $0x30] sm:$0xff]  ;;  %vm1502_vm0 = vcmask 523264   ;;  %v1529_v2 = vld [vmem:[%s14325_s20 + $0x28] sm:$0xff]  ;;  %vm1560_vm1 = vcmask 261120  }
 0x19a   : > { %1543 = vmatpush.msra.mxu0 %v1531_v0  ;;  %1633 = vmatpush.msra.mxu2 %v1531_v0  ;;  %v10908_v3 = vld [vmem:[%s10871_s3] sm:$0xff]  ;;  %v10911_v4 = vld [vmem:[%s10871_s3 + $0x8] sm:$0xff]  ;;  %v10914_v5 = vld [vmem:[%s10871_s3 + $0x10] sm:$0xff] }
 0x19b   : > { %v10917_v6 = vld [vmem:[%s10871_s3 + $0x18] sm:$0xff]  ;;  %v1503_v7 = vsel %vm1502_vm0, %v10908_v3, 0.0  ;;  %v1528_v8 = vld [vmem:[%s14325_s20 + $0x20] sm:$0xff]  ;;  %v1504_v9 = vsel %vm1502_vm0, %v10911_v4, 0.0  ;;  %v1506_v10 = vsel %vm1502_vm0, %v10914_v5, 0.0  ;;  %v1559_v13 = vld [vmem:[#allocation3 + $0x18] sm:$0xff] }
 0x19c   : > { %1544 = vmatpush.msra.mxu0 %v1530_v1  ;;  %1634 = vmatpush.msra.mxu2 %v1530_v1  ;;  %v1498_v11 = vld [vmem:[%s10871_s3 + $0x20] sm:$0xff]  ;;  %v1505_v12 = vadd.f32 %v1504_v9, %v1503_v7  ;;  %v1527_v15 = vld [vmem:[%s14325_s20 + $0x18] sm:$0xff]  ;;  %v1508_v16 = vsel %vm1502_vm0, %v10917_v6, 0.0  ;;  %v1499_v17 = vld [vmem:[%s10871_s3 + $0x28] sm:$0xff] }
 0x19d   : > { %v1558_v14 = vld [vmem:[#allocation3 + $0x10] sm:$0xff]  ;;  %1576 = vmatpush.msra.mxu1 %v1559_v13  ;;  %v1526_v19 = vld [vmem:[%s14325_s20 + $0x10] sm:$0xff]  ;;  %v1510_v20 = vsel %vm1502_vm0, %v1498_v11, 0.0  ;;  %v1525_v23 = vld [vmem:[%s14325_s20 + $0x8] sm:$0xff]  ;;  %v1512_v24 = vsel %vm1502_vm0, %v1499_v17, 0.0 }
 0x19e   : > { %1545 = vmatpush.msra.mxu0 %v1529_v2  ;;  %1635 = vmatpush.msra.mxu2 %v1529_v2  ;;  %v1507_v18 = vadd.f32 %v1506_v10, %v1505_v12  ;;  %v1500_v21 = vld [vmem:[%s10871_s3 + $0x30] sm:$0xff]  ;;  %v1501_v25 = vld [vmem:[%s10871_s3 + $0x38] sm:$0xff]  ;;  %v1524_v27 = vld [vmem:[%s14325_s20] sm:$0xff] }
 0x19f   : > { %1577 = vmatpush.msra.mxu1 %v1558_v14  ;;  %v1514_v28 = vsel %vm1502_vm0, %v1500_v21, 0.0  ;;  %v1516_v30 = vsel %vm1502_vm0, %v1501_v25, 0.0  ;;  %v1557_v39 = vld [vmem:[#allocation3 + $0x8] sm:$0xff]  ;;  %v1556_v40 = vld [vmem:[#allocation3] sm:$0xff] }
 0x1a0   : > { %1546 = vmatpush.msra.mxu0 %v1528_v8  ;;  %1636 = vmatpush.msra.mxu2 %v1528_v8  ;;  %v1509_v22 = vadd.f32 %v1508_v16, %v1507_v18  ;;  %v7916_v18 = vld [vmem:[%s14326_s17 + $0x70] sm:$0xf] }
 0x1a1   : > { %1578 = vmatpush.msra.mxu1 %v1557_v39 }
 0x1a2   : > { %1547 = vmatpush.msra.mxu0 %v1527_v15  ;;  %1637 = vmatpush.msra.mxu2 %v1527_v15  ;;  %v1511_v26 = vadd.f32 %v1510_v20, %v1509_v22  ;;  %v7908_v20 = vld [vmem:[%s14326_s17 + $0x60] sm:$0xf]  ;;  %v8662_v22 = vld [vmem:[%s14326_s17 + $0x64] sm:$0xf0] }
 0x1a3   : > { %1579 = vmatpush.msra.mxu1 %v1556_v40 }
 0x1a4   : > { %1548 = vmatpush.msra.mxu0 %v1526_v19  ;;  %1638 = vmatpush.msra.mxu2 %v1526_v19  ;;  %v1513_v29 = vadd.f32 %v1512_v24, %v1511_v26  ;;  %v8664_v19 = vld [vmem:[%s14326_s17 + $0x74] sm:$0xf0]  ;;  %v7909_v24 = vor.u32 %v8662_v22, %v7908_v20 }
 0x1a5   : > { %v8660_v26 = vld [vmem:[%s14326_s17 + $0x54] sm:$0xf0] }
 0x1a6   : > { %1549 = vmatpush.msra.mxu0 %v1525_v23  ;;  %1639 = vmatpush.msra.mxu2 %v1525_v23  ;;  %v1515_v31 = vadd.f32 %v1514_v28, %v1513_v29  ;;  %v8044_v23 = vld [vmem:[%s14326_s17 + $0x170] sm:$0xf]  ;;  %v8672_v22 = vld [vmem:[%s14326_s17 + $0xb4] sm:$0xf0] }
 0x1a7   : > { %v7980_v29 = vld [vmem:[%s14326_s17 + $0xf0] sm:$0xf] }
 0x1a8   : > { %1550 = vmatpush.msra.mxu0 %v1524_v27  ;;  %1640 = vmatpush.msra.mxu2 %v1524_v27  ;;  %v1517_v32 = vadd.f32 %v1516_v30, %v1515_v31  ;;  %v8696_v27 = vld [vmem:[%s14326_s17 + $0x174] sm:$0xf0]  ;;  %v8036_v31 = vld [vmem:[%s14326_s17 + $0x160] sm:$0xf] }
 0x1a9   : > { %v8045_v28 = vor.u32 %v8696_v27, %v8044_v23  ;;  %v8680_v30 = vld [vmem:[%s14326_s17 + $0xf4] sm:$0xf0]  ;;  %v8004_v23 = vld [vmem:[%s14326_s17 + $0x120] sm:$0xf]  ;;  %v8092_v27 = vld [vmem:[%s14326_s17 + $0x1d0] sm:$0xf] }
 0x1aa   : > { %1661 = vmatpush.msrb.mxu0 %v1559_v13  ;;  %v1518_v33 = vrot.slane %v1517_v32, 4 }
 0x1ab   : > { %2405 = vmatpush.bf16.msrb.mxu2 %v8045_v28  ;;  %v8708_v28 = vld [vmem:[%s14326_s17 + $0x1d4] sm:$0xf0] }
 0x1ac   : > { %1662 = vmatpush.msrb.mxu0 %v1558_v14  ;;  %v1519_v34 = vadd.f32 %v1518_v33, %v1517_v32  ;;  %v7981_v32 = vor.u32 %v8680_v30, %v7980_v29  ;;  %v8694_v33 = vld [vmem:[%s14326_s17 + $0x164] sm:$0xf0]  ;;  %v8648_v29 = vld [vmem:[#allocation8 + $0x18] sm:$0xff]  ;;  %v8093_v30 = vor.u32 %v8708_v28, %v8092_v27  ;;  %v8724_v28 = vld [vmem:[%s14326_s17 + $0x254] sm:$0xf0] }
 0x1ad   : > { %1758 = vmatpush.bf16.msrb.mxu1 %v8648_v29  ;;  %v8212_v29 = vld [vmem:[%s14326_s17 + $0x2c0] sm:$0xf] }
 0x1ae   : > { %v1520_v35 = vrot.slane %v1519_v34, 2  ;;  %1663 = vmatpush.msrb.mxu0 %v1557_v39  ;;  %v7884_v39 = vld [vmem:[%s14326_s17 + $0x30] sm:$0xf] }
 0x1b0   : > { %v1521_v36 = vadd.f32 %v1520_v35, %v1519_v34  ;;  %1664 = vmatpush.msrb.mxu0 %v1556_v40  ;;  %v8037_v34 = vor.u32 %v8694_v33, %v8036_v31  ;;  %v8656_v40 = vld [vmem:[%s14326_s17 + $0x34] sm:$0xf0]  ;;  %v7940_v31 = vld [vmem:[%s14326_s17 + $0xa0] sm:$0xf] }
 0x1b2   : > { %v1522_v37 = vrot.slane %v1521_v36, 1  ;;  %2406 = vmatpush.bf16.msrb.mxu2 %v8037_v34  ;;  %v7996_v34 = vld [vmem:[%s14326_s17 + $0x110] sm:$0xf] }
 0x1b4   : > { %v1523_v38 = vadd.f32 %v1522_v37, %v1521_v36  ;;  %v7892_v36 = vld [vmem:[%s14326_s17 + $0x40] sm:$0xf]  ;;  %v8658_v37 = vld [vmem:[%s14326_s17 + $0x44] sm:$0xf0] }
 0x1b6   : > { %7834 = vmatmul.msk.f32.vlgmr.msra.gmra.mxu0 %vm1502_vm0, %v1523_v38  ;;  %v7893_v38 = vor.u32 %v8658_v37, %v7892_v36  ;;  %v8084_v37 = vld [vmem:[%s14326_s17 + $0x1c0] sm:$0xf] }
 0x1b7   : > { %2392 = vmatpush.bf16.msra.mxu0 %v7981_v32  ;;  %v8670_v32 = vld [vmem:[%s14326_s17 + $0xa4] sm:$0xf0] }
 0x1b8   : > { %v7941_v33 = vor.u32 %v8670_v32, %v7940_v31  ;;  %v8738_v31 = vld [vmem:[%s14326_s17 + $0x2c4] sm:$0xf0]  ;;  %v8052_v32 = vld [vmem:[%s14326_s17 + $0x180] sm:$0xf] }
 0x233   : > { %v1552_v41 = vpop.f32.mrf.mxu0 }
 0x234   : > { %v1555_v42 = vmul.f32 0.0078125, %v1552_v41  ;;  %v7885_v41 = vor.u32 %v8656_v40, %v7884_v39  ;;  %v8647_v39 = vld [vmem:[#allocation8 + $0x10] sm:$0xff] }
 0x235   : > { %1759 = vmatpush.bf16.msrb.mxu1 %v8647_v39 }
 0x236   : > { %7835 = vmatmul.msk.f32.vlgmr.msra.gmra.mxu1 %vm1560_vm1, %v1555_v42  ;;  %v7876_v42 = vld [vmem:[%s14326_s17 + $0x20] sm:$0xf] }
 0x2b3   : > { %v1581_v43 = vpop.f32.mrf.mxu1 }
 0x2b4   : > { %v1584_v44 = vperm.slane %v1581_v43, 0  ;;  %v8654_v43 = vld [vmem:[%s14326_s17 + $0x24] sm:$0xf0] }
 0x2b6   : > { %v10943_v45 = vsub.f32 %v10908_v3, %v1584_v44  ;;  %v10946_v46 = vsub.f32 %v10911_v4, %v1584_v44  ;;  %v10949_v47 = vsub.f32 %v10914_v5, %v1584_v44  ;;  %v10952_v48 = vsub.f32 %v10917_v6, %v1584_v44 }
 0x2b7   : > { %v10954_v49 = vsub.f32 %v1498_v11, %v1584_v44  ;;  %v10962_v53 = vsub.f32 %v1499_v17, %v1584_v44  ;;  %v10968_v58 = vsub.f32 %v1500_v21, %v1584_v44  ;;  %v10973_v62 = vsub.f32 %v1501_v25, %v1584_v44  ;;  %v7900_v25 = vld [vmem:[%s14326_s17 + $0x50] sm:$0xf] }
 0x2b8   : > { %v1593_v50 = vmul.f32 %v10943_v45, %v10943_v45  ;;  %v1594_v51 = vmul.f32 %v10946_v46, %v10946_v46  ;;  %v1595_v52 = vmul.f32 %v10949_v47, %v10949_v47  ;;  %v1596_v54 = vmul.f32 %v10952_v48, %v10952_v48 }
 0x2b9   : > { %v1597_v59 = vmul.f32 %v10954_v49, %v10954_v49  ;;  %v1598_v63 = vmul.f32 %v10962_v53, %v10962_v53  ;;  %v1599_v2 = vmul.f32 %v10968_v58, %v10968_v58  ;;  %v1600_v5 = vmul.f32 %v10973_v62, %v10973_v62 }
 0x2ba   : > { %v1601_v55 = vsel %vm1502_vm0, %v1593_v50, 0.0  ;;  %v1602_v56 = vsel %vm1502_vm0, %v1594_v51, 0.0  ;;  %v1604_v60 = vsel %vm1502_vm0, %v1595_v52, 0.0  ;;  %v1606_v0 = vsel %vm1502_vm0, %v1596_v54, 0.0  ;;  %v7972_v52 = vld [vmem:[%s14326_s17 + $0xe0] sm:$0xf] }
 0x2bb   : > { %v1603_v57 = vadd.f32 %v1602_v56, %v1601_v55  ;;  %v1608_v3 = vsel %vm1502_vm0, %v1597_v59, 0.0  ;;  %v1610_v6 = vsel %vm1502_vm0, %v1598_v63, 0.0  ;;  %v1612_v8 = vsel %vm1502_vm0, %v1599_v2, 0.0  ;;  %v8678_v54 = vld [vmem:[%s14326_s17 + $0xe4] sm:$0xf0] }
 0x2bc   : > { %v1614_v10 = vsel %vm1502_vm0, %v1600_v5, 0.0  ;;  %v7917_v21 = vor.u32 %v8664_v19, %v7916_v18  ;;  %v7901_v35 = vor.u32 %v8660_v26, %v7900_v25  ;;  %v7877_v44 = vor.u32 %v8654_v43, %v7876_v42  ;;  %v8028_v55 = vld [vmem:[%s14326_s17 + $0x150] sm:$0xf]  ;;  %v8020_v2 = vld [vmem:[%s14326_s17 + $0x140] sm:$0xf] }
 0x2bd   : > { %v1605_v61 = vadd.f32 %v1604_v60, %v1603_v57  ;;  %v7973_v56 = vor.u32 %v8678_v54, %v7972_v52  ;;  %v8692_v57 = vld [vmem:[%s14326_s17 + $0x154] sm:$0xf0]  ;;  %v7868_v60 = vld [vmem:[%s14326_s17 + $0x10] sm:$0xf]  ;;  %v8100_v18 = vld [vmem:[%s14326_s17 + $0x1e0] sm:$0xf] }
 0x2be   : > { %2379 = vmatpush.bf16.msra.mxu3 %v7917_v21  ;;  %v8029_v59 = vor.u32 %v8692_v57, %v8028_v55  ;;  %v8710_v19 = vld [vmem:[%s14326_s17 + $0x1e4] sm:$0xf0]  ;;  %v7948_v21 = vld [vmem:[%s14326_s17 + $0xb0] sm:$0xf]  ;;  %v8668_v42 = vld [vmem:[%s14326_s17 + $0x94] sm:$0xf0] }
 0x2bf   : > { %v1607_v1 = vadd.f32 %v1606_v0, %v1605_v61  ;;  %v8652_v61 = vld [vmem:[%s14326_s17 + $0x14] sm:$0xf0]  ;;  %2393 = vmatpush.bf16.msra.mxu0 %v7973_v56  ;;  %v7964_v0 = vld [vmem:[%s14326_s17 + $0xd0] sm:$0xf]  ;;  %v8101_v20 = vor.u32 %v8710_v19, %v8100_v18  ;;  %v8686_v25 = vld [vmem:[%s14326_s17 + $0x124] sm:$0xf0] }
 0x2c0   : > { %v7869_v63 = vor.u32 %v8652_v61, %v7868_v60  ;;  %2407 = vmatpush.bf16.msrb.mxu2 %v8029_v59  ;;  %v8005_v26 = vor.u32 %v8686_v25, %v8004_v23  ;;  %v7988_v43 = vld [vmem:[%s14326_s17 + $0x100] sm:$0xf]  ;;  %v8236_v52 = vld [vmem:[%s14326_s17 + $0x2f0] sm:$0xf]  ;;  %v8744_v54 = vld [vmem:[%s14326_s17 + $0x2f4] sm:$0xf0] }
 0x2c1   : > { %v1609_v4 = vadd.f32 %v1608_v3, %v1607_v1  ;;  %v8676_v1 = vld [vmem:[%s14326_s17 + $0xd4] sm:$0xf0]  ;;  %v8237_v55 = vor.u32 %v8744_v54, %v8236_v52  ;;  %v8646_v56 = vld [vmem:[#allocation8 + $0x8] sm:$0xff]  ;;  %v8076_v57 = vld [vmem:[%s14326_s17 + $0x1b0] sm:$0xf] }
 0x2c2   : > { %2380 = vmatpush.bf16.msra.mxu3 %v7909_v24  ;;  %v7965_v3 = vor.u32 %v8676_v1, %v7964_v0  ;;  %v7949_v24 = vor.u32 %v8672_v22, %v7948_v21  ;;  %v8704_v59 = vld [vmem:[%s14326_s17 + $0x1b4] sm:$0xf0]  ;;  %v7924_v61 = vld [vmem:[%s14326_s17 + $0x80] sm:$0xf]  ;;  %v8172_v0 = vld [vmem:[%s14326_s17 + $0x270] sm:$0xf]  ;;  %1760 = vmatpush.bf16.msrb.mxu1 %v8646_v56 }
 0x2c3   : > { %v1611_v7 = vadd.f32 %v1610_v6, %v1609_v4  ;;  %v8690_v4 = vld [vmem:[%s14326_s17 + $0x144] sm:$0xf0]  ;;  %v7860_v6 = vld [vmem:[%s14326_s17] sm:$0xf]  ;;  %v8077_v60 = vor.u32 %v8704_v59, %v8076_v57  ;;  %v7918_v18 = vld [vmem:[%s14326_s17 + $0x78] sm:$0xf0] }
 0x2c4   : > { %v8021_v5 = vor.u32 %v8690_v4, %v8020_v2  ;;  %2394 = vmatpush.bf16.msra.mxu0 %v7965_v3  ;;  %v8728_v2 = vld [vmem:[%s14326_s17 + $0x274] sm:$0xf0]  ;;  %v8228_v3 = vld [vmem:[%s14326_s17 + $0x2e0] sm:$0xf]  ;;  %v8742_v4 = vld [vmem:[%s14326_s17 + $0x2e4] sm:$0xf0] }
 0x2c5   : > { %v1613_v9 = vadd.f32 %v1612_v8, %v1611_v7  ;;  %v8650_v7 = vld [vmem:[%s14326_s17 + $0x4] sm:$0xf0]  ;;  %v8060_v19 = vld [vmem:[%s14326_s17 + $0x190] sm:$0xf]  ;;  %v8700_v22 = vld [vmem:[%s14326_s17 + $0x194] sm:$0xf0] }
 0x2c6   : > { %2381 = vmatpush.bf16.msra.mxu3 %v7901_v35  ;;  %v7861_v8 = vor.u32 %v8650_v7, %v7860_v6  ;;  %2408 = vmatpush.bf16.msrb.mxu2 %v8021_v5  ;;  %v8684_v35 = vld [vmem:[%s14326_s17 + $0x114] sm:$0xf0]  ;;  %v8173_v5 = vor.u32 %v8728_v2, %v8172_v0  ;;  %v8229_v6 = vor.u32 %v8742_v4, %v8228_v3  ;;  %v1791_v23 = vld [vmem:[%s10874_s4] sm:$0xff]  ;;  %v7910_v52 = vld [vmem:[%s14326_s17 + $0x68] sm:$0xf0] }
 0x2c7   : > { %v1615_v11 = vadd.f32 %v1614_v10, %v1613_v9  ;;  %v8108_v9 = vld [vmem:[%s14326_s17 + $0x1f0] sm:$0xf]  ;;  %v8712_v10 = vld [vmem:[%s14326_s17 + $0x1f4] sm:$0xf0]  ;;  %v7997_v36 = vor.u32 %v8684_v35, %v7996_v34  ;;  %v11066_v27 = vpack.c.bf16 %v1791_v23, %v1791_v23  ;;  %v8213_v34 = vor.u32 %v8738_v31, %v8212_v29  ;;  %v1792_v56 = vld [vmem:[%s10874_s4 + $0x8] sm:$0xff] }
 0x2c8   : > { %v8645_v7 = vld [vmem:[#allocation8] sm:$0xff]  ;;  %v8677_v57 = vld [vmem:[%s14326_s17 + $0xe4] sm:$0xf]  ;;  %v7974_v59 = vld [vmem:[%s14326_s17 + $0xe8] sm:$0xf0] }
 0x2c9   : > { %v1616_v12 = vrot.slane %v1615_v11, 4  ;;  %1761 = vmatpush.bf16.msrb.mxu1 %v8645_v7  ;;  %v8196_v0 = vld [vmem:[%s14326_s17 + $0x2a0] sm:$0xf]  ;;  %v8734_v2 = vld [vmem:[%s14326_s17 + $0x2a4] sm:$0xf0] }
 0x2ca   : > { %2382 = vmatpush.bf16.msra.mxu3 %v7893_v38  ;;  %v8706_v38 = vld [vmem:[%s14326_s17 + $0x1c4] sm:$0xf0]  ;;  %v7966_v7 = vld [vmem:[%s14326_s17 + $0xd8] sm:$0xf0]  ;;  %v1679_v23 = vld [vmem:[#allocation5] sm:$0x1] }
 0x2cb   : > { %v1617_v13 = vadd.f32 %v1616_v12, %v1615_v11  ;;  %v8109_v11 = vor.u32 %v8712_v10, %v8108_v9  ;;  %v7956_v12 = vld [vmem:[%s14326_s17 + $0xc0] sm:$0xf]  ;;  %v8085_v40 = vor.u32 %v8706_v38, %v8084_v37  ;;  %v8702_v9 = vld [vmem:[%s14326_s17 + $0x1a4] sm:$0xf0]  ;;  %v8679_v37 = vld [vmem:[%s14326_s17 + $0xf4] sm:$0xf] }
 0x2cc   : > { %v7982_v38 = vld [vmem:[%s14326_s17 + $0xf8] sm:$0xf0]  ;;  %v1796_v29 = vld [vmem:[%s10874_s4 + $0x28] sm:$0xff]  ;;  %v8124_v31 = vld [vmem:[%s14326_s17 + $0x210] sm:$0xf] }
 0x2cd   : > { %v1618_v14 = vrot.slane %v1617_v13, 2 }
 0x2ce   : > { %2383 = vmatpush.bf16.msra.mxu3 %v7885_v41  ;;  %v7932_v41 = vld [vmem:[%s14326_s17 + $0x90] sm:$0xf] }
 0x2cf   : > { %v1619_v15 = vadd.f32 %v1618_v14, %v1617_v13  ;;  %v8674_v13 = vld [vmem:[%s14326_s17 + $0xc4] sm:$0xf0]  ;;  %v8012_v14 = vld [vmem:[%s14326_s17 + $0x130] sm:$0xf] }
 0x2d1   : > { %v1620_v16 = vrot.slane %v1619_v15, 1 }
 0x2d2   : > { %2384 = vmatpush.bf16.msra.mxu3 %v7877_v44  ;;  %v8682_v44 = vld [vmem:[%s14326_s17 + $0x104] sm:$0xf0] }
 0x2d3   : > { %v1621_v17 = vadd.f32 %v1620_v16, %v1619_v15  ;;  %v7957_v15 = vor.u32 %v8674_v13, %v7956_v12  ;;  %v8688_v16 = vld [vmem:[%s14326_s17 + $0x134] sm:$0xf0]  ;;  %v8726_v12 = vld [vmem:[%s14326_s17 + $0x264] sm:$0xf0]  ;;  %v8220_v13 = vld [vmem:[%s14326_s17 + $0x2d0] sm:$0xf] }
 0x2d5   : > { %7836 = vmatmul.msk.f32.vlgmr.msra.gmra.mxu2 %vm1502_vm0, %v1621_v17  ;;  %v8013_v17 = vor.u32 %v8688_v16, %v8012_v14  ;;  %2395 = vmatpush.bf16.msra.mxu0 %v7957_v15  ;;  %v8740_v14 = vld [vmem:[%s14326_s17 + $0x2d4] sm:$0xf0] }
 0x2d6   : > { %2385 = vmatpush.bf16.msra.mxu3 %v7869_v63  ;;  %v8666_v63 = vld [vmem:[%s14326_s17 + $0x84] sm:$0xf0]  ;;  %v8221_v16 = vor.u32 %v8740_v14, %v8220_v13 }
 0x2d7   : > { %2409 = vmatpush.bf16.msrb.mxu2 %v8013_v17  ;;  %v7925_v1 = vor.u32 %v8666_v63, %v7924_v61  ;;  %v8663_v17 = vld [vmem:[%s14326_s17 + $0x74] sm:$0xf]  ;;  %v8140_v61 = vld [vmem:[%s14326_s17 + $0x230] sm:$0xf]  ;;  %v8720_v63 = vld [vmem:[%s14326_s17 + $0x234] sm:$0xf0] }
 0x2d8   : > { %v7921_v21 = vor.u32 %v8663_v17, %v7918_v18  ;;  %v8141_v4 = vor.u32 %v8720_v63, %v8140_v61  ;;  %v8711_v61 = vld [vmem:[%s14326_s17 + $0x1f4] sm:$0xf]  ;;  %v8110_v63 = vld [vmem:[%s14326_s17 + $0x1f8] sm:$0xf0] }
 0x2d9   : > { %2396 = vmatpush.bf16.msra.mxu0 %v7949_v24  ;;  %v8156_v24 = vld [vmem:[%s14326_s17 + $0x250] sm:$0xf]  ;;  %v8046_v18 = vld [vmem:[%s14326_s17 + $0x178] sm:$0xf0] }
 0x2da   : > { %2386 = vmatpush.bf16.msra.mxu3 %v7861_v8  ;;  %v8068_v8 = vld [vmem:[%s14326_s17 + $0x1a0] sm:$0xf]  ;;  %2457 = vmatpush.bf16.msra.mxu1 %v7921_v21  ;;  %v1794_v21 = vld [vmem:[%s10874_s4 + $0x18] sm:$0xff] }
 0x2db   : > { %2410 = vmatpush.bf16.msrb.mxu2 %v8005_v26  ;;  %v8069_v10 = vor.u32 %v8702_v9, %v8068_v8  ;;  %v8061_v26 = vor.u32 %v8700_v22, %v8060_v19  ;;  %v8132_v8 = vld [vmem:[%s14326_s17 + $0x220] sm:$0xf]  ;;  %v8659_v19 = vld [vmem:[%s14326_s17 + $0x54] sm:$0xf] }
 0x2dd   : > { %2397 = vmatpush.bf16.msra.mxu0 %v7941_v33  ;;  %v8698_v33 = vld [vmem:[%s14326_s17 + $0x184] sm:$0xf0]  ;;  %2387 = vmatmul.bf16.vlgmr.msra.gmra.mxu3 %v11066_v27 }
 0x2de   : > { %2418 = vmatpush.bf16.msrb.mxu3 %v8109_v11  ;;  %v8164_v11 = vld [vmem:[%s14326_s17 + $0x260] sm:$0xf]  ;;  %v8053_v35 = vor.u32 %v8698_v33, %v8052_v32  ;;  %v8716_v32 = vld [vmem:[%s14326_s17 + $0x214] sm:$0xf0] }
 0x2df   : > { %2411 = vmatpush.bf16.msrb.mxu2 %v7997_v36  ;;  %v8165_v15 = vor.u32 %v8726_v12, %v8164_v11  ;;  %v1793_v36 = vld [vmem:[%s10874_s4 + $0x10] sm:$0xff]  ;;  %v8732_v12 = vld [vmem:[%s14326_s17 + $0x294] sm:$0xf0]  ;;  %v8180_v33 = vld [vmem:[%s14326_s17 + $0x280] sm:$0xf] }
 0x2e0   : > { %v11078_v39 = vpack.c.bf16 %v1793_v36, %v1793_v36  ;;  %v8188_v11 = vld [vmem:[%s14326_s17 + $0x290] sm:$0xf]  ;;  %v8730_v36 = vld [vmem:[%s14326_s17 + $0x284] sm:$0xf0] }
 0x2e2   : > { %2419 = vmatpush.bf16.msrb.mxu3 %v8101_v20 }
 0x2e6   : > { %2420 = vmatpush.bf16.msrb.mxu3 %v8093_v30  ;;  %v8157_v30 = vor.u32 %v8724_v28, %v8156_v24  ;;  %v7958_v28 = vld [vmem:[%s14326_s17 + $0xc8] sm:$0xf0] }
 0x2ea   : > { %2421 = vmatpush.bf16.msrb.mxu3 %v8085_v40  ;;  %v7985_v40 = vor.u32 %v8679_v37, %v7982_v38  ;;  %v8671_v37 = vld [vmem:[%s14326_s17 + $0xb4] sm:$0xf]  ;;  %v7950_v38 = vld [vmem:[%s14326_s17 + $0xb8] sm:$0xf0] }
 0x2ee   : > { %2422 = vmatpush.bf16.msrb.mxu3 %v8077_v60  ;;  %v11090_v60 = vpack.c.bf16 %v1792_v56, %v1792_v56  ;;  %v7953_v56 = vor.u32 %v8671_v37, %v7950_v38  ;;  %v8653_v37 = vld [vmem:[%s14326_s17 + $0x24] sm:$0xf]  ;;  %v7878_v38 = vld [vmem:[%s14326_s17 + $0x28] sm:$0xf0] }
 0x2f2   : > { %2423 = vmatpush.bf16.msrb.mxu3 %v8069_v10  ;;  %v8718_v10 = vld [vmem:[%s14326_s17 + $0x224] sm:$0xf0] }
 0x2f6   : > { %2424 = vmatpush.bf16.msrb.mxu3 %v8061_v26  ;;  %v8673_v26 = vld [vmem:[%s14326_s17 + $0xc4] sm:$0xf] }
 0x2fa   : > { %2425 = vmatpush.bf16.msrb.mxu3 %v8053_v35  ;;  %v8125_v35 = vor.u32 %v8716_v32, %v8124_v31  ;;  %v8707_v32 = vld [vmem:[%s14326_s17 + $0x1d4] sm:$0xf] }
 0x2fe   : > { %2470 = vmatpush.bf16.msra.mxu3 %v7985_v40  ;;  %v8181_v40 = vor.u32 %v8730_v36, %v8180_v33  ;;  %v8094_v33 = vld [vmem:[%s14326_s17 + $0x1d8] sm:$0xf0]  ;;  %v8230_v36 = vld [vmem:[%s14326_s17 + $0x2e8] sm:$0xf0] }
 0x358   : > { %v1642_v50 = vpop.f32.mrf.mxu2 }
 0x359   : > { %v1645_v51 = vmul.f32 0.0078125, %v1642_v50  ;;  %v7933_v50 = vor.u32 %v8668_v42, %v7932_v41  ;;  %v8148_v41 = vld [vmem:[%s14326_s17 + $0x240] sm:$0xf]  ;;  %v8722_v42 = vld [vmem:[%s14326_s17 + $0x244] sm:$0xf0] }
 0x35b   : > { %7837 = vmatmul.msk.f32.vlgmr.msrb.gmra.mxu0 %vm1560_vm1, %v1645_v51  ;;  %v7989_v51 = vor.u32 %v8682_v44, %v7988_v43  ;;  %v8204_v43 = vld [vmem:[%s14326_s17 + $0x2b0] sm:$0xf]  ;;  %v8149_v44 = vor.u32 %v8722_v42, %v8148_v41  ;;  %v8116_v41 = vld [vmem:[%s14326_s17 + $0x200] sm:$0xf]  ;;  %v8714_v42 = vld [vmem:[%s14326_s17 + $0x204] sm:$0xf0] }
 0x35c   : > { %2398 = vmatpush.bf16.msra.mxu0 %v7933_v50  ;;  %v8736_v50 = vld [vmem:[%s14326_s17 + $0x2b4] sm:$0xf0] }
 0x35d   : > { %2412 = vmatpush.bf16.msrb.mxu2 %v7989_v51  ;;  %v8661_v51 = vld [vmem:[%s14326_s17 + $0x64] sm:$0xf]  ;;  %v8205_v54 = vor.u32 %v8736_v50, %v8204_v43  ;;  %v7894_v50 = vld [vmem:[%s14326_s17 + $0x48] sm:$0xf0] }
 0x35e   : > { %v8657_v43 = vld [vmem:[%s14326_s17 + $0x44] sm:$0xf] }
 0x360   : > { %2399 = vmatpush.bf16.msra.mxu0 %v7925_v1  ;;  %2413 = vmatmul.bf16.vlgmr.msrb.gmra.mxu2 %v11078_v39  ;;  %v7977_v1 = vor.u32 %v8677_v57, %v7974_v59  ;;  %v8117_v57 = vor.u32 %v8714_v42, %v8116_v41  ;;  %v1795_v59 = vld [vmem:[%s10874_s4 + $0x20] sm:$0xff]  ;;  %v7881_v42 = vor.u32 %v8653_v37, %v7878_v38  ;;  %v8198_v38 = vld [vmem:[%s14326_s17 + $0x2a8] sm:$0xf0] }
 0x361   : > { %2444 = vmatpush.bf16.msra.mxu2 %v8237_v55  ;;  %v7913_v55 = vor.u32 %v8661_v51, %v7910_v52  ;;  %v11130_v52 = vld [vmem:[#allocation7] ss:$0 sm:$0xff]  ;;  %v8733_v37 = vld [vmem:[%s14326_s17 + $0x2a4] sm:$0xf] }
 0x362   : > { %2471 = vmatpush.bf16.msra.mxu3 %v7977_v1  ;;  %v8669_v1 = vld [vmem:[%s14326_s17 + $0xa4] sm:$0xf] }
 0x363   : > { %2458 = vmatpush.bf16.msra.mxu1 %v7913_v55  ;;  %2400 = vmatmul.bf16.vlgmr.msra.gmra.mxu0 %v11090_v60  ;;  %v7897_v55 = vor.u32 %v8657_v43, %v7894_v50  ;;  %v8691_v43 = vld [vmem:[%s14326_s17 + $0x154] sm:$0xf]  ;;  %v8705_v50 = vld [vmem:[%s14326_s17 + $0x1c4] sm:$0xf] }
 0x364   : > { %2431 = vmatpush.bf16.msrb.mxu0 %v8173_v5  ;;  %v8197_v5 = vor.u32 %v8734_v2, %v8196_v0  ;;  %v7942_v2 = vld [vmem:[%s14326_s17 + $0xa8] sm:$0xf0] }
 0x365   : > { %2445 = vmatpush.bf16.msra.mxu2 %v8229_v6  ;;  %v8675_v6 = vld [vmem:[%s14326_s17 + $0xd4] sm:$0xf] }
 0x366   : > { %v7969_v14 = vor.u32 %v8675_v6, %v7966_v7  ;;  %v11146_v6 = vpack.c.bf16 %v1795_v59, %v1795_v59  ;;  %v7945_v7 = vor.u32 %v8669_v1, %v7942_v2  ;;  %v8739_v59 = vld [vmem:[%s14326_s17 + $0x2d4] sm:$0xf]  ;;  %v8689_v1 = vld [vmem:[%s14326_s17 + $0x144] sm:$0xf] }
 0x368   : > { %2432 = vmatpush.bf16.msrb.mxu0 %v8165_v15  ;;  %v8133_v15 = vor.u32 %v8718_v10, %v8132_v8  ;;  %2472 = vmatpush.bf16.msra.mxu3 %v7969_v14  ;;  %v8665_v14 = vld [vmem:[%s14326_s17 + $0x84] sm:$0xf] }
 0x369   : > { %2446 = vmatpush.bf16.msra.mxu2 %v8221_v16  ;;  %v8189_v16 = vor.u32 %v8732_v12, %v8188_v11  ;;  %v8655_v12 = vld [vmem:[%s14326_s17 + $0x34] sm:$0xf] }
 0x36c   : > { %2433 = vmatpush.bf16.msrb.mxu0 %v8157_v30  ;;  %v7961_v30 = vor.u32 %v8673_v26, %v7958_v28  ;;  %v8238_v26 = vld [vmem:[%s14326_s17 + $0x2f8] sm:$0xf0]  ;;  %v8693_v28 = vld [vmem:[%s14326_s17 + $0x164] sm:$0xf] }
 0x36d   : > { %2447 = vmatpush.bf16.msra.mxu2 %v8213_v34 }
 0x36e   : > { %2473 = vmatpush.bf16.msra.mxu3 %v7961_v30 }
 0x370   : > { %2434 = vmatpush.bf16.msrb.mxu0 %v8149_v44 }
 0x371   : > { %2448 = vmatpush.bf16.msra.mxu2 %v8205_v54  ;;  %v11132_v54 = vpack.c.bf16 %v1796_v29, %v1796_v29  ;;  %v8038_v29 = vld [vmem:[%s14326_s17 + $0x168] sm:$0xf0] }
 0x372   : > { %2474 = vmatpush.bf16.msra.mxu3 %v7953_v56  ;;  %v8041_v31 = vor.u32 %v8693_v28, %v8038_v29  ;;  %v8725_v28 = vld [vmem:[%s14326_s17 + $0x264] sm:$0xf]  ;;  %v8166_v29 = vld [vmem:[%s14326_s17 + $0x268] sm:$0xf0] }
 0x374   : > { %2435 = vmatpush.bf16.msrb.mxu0 %v8141_v4 }
 0x375   : > { %2449 = vmatpush.bf16.msra.mxu2 %v8197_v5 }
 0x376   : > { %2475 = vmatpush.bf16.msra.mxu3 %v7945_v7  ;;  %v8078_v7 = vld [vmem:[%s14326_s17 + $0x1b8] sm:$0xf0] }
 0x378   : > { %2436 = vmatpush.bf16.msrb.mxu0 %v8133_v15 }
 0x379   : > { %2450 = vmatpush.bf16.msra.mxu2 %v8189_v16  ;;  %v7926_v16 = vld [vmem:[%s14326_s17 + $0x88] sm:$0xf0] }
 0x37c   : > { %2437 = vmatpush.bf16.msrb.mxu0 %v8125_v35  ;;  %v8097_v35 = vor.u32 %v8707_v32, %v8094_v33  ;;  %v8685_v32 = vld [vmem:[%s14326_s17 + $0x124] sm:$0xf]  ;;  %v8006_v33 = vld [vmem:[%s14326_s17 + $0x128] sm:$0xf0] }
 0x37d   : > { %2451 = vmatpush.bf16.msra.mxu2 %v8181_v40 }
 0x380   : > { %2452 = vmatmul.bf16.vlgmr.msra.gmra.mxu2 %v11132_v54  ;;  %2438 = vmatpush.bf16.msrb.mxu0 %v8117_v57  ;;  %v7870_v57 = vld [vmem:[%s14326_s17 + $0x18] sm:$0xf0] }
 0x383   : > { %2439 = vmatmul.bf16.vlgmr.msrb.gmra.mxu0 %v11146_v6 }
 0x3d8   : > { %v1666_v20 = vpop.f32.mrf.mxu0 }
 0x3d9   : > { %v11064_v25 = vadd.f32 1e-06, %v1666_v20  ;;  %v7902_v20 = vld [vmem:[%s14326_s17 + $0x58] sm:$0xf0] }
 0x3da   : > { %v7905_v24 = vor.u32 %v8659_v19, %v7902_v20  ;;  %v8709_v20 = vld [vmem:[%s14326_s17 + $0x1e4] sm:$0xf] }
 0x3db   : > { %9045 = vrsqrt.f32 %v11064_v25  ;;  %vm1675_vm3 = vweird.f32 %v11064_v25 }
 0x3dc   : > { %2459 = vmatpush.bf16.msra.mxu1 %v7905_v24 }
 0x3e0   : > { %2460 = vmatpush.bf16.msra.mxu1 %v7897_v55 }
 0x3e1   : > { %v9046_v3 = vpop.eup %9045 }
 0x3e2   : > { %v1670_v9 = vmul.f32 %v9046_v3, %v11064_v25  ;;  %vm1676_vm2 = vweird.f32 %v9046_v3  ;;  %v11112_v25 = vpack.c.bf16 %v1794_v21, %v1794_v21  ;;  %v8102_v21 = vld [vmem:[%s14326_s17 + $0x1e8] sm:$0xf0] }
 0x3e3   : > { %vm11105_vm4 = vmor %vm1675_vm3, %vm1676_vm2  ;;  %v8105_v24 = vor.u32 %v8709_v20, %v8102_v21  ;;  %v8701_v21 = vld [vmem:[%s14326_s17 + $0x1a4] sm:$0xf] }
 0x3e4   : > { %v1671_v13 = vmul.f32 %v9046_v3, %v1670_v9  ;;  %2426 = vmatmul.bf16.vlgmr.msrb.gmra.mxu3 %v11112_v25  ;;  %v8667_v9 = vld [vmem:[%s14326_s17 + $0x94] sm:$0xf] }
 0x3e6   : > { %v1672_v17 = vmul.f32 0.5, %v1671_v13  ;;  %v7886_v13 = vld [vmem:[%s14326_s17 + $0x38] sm:$0xf0] }
 0x3e7   : > { %v7889_v15 = vor.u32 %v8655_v12, %v7886_v13  ;;  %v8649_v12 = vld [vmem:[%s14326_s17 + $0x4] sm:$0xf]  ;;  %v7862_v13 = vld [vmem:[%s14326_s17 + $0x8] sm:$0xf0] }
 0x3e8   : > { %v1673_v22 = vsub.f32 1.5, %v1672_v17  ;;  %v8695_v17 = vld [vmem:[%s14326_s17 + $0x174] sm:$0xf] }
 0x3e9   : > { %v8049_v19 = vor.u32 %v8695_v17, %v8046_v18  ;;  %2461 = vmatpush.bf16.msra.mxu1 %v7889_v15  ;;  %v7865_v15 = vor.u32 %v8649_v12, %v7862_v13  ;;  %v8687_v17 = vld [vmem:[%s14326_s17 + $0x134] sm:$0xf]  ;;  %v8014_v18 = vld [vmem:[%s14326_s17 + $0x138] sm:$0xf0]  ;;  %v8717_v13 = vld [vmem:[%s14326_s17 + $0x224] sm:$0xf] }
 0x3ea   : > { %v1674_v34 = vmul.f32 %v9046_v3, %v1673_v22  ;;  %v8743_v22 = vld [vmem:[%s14326_s17 + $0x2f4] sm:$0xf]  ;;  %v8017_v20 = vor.u32 %v8687_v17, %v8014_v18 }
 0x3eb   : > { %2483 = vmatpush.bf16.msra.mxu0 %v8049_v19  ;;  %v8241_v30 = vor.u32 %v8743_v22, %v8238_v26  ;;  %v8070_v22 = vld [vmem:[%s14326_s17 + $0x1a8] sm:$0xf0]  ;;  %v8206_v26 = vld [vmem:[%s14326_s17 + $0x2b8] sm:$0xf0]  ;;  %v8715_v18 = vld [vmem:[%s14326_s17 + $0x214] sm:$0xf] }
 0x3ec   : > { %v1678_v44 = vsel %vm11105_vm4, %v9046_v3, %v1674_v34  ;;  %v8113_v3 = vor.u32 %v8711_v61, %v8110_v63  ;;  %v8741_v34 = vld [vmem:[%s14326_s17 + $0x2e4] sm:$0xf]  ;;  %v8222_v61 = vld [vmem:[%s14326_s17 + $0x2d8] sm:$0xf0] }
 0x3ed   : > { %v1680_v51 = vmul.f32 %v1679_v23, %v1678_v44  ;;  %v7929_v23 = vor.u32 %v8665_v14, %v7926_v16  ;;  %v8030_v44 = vld [vmem:[%s14326_s17 + $0x158] sm:$0xf0]  ;;  %v8233_v55 = vor.u32 %v8741_v34, %v8230_v36  ;;  %2462 = vmatpush.bf16.msra.mxu1 %v7881_v42  ;;  %v8727_v14 = vld [vmem:[%s14326_s17 + $0x274] sm:$0xf] }
 0x3ee   : > { %2496 = vmatpush.bf16.msrb.mxu2 %v8113_v3  ;;  %v8033_v56 = vor.u32 %v8691_v43, %v8030_v44  ;;  %v8174_v16 = vld [vmem:[%s14326_s17 + $0x278] sm:$0xf0]  ;;  %v8699_v34 = vld [vmem:[%s14326_s17 + $0x194] sm:$0xf] }
 0x3ef   : > { %v11137_v0 = vperm.slane %v1680_v51, 0  ;;  %v8086_v51 = vld [vmem:[%s14326_s17 + $0x1c8] sm:$0xf0]  ;;  %2484 = vmatpush.bf16.msra.mxu0 %v8041_v31  ;;  %v8177_v19 = vor.u32 %v8727_v14, %v8174_v16  ;;  %v8169_v31 = vor.u32 %v8725_v28, %v8166_v29  ;;  %v8062_v36 = vld [vmem:[%s14326_s17 + $0x198] sm:$0xf0] }
 0x3f0   : > { %v8065_v42 = vor.u32 %v8699_v34, %v8062_v36  ;;  %v8723_v43 = vld [vmem:[%s14326_s17 + $0x254] sm:$0xf]  ;;  %v8158_v44 = vld [vmem:[%s14326_s17 + $0x258] sm:$0xf0]  ;;  %v8134_v14 = vld [vmem:[%s14326_s17 + $0x228] sm:$0xf0] }
 0x3f1   : > { %v1682_v4 = vmul.f32 %v11137_v0, %v10943_v45  ;;  %v1683_v5 = vmul.f32 %v11137_v0, %v10946_v46  ;;  %v7934_v46 = vld [vmem:[%s14326_s17 + $0x98] sm:$0xf0]  ;;  %v1684_v40 = vmul.f32 %v11137_v0, %v10949_v47  ;;  %v1685_v41 = vmul.f32 %v11137_v0, %v10952_v48  ;;  %v8651_v47 = vld [vmem:[%s14326_s17 + $0x14] sm:$0xf] }
 0x3f2   : > { %v7937_v11 = vor.u32 %v8667_v9, %v7934_v46  ;;  %2497 = vmatpush.bf16.msrb.mxu2 %v8105_v24  ;;  %v8089_v48 = vor.u32 %v8705_v50, %v8086_v51  ;;  %v7873_v63 = vor.u32 %v8651_v47, %v7870_v57  ;;  %v8737_v46 = vld [vmem:[%s14326_s17 + $0x2c4] sm:$0xf]  ;;  %v8073_v24 = vor.u32 %v8701_v21, %v8070_v22  ;;  %v8683_v50 = vld [vmem:[%s14326_s17 + $0x114] sm:$0xf]  ;;  %v7998_v51 = vld [vmem:[%s14326_s17 + $0x118] sm:$0xf0] }
 0x3f3   : > { %v1694_v8 = vadd.f32 %v11130_v52, %v1682_v4  ;;  %v1695_v45 = vadd.f32 %v11130_v52, %v1683_v5  ;;  %v1696_v2 = vadd.f32 %v11130_v52, %v1684_v40  ;;  %v1697_v3 = vadd.f32 %v11130_v52, %v1685_v41  ;;  %v8022_v4 = vld [vmem:[%s14326_s17 + $0x148] sm:$0xf0]  ;;  %v8703_v5 = vld [vmem:[%s14326_s17 + $0x1b4] sm:$0xf]  ;;  %2485 = vmatpush.bf16.msra.mxu0 %v8033_v56  ;;  %v8713_v22 = vld [vmem:[%s14326_s17 + $0x204] sm:$0xf] }
 0x3f4   : > { %2476 = vmatpush.bf16.msra.mxu3 %v7937_v11  ;;  %2463 = vmatpush.bf16.msra.mxu1 %v7873_v63  ;;  %v8081_v9 = vor.u32 %v8703_v5, %v8078_v7  ;;  %v1686_v40 = vmul.f32 %v11137_v0, %v10954_v49  ;;  %v1687_v41 = vmul.f32 %v11137_v0, %v10962_v53  ;;  %v8054_v56 = vld [vmem:[%s14326_s17 + $0x188] sm:$0xf0] }
 0x3f5   : > { %v1710_v10 = vpack.c.bf16 %v1695_v45, %v1694_v8  ;;  %v8225_v8 = vor.u32 %v8739_v59, %v8222_v61  ;;  %v8025_v45 = vor.u32 %v8689_v1, %v8022_v4  ;;  %v1711_v11 = vpack.c.bf16 %v1697_v3, %v1696_v2  ;;  %v8190_v59 = vld [vmem:[%s14326_s17 + $0x298] sm:$0xf0]  ;;  %v8721_v1 = vld [vmem:[%s14326_s17 + $0x244] sm:$0xf]  ;;  %v8150_v2 = vld [vmem:[%s14326_s17 + $0x248] sm:$0xf0] }
 0x3f6   : > { %2498 = vmatpush.bf16.msrb.mxu2 %v8097_v35  ;;  %v8009_v35 = vor.u32 %v8685_v32, %v8006_v33  ;;  %v8201_v47 = vor.u32 %v8733_v37, %v8198_v38  ;;  %v8161_v49 = vor.u32 %v8723_v43, %v8158_v44  ;;  %v8001_v53 = vor.u32 %v8683_v50, %v7998_v51  ;;  %v8681_v3 = vld [vmem:[%s14326_s17 + $0x104] sm:$0xf]  ;;  %v7990_v4 = vld [vmem:[%s14326_s17 + $0x108] sm:$0xf0]  ;;  %v9044_v32 = vld [vmem:[#allocation10] ss:$0 sm:$0xff] }
 0x3f7   : > { %7854 = vmatmul.msk.bf16.vlgmr.msrb.gmra.mxu1 %vm1502_vm0, %v1710_v10  ;;  %v8214_v10 = vld [vmem:[%s14326_s17 + $0x2c8] sm:$0xf0]  ;;  %2486 = vmatpush.bf16.msra.mxu0 %v8025_v45  ;;  %v1698_v61 = vadd.f32 %v11130_v52, %v1686_v40  ;;  %v1699_v63 = vadd.f32 %v11130_v52, %v1687_v41  ;;  %v8153_v7 = vor.u32 %v8721_v1, %v8150_v2 }
 0x3f8   : > { %2477 = vmatpush.bf16.msra.mxu3 %v7929_v23  ;;  %v8735_v23 = vld [vmem:[%s14326_s17 + $0x2b4] sm:$0xf]  ;;  %2464 = vmatpush.bf16.msra.mxu1 %v7865_v15  ;;  %v8182_v45 = vld [vmem:[%s14326_s17 + $0x288] sm:$0xf0]  ;;  %v8137_v15 = vor.u32 %v8717_v13, %v8134_v14  ;;  %v1688_v16 = vmul.f32 %v11137_v0, %v10968_v58  ;;  %v1689_v17 = vmul.f32 %v11137_v0, %v10973_v62  ;;  %v2388_v58 = vpop.f32.mrf.mxu3  ;;  %v2401_v62 = vpop.f32.mrf.mxu0 }
 0x3f9   : > { %v2402_v28 = vadd.f32 %v2401_v62, %v2388_v58 }
 0x3fa   : > { %2499 = vmatpush.bf16.msrb.mxu2 %v8089_v48  ;;  %v8731_v48 = vld [vmem:[%s14326_s17 + $0x294] sm:$0xf]  ;;  %v1701_v21 = vadd.f32 %v11130_v52, %v1689_v17 }
 0x3fb   : > { %2478 = vmatmul.bf16.vlgmr.msra.gmra.mxu3 %v11090_v60  ;;  %v8217_v60 = vor.u32 %v8737_v46, %v8214_v10  ;;  %2487 = vmatpush.bf16.msra.mxu0 %v8017_v20  ;;  %v8193_v5 = vor.u32 %v8731_v48, %v8190_v59  ;;  %v7993_v46 = vor.u32 %v8681_v3, %v7990_v4 }
 0x3fc   : > { %2522 = vmatpush.bf16.msrb.mxu3 %v8241_v30  ;;  %2509 = vmatpush.bf16.msrb.mxu1 %v8177_v19  ;;  %v8209_v30 = vor.u32 %v8735_v23, %v8206_v26  ;;  %v8126_v19 = vld [vmem:[%s14326_s17 + $0x218] sm:$0xf0]  ;;  %v1700_v20 = vadd.f32 %v11130_v52, %v1688_v16  ;;  %v8118_v23 = vld [vmem:[%s14326_s17 + $0x208] sm:$0xf0] }
 0x3fe   : > { %2500 = vmatpush.bf16.msrb.mxu2 %v8081_v9  ;;  %v1712_v9 = vpack.c.bf16 %v1699_v63, %v1698_v61 }
 0x3ff   : > { %2488 = vmatpush.bf16.msra.mxu0 %v8009_v35 }
 0x400   : > { %2523 = vmatpush.bf16.msrb.mxu3 %v8233_v55  ;;  %v8697_v55 = vld [vmem:[%s14326_s17 + $0x184] sm:$0xf]  ;;  %2510 = vmatpush.bf16.msrb.mxu1 %v8169_v31  ;;  %v2390_v0 = vpop.f32.mrf.mxu3  ;;  %v2403_v26 = vpop.f32.mrf.mxu0 }
 0x401   : > { %v8057_v57 = vor.u32 %v8697_v55, %v8054_v56 }
 0x402   : > { %2501 = vmatpush.bf16.msrb.mxu2 %v8073_v24  ;;  %v1713_v24 = vpack.c.bf16 %v1701_v21, %v1700_v20 }
 0x403   : > { %2489 = vmatpush.bf16.msra.mxu0 %v8001_v53 }
 0x404   : > { %2524 = vmatpush.bf16.msrb.mxu3 %v8225_v8  ;;  %2511 = vmatpush.bf16.msrb.mxu1 %v8161_v49  ;;  %v8729_v8 = vld [vmem:[%s14326_s17 + $0x284] sm:$0xf] }
 0x405   : > { %v8185_v10 = vor.u32 %v8729_v8, %v8182_v45 }
 0x406   : > { %2502 = vmatpush.bf16.msrb.mxu2 %v8065_v42 }
 0x407   : > { %7855 = vmatmul.msk.bf16.gmra.mxu1 %vm1502_vm0, %v1711_v11  ;;  %v8719_v11 = vld [vmem:[%s14326_s17 + $0x234] sm:$0xf]  ;;  %2490 = vmatpush.bf16.msra.mxu0 %v7993_v46 }
 0x408   : > { %2525 = vmatpush.bf16.msrb.mxu3 %v8217_v60  ;;  %v8142_v60 = vld [vmem:[%s14326_s17 + $0x238] sm:$0xf0]  ;;  %2512 = vmatpush.bf16.msrb.mxu1 %v8153_v7  ;;  %v2440_v33 = vpop.f32.mrf.mxu0 }
 0x409   : > { %v8145_v12 = vor.u32 %v8719_v11, %v8142_v60 }
 0x40a   : > { %2503 = vmatpush.bf16.msrb.mxu2 %v8057_v57  ;;  %2491 = vmatmul.bf16.vlgmr.msra.gmra.mxu0 %v11078_v39  ;;  %v8121_v39 = vor.u32 %v8713_v22, %v8118_v23 }
 0x40c   : > { %2526 = vmatpush.bf16.msrb.mxu3 %v8209_v30  ;;  %2513 = vmatpush.bf16.msrb.mxu1 %v8145_v12 }
 0x40d   : > { %2504 = vmatmul.bf16.vlgmr.msrb.gmra.mxu2 %v11112_v25  ;;  %v8129_v25 = vor.u32 %v8715_v18, %v8126_v19 }
 0x410   : > { %2527 = vmatpush.bf16.msrb.mxu3 %v8201_v47  ;;  %2514 = vmatpush.bf16.msrb.mxu1 %v8137_v15  ;;  %v2442_v38 = vpop.f32.mrf.mxu0 }
 0x414   : > { %2528 = vmatpush.bf16.msrb.mxu3 %v8193_v5  ;;  %2515 = vmatpush.bf16.msrb.mxu1 %v8129_v25 }
 0x417   : > { %7856 = vmatmul.msk.bf16.gmra.mxu1 %vm1502_vm0, %v1712_v9 }
 0x418   : > { %2529 = vmatpush.bf16.msrb.mxu3 %v8185_v10  ;;  %2516 = vmatpush.bf16.msrb.mxu1 %v8121_v39 }
 0x41b   : > { %2530 = vmatmul.bf16.vlgmr.msrb.gmra.mxu3 %v11132_v54  ;;  %v2414_v54 = vpop.f32.mrf.mxu2 }
 0x41c   : > { %v2415_v29 = vadd.f32 %v2414_v54, %v2402_v28 }
 0x423   : > { %v2416_v52 = vpop.f32.mrf.mxu2 }
 0x427   : > { %7857 = vmatmul.msk.bf16.gmra.mxu1 %vm1502_vm0, %v1713_v24 }
 0x437   : > { %2465 = vmatmul.bf16.vlgmr.msra.gmra.mxu1 %v11066_v27  ;;  %v2453_v27 = vpop.f32.mrf.mxu2 }
 0x43f   : > { %v2455_v41 = vpop.f32.mrf.mxu2 }
 0x447   : > { %2517 = vmatmul.bf16.vlgmr.msrb.gmra.mxu1 %v11146_v6 }
 0x467   : > { %v2427_v30 = vpop.f32.mrf.mxu3 }
 0x468   : > { %v2428_v31 = vadd.f32 %v2427_v30, %v2415_v29 }
 0x46a   : > { %v2441_v34 = vadd.f32 %v2440_v33, %v2428_v31 }
 0x46c   : > { %v2454_v36 = vadd.f32 %v2453_v27, %v2441_v34 }
 0x46e   : > { %2535 = vst [vmem:[#allocation2] sm:$0xff] %v2454_v36 }
 0x46f   : > { %v2429_v37 = vpop.f32.mrf.mxu3 }
 0x474   : > { %v1763_v35 = vpop.f32.mrf.mxu1 }
 0x475   : > { %v1764_v6 = vadd.f32 %v9044_v32, %v1763_v35 }
 0x477   : > { %1783 = vst.msk [vmem:[%s10880_s8] sm:$0xff] %vm1502_vm0, %v1764_v6 }
 0x47c   : > { %v1765_v40 = vpop.f32.mrf.mxu1 }
 0x47d   : > { %v1766_v42 = vadd.f32 %v9044_v32, %v1765_v40 }
 0x47e   : > { %v2479_v55 = vpop.f32.mrf.mxu3 }
 0x47f   : > { %1784 = vst.msk [vmem:[%s10880_s8 + $0x8] sm:$0xff] %vm1502_vm0, %v1766_v42 }
 0x484   : > { %v1768_v43 = vpop.f32.mrf.mxu1 }
 0x485   : > { %v1769_v44 = vadd.f32 %v9044_v32, %v1768_v43 }
 0x486   : > { %v2481_v49 = vpop.f32.mrf.mxu3 }
 0x487   : > { %1785 = vst.msk [vmem:[%s10880_s8 + $0x10] sm:$0xff] %vm1502_vm0, %v1769_v44  ;;  %v2492_v53 = vpop.f32.mrf.mxu0 }
 0x48c   : > { %v1770_v50 = vpop.f32.mrf.mxu1 }
 0x48d   : > { %v1771_v51 = vadd.f32 %v9044_v32, %v1770_v50 }
 0x48f   : > { %1786 = vst.msk [vmem:[%s10880_s8 + $0x18] sm:$0xff] %vm1502_vm0, %v1771_v51  ;;  %v2494_v63 = vpop.f32.mrf.mxu0 }
 0x490   : > { %v2505_v57 = vpop.f32.mrf.mxu2 }
 0x494   : > { %v1773_v56 = vpop.f32.mrf.mxu1 }
 0x495   : > { %v1774_v47 = vadd.f32 %v9044_v32, %v1773_v56 }
 0x497   : > { %1787 = vst.msk [vmem:[%s10880_s8 + $0x20] sm:$0xff] %vm1502_vm0, %v1774_v47 }
 0x498   : > { %v2507_v1 = vpop.f32.mrf.mxu2 }
 0x49c   : > { %v1775_v48 = vpop.f32.mrf.mxu1 }
 0x49d   : > { %v1776_v59 = vadd.f32 %v9044_v32, %v1775_v48 }
 0x49e   : > { %v2531_v61 = vpop.f32.mrf.mxu3 }
 0x49f   : > { %1788 = vst.msk [vmem:[%s10880_s8 + $0x28] sm:$0xff] %vm1502_vm0, %v1776_v59 }
 0x4a4   : > { %v1778_v2 = vpop.f32.mrf.mxu1 }
 0x4a5   : > { %v1779_v3 = vadd.f32 %v9044_v32, %v1778_v2 }
 0x4a6   : > { %v2533_v4 = vpop.f32.mrf.mxu3 }
 0x4a7   : > { %1789 = vst.msk [vmem:[%s10880_s8 + $0x30] sm:$0xff] %vm1502_vm0, %v1779_v3 }
 0x4ac   : > { %v1780_v5 = vpop.f32.mrf.mxu1 }
 0x4ad   : > { %v1781_v7 = vadd.f32 %v9044_v32, %v1780_v5 }
 0x4af   : > { %1790 = vst.msk [vmem:[%s10880_s8 + $0x38] sm:$0xff] %vm1502_vm0, %v1781_v7 }
 0x4b4   : > { %v2466_v8 = vpop.f32.mrf.mxu1 }
 0x4b5   : > { %v2480_v45 = vadd.f32 %v2479_v55, %v2466_v8 }
 0x4b7   : > { %v2493_v46 = vadd.f32 %v2492_v53, %v2480_v45 }
 0x4b9   : > { %v2506_v10 = vadd.f32 %v2505_v57, %v2493_v46 }
 0x4bc   : > { %v2468_v9 = vpop.f32.mrf.mxu1 }
 0x4c4   : > { %v2518_v11 = vpop.f32.mrf.mxu1 }
 0x4c5   : > { %v2519_v60 = vadd.f32 %v2518_v11, %v2506_v10 }
 0x4c7   : > { %v2532_v12 = vadd.f32 %v2531_v61, %v2519_v60 }
 0x4c9   : > { %2537 = vst [vmem:[#allocation2 + $0x8] sm:$0xff] %v2532_v12 }
 0x4cc   : > { %v2520_v13 = vpop.f32.mrf.mxu1 }
 0x4cd PF: > { %v2544_v14 = vld [vmem:[%s10880_s8 + $0x30] sm:$0xff]  ;;  %vm2548_vm5 = vcmask 523264   ;;  %v2542_v15 = vld [vmem:[%s10880_s8 + $0x20] sm:$0xff]  ;;  %v2545_v25 = vld [vmem:[%s10880_s8 + $0x38] sm:$0xff]  ;;  %v10344_v62 = vmov 64.0   ;;  %s14335_s28 = sld [smem:[#allocation47_spill]] }
 0x4ce   : > { %v2540_v16 = vld [vmem:[%s10880_s8 + $0x10] sm:$0xff]  ;;  %v2567_v17 = vsel %vm2548_vm5, %v2544_v14, 0.0  ;;  %v2561_v18 = vsel %vm2548_vm5, %v2542_v15, 0.0  ;;  %v2543_v20 = vld [vmem:[%s10880_s8 + $0x28] sm:$0xff]  ;;  %v2541_v21 = vld [vmem:[%s10880_s8 + $0x18] sm:$0xff]  ;;  %v2570_v22 = vsel %vm2548_vm5, %v2545_v25, 0.0  ;;  %9056 = vrcp.f32 %v10344_v62 }
 0x4cf   : > { %v2555_v19 = vsel %vm2548_vm5, %v2540_v16, 0.0  ;;  %2568 = vadd.xlane.f32.xlu2 %v2567_v17  ;;  %2562 = vadd.xlane.f32.xlu1 %v2561_v18  ;;  %v2564_v23 = vsel %vm2548_vm5, %v2543_v20, 0.0  ;;  %v2558_v39 = vsel %vm2548_vm5, %v2541_v21, 0.0  ;;  %v2538_v24 = vld [vmem:[%s10880_s8] sm:$0xff]  ;;  %v11298_v44 = vld [vmem:[%s10880_s8 + $0x8] sm:$0xff]  ;;  %s14345_s6 = scalar_lea.vmem [#allocation14], %s10829_s24 }
 0x4d0   : > { %2556 = vadd.xlane.f32.xlu0 %v2555_v19  ;;  %v2549_v58 = vsel %vm2548_vm5, %v2538_v24, 0.0  ;;  %v2552_v49 = vsel %vm2548_vm5, %v11298_v44, 0.0  ;;  %v8268_v46 = vld [vmem:[%s10889_s10 + $0x30] sm:$0xf]  ;;  %v8752_v10 = vld [vmem:[%s10889_s10 + $0x34] sm:$0xf0] }
 0x4d1   : > { %v8751_v11 = vld [vmem:[%s10889_s10 + $0x34] sm:$0xf]  ;;  %v8269_v60 = vor.u32 %v8752_v10, %v8268_v46  ;;  %v8270_v12 = vld [vmem:[%s10889_s10 + $0x38] sm:$0xf0]  ;;  %v8262_v18 = vld [vmem:[%s10889_s10 + $0x28] sm:$0xf0] }
 0x4d2   : > { %v8273_v13 = vor.u32 %v8751_v11, %v8270_v12  ;;  %v8244_v62 = vld [vmem:[%s10889_s10] sm:$0xf]  ;;  %s14347_s7 = sld [smem:[#allocation68_spill]]  ;;  %s14358_s21 = scalar_lea.vmem [#allocation22], %s10829_s24 }
 0x4d3   : > { %8801 = vmatpush.bf16.msra.mxu2 %v8269_v60  ;;  %2822 = vmatpush.bf16.msra.mxu0 %v8269_v60  ;;  %s14359_s15 = scalar_lea.vmem [#allocation23], %s10829_s24 }
 0x4d4   : > { %v9057_v54 = vpop.eup %9056  ;;  %8805 = vmatpush.bf16.msra.mxu1 %v8273_v13 }
 0x4d5   : > { %v2574_v0 = vmul.f32 64.0, %v9057_v54  ;;  %vm2578_vm6 = vweird.f32 %v9057_v54 }
 0x4d7   : > { %2571 = vadd.xlane.f32.xlu2 %v2570_v22  ;;  %2565 = vadd.xlane.f32.xlu1 %v2564_v23  ;;  %v2575_v26 = vsub.f32 1.0, %v2574_v0  ;;  %v8254_v23 = vld [vmem:[%s10889_s10 + $0x18] sm:$0xf0]  ;;  %v8745_v0 = vld [vmem:[%s10889_s10 + $0x4] sm:$0xf] }
 0x4d8   : > { %2559 = vadd.xlane.f32.xlu0 %v2558_v39  ;;  %s8366_s26 = sshll.u32 %s14347_s7, 3  ;;  %p8615_p9 = scmp.eq.s32.totalorder %s14347_s7, 1 }
 0x4d9   : > { %v2576_v28 = vmul.f32 %v9057_v54, %v2575_v26  ;;  %s4761_s18 = scalar_lea.vmem [#allocation2], %s8366_s26 }
 0x4db   : > { %v2577_v52 = vadd.f32 %v9057_v54, %v2576_v28 }
 0x4dd   : > { %v11283_v29 = vsel %vm2578_vm6, %v9057_v54, %v2577_v52  ;;  %v8746_v54 = vld [vmem:[%s10889_s10 + $0x4] sm:$0xf0]  ;;  %v8246_v52 = vld [vmem:[%s10889_s10 + $0x8] sm:$0xf0] }
 0x4de   : > { %14329 = vst [vmem:[#allocation78_spill] sm:$0xff] %v11283_v29  ;;  %v8245_v28 = vor.u32 %v8746_v54, %v8244_v62 }
 0x4df   : > { %2550 = vadd.xlane.f32.xlu2 %v2549_v58 }
 0x542   : > { %v2569_v30 = vpop.xlane.xlu2 %2568  ;;  %v2563_v31 = vpop.xlane.xlu1 %2562 }
 0x543   : > { %v2557_v32 = vpop.xlane.xlu0 %2556  ;;  %v2586_v40 = vmul.f32 %v11283_v29, %v2569_v30  ;;  %v2584_v41 = vmul.f32 %v11283_v29, %v2563_v31  ;;  %v8249_v30 = vor.u32 %v8745_v0, %v8246_v52 }
 0x544   : > { %v2582_v33 = vmul.f32 %v11283_v29, %v2557_v32 }
 0x545   : > { %v11304_v55 = vsub.f32 %v2544_v14, %v2586_v40  ;;  %v11306_v56 = vsub.f32 %v2542_v15, %v2584_v41  ;;  %v8260_v14 = vld [vmem:[%s10889_s10 + $0x20] sm:$0xf]  ;;  %v8750_v15 = vld [vmem:[%s10889_s10 + $0x24] sm:$0xf0] }
 0x546   : > { %v11286_v34 = vsub.f32 %v2540_v16, %v2582_v33  ;;  %v8749_v16 = vld [vmem:[%s10889_s10 + $0x24] sm:$0xf]  ;;  %v8261_v17 = vor.u32 %v8750_v15, %v8260_v14 }
 0x547   : > { %v2600_v63 = vmul.f32 %v11306_v56, %v11306_v56  ;;  %v2602_v1 = vmul.f32 %v11304_v55, %v11304_v55  ;;  %v8265_v19 = vor.u32 %v8749_v16, %v8262_v18 }
 0x548   : > { %v2598_v35 = vmul.f32 %v11286_v34, %v11286_v34  ;;  %8802 = vmatpush.bf16.msra.mxu2 %v8261_v17  ;;  %2823 = vmatpush.bf16.msra.mxu0 %v8261_v17 }
 0x549   : > { %v2616_v5 = vsel %vm2548_vm5, %v2600_v63, 0.0  ;;  %v2622_v7 = vsel %vm2548_vm5, %v2602_v1, 0.0  ;;  %8806 = vmatpush.bf16.msra.mxu1 %v8265_v19 }
 0x54a   : > { %v2572_v27 = vpop.xlane.xlu2 %2571  ;;  %v2566_v6 = vpop.xlane.xlu1 %2565  ;;  %v2610_v36 = vsel %vm2548_vm5, %v2598_v35, 0.0 }
 0x54b   : > { %v2585_v37 = vmul.f32 %v11283_v29, %v2566_v6  ;;  %2611 = vadd.xlane.f32.xlu0 %v2610_v36  ;;  %v2560_v38 = vpop.xlane.xlu0 %2559  ;;  %v2587_v61 = vmul.f32 %v11283_v29, %v2572_v27 }
 0x54c   : > { %v2583_v42 = vmul.f32 %v11283_v29, %v2560_v38 }
 0x54d   : > { %v11295_v43 = vsub.f32 %v2543_v20, %v2585_v37  ;;  %v11324_v4 = vsub.f32 %v2545_v25, %v2587_v61  ;;  %v8252_v25 = vld [vmem:[%s10889_s10 + $0x10] sm:$0xf]  ;;  %v8748_v20 = vld [vmem:[%s10889_s10 + $0x14] sm:$0xf0] }
 0x54e   : > { %v11300_v50 = vsub.f32 %v2541_v21, %v2583_v42  ;;  %v8747_v21 = vld [vmem:[%s10889_s10 + $0x14] sm:$0xf]  ;;  %v8253_v22 = vor.u32 %v8748_v20, %v8252_v25 }
 0x54f   : > { %v2601_v51 = vmul.f32 %v11295_v43, %v11295_v43  ;;  %v2603_v45 = vmul.f32 %v11324_v4, %v11324_v4 }
 0x550   : > { %v2599_v47 = vmul.f32 %v11300_v50, %v11300_v50  ;;  %8803 = vmatpush.bf16.msra.mxu2 %v8253_v22  ;;  %2824 = vmatpush.bf16.msra.mxu0 %v8253_v22 }
 0x551   : > { %v2619_v53 = vsel %vm2548_vm5, %v2601_v51, 0.0  ;;  %v2625_v9 = vsel %vm2548_vm5, %v2603_v45, 0.0 }
 0x552   : > { %v2613_v57 = vsel %vm2548_vm5, %v2599_v47, 0.0  ;;  %2620 = vadd.xlane.f32.xlu2 %v2619_v53  ;;  %v2551_v48 = vpop.xlane.xlu2 %2550 }
 0x553   : > { %2614 = vadd.xlane.f32.xlu1 %v2613_v57  ;;  %2553 = vadd.xlane.f32.xlu0 %v2552_v49  ;;  %v2580_v59 = vmul.f32 %v11283_v29, %v2551_v48 }
 0x554   : > { %8804 = vmatpush.bf16.msra.mxu2 %v8245_v28  ;;  %2825 = vmatpush.bf16.msra.mxu0 %v8245_v28 }
 0x555   : > { %v11320_v2 = vsub.f32 %v2538_v24, %v2580_v59  ;;  %v8257_v24 = vor.u32 %v8747_v21, %v8254_v23 }
 0x557   : > { %v2596_v3 = vmul.f32 %v11320_v2, %v11320_v2  ;;  %8807 = vmatpush.bf16.msra.mxu1 %v8257_v24 }
 0x558   : > { %2851 = vmatpush.bf16.msrb.mxu0 %v8273_v13 }
 0x559   : > { %v2604_v8 = vsel %vm2548_vm5, %v2596_v3, 0.0 }
 0x55a   : > { %2605 = vadd.xlane.f32.xlu2 %v2604_v8 }
 0x55b   : > { %2617 = vadd.xlane.f32.xlu1 %v2616_v5  ;;  %2623 = vadd.xlane.f32.xlu0 %v2622_v7 }
 0x55c   : > { %8808 = vmatpush.bf16.msra.mxu1 %v8249_v30  ;;  %2852 = vmatpush.bf16.msrb.mxu0 %v8265_v19  ;;  %v11382_v19 = vld [vmem:[%s1456_s12] ss:$0 sm:$0xff]  ;;  %s14334_s12 = sld [smem:[#allocation46_spill]] }
 0x560   : > { %2853 = vmatpush.bf16.msrb.mxu0 %v8257_v24  ;;  %v11389_v24 = vld [vmem:[%s1459_s13] ss:$0 sm:$0xff]  ;;  %s10345_s13 = smov 64  }
 0x563   : > { %2626 = vadd.xlane.f32.xlu1 %v2625_v9 }
 0x564   : > { %2854 = vmatpush.bf16.msrb.mxu0 %v8249_v30 }
 0x5be   : > { %v2612_v39 = vpop.xlane.xlu0 %2611 }
 0x5bf   : > { %v2630_v58 = vmul.f32 %v2612_v39, %v11283_v29 }
 0x5c1   : > { %v2638_v26 = vadd.f32 1e-05, %v2630_v58 }
 0x5c3   : > { %9058 = vrsqrt.f32 %v2638_v26  ;;  %vm2670_vm8 = vweird.f32 %v2638_v26 }
 0x5c5   : > { %v2621_v31 = vpop.xlane.xlu2 %2620 }
 0x5c6   : > { %v2615_v32 = vpop.xlane.xlu1 %2614  ;;  %v2554_v33 = vpop.xlane.xlu0 %2553  ;;  %v2633_v35 = vmul.f32 %v2621_v31, %v11283_v29 }
 0x5c7   : > { %v2631_v27 = vmul.f32 %v2615_v32, %v11283_v29  ;;  %v2581_v6 = vmul.f32 %v11283_v29, %v2554_v33 }
 0x5c8   : > { %v11352_v36 = vadd.f32 1e-05, %v2633_v35 }
 0x5c9   : > { %v9059_v37 = vpop.eup %9058  ;;  %v2639_v38 = vadd.f32 1e-05, %v2631_v27  ;;  %v11355_v40 = vsub.f32 %v11298_v44, %v2581_v6 }
 0x5ca   : > { %v2665_v41 = vmul.f32 %v9059_v37, %v2638_v26  ;;  %9060 = vrsqrt.f32 %v11352_v36  ;;  %vm2671_vm7 = vweird.f32 %v9059_v37  ;;  %vm2700_vm15 = vweird.f32 %v11352_v36 }
 0x5cb   : > { %9062 = vrsqrt.f32 %v2639_v38  ;;  %v2597_v42 = vmul.f32 %v11355_v40, %v11355_v40  ;;  %vm11367_vm9 = vmor %vm2670_vm8, %vm2671_vm7  ;;  %vm2680_vm10 = vweird.f32 %v2639_v38 }
 0x5cc   : > { %v2666_v51 = vmul.f32 %v9059_v37, %v2665_v41 }
 0x5cd   : > { %v2607_v47 = vsel %vm2548_vm5, %v2597_v42, 0.0  ;;  %v2606_v45 = vpop.xlane.xlu2 %2605 }
 0x5ce   : > { %v2667_v49 = vmul.f32 0.5, %v2666_v51  ;;  %v2618_v53 = vpop.xlane.xlu1 %2617  ;;  %2608 = vadd.xlane.f32.xlu0 %v2607_v47  ;;  %v2624_v48 = vpop.xlane.xlu0 %2623 }
 0x5cf   : > { %v2632_v57 = vmul.f32 %v2618_v53, %v11283_v29  ;;  %v2634_v3 = vmul.f32 %v2624_v48, %v11283_v29 }
 0x5d0   : > { %v11362_v59 = vpop.eup %9060  ;;  %v2668_v44 = vsub.f32 1.5, %v2667_v49 }
 0x5d1   : > { %v9063_v61 = vpop.eup %9062  ;;  %v2640_v63 = vadd.f32 1e-05, %v2632_v57  ;;  %v2695_v7 = vmul.f32 %v11362_v59, %v11352_v36  ;;  %v11371_v46 = vadd.f32 1e-05, %v2634_v3  ;;  %vm2701_vm0 = vweird.f32 %v11362_v59 }
 0x5d2   : > { %v2675_v1 = vmul.f32 %v9063_v61, %v2639_v38  ;;  %v2669_v5 = vmul.f32 %v9059_v37, %v2668_v44  ;;  %vm2681_vm11 = vweird.f32 %v9063_v61  ;;  %vm2702_vm2 = vmor %vm2700_vm15, %vm2701_vm0 }
 0x5d3   : > { %9064 = vrsqrt.f32 %v2640_v63  ;;  %v2696_v60 = vmul.f32 %v11362_v59, %v2695_v7  ;;  %vm2682_vm12 = vmor %vm2680_vm10, %vm2681_vm11  ;;  %vm2690_vm13 = vweird.f32 %v2640_v63  ;;  %vm2710_vm6 = vweird.f32 %v11371_v46 }
 0x5d4   : > { %v2676_v8 = vmul.f32 %v9063_v61, %v2675_v1  ;;  %v2673_v11 = vsel %vm11367_vm9, %v9059_v37, %v2669_v5  ;;  %9066 = vrsqrt.f32 %v11371_v46 }
 0x5d5   : > { %v2726_v18 = vmul.f32 %v2673_v11, %v11286_v34  ;;  %v2697_v25 = vmul.f32 0.5, %v2696_v60 }
 0x5d6   : > { %v2677_v9 = vmul.f32 0.5, %v2676_v8  ;;  %v2627_v10 = vpop.xlane.xlu1 %2626 }
 0x5d7   : > { %v2635_v12 = vmul.f32 %v2627_v10, %v11283_v29  ;;  %v2737_v39 = vmul.f32 %v11382_v19, %v2726_v18  ;;  %v2698_v58 = vsub.f32 1.5, %v2697_v25 }
 0x5d8   : > { %v2678_v13 = vsub.f32 1.5, %v2677_v9  ;;  %v2628_v9 = vmul.f32 %v2606_v45, %v11283_v29 }
 0x5d9   : > { %v9065_v14 = vpop.eup %9064  ;;  %v2643_v15 = vadd.f32 1e-05, %v2635_v12  ;;  %v2748_v28 = vadd.f32 %v11389_v24, %v2737_v39  ;;  %v2699_v52 = vmul.f32 %v11362_v59, %v2698_v58 }
 0x5da   : > { %v2679_v16 = vmul.f32 %v9063_v61, %v2678_v13  ;;  %v2685_v17 = vmul.f32 %v9065_v14, %v2640_v63  ;;  %vm2691_vm14 = vweird.f32 %v9065_v14  ;;  %v9067_v62 = vpop.eup %9066 }
 0x5db   : > { %9068 = vrsqrt.f32 %v2643_v15  ;;  %vm2692_vm1 = vmor %vm2690_vm13, %vm2691_vm14  ;;  %v2705_v30 = vmul.f32 %v9067_v62, %v11371_v46  ;;  %v2703_v27 = vsel %vm2702_vm2, %v11362_v59, %v2699_v52  ;;  %vm2720_vm3 = vweird.f32 %v2643_v15 }
 0x5dc   : > { %v2683_v20 = vsel %vm2682_vm12, %v9063_v61, %v2679_v16  ;;  %v2686_v21 = vmul.f32 %v9065_v14, %v2685_v17  ;;  %v2729_v38 = vmul.f32 %v2703_v27, %v11295_v43  ;;  %vm2711_vm7 = vweird.f32 %v9067_v62 }
 0x5dd   : > { %v2727_v22 = vmul.f32 %v2683_v20, %v11300_v50  ;;  %v2706_v6 = vmul.f32 %v9067_v62, %v2705_v30  ;;  %vm2712_vm9 = vmor %vm2710_vm6, %vm2711_vm7  ;;  %v2636_v46 = vadd.f32 1e-05, %v2628_v9  ;;  %v2879_v9 = vld [vmem:[%s14334_s12 + $0x18] sm:$0xff] }
 0x5de   : > { %v2687_v23 = vmul.f32 0.5, %v2686_v21  ;;  %v2740_v47 = vmul.f32 %v11382_v19, %v2729_v38 }
 0x5df   : > { %v2738_v34 = vmul.f32 %v11382_v19, %v2727_v22  ;;  %v2707_v41 = vmul.f32 0.5, %v2706_v6  ;;  %9070 = vrsqrt.f32 %v2636_v46  ;;  %vm2650_vm10 = vweird.f32 %v2636_v46 }
 0x5e0   : > { %v2688_v54 = vsub.f32 1.5, %v2687_v23 }
 0x5e1   : > { %v2749_v0 = vadd.f32 %v11389_v24, %v2738_v34  ;;  %v9069_v50 = vpop.eup %9068  ;;  %v2708_v49 = vsub.f32 1.5, %v2707_v41 }
 0x5e2   : > { %v2689_v26 = vmul.f32 %v9065_v14, %v2688_v54  ;;  %v2715_v31 = vmul.f32 %v9069_v50, %v2643_v15  ;;  %vm2721_vm4 = vweird.f32 %v9069_v50 }
 0x5e3   : > { %v2763_v32 = vpack.c.bf16 %v2749_v0, %v2748_v28  ;;  %vm2722_vm8 = vmor %vm2720_vm3, %vm2721_vm4  ;;  %v2709_v48 = vmul.f32 %v9067_v62, %v2708_v49 }
 0x5e4   : > { %v2693_v33 = vsel %vm2692_vm1, %v9065_v14, %v2689_v26  ;;  %v2716_v35 = vmul.f32 %v9069_v50, %v2715_v31 }
 0x5e5   : > { %8275 = vmatmul.msk.bf16.vlgmr.msra.gmra.mxu2 %vm2548_vm5, %v2763_v32  ;;  %8279 = vmatmul.msk.bf16.vlgmr.msra.gmra.mxu1 %vm2548_vm5, %v2763_v32  ;;  %v2728_v36 = vmul.f32 %v2693_v33, %v11306_v56  ;;  %v2751_v56 = vadd.f32 %v11389_v24, %v2740_v47  ;;  %v2713_v44 = vsel %vm2712_vm9, %v9067_v62, %v2709_v48 }
 0x5e6   : > { %v2717_v37 = vmul.f32 0.5, %v2716_v35  ;;  %v2730_v63 = vmul.f32 %v2713_v44, %v11304_v55 }
 0x5e7   : > { %v2739_v42 = vmul.f32 %v11382_v19, %v2728_v36 }
 0x5e8   : > { %v2718_v51 = vsub.f32 1.5, %v2717_v37  ;;  %v2741_v3 = vmul.f32 %v11382_v19, %v2730_v63 }
 0x5e9   : > { %v2750_v53 = vadd.f32 %v11389_v24, %v2739_v42 }
 0x5ea   : > { %v2719_v57 = vmul.f32 %v9069_v50, %v2718_v51  ;;  %v2752_v7 = vadd.f32 %v11389_v24, %v2741_v3 }
 0x5eb   : > { %v2764_v43 = vpack.c.bf16 %v2751_v56, %v2750_v53 }
 0x5ec   : > { %v2723_v59 = vsel %vm2722_vm8, %v9069_v50, %v2719_v57 }
 0x5ed   : > { %v2731_v61 = vmul.f32 %v2723_v59, %v11324_v4  ;;  %v9071_v4 = vpop.eup %9070 }
 0x5ee   : > { %v2645_v55 = vmul.f32 %v9071_v4, %v2636_v46  ;;  %vm2651_vm11 = vweird.f32 %v9071_v4  ;;  %v2878_v46 = vld [vmem:[%s14334_s12 + $0x10] sm:$0xff] }
 0x5ef   : > { %v2742_v1 = vmul.f32 %v11382_v19, %v2731_v61  ;;  %vm2652_vm12 = vmor %vm2650_vm10, %vm2651_vm11 }
 0x5f0   : > { %v2646_v10 = vmul.f32 %v9071_v4, %v2645_v55 }
 0x5f1   : > { %v2753_v5 = vadd.f32 %v11389_v24, %v2742_v1  ;;  %v2877_v1 = vld [vmem:[%s14334_s12 + $0x8] sm:$0xff] }
 0x5f2   : > { %v2647_v13 = vmul.f32 0.5, %v2646_v10 }
 0x5f3   : > { %v2765_v8 = vpack.c.bf16 %v2753_v5, %v2752_v7  ;;  %v2876_v5 = vld [vmem:[%s14334_s12] sm:$0xff] }
 0x5f4   : > { %v2648_v14 = vsub.f32 1.5, %v2647_v13 }
 0x5f5   : > { %8276 = vmatmul.msk.bf16.gmra.mxu2 %vm2548_vm5, %v2764_v43  ;;  %8280 = vmatmul.msk.bf16.gmra.mxu1 %vm2548_vm5, %v2764_v43 }
 0x5f6   : > { %v2649_v16 = vmul.f32 %v9071_v4, %v2648_v14 }
 0x5f8   : > { %v2653_v25 = vsel %vm2652_vm12, %v9071_v4, %v2649_v16  ;;  %v2882_v16 = vld [vmem:[%s14334_s12 + $0x30] sm:$0xff] }
 0x5f9   : > { %v2724_v22 = vmul.f32 %v2653_v25, %v11320_v2 }
 0x5fb   : > { %v2735_v34 = vmul.f32 %v11382_v19, %v2724_v22 }
 0x5fd   : > { %v2746_v54 = vadd.f32 %v11389_v24, %v2735_v34  ;;  %v2886_v34 = vld [vmem:[%s14334_s12 + $0x50] sm:$0xff] }
 0x605   : > { %8277 = vmatmul.msk.bf16.gmra.mxu2 %vm2548_vm5, %v2765_v8  ;;  %8281 = vmatmul.msk.bf16.gmra.mxu1 %vm2548_vm5, %v2765_v8 }
 0x641   : > { %v2609_v11 = vpop.xlane.xlu0 %2608 }
 0x642   : > { %v2629_v60 = vmul.f32 %v2609_v11, %v11283_v29  ;;  %v2881_v11 = vld [vmem:[%s14334_s12 + $0x28] sm:$0xff] }
 0x644   : > { %v2637_v12 = vadd.f32 1e-05, %v2629_v60  ;;  %v2880_v60 = vld [vmem:[%s14334_s12 + $0x20] sm:$0xff] }
 0x646   : > { %9072 = vrsqrt.f32 %v2637_v12  ;;  %vm2660_vm14 = vweird.f32 %v2637_v12 }
 0x64c   : > { %v9073_v15 = vpop.eup %9072 }
 0x64d   : > { %v2655_v17 = vmul.f32 %v9073_v15, %v2637_v12  ;;  %vm2661_vm13 = vweird.f32 %v9073_v15 }
 0x64e   : > { %vm2662_vm15 = vmor %vm2660_vm14, %vm2661_vm13 }
 0x64f   : > { %v2656_v18 = vmul.f32 %v9073_v15, %v2655_v17 }
 0x651   : > { %v2657_v20 = vmul.f32 0.5, %v2656_v18 }
 0x653   : > { %v2658_v21 = vsub.f32 1.5, %v2657_v20  ;;  %v2885_v20 = vld [vmem:[%s14334_s12 + $0x48] sm:$0xff] }
 0x655   : > { %v2659_v23 = vmul.f32 %v9073_v15, %v2658_v21  ;;  %v2884_v21 = vld [vmem:[%s14334_s12 + $0x40] sm:$0xff] }
 0x657   : > { %v2663_v39 = vsel %vm2662_vm15, %v9073_v15, %v2659_v23  ;;  %v2883_v15 = vld [vmem:[%s14334_s12 + $0x38] sm:$0xff] }
 0x658   : > { %v2725_v58 = vmul.f32 %v2663_v39, %v11355_v40 }
 0x65a   : > { %v2736_v62 = vmul.f32 %v11382_v19, %v2725_v58  ;;  %v2887_v58 = vld [vmem:[%s14334_s12 + $0x58] sm:$0xff] }
 0x65c   : > { %v2747_v0 = vadd.f32 %v11389_v24, %v2736_v62 }
 0x65e   : > { %v2762_v50 = vpack.c.bf16 %v2747_v0, %v2746_v54 }
 0x660   : > { %8274 = vmatmul.msk.bf16.vlgmr.msra.gmra.mxu0 %vm2548_vm5, %v2762_v50 }
 0x662   : > { %v2861_v26 = vpop.f32.mrf.mxu1 }
 0x668   : > { %v11427_v28 = vpop.f32.mrf.mxu2 }
 0x669   : > { %v2942_v55 = vmul.f32 %v2878_v46, %v11427_v28  ;;  %v2950_v54 = vmul.f32 %v2886_v34, %v11427_v28  ;;  %v2903_v34 = vld [vmem:[%s14334_s12 + $0xd8] sm:$0xff] }
 0x66a   : > { %v2863_v2 = vpop.f32.mrf.mxu1 }
 0x66b   : > { %v4066_v41 = vpack.c.bf16 %v2863_v2, %v2861_v26  ;;  %v2888_v26 = vld [vmem:[%s14334_s12 + $0x60] sm:$0xff] }
 0x670   : > { %8278 = vmatmul.msk.bf16.vlgmr.msrb.gmra.mxu0 %vm2548_vm5, %v2762_v50  ;;  %v11430_v52 = vpop.f32.mrf.mxu2  ;;  %v2889_v50 = vld [vmem:[%s14334_s12 + $0x68] sm:$0xff] }
 0x671   : > { %v3037_v40 = vpack.c.bf16 %v11430_v52, %v11427_v28  ;;  %v2943_v4 = vmul.f32 %v2879_v9, %v11430_v52  ;;  %v2951_v62 = vmul.f32 %v2887_v58, %v11430_v52 }
 0x672   : > { %v2866_v30 = vpop.f32.mrf.mxu1 }
 0x673   : > { %3046 = vrot.lane.b32.xlu0 %v3037_v40, %s10345_s13  ;;  %v3005_v10 = vpack.c.bf16 %v2943_v4, %v2942_v55  ;;  %v3009_v0 = vpack.c.bf16 %v2951_v62, %v2950_v54  ;;  %v2899_v55 = vld [vmem:[%s14334_s12 + $0xb8] sm:$0xff]  ;;  %v2902_v62 = vld [vmem:[%s14334_s12 + $0xd0] sm:$0xff]  ;;  %v2967_v54 = vmul.f32 %v2903_v34, %v11430_v52  ;;  %v2912_v34 = vld [vmem:[%s14334_s12 + $0x120] sm:$0xff] }
 0x678   : > { %v11435_v19 = vpop.f32.mrf.mxu2 }
 0x679   : > { %v2944_v13 = vmul.f32 %v2880_v60, %v11435_v19  ;;  %v2952_v40 = vmul.f32 %v2888_v26, %v11435_v19  ;;  %v2966_v26 = vmul.f32 %v2902_v62, %v11427_v28 }
 0x67a   : > { %v2868_v24 = vpop.f32.mrf.mxu1 }
 0x67b   : > { %v4067_v36 = vpack.c.bf16 %v2868_v24, %v2866_v30  ;;  %v2891_v24 = vld [vmem:[%s14334_s12 + $0x78] sm:$0xff] }
 0x680   : > { %v11437_v31 = vpop.f32.mrf.mxu2 }
 0x681   : > { %v3038_v32 = vpack.c.bf16 %v11437_v31, %v11435_v19  ;;  %v2945_v12 = vmul.f32 %v2881_v11, %v11437_v31  ;;  %v2953_v2 = vmul.f32 %v2889_v50, %v11437_v31 }
 0x682   : > { %v2871_v33 = vpop.f32.mrf.mxu1 }
 0x683   : > { %3048 = vrot.lane.b32.xlu2 %v3038_v32, %s10345_s13  ;;  %v3006_v14 = vpack.c.bf16 %v2945_v12, %v2944_v13  ;;  %v3010_v30 = vpack.c.bf16 %v2953_v2, %v2952_v40  ;;  %v2890_v32 = vld [vmem:[%s14334_s12 + $0x70] sm:$0xff]  ;;  %v3017_v2 = vpack.c.bf16 %v2967_v54, %v2966_v26 }
 0x688   : > { %v11442_v35 = vpop.f32.mrf.mxu2 }
 0x689   : > { %v2946_v18 = vmul.f32 %v2882_v16, %v11442_v35 }
 0x68a   : > { %v2873_v27 = vpop.f32.mrf.mxu1 }
 0x68b   : > { %v4068_v6 = vpack.c.bf16 %v2873_v27, %v2871_v33  ;;  %v2954_v27 = vmul.f32 %v2890_v32, %v11442_v35  ;;  %v2904_v32 = vld [vmem:[%s14334_s12 + $0xe0] sm:$0xff] }
 0x68d   : > { %4169 = vmatpush.bf16.msra.mxu0 %v4068_v6  ;;  %8809 = vmatpush.bf16.msra.mxu3 %v4068_v6 }
 0x690   : > { %v11444_v37 = vpop.f32.mrf.mxu2 }
 0x691   : > { %4170 = vmatpush.bf16.msra.mxu0 %v4067_v36  ;;  %8810 = vmatpush.bf16.msra.mxu3 %v4067_v36  ;;  %v3039_v38 = vpack.c.bf16 %v11444_v37, %v11442_v35  ;;  %v2947_v17 = vmul.f32 %v2883_v15, %v11444_v37  ;;  %v2955_v33 = vmul.f32 %v2891_v24, %v11444_v37  ;;  %v2893_v36 = vld [vmem:[%s14334_s12 + $0x88] sm:$0xff] }
 0x692   : > { %v2963_v11 = vmul.f32 %v2899_v55, %v11444_v37  ;;  %v2905_v24 = vld [vmem:[%s14334_s12 + $0xe8] sm:$0xff] }
 0x693   : > { %3050 = vrot.lane.b32.xlu1 %v3039_v38, %s10345_s13  ;;  %v3007_v25 = vpack.c.bf16 %v2947_v17, %v2946_v18  ;;  %v3011_v6 = vpack.c.bf16 %v2955_v33, %v2954_v27  ;;  %v2892_v38 = vld [vmem:[%s14334_s12 + $0x80] sm:$0xff]  ;;  %v2901_v17 = vld [vmem:[%s14334_s12 + $0xc8] sm:$0xff]  ;;  %v2969_v33 = vmul.f32 %v2905_v24, %v11437_v31 }
 0x694   : > { %v2900_v18 = vld [vmem:[%s14334_s12 + $0xc0] sm:$0xff] }
 0x695   : > { %4171 = vmatpush.bf16.msra.mxu0 %v4066_v41  ;;  %8811 = vmatpush.bf16.msra.mxu3 %v4066_v41 }
 0x6dd   : > { %v11449_v42 = vpop.f32.mrf.mxu0  ;;  %v3049_v43 = vpop.permute.xlu2 %3048 }
 0x6de   : > { %v3155_v59 = vsel %vm2548_vm5, %v3049_v43, 0  ;;  %v2940_v8 = vmul.f32 %v2876_v5, %v11449_v42  ;;  %v2948_v23 = vmul.f32 %v2884_v21, %v11449_v42 }
 0x6e5   : > { %v11451_v51 = vpop.f32.mrf.mxu0  ;;  %v3047_v44 = vpop.permute.xlu0 %3046 }
 0x6e6   : > { %v3036_v47 = vpack.c.bf16 %v11451_v51, %v11449_v42  ;;  %v3152_v61 = vsel %vm2548_vm5, %v3047_v44, 0  ;;  %v2941_v7 = vmul.f32 %v2877_v1, %v11451_v51  ;;  %v2949_v22 = vmul.f32 %v2885_v20, %v11451_v51  ;;  %v2897_v1 = vld [vmem:[%s14334_s12 + $0xa8] sm:$0xff] }
 0x6e7   : > { %v2957_v41 = vmul.f32 %v2893_v36, %v11451_v51  ;;  %v2961_v5 = vmul.f32 %v2897_v1, %v11437_v31 }
 0x6e8   : > { %3044 = vrot.lane.b32.xlu2 %v3036_v47, %s10345_s13  ;;  %v3004_v45 = vpack.c.bf16 %v2941_v7, %v2940_v8  ;;  %v3008_v39 = vpack.c.bf16 %v2949_v22, %v2948_v23  ;;  %v2956_v47 = vmul.f32 %v2892_v38, %v11449_v42  ;;  %v2964_v22 = vmul.f32 %v2900_v18, %v11449_v42 }
 0x6ed   : > { %v2856_v49 = vpop.f32.mrf.mxu0 }
 0x6f5   : > { %v2858_v53 = vpop.f32.mrf.mxu0 }
 0x6f6   : > { %v4065_v57 = vpack.c.bf16 %v2858_v53, %v2856_v49  ;;  %v3012_v49 = vpack.c.bf16 %v2957_v41, %v2956_v47  ;;  %v2907_v41 = vld [vmem:[%s14334_s12 + $0xf8] sm:$0xff]  ;;  %v2906_v47 = vld [vmem:[%s14334_s12 + $0xf0] sm:$0xff] }
 0x6f8   : > { %4172 = vmatpush.bf16.msra.mxu0 %v4065_v57  ;;  %8812 = vmatpush.bf16.msra.mxu3 %v4065_v57  ;;  %v2895_v57 = vld [vmem:[%s14334_s12 + $0x98] sm:$0xff] }
 0x705   : > { %v3051_v56 = vpop.permute.xlu1 %3050 }
 0x706   : > { %v3158_v48 = vsel %vm2548_vm5, %v3051_v56, 0  ;;  %v2894_v56 = vld [vmem:[%s14334_s12 + $0x90] sm:$0xff] }
 0x707   : > { %3164 = vmatpush.bf16.xpose.msrb.mxu2 %v3158_v48  ;;  %v2959_v48 = vmul.f32 %v2895_v57, %v11430_v52 }
 0x70f   : > { %3165 = vmatpush.bf16.xpose.msrb.mxu2 %v3155_v59  ;;  %v2958_v59 = vmul.f32 %v2894_v56, %v11427_v28  ;;  %v2970_v56 = vmul.f32 %v2906_v47, %v11442_v35 }
 0x711   : > { %v3013_v44 = vpack.c.bf16 %v2959_v48, %v2958_v59 }
 0x717   : > { %3166 = vmatpush.bf16.xpose.msrb.mxu2 %v3152_v61 }
 0x742   : > { %v3045_v63 = vpop.permute.xlu2 %3044 }
 0x743   : > { %v3149_v3 = vsel %vm2548_vm5, %v3045_v63, 0 }
 0x744   : > { %3167 = vmatpush.bf16.xpose.msrb.mxu2 %v3149_v3  ;;  %v2896_v3 = vld [vmem:[%s14334_s12 + $0xa0] sm:$0xff] }
 0x74b   : > { %8282 = vmatmul.msk.bf16.vlgmr.msrb.gmra.mxu2 %vm2548_vm5, %v3004_v45  ;;  %v2960_v45 = vmul.f32 %v2896_v3, %v11435_v19 }
 0x74d   : > { %v3014_v9 = vpack.c.bf16 %v2961_v5, %v2960_v45  ;;  %v2911_v45 = vld [vmem:[%s14334_s12 + $0x118] sm:$0xff] }
 0x75b   : > { %8283 = vmatmul.msk.bf16.gmra.mxu2 %vm2548_vm5, %v3005_v10  ;;  %v2898_v10 = vld [vmem:[%s14334_s12 + $0xb0] sm:$0xff] }
 0x75c   : > { %v2962_v13 = vmul.f32 %v2898_v10, %v11442_v35  ;;  %v2910_v10 = vld [vmem:[%s14334_s12 + $0x110] sm:$0xff] }
 0x76b   : > { %8284 = vmatmul.msk.bf16.gmra.mxu2 %vm2548_vm5, %v3006_v14  ;;  %v3015_v14 = vpack.c.bf16 %v2963_v11, %v2962_v13  ;;  %v2975_v11 = vmul.f32 %v2911_v45, %v11430_v52  ;;  %v2974_v13 = vmul.f32 %v2910_v10, %v11427_v28 }
 0x77b   : > { %8285 = vmatmul.msk.bf16.gmra.mxu2 %vm2548_vm5, %v3007_v25  ;;  %v2965_v25 = vmul.f32 %v2901_v17, %v11451_v51 }
 0x77d   : > { %v3016_v23 = vpack.c.bf16 %v2965_v25, %v2964_v22  ;;  %v2913_v22 = vld [vmem:[%s14334_s12 + $0x128] sm:$0xff] }
 0x77e   : > { %v2977_v62 = vmul.f32 %v2913_v22, %v11437_v31 }
 0x78b   : > { %8286 = vmatmul.msk.bf16.gmra.mxu2 %vm2548_vm5, %v3008_v39 }
 0x79b   : > { %8287 = vmatmul.msk.bf16.gmra.mxu2 %vm2548_vm5, %v3009_v0 }
 0x7ab   : > { %8288 = vmatmul.msk.bf16.gmra.mxu2 %vm2548_vm5, %v3010_v30 }
 0x7bb   : > { %8289 = vmatmul.msk.bf16.gmra.mxu2 %vm2548_vm5, %v3011_v6  ;;  %v2968_v6 = vmul.f32 %v2904_v32, %v11435_v19 }
 0x7bd   : > { %v3018_v36 = vpack.c.bf16 %v2969_v33, %v2968_v6 }
 0x7cb   : > { %8290 = vmatmul.msk.bf16.gmra.mxu2 %vm2548_vm5, %v3012_v49  ;;  %v2971_v49 = vmul.f32 %v2907_v41, %v11444_v37 }
 0x7cd   : > { %v3019_v48 = vpack.c.bf16 %v2971_v49, %v2970_v56  ;;  %v2915_v49 = vld [vmem:[%s14334_s12 + $0x138] sm:$0xff] }
 0x7ce   : > { %v11505_v53 = vpop.f32.mrf.mxu2 }
 0x7d6   : > { %v11510_v43 = vpop.f32.mrf.mxu2 }
 0x7db   : > { %8291 = vmatmul.msk.bf16.gmra.mxu2 %vm2548_vm5, %v3013_v44  ;;  %v2909_v44 = vld [vmem:[%s14334_s12 + $0x108] sm:$0xff] }
 0x7dc   : > { %v2973_v1 = vmul.f32 %v2909_v44, %v11451_v51  ;;  %v2914_v44 = vld [vmem:[%s14334_s12 + $0x130] sm:$0xff] }
 0x7dd   : > { %v2978_v45 = vmul.f32 %v2914_v44, %v11442_v35 }
 0x7de   : > { %v11514_v61 = vpop.f32.mrf.mxu2 }
 0x7df   : > { %v3335_v63 = vsel %vm2548_vm5, %v11514_v61, -inf }
 0x7e0   : > { %3336 = vmax.xlane.f32.xlu1 %v3335_v63  ;;  %v2908_v63 = vld [vmem:[%s14334_s12 + $0x100] sm:$0xff] }
 0x7e1   : > { %v2972_v3 = vmul.f32 %v2908_v63, %v11449_v42 }
 0x7e3   : > { %v3020_v5 = vpack.c.bf16 %v2973_v1, %v2972_v3 }
 0x7e6   : > { %v11521_v7 = vpop.f32.mrf.mxu2 }
 0x7e7   : > { %v3338_v8 = vsel %vm2548_vm5, %v11521_v7, -inf }
 0x7e8   : > { %3339 = vmax.xlane.f32.xlu0 %v3338_v8 }
 0x7eb   : > { %8292 = vmatmul.msk.bf16.gmra.mxu2 %vm2548_vm5, %v3014_v9 }
 0x7ee   : > { %v11527_v46 = vpop.f32.mrf.mxu2 }
 0x7ef   : > { %v3341_v4 = vsel %vm2548_vm5, %v11527_v46, -inf }
 0x7f0   : > { %3342 = vmax.xlane.f32.xlu2 %v3341_v4 }
 0x7f6   : > { %v11534_v60 = vpop.f32.mrf.mxu2 }
 0x7f7   : > { %v3344_v12 = vsel %vm2548_vm5, %v11534_v60, -inf }
 0x7f8   : > { %3345 = vmax.xlane.f32.xlu1 %v3344_v12 }
 0x7fb   : > { %8293 = vmatmul.msk.bf16.gmra.mxu2 %vm2548_vm5, %v3015_v14  ;;  %v3021_v14 = vpack.c.bf16 %v2975_v11, %v2974_v13 }
 0x7fe   : > { %v11540_v15 = vpop.f32.mrf.mxu2 }
 0x7ff   : > { %v3347_v16 = vsel %vm2548_vm5, %v11540_v15, -inf }
 0x800   : > { %3348 = vmax.xlane.f32.xlu0 %v3347_v16 }
 0x806   : > { %v11547_v20 = vpop.f32.mrf.mxu2 }
 0x807   : > { %v3350_v21 = vsel %vm2548_vm5, %v11547_v20, -inf }
 0x808   : > { %3351 = vmax.xlane.f32.xlu2 %v3350_v21 }
 0x80b   : > { %8294 = vmatmul.msk.bf16.gmra.mxu2 %vm2548_vm5, %v3016_v23 }
 0x80e   : > { %v11553_v39 = vpop.f32.mrf.mxu2 }
 0x80f   : > { %v3353_v58 = vsel %vm2548_vm5, %v11553_v39, -inf }
 0x810   : > { %3354 = vmax.xlane.f32.xlu1 %v3353_v58 }
 0x816   : > { %v11560_v0 = vpop.f32.mrf.mxu2 }
 0x817   : > { %v3356_v50 = vsel %vm2548_vm5, %v11560_v0, -inf }
 0x818   : > { %3357 = vmax.xlane.f32.xlu0 %v3356_v50 }
 0x81b   : > { %8295 = vmatmul.msk.bf16.gmra.mxu2 %vm2548_vm5, %v3017_v2  ;;  %v2976_v2 = vmul.f32 %v2912_v34, %v11435_v19 }
 0x81e   : > { %v11566_v40 = vpop.f32.mrf.mxu2 }
 0x81f   : > { %v3359_v30 = vsel %vm2548_vm5, %v11566_v40, -inf }
 0x820   : > { %3360 = vmax.xlane.f32.xlu0 %v3359_v30 }
 0x826   : > { %v11573_v27 = vpop.f32.mrf.mxu2 }
 0x827   : > { %v3362_v26 = vsel %vm2548_vm5, %v11573_v27, -inf }
 0x82b   : > { %8296 = vmatmul.msk.bf16.gmra.mxu2 %vm2548_vm5, %v3018_v36 }
 0x82e   : > { %v11577_v38 = vpop.f32.mrf.mxu2 }
 0x82f   : > { %v3365_v41 = vsel %vm2548_vm5, %v11577_v38, -inf }
 0x836   : > { %v11582_v57 = vpop.f32.mrf.mxu2 }
 0x83b   : > { %8297 = vmatmul.msk.bf16.gmra.mxu2 %vm2548_vm5, %v3019_v48 }
 0x83e   : > { %v11586_v59 = vpop.f32.mrf.mxu2 }
 0x846   : > { %v11592_v8 = vpop.f32.mrf.mxu2 }
 0x84b   : > { %8298 = vmatmul.msk.bf16.gmra.mxu2 %vm2548_vm5, %v3020_v5  ;;  %v3368_v5 = vsel %vm2548_vm5, %v11582_v57, -inf }
 0x84e   : > { %v11596_v4 = vpop.f32.mrf.mxu2 }
 0x853   : > { %v3337_v9 = vpop.xlane.xlu1 %3336 }
 0x854   : > { %v3523_v55 = vsub.f32 %v11514_v61, %v3337_v9 }
 0x856   : > { %v3589_v12 = vmul.f32 1.442695, %v3523_v55  ;;  %v11606_v25 = vpop.f32.mrf.mxu2 }
 0x858   : > { %9074 = vpow2.f32 %v3589_v12 }
 0x85b   : > { %v3340_v16 = vpop.xlane.xlu0 %3339  ;;  %8299 = vmatmul.msk.bf16.gmra.mxu2 %vm2548_vm5, %v3021_v14  ;;  %v3371_v14 = vsel %vm2548_vm5, %v11586_v59, -inf }
 0x85c   : > { %v3524_v17 = vsub.f32 %v11521_v7, %v3340_v16  ;;  %v2917_v16 = vld [vmem:[%s14334_s12 + $0x148] sm:$0xff] }
 0x85d   : > { %v2981_v22 = vmul.f32 %v2917_v16, %v11451_v51 }
 0x85e   : > { %v11604_v18 = vpop.eup %9074  ;;  %v3591_v61 = vmul.f32 1.442695, %v3524_v17  ;;  %v11621_v30 = vpop.f32.mrf.mxu2 }
 0x85f   : > { %v3719_v21 = vsel %vm2548_vm5, %v11604_v18, 0.0 }
 0x860   : > { %9076 = vpow2.f32 %v3591_v61  ;;  %3720 = vadd.xlane.f32.xlu2 %v3719_v21  ;;  %v2916_v21 = vld [vmem:[%s14334_s12 + $0x140] sm:$0xff] }
 0x863   : > { %v3343_v23 = vpop.xlane.xlu2 %3342 }
 0x864   : > { %v3525_v58 = vsub.f32 %v11527_v46, %v3343_v23  ;;  %v3022_v46 = vpack.c.bf16 %v2977_v62, %v2976_v2  ;;  %v3374_v62 = vsel %vm2548_vm5, %v11592_v8, -inf }
 0x866   : > { %v11614_v54 = vpop.eup %9076  ;;  %v3593_v7 = vmul.f32 1.442695, %v3525_v58  ;;  %v11631_v47 = vpop.f32.mrf.mxu2 }
 0x867   : > { %v3722_v50 = vsel %vm2548_vm5, %v11614_v54, 0.0  ;;  %v3386_v16 = vsel %vm2548_vm5, %v11631_v47, -inf }
 0x868   : > { %9078 = vpow2.f32 %v3593_v7  ;;  %3723 = vadd.xlane.f32.xlu1 %v3722_v50  ;;  %3363 = vmax.xlane.f32.xlu2 %v3362_v26  ;;  %v2980_v7 = vmul.f32 %v2916_v21, %v11449_v42 }
 0x86b   : > { %v3346_v24 = vpop.xlane.xlu1 %3345  ;;  %8300 = vmatmul.msk.bf16.gmra.mxu2 %vm2548_vm5, %v3022_v46 }
 0x86c   : > { %v3526_v32 = vsub.f32 %v11534_v60, %v3346_v24  ;;  %v2979_v60 = vmul.f32 %v2915_v49, %v11444_v37 }
 0x86e   : > { %v11625_v33 = vpop.eup %9078  ;;  %v3595_v6 = vmul.f32 1.442695, %v3526_v32  ;;  %v11645_v55 = vpop.f32.mrf.mxu2  ;;  %v3377_v32 = vsel %vm2548_vm5, %v11596_v4, -inf }
 0x86f   : > { %v3725_v36 = vsel %vm2548_vm5, %v11625_v33, 0.0 }
 0x870   : > { %9080 = vpow2.f32 %v3595_v6  ;;  %3726 = vadd.xlane.f32.xlu1 %v3725_v36  ;;  %3366 = vmax.xlane.f32.xlu2 %v3365_v41  ;;  %v2919_v36 = vld [vmem:[%s14334_s12 + $0x158] sm:$0xff] }
 0x873   : > { %v3349_v56 = vpop.xlane.xlu0 %3348 }
 0x874   : > { %v3527_v48 = vsub.f32 %v11540_v15, %v3349_v56  ;;  %v3023_v15 = vpack.c.bf16 %v2979_v60, %v2978_v45  ;;  %v2918_v56 = vld [vmem:[%s14334_s12 + $0x150] sm:$0xff] }
 0x876   : > { %v11637_v63 = vpop.eup %9080  ;;  %v3597_v1 = vmul.f32 1.442695, %v3527_v48  ;;  %v11660_v23 = vpop.f32.mrf.mxu2 }
 0x877   : > { %v3728_v3 = vsel %vm2548_vm5, %v11637_v63, 0.0 }
 0x878   : > { %9082 = vpow2.f32 %v3597_v1  ;;  %3729 = vadd.xlane.f32.xlu0 %v3728_v3  ;;  %3369 = vmax.xlane.f32.xlu1 %v3368_v5  ;;  %v3380_v1 = vsel %vm2548_vm5, %v11606_v25, -inf  ;;  %v2982_v3 = vmul.f32 %v2918_v56, %v11427_v28  ;;  %v2927_v56 = vld [vmem:[%s14334_s12 + $0x198] sm:$0xff] }
 0x87b   : > { %v3352_v9 = vpop.xlane.xlu2 %3351  ;;  %8301 = vmatmul.msk.bf16.gmra.mxu2 %vm2548_vm5, %v3023_v15 }
 0x87c   : > { %v3528_v10 = vsub.f32 %v11547_v20, %v3352_v9  ;;  %v3383_v9 = vsel %vm2548_vm5, %v11621_v30, -inf }
 0x87e   : > { %v11648_v11 = vpop.eup %9082  ;;  %v3599_v12 = vmul.f32 1.442695, %v3528_v10  ;;  %v11675_v6 = vpop.f32.mrf.mxu2  ;;  %v2921_v10 = vld [vmem:[%s14334_s12 + $0x168] sm:$0xff] }
 0x87f   : > { %v3731_v13 = vsel %vm2548_vm5, %v11648_v11, 0.0 }
 0x880   : > { %9084 = vpow2.f32 %v3599_v12  ;;  %3732 = vadd.xlane.f32.xlu0 %v3731_v13  ;;  %3372 = vmax.xlane.f32.xlu1 %v3371_v14  ;;  %v2920_v13 = vld [vmem:[%s14334_s12 + $0x160] sm:$0xff]  ;;  %v2985_v14 = vmul.f32 %v2921_v10, %v11437_v31 }
 0x883   : > { %v3355_v17 = vpop.xlane.xlu1 %3354 }
 0x884   : > { %v3529_v61 = vsub.f32 %v11553_v39, %v3355_v17  ;;  %v3024_v39 = vpack.c.bf16 %v2981_v22, %v2980_v7  ;;  %v2984_v17 = vmul.f32 %v2920_v13, %v11435_v19  ;;  %v3389_v22 = vsel %vm2548_vm5, %v11645_v55, -inf }
 0x886   : > { %v11658_v20 = vpop.eup %9084  ;;  %v3601_v58 = vmul.f32 1.442695, %v3529_v61  ;;  %v11688_v5 = vpop.f32.mrf.mxu2  ;;  %v3026_v61 = vpack.c.bf16 %v2985_v14, %v2984_v17 }
 0x887   : > { %v3734_v34 = vsel %vm2548_vm5, %v11658_v20, 0.0 }
 0x888   : > { %9086 = vpow2.f32 %v3601_v58  ;;  %3735 = vadd.xlane.f32.xlu2 %v3734_v34  ;;  %3375 = vmax.xlane.f32.xlu0 %v3374_v62  ;;  %v2923_v58 = vld [vmem:[%s14334_s12 + $0x178] sm:$0xff]  ;;  %v2922_v34 = vld [vmem:[%s14334_s12 + $0x170] sm:$0xff] }
 0x889   : > { %v2987_v62 = vmul.f32 %v2923_v58, %v11444_v37  ;;  %v2986_v7 = vmul.f32 %v2922_v34, %v11442_v35 }
 0x88b   : > { %v3358_v50 = vpop.xlane.xlu0 %3357  ;;  %8302 = vmatmul.msk.bf16.gmra.mxu2 %vm2548_vm5, %v3024_v39 }
 0x88c   : > { %v3530_v26 = vsub.f32 %v11560_v0, %v3358_v50  ;;  %v2983_v0 = vmul.f32 %v2919_v36, %v11430_v52  ;;  %v3027_v50 = vpack.c.bf16 %v2987_v62, %v2986_v7 }
 0x88e   : > { %v11669_v2 = vpop.eup %9086  ;;  %v3603_v46 = vmul.f32 1.442695, %v3530_v26  ;;  %v11698_v12 = vpop.f32.mrf.mxu2 }
 0x88f   : > { %v3737_v24 = vsel %vm2548_vm5, %v11669_v2, 0.0 }
 0x890   : > { %9088 = vpow2.f32 %v3603_v46  ;;  %3738 = vadd.xlane.f32.xlu2 %v3737_v24  ;;  %3378 = vmax.xlane.f32.xlu0 %v3377_v32  ;;  %v2925_v46 = vld [vmem:[%s14334_s12 + $0x188] sm:$0xff]  ;;  %v2924_v24 = vld [vmem:[%s14334_s12 + $0x180] sm:$0xff] }
 0x891   : > { %v2989_v32 = vmul.f32 %v2925_v46, %v11451_v51  ;;  %v2988_v36 = vmul.f32 %v2924_v24, %v11449_v42 }
 0x893   : > { %v3361_v41 = vpop.xlane.xlu0 %3360 }
 0x894   : > { %v3531_v49 = vsub.f32 %v11566_v40, %v3361_v41  ;;  %v3025_v40 = vpack.c.bf16 %v2983_v0, %v2982_v3  ;;  %v3028_v41 = vpack.c.bf16 %v2989_v32, %v2988_v36 }
 0x896   : > { %v11681_v48 = vpop.eup %9088  ;;  %v3605_v44 = vmul.f32 1.442695, %v3531_v49  ;;  %v11706_v21 = vpop.f32.mrf.mxu2 }
 0x897   : > { %v3740_v60 = vsel %vm2548_vm5, %v11681_v48, 0.0 }
 0x898   : > { %9090 = vpow2.f32 %v3605_v44  ;;  %3741 = vadd.xlane.f32.xlu1 %v3740_v60  ;;  %3381 = vmax.xlane.f32.xlu2 %v3380_v1  ;;  %v2926_v44 = vld [vmem:[%s14334_s12 + $0x190] sm:$0xff]  ;;  %v2991_v60 = vmul.f32 %v2927_v56, %v11430_v52 }
 0x899   : > { %v2990_v3 = vmul.f32 %v2926_v44, %v11427_v28 }
 0x89b   : > { %8303 = vmatmul.msk.bf16.gmra.mxu2 %vm2548_vm5, %v3025_v40  ;;  %v3029_v40 = vpack.c.bf16 %v2991_v60, %v2990_v3 }
 0x89e   : > { %v11691_v45 = vpop.eup %9090  ;;  %v11714_v39 = vpop.f32.mrf.mxu2 }
 0x89f   : > { %v3743_v15 = vsel %vm2548_vm5, %v11691_v45, 0.0 }
 0x8a0   : > { %3744 = vadd.xlane.f32.xlu1 %v3743_v15  ;;  %3384 = vmax.xlane.f32.xlu2 %v3383_v9 }
 0x8a6   : > { %v11717_v26 = vpop.f32.mrf.mxu2 }
 0x8a8   : > { %3387 = vmax.xlane.f32.xlu1 %v3386_v16 }
 0x8ab   : > { %8304 = vmatmul.msk.bf16.gmra.mxu2 %vm2548_vm5, %v3026_v61  ;;  %v2929_v61 = vld [vmem:[%s14334_s12 + $0x1a8] sm:$0xff] }
 0x8ac   : > { %v2993_v24 = vmul.f32 %v2929_v61, %v11437_v31 }
 0x8ae   : > { %v11724_v49 = vpop.f32.mrf.mxu2 }
 0x8b0   : > { %3390 = vmax.xlane.f32.xlu1 %v3389_v22 }
 0x8b6   : > { %v11729_v1 = vpop.f32.mrf.mxu2 }
 0x8bb   : > { %8305 = vmatmul.msk.bf16.gmra.mxu2 %vm2548_vm5, %v3027_v50  ;;  %v2928_v50 = vld [vmem:[%s14334_s12 + $0x1a0] sm:$0xff] }
 0x8be   : > { %v11734_v16 = vpop.f32.mrf.mxu2 }
 0x8cb   : > { %8306 = vmatmul.msk.bf16.gmra.mxu2 %vm2548_vm5, %v3028_v41  ;;  %v2992_v41 = vmul.f32 %v2928_v50, %v11435_v19 }
 0x8d3   : > { %v3721_v0 = vpop.xlane.xlu2 %3720 }
 0x8d4   : > { %9092 = vrcp.f32 %v3721_v0 }
 0x8da   : > { %v9093_v14 = vpop.eup %9092 }
 0x8db   : > { %v3724_v15 = vpop.xlane.xlu1 %3723  ;;  %v3364_v9 = vpop.xlane.xlu2 %3363  ;;  %8307 = vmatmul.msk.bf16.gmra.mxu2 %vm2548_vm5, %v3029_v40  ;;  %v3971_v34 = vmul.f32 %v9093_v14, %v11604_v18  ;;  %v3030_v18 = vpack.c.bf16 %v2993_v24, %v2992_v41 }
 0x8dc   : > { %9094 = vrcp.f32 %v3724_v15  ;;  %v3532_v10 = vsub.f32 %v11573_v27, %v3364_v9  ;;  %v2931_v9 = vld [vmem:[%s14334_s12 + $0x1b8] sm:$0xff] }
 0x8de   : > { %v3607_v13 = vmul.f32 1.442695, %v3532_v10 }
 0x8e0   : > { %9096 = vpow2.f32 %v3607_v13 }
 0x8e2   : > { %v9095_v17 = vpop.eup %9094 }
 0x8e3   : > { %v3727_v22 = vpop.xlane.xlu1 %3726  ;;  %v3367_v58 = vpop.xlane.xlu2 %3366  ;;  %v3972_v62 = vmul.f32 %v9095_v17, %v11614_v54 }
 0x8e4   : > { %v3533_v7 = vsub.f32 %v11577_v38, %v3367_v58  ;;  %v11748_v54 = vpop.f32.mrf.mxu2 }
 0x8e5   : > { %v4034_v46 = vpack.c.bf16 %v3972_v62, %v3971_v34  ;;  %v2995_v34 = vmul.f32 %v2931_v9, %v11444_v37 }
 0x8e6   : > { %v11742_v27 = vpop.eup %9096  ;;  %v3609_v32 = vmul.f32 1.442695, %v3533_v7 }
 0x8e7   : > { %8315 = vmatmul.msk.bf16.vlgmr.msra.gmra.mxu3 %vm2548_vm5, %v4034_v46  ;;  %v3746_v36 = vsel %vm2548_vm5, %v11742_v27, 0.0 }
 0x8e8   : > { %9098 = vpow2.f32 %v3609_v32  ;;  %3747 = vadd.xlane.f32.xlu0 %v3746_v36 }
 0x8e9   : > { %9100 = vrcp.f32 %v3727_v22  ;;  %v2930_v22 = vld [vmem:[%s14334_s12 + $0x1b0] sm:$0xff] }
 0x8eb   : > { %v3730_v38 = vpop.xlane.xlu0 %3729  ;;  %v3370_v56 = vpop.xlane.xlu1 %3369  ;;  %8308 = vmatmul.msk.bf16.gmra.mxu2 %vm2548_vm5, %v3030_v18 }
 0x8ec   : > { %9102 = vrcp.f32 %v3730_v38  ;;  %v3534_v0 = vsub.f32 %v11582_v57, %v3370_v56  ;;  %v11759_v61 = vpop.f32.mrf.mxu2  ;;  %v3395_v56 = vsel %vm2548_vm5, %v11675_v6, -inf }
 0x8ee   : > { %v11752_v44 = vpop.eup %9098  ;;  %v3611_v60 = vmul.f32 1.442695, %v3534_v0 }
 0x8ef   : > { %v3749_v3 = vsel %vm2548_vm5, %v11752_v44, 0.0  ;;  %v9101_v40 = vpop.eup %9100 }
 0x8f0   : > { %9104 = vpow2.f32 %v3611_v60  ;;  %3750 = vadd.xlane.f32.xlu0 %v3749_v3  ;;  %v3973_v14 = vmul.f32 %v9101_v40, %v11625_v33  ;;  %v3392_v33 = vsel %vm2548_vm5, %v11660_v23, -inf  ;;  %v2933_v3 = vld [vmem:[%s14334_s12 + $0x1c8] sm:$0xff] }
 0x8f2   : > { %v9103_v15 = vpop.eup %9102 }
 0x8f3   : > { %v3733_v10 = vpop.xlane.xlu0 %3732  ;;  %v3373_v13 = vpop.xlane.xlu1 %3372  ;;  %v3974_v17 = vmul.f32 %v9103_v15, %v11637_v63  ;;  %v2994_v63 = vmul.f32 %v2930_v22, %v11442_v35 }
 0x8f4   : > { %v3535_v57 = vsub.f32 %v11586_v59, %v3373_v13  ;;  %v11776_v41 = vpop.f32.mrf.mxu2  ;;  %v2932_v13 = vld [vmem:[%s14334_s12 + $0x1c0] sm:$0xff] }
 0x8f5   : > { %v4035_v58 = vpack.c.bf16 %v3974_v17, %v3973_v14  ;;  %v3031_v59 = vpack.c.bf16 %v2995_v34, %v2994_v63  ;;  %v2997_v17 = vmul.f32 %v2933_v3, %v11451_v51  ;;  %v3398_v34 = vsel %vm2548_vm5, %v11688_v5, -inf  ;;  %v2934_v3 = vld [vmem:[%s14334_s12 + $0x1d0] sm:$0xff] }
 0x8f6   : > { %v11764_v62 = vpop.eup %9104  ;;  %v3613_v7 = vmul.f32 1.442695, %v3535_v57 }
 0x8f7   : > { %8316 = vmatmul.msk.bf16.gmra.mxu3 %vm2548_vm5, %v4035_v58  ;;  %v3752_v50 = vsel %vm2548_vm5, %v11764_v62, 0.0 }
 0x8f8   : > { %9106 = vpow2.f32 %v3613_v7  ;;  %3753 = vadd.xlane.f32.xlu2 %v3752_v50  ;;  %3393 = vmax.xlane.f32.xlu0 %v3392_v33 }
 0x8f9   : > { %9108 = vrcp.f32 %v3733_v10 }
 0x8fb   : > { %v3736_v46 = vpop.xlane.xlu2 %3735  ;;  %v3376_v24 = vpop.xlane.xlu0 %3375  ;;  %8309 = vmatmul.msk.bf16.gmra.mxu2 %vm2548_vm5, %v3031_v59  ;;  %v3401_v59 = vsel %vm2548_vm5, %v11698_v12, -inf }
 0x8fc   : > { %9110 = vrcp.f32 %v3736_v46  ;;  %v3536_v32 = vsub.f32 %v11592_v8, %v3376_v24 }
 0x8fe   : > { %v11774_v36 = vpop.eup %9106  ;;  %v3615_v18 = vmul.f32 1.442695, %v3536_v32 }
 0x8ff   : > { %v3755_v38 = vsel %vm2548_vm5, %v11774_v36, 0.0  ;;  %v9109_v0 = vpop.eup %9108 }
 0x900   : > { %9112 = vpow2.f32 %v3615_v18  ;;  %3756 = vadd.xlane.f32.xlu2 %v3755_v38  ;;  %3396 = vmax.xlane.f32.xlu0 %v3395_v56  ;;  %v3975_v15 = vmul.f32 %v9109_v0, %v11648_v11  ;;  %v2996_v11 = vmul.f32 %v2932_v13, %v11449_v42  ;;  %v2935_v18 = vld [vmem:[%s14334_s12 + $0x1d8] sm:$0xff]  ;;  %v3404_v13 = vsel %vm2548_vm5, %v11706_v21, -inf }
 0x902   : > { %v9111_v60 = vpop.eup %9110 }
 0x903   : > { %v3739_v40 = vpop.xlane.xlu2 %3738  ;;  %v3379_v8 = vpop.xlane.xlu0 %3378  ;;  %v3976_v9 = vmul.f32 %v9111_v60, %v11658_v20 }
 0x904   : > { %v3537_v10 = vsub.f32 %v11596_v4, %v3379_v8  ;;  %v11796_v20 = vpop.f32.mrf.mxu2  ;;  %v3032_v4 = vpack.c.bf16 %v2997_v17, %v2996_v11  ;;  %v2999_v8 = vmul.f32 %v2935_v18, %v11430_v52  ;;  %v3413_v18 = vsel %vm2548_vm5, %v11724_v49, -inf }
 0x905   : > { %v4036_v14 = vpack.c.bf16 %v3976_v9, %v3975_v15 }
 0x906   : > { %v11788_v57 = vpop.eup %9112  ;;  %v3617_v22 = vmul.f32 1.442695, %v3537_v10 }
 0x907   : > { %8317 = vmatmul.msk.bf16.gmra.mxu3 %vm2548_vm5, %v4036_v14  ;;  %v3758_v58 = vsel %vm2548_vm5, %v11788_v57, 0.0 }
 0x908   : > { %9114 = vpow2.f32 %v3617_v22  ;;  %3759 = vadd.xlane.f32.xlu1 %v3758_v58  ;;  %3399 = vmax.xlane.f32.xlu2 %v3398_v34  ;;  %v2937_v34 = vld [vmem:[%s14334_s12 + $0x1e8] sm:$0xff] }
 0x909   : > { %9116 = vrcp.f32 %v3739_v40 }
 0x90b   : > { %v3742_v51 = vpop.xlane.xlu1 %3741  ;;  %v3382_v7 = vpop.xlane.xlu2 %3381  ;;  %8310 = vmatmul.msk.bf16.gmra.mxu2 %vm2548_vm5, %v3032_v4 }
 0x90c   : > { %9118 = vrcp.f32 %v3742_v51  ;;  %v3538_v50 = vsub.f32 %v11606_v25, %v3382_v7  ;;  %v11806_v32 = vpop.f32.mrf.mxu2  ;;  %v2936_v51 = vld [vmem:[%s14334_s12 + $0x1e0] sm:$0xff] }
 0x90e   : > { %v11800_v33 = vpop.eup %9114  ;;  %v3619_v63 = vmul.f32 1.442695, %v3538_v50 }
 0x90f   : > { %v3761_v42 = vsel %vm2548_vm5, %v11800_v33, 0.0  ;;  %v9117_v46 = vpop.eup %9116 }
 0x910   : > { %9120 = vpow2.f32 %v3619_v63  ;;  %3762 = vadd.xlane.f32.xlu1 %v3761_v42  ;;  %3402 = vmax.xlane.f32.xlu2 %v3401_v59  ;;  %v3977_v56 = vmul.f32 %v9117_v46, %v11669_v2  ;;  %v2998_v2 = vmul.f32 %v2934_v3, %v11427_v28  ;;  %v3407_v28 = vsel %vm2548_vm5, %v11714_v39, -inf }
 0x911   : > { %v3410_v59 = vsel %vm2548_vm5, %v11717_v26, -inf  ;;  %v3000_v46 = vmul.f32 %v2936_v51, %v11435_v19  ;;  %v2938_v19 = vld [vmem:[%s14334_s12 + $0x1f0] sm:$0xff] }
 0x912   : > { %v9119_v24 = vpop.eup %9118  ;;  %v3002_v3 = vmul.f32 %v2938_v19, %v11442_v35 }
 0x913   : > { %v3745_v38 = vpop.xlane.xlu1 %3744  ;;  %v3385_v25 = vpop.xlane.xlu2 %3384  ;;  %v3978_v0 = vmul.f32 %v9119_v24, %v11681_v48 }
 0x914   : > { %v3539_v60 = vsub.f32 %v11621_v30, %v3385_v25  ;;  %v3033_v30 = vpack.c.bf16 %v2999_v8, %v2998_v2  ;;  %v11824_v14 = vpop.f32.mrf.mxu2 }
 0x915   : > { %v4037_v40 = vpack.c.bf16 %v3978_v0, %v3977_v56  ;;  %v2939_v56 = vld [vmem:[%s14334_s12 + $0x1f8] sm:$0xff] }
 0x916   : > { %v11814_v15 = vpop.eup %9120  ;;  %v3621_v9 = vmul.f32 1.442695, %v3539_v60  ;;  %v3003_v0 = vmul.f32 %v2939_v56, %v11444_v37  ;;  %v3416_v60 = vsel %vm2548_vm5, %v11729_v1, -inf }
 0x917   : > { %8318 = vmatmul.msk.bf16.gmra.mxu3 %vm2548_vm5, %v4037_v40  ;;  %v3764_v10 = vsel %vm2548_vm5, %v11814_v15, 0.0 }
 0x918   : > { %9122 = vpow2.f32 %v3621_v9  ;;  %3765 = vadd.xlane.f32.xlu0 %v3764_v10  ;;  %3405 = vmax.xlane.f32.xlu1 %v3404_v13  ;;  %v3035_v40 = vpack.c.bf16 %v3003_v0, %v3002_v3  ;;  %v3419_v9 = vsel %vm2548_vm5, %v11734_v16, -inf }
 0x91b   : > { %v3388_v52 = vpop.xlane.xlu1 %3387  ;;  %8311 = vmatmul.msk.bf16.gmra.mxu2 %vm2548_vm5, %v3033_v30 }
 0x91c   : > { %v3540_v48 = vsub.f32 %v11631_v47, %v3388_v52  ;;  %v3001_v47 = vmul.f32 %v2937_v34, %v11437_v31  ;;  %v11838_v63 = vpop.f32.mrf.mxu2 }
 0x91e   : > { %v11826_v17 = vpop.eup %9122  ;;  %v3623_v22 = vmul.f32 1.442695, %v3540_v48 }
 0x91f   : > { %v3767_v58 = vsel %vm2548_vm5, %v11826_v17, 0.0 }
 0x920   : > { %9124 = vpow2.f32 %v3623_v22  ;;  %3768 = vadd.xlane.f32.xlu0 %v3767_v58  ;;  %3408 = vmax.xlane.f32.xlu1 %v3407_v28 }
 0x923   : > { %v3391_v11 = vpop.xlane.xlu1 %3390 }
 0x924   : > { %v3541_v4 = vsub.f32 %v11645_v55, %v3391_v11  ;;  %v3034_v55 = vpack.c.bf16 %v3001_v47, %v3000_v46  ;;  %v11852_v25 = vpop.f32.mrf.mxu2 }
 0x926   : > { %v11836_v7 = vpop.eup %9124  ;;  %v3625_v50 = vmul.f32 1.442695, %v3541_v4 }
 0x927   : > { %v3770_v42 = vsel %vm2548_vm5, %v11836_v7, 0.0 }
 0x928   : > { %9126 = vpow2.f32 %v3625_v50  ;;  %3771 = vadd.xlane.f32.xlu2 %v3770_v42  ;;  %3411 = vmax.xlane.f32.xlu0 %v3410_v59 }
 0x929   : > { %9128 = vrcp.f32 %v3745_v38 }
 0x92b   : > { %8312 = vmatmul.msk.bf16.gmra.mxu2 %vm2548_vm5, %v3034_v55 }
 0x92c   : > { %v11860_v8 = vpop.f32.mrf.mxu2 }
 0x92e   : > { %v11846_v31 = vpop.eup %9126 }
 0x92f   : > { %v3773_v24 = vsel %vm2548_vm5, %v11846_v31, 0.0  ;;  %v9129_v13 = vpop.eup %9128 }
 0x930   : > { %3774 = vadd.xlane.f32.xlu2 %v3773_v24  ;;  %3414 = vmax.xlane.f32.xlu0 %v3413_v18  ;;  %v3979_v30 = vmul.f32 %v9129_v13, %v11691_v45  ;;  %v3422_v13 = vsel %vm2548_vm5, %v11748_v54, -inf }
 0x938   : > { %3417 = vmax.xlane.f32.xlu2 %v3416_v60 }
 0x93b   : > { %8313 = vmatmul.msk.bf16.gmra.mxu2 %vm2548_vm5, %v3035_v40 }
 0x940   : > { %3420 = vmax.xlane.f32.xlu2 %v3419_v9 }
 0x95b   : > { %v3748_v10 = vpop.xlane.xlu0 %3747 }
 0x95c   : > { %9130 = vrcp.f32 %v3748_v10 }
 0x962   : > { %v9131_v37 = vpop.eup %9130 }
 0x963   : > { %v3751_v2 = vpop.xlane.xlu0 %3750  ;;  %v3980_v35 = vmul.f32 %v9131_v37, %v11742_v27 }
 0x964   : > { %9132 = vrcp.f32 %v3751_v2 }
 0x965   : > { %v4038_v52 = vpack.c.bf16 %v3980_v35, %v3979_v30  ;;  %v3425_v35 = vsel %vm2548_vm5, %v11759_v61, -inf }
 0x967   : > { %8319 = vmatmul.msk.bf16.gmra.mxu3 %vm2548_vm5, %v4038_v52 }
 0x96a   : > { %v9133_v38 = vpop.eup %9132 }
 0x96b   : > { %v3754_v48 = vpop.xlane.xlu2 %3753  ;;  %v3394_v22 = vpop.xlane.xlu0 %3393  ;;  %v3981_v51 = vmul.f32 %v9133_v38, %v11752_v44 }
 0x96c   : > { %9134 = vrcp.f32 %v3754_v48  ;;  %v3542_v58 = vsub.f32 %v11660_v23, %v3394_v22 }
 0x96e   : > { %v3627_v28 = vmul.f32 1.442695, %v3542_v58 }
 0x970   : > { %9136 = vpow2.f32 %v3627_v28 }
 0x972   : > { %v9135_v34 = vpop.eup %9134 }
 0x973   : > { %v3757_v11 = vpop.xlane.xlu2 %3756  ;;  %v3397_v4 = vpop.xlane.xlu0 %3396  ;;  %v3982_v45 = vmul.f32 %v9135_v34, %v11764_v62 }
 0x974   : > { %v3543_v27 = vsub.f32 %v11675_v6, %v3397_v4 }
 0x975   : > { %v4039_v47 = vpack.c.bf16 %v3982_v45, %v3981_v51  ;;  %v3428_v45 = vsel %vm2548_vm5, %v11776_v41, -inf }
 0x976   : > { %v11872_v50 = vpop.eup %9136  ;;  %v3629_v42 = vmul.f32 1.442695, %v3543_v27  ;;  %v11909_v27 = vpop.f32.mrf.mxu3 }
 0x977   : > { %8320 = vmatmul.msk.bf16.gmra.mxu3 %vm2548_vm5, %v4039_v47  ;;  %v3776_v23 = vsel %vm2548_vm5, %v11872_v50, 0.0 }
 0x978   : > { %9138 = vpow2.f32 %v3629_v42  ;;  %3777 = vadd.xlane.f32.xlu1 %v3776_v23 }
 0x979   : > { %9140 = vrcp.f32 %v3757_v11 }
 0x97b   : > { %v3760_v59 = vpop.xlane.xlu1 %3759  ;;  %v3400_v46 = vpop.xlane.xlu2 %3399 }
 0x97c   : > { %9142 = vrcp.f32 %v3760_v59  ;;  %v3544_v44 = vsub.f32 %v11688_v5, %v3400_v46  ;;  %v3431_v59 = vsel %vm2548_vm5, %v11796_v20, -inf }
 0x97e   : > { %v11878_v62 = vpop.eup %9138  ;;  %v3631_v6 = vmul.f32 1.442695, %v3544_v44 }
 0x97f   : > { %v3779_v55 = vsel %vm2548_vm5, %v11878_v62, 0.0  ;;  %v9141_v24 = vpop.eup %9140 }
 0x980   : > { %9144 = vpow2.f32 %v3631_v6  ;;  %3780 = vadd.xlane.f32.xlu1 %v3779_v55  ;;  %v3983_v0 = vmul.f32 %v9141_v24, %v11774_v36 }
 0x982   : > { %v9143_v18 = vpop.eup %9142 }
 0x983   : > { %v3763_v56 = vpop.xlane.xlu1 %3762  ;;  %v3403_v19 = vpop.xlane.xlu2 %3402  ;;  %v3984_v60 = vmul.f32 %v9143_v18, %v11788_v57 }
 0x984   : > { %v3545_v3 = vsub.f32 %v11698_v12, %v3403_v19 }
 0x985   : > { %v4040_v40 = vpack.c.bf16 %v3984_v60, %v3983_v0  ;;  %v11923_v0 = vpop.f32.mrf.mxu3 }
 0x986   : > { %v11885_v5 = vpop.eup %9144  ;;  %v3633_v9 = vmul.f32 1.442695, %v3545_v3 }
 0x987   : > { %8321 = vmatmul.msk.bf16.gmra.mxu3 %vm2548_vm5, %v4040_v40  ;;  %v3782_v10 = vsel %vm2548_vm5, %v11885_v5, 0.0  ;;  %v3434_v40 = vsel %vm2548_vm5, %v11806_v32, -inf }
 0x988   : > { %9146 = vpow2.f32 %v3633_v9  ;;  %3783 = vadd.xlane.f32.xlu0 %v3782_v10  ;;  %3423 = vmax.xlane.f32.xlu1 %v3422_v13  ;;  %v3437_v13 = vsel %vm2548_vm5, %v11824_v14, -inf }
 0x989   : > { %9148 = vrcp.f32 %v3763_v56 }
 0x98b   : > { %v3766_v36 = vpop.xlane.xlu0 %3765  ;;  %v3406_v57 = vpop.xlane.xlu1 %3405 }
 0x98c   : > { %9150 = vrcp.f32 %v3766_v36  ;;  %v3546_v12 = vsub.f32 %v11706_v21, %v3406_v57 }
 0x98d   : > { %v4184_v36 = vpop.f32.mrf.mxu3 }
 0x98e   : > { %v11893_v37 = vpop.eup %9146  ;;  %v3635_v2 = vmul.f32 1.442695, %v3546_v12 }
 0x98f   : > { %v3785_v30 = vsel %vm2548_vm5, %v11893_v37, 0.0  ;;  %v9149_v52 = vpop.eup %9148 }
 0x990   : > { %9152 = vpow2.f32 %v3635_v2  ;;  %3786 = vadd.xlane.f32.xlu0 %v3785_v30  ;;  %3426 = vmax.xlane.f32.xlu1 %v3425_v35  ;;  %v3985_v28 = vmul.f32 %v9149_v52, %v11800_v33  ;;  %v3440_v35 = vsel %vm2548_vm5, %v11838_v63, -inf }
 0x992   : > { %v9151_v48 = vpop.eup %9150 }
 0x993   : > { %v3769_v22 = vpop.xlane.xlu0 %3768  ;;  %v3409_v58 = vpop.xlane.xlu1 %3408  ;;  %v3986_v21 = vmul.f32 %v9151_v48, %v11814_v15 }
 0x994   : > { %v3547_v38 = vsub.f32 %v11714_v39, %v3409_v58 }
 0x995   : > { %v4041_v34 = vpack.c.bf16 %v3986_v21, %v3985_v28  ;;  %v11944_v52 = vpop.f32.mrf.mxu3  ;;  %v3446_v28 = vsel %vm2548_vm5, %v11860_v8, -inf  ;;  %v11954_v21 = vpop.f32.mrf.mxu2 }
 0x996   : > { %v11902_v11 = vpop.eup %9152  ;;  %v3637_v4 = vmul.f32 1.442695, %v3547_v38 }
 0x997   : > { %8322 = vmatmul.msk.bf16.gmra.mxu3 %vm2548_vm5, %v4041_v34  ;;  %v3788_v51 = vsel %vm2548_vm5, %v11902_v11, 0.0  ;;  %v3449_v34 = vsel %vm2548_vm5, %v11954_v21, -inf }
 0x998   : > { %9154 = vpow2.f32 %v3637_v4  ;;  %3789 = vadd.xlane.f32.xlu2 %v3788_v51  ;;  %3429 = vmax.xlane.f32.xlu0 %v3428_v45  ;;  %v11965_v45 = vld [vmem:[%s14335_s28] sm:$0xff] }
 0x999   : > { %9156 = vrcp.f32 %v3769_v22  ;;  %v3443_v22 = vsel %vm2548_vm5, %v11852_v25, -inf }
 0x99b   : > { %v3772_v33 = vpop.xlane.xlu2 %3771  ;;  %v3412_v15 = vpop.xlane.xlu0 %3411 }
 0x99c   : > { %9158 = vrcp.f32 %v3772_v33  ;;  %v3548_v39 = vsub.f32 %v11717_v26, %v3412_v15  ;;  %v11968_v33 = vperm.slane %v11965_v45, 0  ;;  %v11971_v15 = vperm.slane %v11965_v45, 1 }
 0x99d   : > { %v4189_v58 = vpop.f32.mrf.mxu3 }
 0x99e   : > { %v11912_v47 = vpop.eup %9154  ;;  %v3639_v42 = vmul.f32 1.442695, %v3548_v39 }
 0x99f   : > { %v3791_v23 = vsel %vm2548_vm5, %v11912_v47, 0.0  ;;  %v9157_v46 = vpop.eup %9156 }
 0x9a0   : > { %9160 = vpow2.f32 %v3639_v42  ;;  %3792 = vadd.xlane.f32.xlu2 %v3791_v23  ;;  %3432 = vmax.xlane.f32.xlu0 %v3431_v59  ;;  %v3987_v24 = vmul.f32 %v9157_v46, %v11826_v17  ;;  %v4338_v42 = vmul.f32 %v11968_v33, %v11909_v27 }
 0x9a2   : > { %v9159_v44 = vpop.eup %9158 }
 0x9a3   : > { %v3775_v6 = vpop.xlane.xlu2 %3774  ;;  %v3415_v55 = vpop.xlane.xlu0 %3414  ;;  %v3988_v26 = vmul.f32 %v9159_v44, %v11836_v7 }
 0x9a4   : > { %v3549_v18 = vsub.f32 %v11724_v49, %v3415_v55 }
 0x9a5   : > { %v4042_v56 = vpack.c.bf16 %v3988_v26, %v3987_v24  ;;  %v11956_v38 = vpop.f32.mrf.mxu3 }
 0x9a6   : > { %v11921_v19 = vpop.eup %9160  ;;  %v3641_v60 = vmul.f32 1.442695, %v3549_v18 }
 0x9a7   : > { %8323 = vmatmul.msk.bf16.gmra.mxu3 %vm2548_vm5, %v4042_v56  ;;  %v3794_v3 = vsel %vm2548_vm5, %v11921_v19, 0.0 }
 0x9a8   : > { %9162 = vpow2.f32 %v3641_v60  ;;  %3795 = vadd.xlane.f32.xlu1 %v3794_v3  ;;  %3435 = vmax.xlane.f32.xlu2 %v3434_v40  ;;  %v4340_v60 = vmul.f32 %v11968_v33, %v4184_v36 }
 0x9ab   : > { %v3418_v17 = vpop.xlane.xlu2 %3417 }
 0x9ac   : > { %v3550_v49 = vsub.f32 %v11729_v1, %v3418_v17 }
 0x9ad   : > { %v11960_v4 = vpop.f32.mrf.mxu3 }
 0x9ae   : > { %v11931_v7 = vpop.eup %9162  ;;  %v3643_v9 = vmul.f32 1.442695, %v3550_v49 }
 0x9af   : > { %v3797_v10 = vsel %vm2548_vm5, %v11931_v7, 0.0 }
 0x9b0   : > { %9164 = vpow2.f32 %v3643_v9  ;;  %3798 = vadd.xlane.f32.xlu1 %v3797_v10  ;;  %3438 = vmax.xlane.f32.xlu2 %v3437_v13  ;;  %v11988_v13 = vpop.f32.mrf.mxu2 }
 0x9b3   : > { %v3421_v57 = vpop.xlane.xlu2 %3420 }
 0x9b4   : > { %v3551_v12 = vsub.f32 %v11734_v16, %v3421_v57 }
 0x9b5   : > { %v11962_v51 = vpop.f32.mrf.mxu3 }
 0x9b6   : > { %v11938_v2 = vpop.eup %9164  ;;  %v3645_v30 = vmul.f32 1.442695, %v3551_v12 }
 0x9b7   : > { %v3800_v1 = vsel %vm2548_vm5, %v11938_v2, 0.0 }
 0x9b8   : > { %9166 = vpow2.f32 %v3645_v30  ;;  %3801 = vadd.xlane.f32.xlu0 %v3800_v1  ;;  %3441 = vmax.xlane.f32.xlu1 %v3440_v35 }
 0x9b9   : > { %9168 = vrcp.f32 %v3775_v6 }
 0x9be   : > { %v11946_v48 = vpop.eup %9166 }
 0x9bf   : > { %v3803_v16 = vsel %vm2548_vm5, %v11946_v48, 0.0  ;;  %v9169_v44 = vpop.eup %9168 }
 0x9c0   : > { %3804 = vadd.xlane.f32.xlu0 %v3803_v16  ;;  %3444 = vmax.xlane.f32.xlu1 %v3443_v22  ;;  %v3989_v18 = vmul.f32 %v9169_v44, %v11846_v31 }
 0x9c8   : > { %3447 = vmax.xlane.f32.xlu0 %v3446_v28 }
 0x9d0   : > { %3450 = vmax.xlane.f32.xlu0 %v3449_v34 }
 0x9ea   : > { %v4199_v39 = vpop.f32.mrf.mxu3 }
 0x9eb   : > { %v4347_v23 = vmul.f32 %v11971_v15, %v4199_v39  ;;  %v3778_v59 = vpop.xlane.xlu1 %3777  ;;  %v4342_v39 = vmul.f32 %v11968_v33, %v4189_v58 }
 0x9ec   : > { %9170 = vrcp.f32 %v3778_v59 }
 0x9ed   : > { %v11976_v46 = vadd.f32 %v4347_v23, %v4338_v42 }
 0x9f2   : > { %v9171_v55 = vpop.eup %9170  ;;  %v11978_v24 = vpop.f32.mrf.mxu3 }
 0x9f3   : > { %v3781_v26 = vpop.xlane.xlu1 %3780  ;;  %v3990_v56 = vmul.f32 %v9171_v55, %v11872_v50 }
 0x9f4   : > { %9172 = vrcp.f32 %v3781_v26 }
 0x9f5   : > { %v4043_v6 = vpack.c.bf16 %v3990_v56, %v3989_v18 }
 0x9f7   : > { %8324 = vmatmul.msk.bf16.gmra.mxu3 %vm2548_vm5, %v4043_v6 }
 0x9fa   : > { %v4204_v27 = vpop.f32.mrf.mxu3  ;;  %v9173_v31 = vpop.eup %9172 }
 0x9fb   : > { %v4349_v3 = vmul.f32 %v11971_v15, %v4204_v27  ;;  %v3784_v40 = vpop.xlane.xlu0 %3783  ;;  %v3424_v17 = vpop.xlane.xlu1 %3423  ;;  %v3991_v36 = vmul.f32 %v9173_v31, %v11878_v62 }
 0x9fc   : > { %9174 = vrcp.f32 %v3784_v40  ;;  %v3552_v49 = vsub.f32 %v11748_v54, %v3424_v17 }
 0x9fd   : > { %v11986_v9 = vadd.f32 %v4349_v3, %v4340_v60 }
 0x9fe   : > { %v3647_v10 = vmul.f32 1.442695, %v3552_v49 }
 0xa00   : > { %9176 = vpow2.f32 %v3647_v10 }
 0xa02   : > { %v9175_v50 = vpop.eup %9174  ;;  %v11990_v57 = vpop.f32.mrf.mxu3 }
 0xa03   : > { %v3787_v12 = vpop.xlane.xlu0 %3786  ;;  %v3427_v30 = vpop.xlane.xlu1 %3426  ;;  %v3992_v1 = vmul.f32 %v9175_v50, %v11885_v5  ;;  %v3452_v50 = vsel %vm2548_vm5, %v11988_v13, -inf }
 0xa04   : > { %v3553_v35 = vsub.f32 %v11759_v61, %v3427_v30  ;;  %v12002_v61 = vpop.f32.mrf.mxu2 }
 0xa05   : > { %v4044_v16 = vpack.c.bf16 %v3992_v1, %v3991_v36 }
 0xa06   : > { %v11995_v54 = vpop.eup %9176  ;;  %v3649_v22 = vmul.f32 1.442695, %v3553_v35  ;;  %v3455_v35 = vsel %vm2548_vm5, %v12002_v61, -inf }
 0xa07   : > { %8325 = vmatmul.msk.bf16.gmra.mxu3 %vm2548_vm5, %v4044_v16  ;;  %v3806_v28 = vsel %vm2548_vm5, %v11995_v54, 0.0 }
 0xa08   : > { %9178 = vpow2.f32 %v3649_v22  ;;  %3807 = vadd.xlane.f32.xlu2 %v3806_v28 }
 0xa09   : > { %9180 = vrcp.f32 %v3787_v12 }
 0xa0a   : > { %v4209_v34 = vpop.f32.mrf.mxu3 }
 0xa0b   : > { %v4351_v62 = vmul.f32 %v11971_v15, %v4209_v34  ;;  %v3790_v5 = vpop.xlane.xlu2 %3789  ;;  %v3430_v42 = vpop.xlane.xlu0 %3429 }
 0xa0c   : > { %9182 = vrcp.f32 %v3790_v5  ;;  %v3554_v23 = vsub.f32 %v11776_v41, %v3430_v42  ;;  %v12018_v49 = vpop.f32.mrf.mxu2 }
 0xa0d   : > { %v12005_v59 = vadd.f32 %v4351_v62, %v4342_v39 }
 0xa0e   : > { %v12007_v44 = vpop.eup %9178  ;;  %v3651_v55 = vmul.f32 1.442695, %v3554_v23 }
 0xa0f   : > { %v3809_v26 = vsel %vm2548_vm5, %v12007_v44, 0.0  ;;  %v9181_v18 = vpop.eup %9180 }
 0xa10   : > { %9184 = vpow2.f32 %v3651_v55  ;;  %3810 = vadd.xlane.f32.xlu2 %v3809_v26  ;;  %v3993_v60 = vmul.f32 %v9181_v18, %v11893_v37 }
 0xa12   : > { %v9183_v58 = vpop.eup %9182  ;;  %v12011_v56 = vpop.f32.mrf.mxu3 }
 0xa13   : > { %v3793_v6 = vpop.xlane.xlu2 %3792  ;;  %v3433_v27 = vpop.xlane.xlu0 %3432  ;;  %v3994_v41 = vmul.f32 %v9183_v58, %v11902_v11  ;;  %v3458_v58 = vsel %vm2548_vm5, %v12018_v49, -inf }
 0xa14   : > { %v3555_v3 = vsub.f32 %v11796_v20, %v3433_v27  ;;  %v12034_v22 = vpop.f32.mrf.mxu2 }
 0xa15   : > { %v4045_v40 = vpack.c.bf16 %v3994_v41, %v3993_v60 }
 0xa16   : > { %v12016_v17 = vpop.eup %9184  ;;  %v3653_v10 = vmul.f32 1.442695, %v3555_v3 }
 0xa17   : > { %8326 = vmatmul.msk.bf16.gmra.mxu3 %vm2548_vm5, %v4045_v40  ;;  %v3812_v31 = vsel %vm2548_vm5, %v12016_v17, 0.0 }
 0xa18   : > { %9186 = vpow2.f32 %v3653_v10  ;;  %3813 = vadd.xlane.f32.xlu1 %v3812_v31  ;;  %3453 = vmax.xlane.f32.xlu2 %v3452_v50  ;;  %v3461_v50 = vsel %vm2548_vm5, %v12034_v22, -inf }
 0xa19   : > { %9188 = vrcp.f32 %v3793_v6 }
 0xa1a   : > { %v12025_v37 = vpop.f32.mrf.mxu3 }
 0xa1b   : > { %v3796_v20 = vpop.xlane.xlu1 %3795  ;;  %v3436_v11 = vpop.xlane.xlu2 %3435 }
 0xa1c   : > { %9190 = vrcp.f32 %v3796_v20  ;;  %v3556_v12 = vsub.f32 %v11806_v32, %v3436_v11 }
 0xa1e   : > { %v12028_v30 = vpop.eup %9186  ;;  %v3655_v36 = vmul.f32 1.442695, %v3556_v12 }
 0xa1f   : > { %v3815_v1 = vsel %vm2548_vm5, %v12028_v30, 0.0  ;;  %v9189_v16 = vpop.eup %9188 }
 0xa20   : > { %9192 = vpow2.f32 %v3655_v36  ;;  %3816 = vadd.xlane.f32.xlu1 %v3815_v1  ;;  %3456 = vmax.xlane.f32.xlu2 %v3455_v35  ;;  %v3995_v32 = vmul.f32 %v9189_v16, %v11912_v47  ;;  %v12049_v47 = vperm.slane %v11965_v45, 2 }
 0xa22   : > { %v9191_v28 = vpop.eup %9190  ;;  %v12036_v34 = vpop.f32.mrf.mxu3 }
 0xa23   : > { %v3996_v39 = vmul.f32 %v9191_v28, %v11921_v19  ;;  %v3799_v62 = vpop.xlane.xlu1 %3798  ;;  %v3439_v5 = vpop.xlane.xlu2 %3438 }
 0xa24   : > { %v3557_v42 = vsub.f32 %v11824_v14, %v3439_v5  ;;  %v12051_v19 = vpop.f32.mrf.mxu2 }
 0xa25   : > { %v4046_v23 = vpack.c.bf16 %v3996_v39, %v3995_v32 }
 0xa26   : > { %v12041_v55 = vpop.eup %9192  ;;  %v3657_v26 = vmul.f32 1.442695, %v3557_v42 }
 0xa27   : > { %8327 = vmatmul.msk.bf16.gmra.mxu3 %vm2548_vm5, %v4046_v23  ;;  %v3818_v18 = vsel %vm2548_vm5, %v12041_v55, 0.0 }
 0xa28   : > { %9194 = vpow2.f32 %v3657_v26  ;;  %3819 = vadd.xlane.f32.xlu0 %v3818_v18  ;;  %3459 = vmax.xlane.f32.xlu1 %v3458_v58 }
 0xa29   : > { %9196 = vrcp.f32 %v3799_v62 }
 0xa2a   : > { %v4219_v14 = vpop.f32.mrf.mxu3 }
 0xa2b   : > { %v4364_v6 = vmul.f32 %v12049_v47, %v4219_v14  ;;  %v3802_v27 = vpop.xlane.xlu0 %3801  ;;  %v3442_v60 = vpop.xlane.xlu1 %3441 }
 0xa2c   : > { %9198 = vrcp.f32 %v3802_v27  ;;  %v3558_v41 = vsub.f32 %v11838_v63, %v3442_v60  ;;  %v12066_v1 = vpop.f32.mrf.mxu2 }
 0xa2d   : > { %v12056_v3 = vadd.f32 %v4364_v6, %v11976_v46  ;;  %v3467_v26 = vsel %vm2548_vm5, %v12066_v1, -inf }
 0xa2e   : > { %v12058_v40 = vpop.eup %9194  ;;  %v3659_v10 = vmul.f32 1.442695, %v3558_v41 }
 0xa2f   : > { %v3821_v31 = vsel %vm2548_vm5, %v12058_v40, 0.0  ;;  %v9197_v20 = vpop.eup %9196 }
 0xa30   : > { %9200 = vpow2.f32 %v3659_v10  ;;  %3822 = vadd.xlane.f32.xlu0 %v3821_v31  ;;  %3462 = vmax.xlane.f32.xlu1 %v3461_v50  ;;  %v3997_v12 = vmul.f32 %v9197_v20, %v11931_v7  ;;  %v3464_v7 = vsel %vm2548_vm5, %v12051_v19, -inf }
 0xa32   : > { %v9199_v11 = vpop.eup %9198 }
 0xa33   : > { %v3998_v63 = vmul.f32 %v9199_v11, %v11938_v2  ;;  %v3805_v46 = vpop.xlane.xlu0 %3804  ;;  %v3445_v36 = vpop.xlane.xlu1 %3444 }
 0xa34   : > { %v3559_v35 = vsub.f32 %v11852_v25, %v3445_v36  ;;  %v12079_v25 = vpop.f32.mrf.mxu2 }
 0xa35   : > { %v4047_v16 = vpack.c.bf16 %v3998_v63, %v3997_v12  ;;  %v3470_v27 = vsel %vm2548_vm5, %v12079_v25, -inf  ;;  %v12108_v12 = vpop.f32.mrf.mxu3 }
 0xa36   : > { %v12069_v28 = vpop.eup %9200  ;;  %v3661_v32 = vmul.f32 1.442695, %v3559_v35 }
 0xa37   : > { %8328 = vmatmul.msk.bf16.gmra.mxu3 %vm2548_vm5, %v4047_v16  ;;  %v3824_v39 = vsel %vm2548_vm5, %v12069_v28, 0.0 }
 0xa38   : > { %9202 = vpow2.f32 %v3661_v32  ;;  %3825 = vadd.xlane.f32.xlu2 %v3824_v39  ;;  %3465 = vmax.xlane.f32.xlu0 %v3464_v7 }
 0xa3b   : > { %v3448_v2 = vpop.xlane.xlu0 %3447 }
 0xa3c   : > { %v3560_v62 = vsub.f32 %v11860_v8, %v3448_v2  ;;  %v12092_v60 = vpop.f32.mrf.mxu2 }
 0xa3e   : > { %v12077_v5 = vpop.eup %9202  ;;  %v3663_v42 = vmul.f32 1.442695, %v3560_v62 }
 0xa3f   : > { %v3827_v23 = vsel %vm2548_vm5, %v12077_v5, 0.0 }
 0xa40   : > { %9204 = vpow2.f32 %v3663_v42  ;;  %3828 = vadd.xlane.f32.xlu2 %v3827_v23  ;;  %3468 = vmax.xlane.f32.xlu0 %v3467_v26 }
 0xa43   : > { %v3451_v18 = vpop.xlane.xlu0 %3450 }
 0xa44   : > { %v3561_v58 = vsub.f32 %v11954_v21, %v3451_v18  ;;  %v3473_v21 = vsel %vm2548_vm5, %v12092_v60, -inf  ;;  %v12100_v31 = vpop.f32.mrf.mxu2 }
 0xa45   : > { %v3476_v50 = vsel %vm2548_vm5, %v12100_v31, -inf }
 0xa46   : > { %v12086_v14 = vpop.eup %9204  ;;  %v3665_v8 = vmul.f32 1.442695, %v3561_v58 }
 0xa47   : > { %v3830_v6 = vsel %vm2548_vm5, %v12086_v14, 0.0 }
 0xa48   : > { %9206 = vpow2.f32 %v3665_v8  ;;  %3831 = vadd.xlane.f32.xlu1 %v3830_v6  ;;  %3471 = vmax.xlane.f32.xlu2 %v3470_v27 }
 0xa49   : > { %9208 = vrcp.f32 %v3805_v46 }
 0xa4c   : > { %v12104_v20 = vpop.f32.mrf.mxu2 }
 0xa4d   : > { %v3479_v11 = vsel %vm2548_vm5, %v12104_v20, -inf }
 0xa4e   : > { %v12094_v41 = vpop.eup %9206 }
 0xa4f   : > { %v3833_v10 = vsel %vm2548_vm5, %v12094_v41, 0.0  ;;  %v9209_v32 = vpop.eup %9208 }
 0xa50   : > { %3834 = vadd.xlane.f32.xlu1 %v3833_v10  ;;  %3474 = vmax.xlane.f32.xlu2 %v3473_v21  ;;  %v3999_v2 = vmul.f32 %v9209_v32, %v11946_v48 }
 0xa54   : > { %v12124_v27 = vpop.f32.mrf.mxu2 }
 0xa58   : > { %3477 = vmax.xlane.f32.xlu1 %v3476_v50 }
 0xa60   : > { %3480 = vmax.xlane.f32.xlu1 %v3479_v11 }
 0xa7a   : > { %v4224_v63 = vpop.f32.mrf.mxu3 }
 0xa7b   : > { %v4366_v36 = vmul.f32 %v12049_v47, %v4224_v63  ;;  %v3808_v35 = vpop.xlane.xlu2 %3807 }
 0xa7c   : > { %9210 = vrcp.f32 %v3808_v35 }
 0xa7d   : > { %v12112_v16 = vadd.f32 %v4366_v36, %v11986_v9 }
 0xa82   : > { %v9211_v39 = vpop.eup %9210  ;;  %v12114_v7 = vpop.f32.mrf.mxu3 }
 0xa83   : > { %v4000_v62 = vmul.f32 %v9211_v39, %v11995_v54  ;;  %v3811_v42 = vpop.xlane.xlu2 %3810 }
 0xa84   : > { %9212 = vrcp.f32 %v3811_v42 }
 0xa85   : > { %v4048_v23 = vpack.c.bf16 %v4000_v62, %v3999_v2  ;;  %v12138_v2 = vpop.f32.mrf.mxu2 }
 0xa87   : > { %8329 = vmatmul.msk.bf16.gmra.mxu3 %vm2548_vm5, %v4048_v23 }
 0xa8a   : > { %v4229_v46 = vpop.f32.mrf.mxu3  ;;  %v9213_v48 = vpop.eup %9212 }
 0xa8b   : > { %v4368_v26 = vmul.f32 %v12049_v47, %v4229_v46  ;;  %v3814_v18 = vpop.xlane.xlu1 %3813  ;;  %v3454_v58 = vpop.xlane.xlu2 %3453  ;;  %v4001_v21 = vmul.f32 %v9213_v48, %v12007_v44 }
 0xa8c   : > { %9214 = vrcp.f32 %v3814_v18  ;;  %v3562_v9 = vsub.f32 %v11988_v13, %v3454_v58 }
 0xa8d   : > { %v12122_v8 = vadd.f32 %v4368_v26, %v12005_v59 }
 0xa8e   : > { %v3667_v6 = vmul.f32 1.442695, %v3562_v9 }
 0xa90   : > { %9216 = vpow2.f32 %v3667_v6 }
 0xa92   : > { %v9215_v54 = vpop.eup %9214  ;;  %v12126_v10 = vpop.f32.mrf.mxu3 }
 0xa93   : > { %v4002_v50 = vmul.f32 %v9215_v54, %v12016_v17  ;;  %v3817_v11 = vpop.xlane.xlu1 %3816  ;;  %v3457_v63 = vpop.xlane.xlu2 %3456 }
 0xa94   : > { %v3563_v36 = vsub.f32 %v12002_v61, %v3457_v63 }
 0xa95   : > { %v4049_v13 = vpack.c.bf16 %v4002_v50, %v4001_v21  ;;  %v12152_v50 = vpop.f32.mrf.mxu2 }
 0xa96   : > { %v12131_v35 = vpop.eup %9216  ;;  %v3669_v59 = vmul.f32 1.442695, %v3563_v36 }
 0xa97   : > { %8330 = vmatmul.msk.bf16.gmra.mxu3 %vm2548_vm5, %v4049_v13  ;;  %v3836_v32 = vsel %vm2548_vm5, %v12131_v35, 0.0 }
 0xa98   : > { %9218 = vpow2.f32 %v3669_v59  ;;  %3837 = vadd.xlane.f32.xlu0 %v3836_v32 }
 0xa99   : > { %9220 = vrcp.f32 %v3817_v11 }
 0xa9a   : > { %v12136_v39 = vpop.f32.mrf.mxu3 }
 0xa9b   : > { %v3820_v44 = vpop.xlane.xlu0 %3819  ;;  %v3460_v17 = vpop.xlane.xlu1 %3459 }
 0xa9c   : > { %9222 = vrcp.f32 %v3820_v44  ;;  %v3564_v61 = vsub.f32 %v12018_v49, %v3460_v17 }
 0xa9e   : > { %v12141_v62 = vpop.eup %9218  ;;  %v3671_v42 = vmul.f32 1.442695, %v3564_v61 }
 0xa9f   : > { %v3839_v23 = vsel %vm2548_vm5, %v12141_v62, 0.0  ;;  %v9221_v46 = vpop.eup %9220 }
 0xaa0   : > { %9224 = vpow2.f32 %v3671_v42  ;;  %3840 = vadd.xlane.f32.xlu0 %v3839_v23  ;;  %v4003_v58 = vmul.f32 %v9221_v46, %v12028_v30  ;;  %v3482_v30 = vsel %vm2548_vm5, %v12124_v27, -inf  ;;  %v3485_v23 = vsel %vm2548_vm5, %v12138_v2, -inf }
 0xaa2   : > { %v9223_v26 = vpop.eup %9222  ;;  %v12145_v18 = vpop.f32.mrf.mxu3 }
 0xaa3   : > { %v4004_v9 = vmul.f32 %v9223_v26, %v12041_v55  ;;  %v3823_v6 = vpop.xlane.xlu0 %3822  ;;  %v3463_v48 = vpop.xlane.xlu1 %3462  ;;  %v12160_v55 = vperm.slane %v11965_v45, 3 }
 0xaa4   : > { %v3565_v49 = vsub.f32 %v12034_v22, %v3463_v48  ;;  %v12173_v26 = vpop.f32.mrf.mxu2 }
 0xaa5   : > { %v4050_v54 = vpack.c.bf16 %v4004_v9, %v4003_v58 }
 0xaa6   : > { %v12150_v21 = vpop.eup %9224  ;;  %v3673_v11 = vmul.f32 1.442695, %v3565_v49 }
 0xaa7   : > { %8331 = vmatmul.msk.bf16.gmra.mxu3 %vm2548_vm5, %v4050_v54  ;;  %v3842_v63 = vsel %vm2548_vm5, %v12150_v21, 0.0 }
 0xaa8   : > { %9226 = vpow2.f32 %v3673_v11  ;;  %3843 = vadd.xlane.f32.xlu2 %v3842_v63  ;;  %3483 = vmax.xlane.f32.xlu0 %v3482_v30 }
 0xaa9   : > { %9228 = vrcp.f32 %v3823_v6 }
 0xaaa   : > { %v4239_v22 = vpop.f32.mrf.mxu3 }
 0xaab   : > { %v4381_v36 = vmul.f32 %v12160_v55, %v4239_v22  ;;  %v3826_v13 = vpop.xlane.xlu2 %3825  ;;  %v3466_v59 = vpop.xlane.xlu0 %3465  ;;  %v3488_v22 = vsel %vm2548_vm5, %v12152_v50, -inf }
 0xaac   : > { %9230 = vrcp.f32 %v3826_v13  ;;  %v3566_v32 = vsub.f32 %v12051_v19, %v3466_v59 }
 0xaad   : > { %v12165_v44 = vadd.f32 %v4381_v36, %v12056_v3 }
 0xaae   : > { %v12167_v17 = vpop.eup %9226  ;;  %v3675_v61 = vmul.f32 1.442695, %v3566_v32 }
 0xaaf   : > { %v3845_v42 = vsel %vm2548_vm5, %v12167_v17, 0.0  ;;  %v9229_v46 = vpop.eup %9228 }
 0xab0   : > { %9232 = vpow2.f32 %v3675_v61  ;;  %3846 = vadd.xlane.f32.xlu2 %v3845_v42  ;;  %3486 = vmax.xlane.f32.xlu0 %v3485_v23  ;;  %v4005_v3 = vmul.f32 %v9229_v46, %v12058_v40  ;;  %v12187_v40 = vpop.f32.mrf.mxu2  ;;  %v3491_v46 = vsel %vm2548_vm5, %v12173_v26, -inf }
 0xab2   : > { %v9231_v58 = vpop.eup %9230  ;;  %v12175_v19 = vpop.f32.mrf.mxu3 }
 0xab3   : > { %v4006_v9 = vmul.f32 %v9231_v58, %v12069_v28  ;;  %v3829_v6 = vpop.xlane.xlu2 %3828  ;;  %v3469_v48 = vpop.xlane.xlu0 %3468 }
 0xab4   : > { %v3567_v49 = vsub.f32 %v12066_v1, %v3469_v48 }
 0xab5   : > { %v4051_v54 = vpack.c.bf16 %v4006_v9, %v4005_v3 }
 0xab6   : > { %v12180_v11 = vpop.eup %9232  ;;  %v3677_v63 = vmul.f32 1.442695, %v3567_v49 }
 0xab7   : > { %8332 = vmatmul.msk.bf16.gmra.mxu3 %vm2548_vm5, %v4051_v54  ;;  %v3848_v30 = vsel %vm2548_vm5, %v12180_v11, 0.0 }
 0xab8   : > { %9234 = vpow2.f32 %v3677_v63  ;;  %3849 = vadd.xlane.f32.xlu1 %v3848_v30  ;;  %3489 = vmax.xlane.f32.xlu2 %v3488_v22  ;;  %v12202_v48 = vpop.f32.mrf.mxu2 }
 0xab9   : > { %9236 = vrcp.f32 %v3829_v6 }
 0xaba   : > { %v4244_v28 = vpop.f32.mrf.mxu3 }
 0xabb   : > { %v4383_v1 = vmul.f32 %v12160_v55, %v4244_v28  ;;  %v3832_v36 = vpop.xlane.xlu1 %3831  ;;  %v3472_v13 = vpop.xlane.xlu2 %3471 }
 0xabc   : > { %9238 = vrcp.f32 %v3832_v36  ;;  %v3568_v59 = vsub.f32 %v12079_v25, %v3472_v13 }
 0xabd   : > { %v12192_v32 = vadd.f32 %v4383_v1, %v12112_v16 }
 0xabe   : > { %v12194_v61 = vpop.eup %9234  ;;  %v3679_v42 = vmul.f32 1.442695, %v3568_v59  ;;  %v3329_v59 = vsel %vm2548_vm5, %v11505_v53, -inf }
 0xabf   : > { %v3851_v23 = vsel %vm2548_vm5, %v12194_v61, 0.0  ;;  %v9237_v58 = vpop.eup %9236 }
 0xac0   : > { %9240 = vpow2.f32 %v3679_v42  ;;  %3852 = vadd.xlane.f32.xlu1 %v3851_v23  ;;  %3492 = vmax.xlane.f32.xlu2 %v3491_v46  ;;  %v4007_v9 = vmul.f32 %v9237_v58, %v12077_v5  ;;  %v3494_v5 = vsel %vm2548_vm5, %v12187_v40, -inf  ;;  %v3332_v58 = vsel %vm2548_vm5, %v11510_v43, -inf }
 0xac2   : > { %v9239_v3 = vpop.eup %9238 }
 0xac3   : > { %v4008_v25 = vmul.f32 %v9239_v3, %v12086_v14  ;;  %v3835_v16 = vpop.xlane.xlu1 %3834  ;;  %v3475_v6 = vpop.xlane.xlu2 %3474 }
 0xac4   : > { %v3569_v49 = vsub.f32 %v12092_v60, %v3475_v6  ;;  %v12215_v60 = vpop.f32.mrf.mxu2 }
 0xac5   : > { %v4052_v54 = vpack.c.bf16 %v4008_v25, %v4007_v9  ;;  %v3500_v25 = vsel %vm2548_vm5, %v12215_v60, -inf }
 0xac6   : > { %v12205_v63 = vpop.eup %9240  ;;  %v3681_v30 = vmul.f32 1.442695, %v3569_v49  ;;  %v3497_v49 = vsel %vm2548_vm5, %v12202_v48, -inf }
 0xac7   : > { %8333 = vmatmul.msk.bf16.gmra.mxu3 %vm2548_vm5, %v4052_v54  ;;  %v3854_v22 = vsel %vm2548_vm5, %v12205_v63, 0.0 }
 0xac8   : > { %9242 = vpow2.f32 %v3681_v30  ;;  %3855 = vadd.xlane.f32.xlu0 %v3854_v22  ;;  %3495 = vmax.xlane.f32.xlu1 %v3494_v5 }
 0xacb   : > { %v3478_v14 = vpop.xlane.xlu1 %3477 }
 0xacc   : > { %v3570_v28 = vsub.f32 %v12100_v31, %v3478_v14  ;;  %v12228_v9 = vpop.f32.mrf.mxu2 }
 0xacd   : > { %v3503_v54 = vsel %vm2548_vm5, %v12228_v9, -inf }
 0xace   : > { %v12213_v1 = vpop.eup %9242  ;;  %v3683_v36 = vmul.f32 1.442695, %v3570_v28  ;;  %v12248_v28 = vpop.f32.mrf.mxu3 }
 0xacf   : > { %v3857_v13 = vsel %vm2548_vm5, %v12213_v1, 0.0 }
 0xad0   : > { %9244 = vpow2.f32 %v3683_v36  ;;  %3858 = vadd.xlane.f32.xlu0 %v3857_v13  ;;  %3330 = vmax.xlane.f32.xlu1 %v3329_v59 }
 0xad3   : > { %v3481_v42 = vpop.xlane.xlu1 %3480 }
 0xad4   : > { %v3571_v23 = vsub.f32 %v12104_v20, %v3481_v42  ;;  %v12240_v30 = vpop.f32.mrf.mxu2 }
 0xad5   : > { %v3506_v22 = vsel %vm2548_vm5, %v12240_v30, -inf }
 0xad6   : > { %v12222_v46 = vpop.eup %9244  ;;  %v3685_v31 = vmul.f32 1.442695, %v3571_v23 }
 0xad7   : > { %v3860_v3 = vsel %vm2548_vm5, %v12222_v46, 0.0 }
 0xad8   : > { %9246 = vpow2.f32 %v3685_v31  ;;  %3333 = vmax.xlane.f32.xlu0 %v3332_v58  ;;  %3861 = vadd.xlane.f32.xlu2 %v3860_v3 }
 0xad9   : > { %3501 = vmax.xlane.f32.xlu1 %v3500_v25  ;;  %9248 = vrcp.f32 %v3835_v16 }
 0xadc   : > { %v12244_v5 = vpop.f32.mrf.mxu2 }
 0xadd   : > { %v3509_v14 = vsel %vm2548_vm5, %v12244_v5, -inf }
 0xade   : > { %v12232_v6 = vpop.eup %9246 }
 0xadf   : > { %v3863_v20 = vsel %vm2548_vm5, %v12232_v6, 0.0  ;;  %v9249_v23 = vpop.eup %9248 }
 0xae0   : > { %3864 = vadd.xlane.f32.xlu0 %v3863_v20  ;;  %3498 = vmax.xlane.f32.xlu2 %v3497_v49  ;;  %v4009_v3 = vmul.f32 %v9249_v23, %v12094_v41 }
 0xae1   : > { %3504 = vmax.xlane.f32.xlu1 %v3503_v54 }
 0xae8   : > { %3507 = vmax.xlane.f32.xlu0 %v3506_v22 }
 0xaf0   : > { %3510 = vmax.xlane.f32.xlu0 %v3509_v14 }
 0xb0a   : > { %v4249_v36 = vpop.f32.mrf.mxu3 }
 0xb0b   : > { %v4385_v13 = vmul.f32 %v12160_v55, %v4249_v36  ;;  %v3838_v59 = vpop.xlane.xlu0 %3837 }
 0xb0c   : > { %9250 = vrcp.f32 %v3838_v59 }
 0xb0d   : > { %v12252_v42 = vadd.f32 %v4385_v13, %v12122_v8 }
 0xb12   : > { %v9251_v31 = vpop.eup %9250  ;;  %v12254_v58 = vpop.f32.mrf.mxu3 }
 0xb13   : > { %v4010_v25 = vmul.f32 %v9251_v31, %v12131_v35  ;;  %v3841_v20 = vpop.xlane.xlu0 %3840 }
 0xb14   : > { %9252 = vrcp.f32 %v3841_v20 }
 0xb15   : > { %v4053_v49 = vpack.c.bf16 %v4010_v25, %v4009_v3 }
 0xb17   : > { %8334 = vmatmul.msk.bf16.gmra.mxu3 %vm2548_vm5, %v4053_v49 }
 0xb1a   : > { %v12259_v16 = vpop.f32.mrf.mxu3  ;;  %v9253_v36 = vpop.eup %9252 }
 0xb1b   : > { %v3844_v54 = vpop.xlane.xlu2 %3843  ;;  %v3484_v22 = vpop.xlane.xlu0 %3483  ;;  %v4011_v41 = vmul.f32 %v9253_v36, %v12141_v62 }
 0xb1c   : > { %9254 = vrcp.f32 %v3844_v54  ;;  %v3572_v8 = vsub.f32 %v12124_v27, %v3484_v22  ;;  %v12273_v54 = vperm.slane %v11965_v45, 4 }
 0xb1e   : > { %v3687_v14 = vmul.f32 1.442695, %v3572_v8 }
 0xb20   : > { %9256 = vpow2.f32 %v3687_v14 }
 0xb22   : > { %v9255_v13 = vpop.eup %9254  ;;  %v12262_v59 = vpop.f32.mrf.mxu3 }
 0xb23   : > { %v4012_v35 = vmul.f32 %v9255_v13, %v12150_v21  ;;  %v3847_v23 = vpop.xlane.xlu2 %3846  ;;  %v3487_v31 = vpop.xlane.xlu0 %3486 }
 0xb24   : > { %v3573_v3 = vsub.f32 %v12138_v2, %v3487_v31 }
 0xb25   : > { %v4054_v25 = vpack.c.bf16 %v4012_v35, %v4011_v41 }
 0xb26   : > { %v12267_v20 = vpop.eup %9256  ;;  %v3689_v49 = vmul.f32 1.442695, %v3573_v3 }
 0xb27   : > { %8335 = vmatmul.msk.bf16.gmra.mxu3 %vm2548_vm5, %v4054_v25  ;;  %v3866_v27 = vsel %vm2548_vm5, %v12267_v20, 0.0 }
 0xb28   : > { %9258 = vpow2.f32 %v3689_v49  ;;  %3867 = vadd.xlane.f32.xlu2 %v3866_v27 }
 0xb29   : > { %9260 = vrcp.f32 %v3847_v23 }
 0xb2a   : > { %v4259_v62 = vpop.f32.mrf.mxu3 }
 0xb2b   : > { %v4398_v21 = vmul.f32 %v12273_v54, %v4259_v62  ;;  %v3850_v22 = vpop.xlane.xlu1 %3849  ;;  %v3490_v2 = vpop.xlane.xlu2 %3489 }
 0xb2c   : > { %9262 = vrcp.f32 %v3850_v22  ;;  %v3574_v8 = vsub.f32 %v12152_v50, %v3490_v2 }
 0xb2d   : > { %v12278_v14 = vadd.f32 %v4398_v21, %v12165_v44  ;;  %v12288_v44 = vpop.f32.mrf.mxu2 }
 0xb2e   : > { %v12280_v36 = vpop.eup %9258  ;;  %v3691_v13 = vmul.f32 1.442695, %v3574_v8 }
 0xb2f   : > { %v3869_v41 = vsel %vm2548_vm5, %v12280_v36, 0.0  ;;  %v9261_v45 = vpop.eup %9260 }
 0xb30   : > { %9264 = vpow2.f32 %v3691_v13  ;;  %3870 = vadd.xlane.f32.xlu2 %v3869_v41  ;;  %v4013_v31 = vmul.f32 %v9261_v45, %v12167_v17  ;;  %v3512_v17 = vsel %vm2548_vm5, %v12288_v44, -inf }
 0xb32   : > { %v9263_v35 = vpop.eup %9262  ;;  %v12284_v23 = vpop.f32.mrf.mxu3 }
 0xb33   : > { %v4014_v3 = vmul.f32 %v9263_v35, %v12180_v11  ;;  %v3853_v50 = vpop.xlane.xlu1 %3852  ;;  %v3493_v25 = vpop.xlane.xlu2 %3492 }
 0xb34   : > { %v3575_v49 = vsub.f32 %v12173_v26, %v3493_v25 }
 0xb35   : > { %v4055_v27 = vpack.c.bf16 %v4014_v3, %v4013_v31 }
 0xb36   : > { %v12291_v62 = vpop.eup %9264  ;;  %v3693_v21 = vmul.f32 1.442695, %v3575_v49 }
 0xb37   : > { %8336 = vmatmul.msk.bf16.gmra.mxu3 %vm2548_vm5, %v4055_v27  ;;  %v3872_v22 = vsel %vm2548_vm5, %v12291_v62, 0.0 }
 0xb38   : > { %9266 = vpow2.f32 %v3693_v21  ;;  %3873 = vadd.xlane.f32.xlu1 %v3872_v22  ;;  %3513 = vmax.xlane.f32.xlu2 %v3512_v17 }
 0xb39   : > { %9268 = vrcp.f32 %v3853_v50 }
 0xb3a   : > { %v4264_v11 = vpop.f32.mrf.mxu3 }
 0xb3b   : > { %v4400_v2 = vmul.f32 %v12273_v54, %v4264_v11  ;;  %v3856_v26 = vpop.xlane.xlu0 %3855  ;;  %v3496_v8 = vpop.xlane.xlu1 %3495 }
 0xb3c   : > { %9270 = vrcp.f32 %v3856_v26  ;;  %v3576_v13 = vsub.f32 %v12187_v40, %v3496_v8  ;;  %v12317_v26 = vpop.f32.mrf.mxu2 }
 0xb3d   : > { %v12301_v41 = vadd.f32 %v4400_v2, %v12192_v32 }
 0xb3e   : > { %v12303_v45 = vpop.eup %9266  ;;  %v3695_v35 = vmul.f32 1.442695, %v3576_v13 }
 0xb3f   : > { %v3875_v31 = vsel %vm2548_vm5, %v12303_v45, 0.0  ;;  %v9269_v3 = vpop.eup %9268 }
 0xb40   : > { %9272 = vpow2.f32 %v3695_v35  ;;  %3876 = vadd.xlane.f32.xlu1 %v3875_v31  ;;  %v4015_v49 = vmul.f32 %v9269_v3, %v12194_v61 }
 0xb42   : > { %v9271_v50 = vpop.eup %9270  ;;  %v12307_v25 = vpop.f32.mrf.mxu3 }
 0xb43   : > { %v4016_v27 = vmul.f32 %v9271_v50, %v12205_v63  ;;  %v3859_v40 = vpop.xlane.xlu0 %3858  ;;  %v3331_v21 = vpop.xlane.xlu1 %3330 }
 0xb44   : > { %v3521_v32 = vsub.f32 %v11505_v53, %v3331_v21  ;;  %v3515_v21 = vsel %vm2548_vm5, %v12317_v26, -inf }
 0xb45   : > { %v4056_v22 = vpack.c.bf16 %v4016_v27, %v4015_v49 }
 0xb46   : > { %v12312_v17 = vpop.eup %9272  ;;  %v3585_v11 = vmul.f32 1.442695, %v3521_v32 }
 0xb47   : > { %8337 = vmatmul.msk.bf16.gmra.mxu3 %vm2548_vm5, %v4056_v22  ;;  %v3878_v2 = vsel %vm2548_vm5, %v12312_v17, 0.0 }
 0xb48   : > { %9274 = vpow2.f32 %v3585_v11  ;;  %3879 = vadd.xlane.f32.xlu0 %v3878_v2  ;;  %v12333_v2 = vpop.f32.mrf.mxu2 }
 0xb49   : > { %9276 = vrcp.f32 %v3859_v40 }
 0xb4a   : > { %v4269_v61 = vpop.f32.mrf.mxu3 }
 0xb4b   : > { %v4402_v63 = vmul.f32 %v12273_v54, %v4269_v61  ;;  %v3334_v8 = vpop.xlane.xlu0 %3333  ;;  %v3862_v13 = vpop.xlane.xlu2 %3861 }
 0xb4c   : > { %v3522_v53 = vsub.f32 %v11510_v43, %v3334_v8  ;;  %9278 = vrcp.f32 %v3862_v13  ;;  %v3502_v35 = vpop.xlane.xlu1 %3501 }
 0xb4d   : > { %v12322_v31 = vadd.f32 %v4402_v63, %v12252_v42  ;;  %v3578_v3 = vsub.f32 %v12215_v60, %v3502_v35 }
 0xb4e   : > { %v12325_v50 = vpop.eup %9274  ;;  %v3587_v49 = vmul.f32 1.442695, %v3522_v53 }
 0xb4f   : > { %v3699_v27 = vmul.f32 1.442695, %v3578_v3  ;;  %v3713_v40 = vsel %vm2548_vm5, %v12325_v50, 0.0  ;;  %v9277_v32 = vpop.eup %9276 }
 0xb50   : > { %9280 = vpow2.f32 %v3587_v49  ;;  %3714 = vadd.xlane.f32.xlu2 %v3713_v40  ;;  %3516 = vmax.xlane.f32.xlu0 %v3515_v21  ;;  %v4017_v42 = vmul.f32 %v9277_v32, %v12213_v1 }
 0xb51   : > { %9282 = vpow2.f32 %v3699_v27 }
 0xb52   : > { %v9279_v43 = vpop.eup %9278 }
 0xb53   : > { %v4018_v60 = vmul.f32 %v9279_v43, %v12222_v46  ;;  %v3865_v22 = vpop.xlane.xlu0 %3864  ;;  %v3499_v11 = vpop.xlane.xlu2 %3498  ;;  %v3518_v46 = vsel %vm2548_vm5, %v12333_v2, -inf }
 0xb54   : > { %v3577_v61 = vsub.f32 %v12202_v48, %v3499_v11  ;;  %v3505_v63 = vpop.xlane.xlu1 %3504 }
 0xb55   : > { %v3579_v8 = vsub.f32 %v12228_v9, %v3505_v63  ;;  %v4057_v13 = vpack.c.bf16 %v4018_v60, %v4017_v42 }
 0xb56   : > { %v12337_v53 = vpop.eup %9280  ;;  %v3697_v35 = vmul.f32 1.442695, %v3577_v61 }
 0xb57   : > { %v12339_v3 = vpop.eup %9282  ;;  %v3701_v49 = vmul.f32 1.442695, %v3579_v8  ;;  %8338 = vmatmul.msk.bf16.gmra.mxu3 %vm2548_vm5, %v4057_v13  ;;  %v3716_v1 = vsel %vm2548_vm5, %v12337_v53, 0.0 }
 0xb58   : > { %9284 = vpow2.f32 %v3697_v35  ;;  %3717 = vadd.xlane.f32.xlu1 %v3716_v1  ;;  %v3884_v48 = vsel %vm2548_vm5, %v12339_v3, 0.0  ;;  %3519 = vmax.xlane.f32.xlu2 %v3518_v46  ;;  %v12366_v35 = vpop.f32.mrf.mxu3 }
 0xb59   : > { %9286 = vpow2.f32 %v3701_v49  ;;  %3885 = vadd.xlane.f32.xlu0 %v3884_v48 }
 0xb5b   : > { %v3508_v9 = vpop.xlane.xlu0 %3507 }
 0xb5c   : > { %v3580_v27 = vsub.f32 %v12240_v30, %v3508_v9 }
 0xb5e   : > { %v12349_v40 = vpop.eup %9284  ;;  %v3703_v21 = vmul.f32 1.442695, %v3580_v27 }
 0xb5f   : > { %v12351_v32 = vpop.eup %9286  ;;  %v3881_v43 = vsel %vm2548_vm5, %v12349_v40, 0.0 }
 0xb60   : > { %9288 = vpow2.f32 %v3703_v21  ;;  %3882 = vadd.xlane.f32.xlu1 %v3881_v43  ;;  %v3887_v42 = vsel %vm2548_vm5, %v12351_v32, 0.0 }
 0xb61   : > { %3888 = vadd.xlane.f32.xlu2 %v3887_v42  ;;  %v12376_v42 = vld [vmem:[%s14335_s28] sm:$0xff] }
 0xb63   : > { %v3511_v60 = vpop.xlane.xlu0 %3510 }
 0xb64   : > { %v3581_v11 = vsub.f32 %v12244_v5, %v3511_v60 }
 0xb66   : > { %v12358_v61 = vpop.eup %9288  ;;  %v3705_v30 = vmul.f32 1.442695, %v3581_v11 }
 0xb67   : > { %v3890_v63 = vsel %vm2548_vm5, %v12358_v61, 0.0 }
 0xb68   : > { %9290 = vpow2.f32 %v3705_v30  ;;  %3891 = vadd.xlane.f32.xlu1 %v3890_v63 }
 0xb69   : > { %9292 = vrcp.f32 %v3865_v22  ;;  %v12379_v22 = vperm.slane %v12376_v42, 5 }
 0xb6e   : > { %v12362_v8 = vpop.eup %9290 }
 0xb6f   : > { %v3893_v13 = vsel %vm2548_vm5, %v12362_v8, 0.0  ;;  %v9293_v1 = vpop.eup %9292 }
 0xb70   : > { %3894 = vadd.xlane.f32.xlu0 %v3893_v13  ;;  %v4019_v9 = vmul.f32 %v9293_v1, %v12232_v6 }
 0xb9a   : > { %v12368_v49 = vpop.f32.mrf.mxu3 }
 0xb9b   : > { %v3868_v5 = vpop.xlane.xlu2 %3867 }
 0xb9c   : > { %9294 = vrcp.f32 %v3868_v5 }
 0xba2   : > { %v9295_v46 = vpop.eup %9294  ;;  %v12370_v48 = vpop.f32.mrf.mxu3 }
 0xba3   : > { %v4020_v27 = vmul.f32 %v9295_v46, %v12267_v20  ;;  %v3871_v21 = vpop.xlane.xlu2 %3870 }
 0xba4   : > { %9296 = vrcp.f32 %v3871_v21 }
 0xba5   : > { %v4058_v43 = vpack.c.bf16 %v4020_v27, %v4019_v9 }
 0xba7   : > { %8339 = vmatmul.msk.bf16.gmra.mxu3 %vm2548_vm5, %v4058_v43 }
 0xbaa   : > { %v4279_v60 = vpop.f32.mrf.mxu3  ;;  %v9297_v5 = vpop.eup %9296 }
 0xbab   : > { %v4415_v11 = vmul.f32 %v12379_v22, %v4279_v60  ;;  %v3874_v30 = vpop.xlane.xlu1 %3873  ;;  %v3514_v63 = vpop.xlane.xlu2 %3513  ;;  %v4021_v9 = vmul.f32 %v9297_v5, %v12280_v36 }
 0xbac   : > { %9298 = vrcp.f32 %v3874_v30  ;;  %v3582_v6 = vsub.f32 %v12288_v44, %v3514_v63 }
 0xbad   : > { %v12384_v20 = vadd.f32 %v4415_v11, %v12278_v14 }
 0xbae   : > { %v3707_v13 = vmul.f32 1.442695, %v3582_v6 }
 0xbb0   : > { %9300 = vpow2.f32 %v3707_v13 }
 0xbb2   : > { %v9299_v1 = vpop.eup %9298  ;;  %v12386_v46 = vpop.f32.mrf.mxu3 }
 0xbb3   : > { %v4022_v27 = vmul.f32 %v9299_v1, %v12291_v62  ;;  %v3877_v60 = vpop.xlane.xlu1 %3876 }
 0xbb4   : > { %9302 = vrcp.f32 %v3877_v60 }
 0xbb5   : > { %v4059_v21 = vpack.c.bf16 %v4022_v27, %v4021_v9 }
 0xbb6   : > { %v12390_v43 = vpop.eup %9300 }
 0xbb7   : > { %8340 = vmatmul.msk.bf16.gmra.mxu3 %vm2548_vm5, %v4059_v21  ;;  %v3896_v14 = vsel %vm2548_vm5, %v12390_v43, 0.0 }
 0xbb8   : > { %3897 = vadd.xlane.f32.xlu2 %v3896_v14 }
 0xbba   : > { %v4284_v44 = vpop.f32.mrf.mxu3  ;;  %v9303_v62 = vpop.eup %9302 }
 0xbbb   : > { %v4417_v11 = vmul.f32 %v12379_v22, %v4284_v44  ;;  %v3880_v30 = vpop.xlane.xlu0 %3879  ;;  %v4023_v13 = vmul.f32 %v9303_v62, %v12303_v45 }
 0xbbc   : > { %9304 = vrcp.f32 %v3880_v30 }
 0xbbd   : > { %v12397_v36 = vadd.f32 %v4417_v11, %v12301_v41 }
 0xbc2   : > { %v9305_v63 = vpop.eup %9304  ;;  %v12399_v6 = vpop.f32.mrf.mxu3 }
 0xbc3   : > { %v4024_v5 = vmul.f32 %v9305_v63, %v12312_v17  ;;  %v3715_v1 = vpop.xlane.xlu2 %3714  ;;  %v3517_v9 = vpop.xlane.xlu0 %3516 }
 0xbc4   : > { %v3583_v27 = vsub.f32 %v12317_v26, %v3517_v9 }
 0xbc5   : > { %v4060_v21 = vpack.c.bf16 %v4024_v5, %v4023_v13 }
 0xbc6   : > { %v3709_v60 = vmul.f32 1.442695, %v3583_v27 }
 0xbc7   : > { %8341 = vmatmul.msk.bf16.gmra.mxu3 %vm2548_vm5, %v4060_v21 }
 0xbc8   : > { %9306 = vpow2.f32 %v3709_v60 }
 0xbc9   : > { %9308 = vrcp.f32 %v3715_v1 }
 0xbca   : > { %v4289_v41 = vpop.f32.mrf.mxu3 }
 0xbcb   : > { %v4419_v14 = vmul.f32 %v12379_v22, %v4289_v41  ;;  %v3718_v44 = vpop.xlane.xlu1 %3717  ;;  %v3520_v11 = vpop.xlane.xlu2 %3519 }
 0xbcc   : > { %9310 = vrcp.f32 %v3718_v44  ;;  %v3584_v45 = vsub.f32 %v12333_v2, %v3520_v11  ;;  %v3886_v62 = vpop.xlane.xlu0 %3885 }
 0xbcd   : > { %v12408_v17 = vadd.f32 %v4419_v14, %v12322_v31 }
 0xbce   : > { %v12410_v30 = vpop.eup %9306  ;;  %v3711_v26 = vmul.f32 1.442695, %v3584_v45 }
 0xbcf   : > { %v3899_v63 = vsel %vm2548_vm5, %v12410_v30, 0.0  ;;  %v9309_v13 = vpop.eup %9308 }
 0xbd0   : > { %9312 = vpow2.f32 %v3711_v26  ;;  %3900 = vadd.xlane.f32.xlu1 %v3899_v63  ;;  %v3969_v1 = vmul.f32 %v9309_v13, %v12325_v50 }
 0xbd1   : > { %9314 = vrcp.f32 %v3886_v62 }
 0xbd2   : > { %v9311_v5 = vpop.eup %9310 }
 0xbd3   : > { %v3970_v9 = vmul.f32 %v9311_v5, %v12337_v53  ;;  %v3883_v2 = vpop.xlane.xlu1 %3882  ;;  %v12424_v5 = vpop.f32.mrf.mxu3 }
 0xbd4   : > { %9316 = vrcp.f32 %v3883_v2  ;;  %v3889_v50 = vpop.xlane.xlu2 %3888 }
 0xbd5   : > { %v4033_v31 = vpack.c.bf16 %v3970_v9, %v3969_v1  ;;  %v12429_v9 = vperm.slane %v12376_v42, 6 }
 0xbd6   : > { %v9313_v27 = vpop.eup %9312 }
 0xbd7   : > { %8314 = vmatmul.msk.bf16.vlgmr.msra.gmra.mxu0 %vm2548_vm5, %v4033_v31  ;;  %v3902_v21 = vsel %vm2548_vm5, %v9313_v27, 0.0  ;;  %v9315_v60 = vpop.eup %9314 }
 0xbd8   : > { %3903 = vadd.xlane.f32.xlu0 %v3902_v21  ;;  %v4026_v14 = vmul.f32 %v9315_v60, %v12339_v3 }
 0xbda   : > { %v9317_v41 = vpop.eup %9316 }
 0xbdb   : > { %v4025_v44 = vmul.f32 %v9317_v41, %v12349_v40  ;;  %v3892_v11 = vpop.xlane.xlu1 %3891  ;;  %v4294_v3 = vpop.f32.mrf.mxu3 }
 0xbdc   : > { %9318 = vrcp.f32 %v3892_v11 }
 0xbdd   : > { %v4061_v45 = vpack.c.bf16 %v4026_v14, %v4025_v44  ;;  %9320 = vrcp.f32 %v3889_v50 }
 0xbdf   : > { %8342 = vmatmul.msk.bf16.gmra.mxu3 %vm2548_vm5, %v4061_v45 }
 0xbe2   : > { %v9319_v53 = vpop.eup %9318 }
 0xbe3   : > { %v9321_v26 = vpop.eup %9320  ;;  %v4028_v62 = vmul.f32 %v9319_v53, %v12358_v61  ;;  %v12426_v40 = vpop.f32.mrf.mxu3 }
 0xbe4   : > { %v4027_v63 = vmul.f32 %v9321_v26, %v12351_v32  ;;  %v3895_v1 = vpop.xlane.xlu0 %3894  ;;  %v8756_v26 = vld [vmem:[%s10892_s11 + $0x18] sm:$0xff] }
 0xbe5   : > { %9322 = vrcp.f32 %v3895_v1  ;;  %4515 = vmatpush.bf16.msrb.mxu0 %v8756_v26  ;;  %v8754_v1 = vld [vmem:[%s10892_s11 + $0x8] sm:$0xff]  ;;  %v4379_v26 = vmul.f32 %v12160_v55, %v12136_v39  ;;  %v4363_v39 = vmul.f32 %v12049_v47, %v12036_v34 }
 0xbe6   : > { %v4062_v13 = vpack.c.bf16 %v4028_v62, %v4027_v63  ;;  %v8755_v62 = vld [vmem:[%s10892_s11 + $0x10] sm:$0xff] }
 0xbe9   : > { %4516 = vmatpush.bf16.msrb.mxu0 %v8755_v62 }
 0xbeb   : > { %v9323_v21 = vpop.eup %9322 }
 0xbec   : > { %v4029_v14 = vmul.f32 %v9323_v21, %v12362_v8 }
 0xbed   : > { %4517 = vmatpush.bf16.msrb.mxu0 %v8754_v1  ;;  %v4430_v1 = vmul.f32 %v12429_v9, %v4294_v3 }
 0xbef   : > { %8343 = vmatmul.msk.bf16.gmra.mxu3 %vm2548_vm5, %v4062_v13 }
 0xc2a   : > { %v4299_v2 = vpop.f32.mrf.mxu3 }
 0xc2b   : > { %v4432_v31 = vmul.f32 %v12429_v9, %v4299_v2  ;;  %v3898_v61 = vpop.xlane.xlu2 %3897 }
 0xc2c   : > { %9324 = vrcp.f32 %v3898_v61 }
 0xc2d   : > { %v12433_v32 = vadd.f32 %v4432_v31, %v12384_v20 }
 0xc32   : > { %v9325_v60 = vpop.eup %9324  ;;  %v12435_v41 = vpop.f32.mrf.mxu3 }
 0xc33   : > { %v4030_v44 = vmul.f32 %v9325_v60, %v12390_v43 }
 0xc35   : > { %v4063_v11 = vpack.c.bf16 %v4030_v44, %v4029_v14  ;;  %v4345_v44 = vmul.f32 %v11971_v15, %v11960_v4 }
 0xc37   : > { %8344 = vmatmul.msk.bf16.gmra.mxu3 %vm2548_vm5, %v4063_v11 }
 0xc3a   : > { %v4304_v45 = vpop.f32.mrf.mxu3 }
 0xc3b   : > { %v4434_v50 = vmul.f32 %v12429_v9, %v4304_v45 }
 0xc3d   : > { %v12442_v53 = vadd.f32 %v4434_v50, %v12397_v36  ;;  %v8753_v36 = vld [vmem:[%s10892_s11] sm:$0xff]  ;;  %v4362_v50 = vmul.f32 %v12049_v47, %v12025_v37  ;;  %v4413_v37 = vmul.f32 %v12379_v22, %v12368_v49 }
 0xc3e   : > { %4518 = vmatpush.bf16.msrb.mxu0 %v8753_v36 }
 0xc42   : > { %v12444_v20 = vpop.f32.mrf.mxu3 }
 0xc43   : > { %v3901_v63 = vpop.xlane.xlu1 %3900 }
 0xc44   : > { %9326 = vrcp.f32 %v3901_v63 }
 0xc4a   : > { %v4309_v8 = vpop.f32.mrf.mxu3  ;;  %v9327_v31 = vpop.eup %9326 }
 0xc4b   : > { %v4436_v43 = vmul.f32 %v12429_v9, %v4309_v8  ;;  %v3904_v13 = vpop.xlane.xlu0 %3903  ;;  %v4031_v21 = vmul.f32 %v9327_v31, %v12410_v30  ;;  %v4396_v30 = vmul.f32 %v12273_v54, %v12259_v16  ;;  %v4346_v8 = vmul.f32 %v11971_v15, %v11962_v51 }
 0xc4c   : > { %9328 = vrcp.f32 %v3904_v13  ;;  %v4380_v16 = vmul.f32 %v12160_v55, %v12145_v18  ;;  %v4397_v51 = vmul.f32 %v12273_v54, %v12262_v59  ;;  %v4348_v59 = vmul.f32 %v11971_v15, %v11978_v24 }
 0xc4d   : > { %v12451_v2 = vadd.f32 %v4436_v43, %v12408_v17  ;;  %v4399_v24 = vmul.f32 %v12273_v54, %v12284_v23  ;;  %v4350_v23 = vmul.f32 %v11971_v15, %v11990_v57 }
 0xc52   : > { %v9329_v61 = vpop.eup %9328  ;;  %v12463_v63 = vpop.f32.mrf.mxu3 }
 0xc53   : > { %v4032_v60 = vmul.f32 %v9329_v61, %v9313_v27 }
 0xc54   : > { %v4174_v14 = vpop.f32.mrf.mxu0 }
 0xc55   : > { %v4336_v11 = vmul.f32 %v11968_v33, %v4174_v14  ;;  %v4064_v45 = vpack.c.bf16 %v4032_v60, %v4031_v21  ;;  %v4414_v14 = vmul.f32 %v12379_v22, %v12370_v48  ;;  %v4339_v48 = vmul.f32 %v11968_v33, %v11923_v0 }
 0xc57   : > { %v4353_v17 = vadd.f32 %v4345_v44, %v4336_v11  ;;  %8345 = vmatmul.msk.bf16.gmra.mxu3 %vm2548_vm5, %v4064_v45  ;;  %v12482_v44 = vperm.slane %v12376_v42, 7  ;;  %v4431_v11 = vmul.f32 %v12429_v9, %v12426_v40  ;;  %v4365_v42 = vmul.f32 %v12049_v47, %v12108_v12 }
 0xc58   : > { %v4382_v40 = vmul.f32 %v12160_v55, %v12175_v19  ;;  %v4433_v12 = vmul.f32 %v12429_v9, %v12435_v41  ;;  %v4367_v41 = vmul.f32 %v12049_v47, %v12114_v7 }
 0xc59   : > { %v4370_v62 = vadd.f32 %v4362_v50, %v4353_v17 }
 0xc5b   : > { %v4387_v27 = vadd.f32 %v4379_v26, %v4370_v62 }
 0xc5c   : > { %v4176_v4 = vpop.f32.mrf.mxu0 }
 0xc5d   : > { %v4337_v43 = vmul.f32 %v11968_v33, %v4176_v4  ;;  %v4404_v13 = vadd.f32 %v4396_v30, %v4387_v27  ;;  %v4356_v27 = vadd.f32 %v4348_v59, %v4339_v48  ;;  %v4403_v48 = vmul.f32 %v12273_v54, %v12366_v35 }
 0xc5f   : > { %v4354_v36 = vadd.f32 %v4346_v8, %v4337_v43  ;;  %v4421_v31 = vadd.f32 %v4413_v37, %v4404_v13  ;;  %v4373_v8 = vadd.f32 %v4365_v42, %v4356_v27  ;;  %v4416_v43 = vmul.f32 %v12379_v22, %v12386_v46 }
 0xc60   : > { %v4341_v46 = vmul.f32 %v11968_v33, %v11944_v52  ;;  %v4435_v52 = vmul.f32 %v12429_v9, %v12444_v20  ;;  %v4369_v20 = vmul.f32 %v12049_v47, %v12126_v10  ;;  %v4437_v10 = vmul.f32 %v12429_v9, %v12463_v63 }
 0xc61   : > { %v4371_v61 = vadd.f32 %v4363_v39, %v4354_v36  ;;  %v4438_v21 = vadd.f32 %v4430_v1, %v4421_v31  ;;  %v4390_v37 = vadd.f32 %v4382_v40, %v4373_v8 }
 0xc62   : > { %v4314_v60 = vpop.f32.mrf.mxu3 }
 0xc63   : > { %v4388_v49 = vadd.f32 %v4380_v16, %v4371_v61  ;;  %v4447_v18 = vmul.f32 %v12482_v44, %v4314_v60  ;;  %v4407_v0 = vadd.f32 %v4399_v24, %v4390_v37  ;;  %v4384_v60 = vmul.f32 %v12160_v55, %v12248_v28 }
 0xc65   : > { %v4405_v34 = vadd.f32 %v4397_v51, %v4388_v49  ;;  %v4455_v26 = vadd.f32 %v4447_v18, %v4438_v21  ;;  %v4424_v13 = vadd.f32 %v4416_v43, %v4407_v0  ;;  %v4358_v21 = vadd.f32 %v4350_v23, %v4341_v46  ;;  %v9651_v43 = vld [vmem:[%s10880_s8] sm:$0xff] }
 0xc67   : > { %v4422_v3 = vadd.f32 %v4414_v14, %v4405_v34  ;;  %v4441_v19 = vadd.f32 %v4433_v12, %v4424_v13  ;;  %v4375_v49 = vadd.f32 %v4367_v41, %v4358_v21  ;;  %v4418_v34 = vmul.f32 %v12379_v22, %v12399_v6  ;;  %v9654_v41 = vld [vmem:[%s10880_s8 + $0x18] sm:$0xff] }
 0xc68   : > { %v4343_v6 = vmul.f32 %v11968_v33, %v11956_v38 }
 0xc69   : > { %v4439_v50 = vadd.f32 %v4431_v11, %v4422_v3  ;;  %v4392_v14 = vadd.f32 %v4384_v60, %v4375_v49 }
 0xc6a   : > { %v4316_v45 = vpop.f32.mrf.mxu3 }
 0xc6b   : > { %v4448_v17 = vmul.f32 %v12482_v44, %v4316_v45 }
 0xc6d   : > { %v4456_v62 = vadd.f32 %v4448_v17, %v4439_v50 }
 0xc6f   : > { %v4471_v30 = vpack.c.bf16 %v4456_v62, %v4455_v26  ;;  %v4386_v26 = vmul.f32 %v12160_v55, %v12254_v58 }
 0xc71   : > { %8362 = vmatmul.msk.bf16.vlgmr.msrb.gmra.mxu0 %vm2548_vm5, %v4471_v30 }
 0xc72   : > { %v4319_v4 = vpop.f32.mrf.mxu3 }
 0xc73   : > { %v4449_v39 = vmul.f32 %v12482_v44, %v4319_v4 }
 0xc75   : > { %v4457_v31 = vadd.f32 %v4449_v39, %v12433_v32  ;;  %v4401_v32 = vmul.f32 %v12273_v54, %v12307_v25  ;;  %v4352_v25 = vmul.f32 %v11971_v15, %v12011_v56  ;;  %v4420_v56 = vmul.f32 %v12379_v22, %v12424_v5  ;;  %v9049_v5 = vld [vmem:[%s1472_s29] ss:$0 sm:$0xff]  ;;  %v9652_v39 = vld [vmem:[%s10880_s8 + $0x8] sm:$0xff] }
 0xc77   : > { %v4409_v57 = vadd.f32 %v4401_v32, %v4392_v14  ;;  %v4360_v59 = vadd.f32 %v4352_v25, %v4343_v6  ;;  %v9655_v32 = vld [vmem:[%s10880_s8 + $0x20] sm:$0xff] }
 0xc79   : > { %v4426_v3 = vadd.f32 %v4418_v34, %v4409_v57 }
 0xc7a   : > { %v4321_v1 = vpop.f32.mrf.mxu3 }
 0xc7b   : > { %v4450_v36 = vmul.f32 %v12482_v44, %v4321_v1  ;;  %v4443_v18 = vadd.f32 %v4435_v52, %v4426_v3  ;;  %v9656_v3 = vld [vmem:[%s10880_s8 + $0x28] sm:$0xff] }
 0xc7d   : > { %v4458_v16 = vadd.f32 %v4450_v36, %v4441_v19 }
 0xc7f   : > { %v4472_v61 = vpack.c.bf16 %v4458_v16, %v4457_v31  ;;  %v9653_v31 = vld [vmem:[%s10880_s8 + $0x10] sm:$0xff] }
 0xc81   : > { %8363 = vmatmul.msk.bf16.gmra.mxu0 %vm2548_vm5, %v4472_v61 }
 0xcba   : > { %v4324_v51 = vpop.f32.mrf.mxu3 }
 0xcbb   : > { %v4451_v7 = vmul.f32 %v12482_v44, %v4324_v51 }
 0xcbd   : > { %v4459_v45 = vadd.f32 %v4451_v7, %v12442_v53  ;;  %v4377_v53 = vadd.f32 %v4369_v20, %v4360_v59 }
 0xcbf   : > { %v4394_v42 = vadd.f32 %v4386_v26, %v4377_v53 }
 0xcc1   : > { %v4411_v38 = vadd.f32 %v4403_v48, %v4394_v42  ;;  %v9658_v48 = vld [vmem:[%s10880_s8 + $0x38] sm:$0xff] }
 0xcc2   : > { %v4326_v11 = vpop.f32.mrf.mxu3 }
 0xcc3   : > { %v4452_v28 = vmul.f32 %v12482_v44, %v4326_v11  ;;  %v4428_v30 = vadd.f32 %v4420_v56, %v4411_v38 }
 0xcc5   : > { %v4460_v50 = vadd.f32 %v4452_v28, %v4443_v18  ;;  %v4445_v40 = vadd.f32 %v4437_v10, %v4428_v30 }
 0xcc7   : > { %v4473_v17 = vpack.c.bf16 %v4460_v50, %v4459_v45  ;;  %v9657_v45 = vld [vmem:[%s10880_s8 + $0x30] sm:$0xff] }
 0xcc9   : > { %8364 = vmatmul.msk.bf16.gmra.mxu0 %vm2548_vm5, %v4473_v17 }
 0xcda   : > { %v4329_v62 = vpop.f32.mrf.mxu3 }
 0xcdb   : > { %v4453_v27 = vmul.f32 %v12482_v44, %v4329_v62 }
 0xcdd   : > { %v4461_v8 = vadd.f32 %v4453_v27, %v12451_v2 }
 0xce2   : > { %v4331_v58 = vpop.f32.mrf.mxu3 }
 0xce3   : > { %v4454_v4 = vmul.f32 %v12482_v44, %v4331_v58 }
 0xce5   : > { %v4462_v35 = vadd.f32 %v4454_v4, %v4445_v40 }
 0xce7   : > { %v4474_v24 = vpack.c.bf16 %v4462_v35, %v4461_v8 }
 0xce9   : > { %8365 = vmatmul.msk.bf16.gmra.mxu0 %vm2548_vm5, %v4474_v24 }
 0xcee   : > { %v4520_v37 = vpop.f32.mrf.mxu0 }
 0xcef   : > { %v4540_v63 = vadd.f32 %v9651_v43, %v4520_v37 }
 0xcf1   : > { %v12547_v0 = vadd.f32 %v9049_v5, %v4540_v63 }
 0xcf3   : > { %14337 = vst [vmem:[#allocation79_spill] sm:$0xff] %v12547_v0  ;;  %v4562_v12 = vsel %vm2548_vm5, %v12547_v0, 0.0 }
 0xcf4   : > { %4563 = vadd.xlane.f32.xlu2 %v4562_v12 }
 0xcf6   : > { %v4522_v13 = vpop.f32.mrf.mxu0 }
 0xcf7   : > { %v4541_v2 = vadd.f32 %v9652_v39, %v4522_v13 }
 0xcf9   : > { %v12552_v1 = vadd.f32 %v9049_v5, %v4541_v2 }
 0xcfb   : > { %14338 = vst [vmem:[#allocation80_spill] sm:$0xff] %v12552_v1  ;;  %v4565_v19 = vsel %vm2548_vm5, %v12552_v1, 0.0 }
 0xcfc   : > { %4566 = vadd.xlane.f32.xlu1 %v4565_v19 }
 0xcfe   : > { %v4525_v36 = vpop.f32.mrf.mxu0 }
 0xcff   : > { %v4542_v16 = vadd.f32 %v9653_v31, %v4525_v36  ;;  %v8760_v36 = vld [vmem:[%s10838_s5 + $0x18] sm:$0xff] }
 0xd00   : > { %4815 = vmatpush.bf16.msrb.mxu1 %v8760_v36 }
 0xd01   : > { %v12557_v61 = vadd.f32 %v9049_v5, %v4542_v16 }
 0xd03   : > { %14339 = vst [vmem:[#allocation81_spill] sm:$0xff] %v12557_v61  ;;  %v4568_v23 = vsel %vm2548_vm5, %v12557_v61, 0.0 }
 0xd04   : > { %4569 = vadd.xlane.f32.xlu0 %v4568_v23 }
 0xd06   : > { %v4527_v46 = vpop.f32.mrf.mxu0 }
 0xd07   : > { %v4543_v21 = vadd.f32 %v9654_v41, %v4527_v46 }
 0xd09   : > { %v12562_v60 = vadd.f32 %v9049_v5, %v4543_v21 }
 0xd0b   : > { %14340 = vst [vmem:[#allocation82_spill] sm:$0xff] %v12562_v60  ;;  %v4571_v51 = vsel %vm2548_vm5, %v12562_v60, 0.0 }
 0xd0c   : > { %4572 = vadd.xlane.f32.xlu2 %v4571_v51 }
 0xd46   : > { %v4530_v49 = vpop.f32.mrf.mxu0 }
 0xd47   : > { %v4544_v14 = vadd.f32 %v9655_v32, %v4530_v49  ;;  %v8759_v32 = vld [vmem:[%s10838_s5 + $0x10] sm:$0xff] }
 0xd48   : > { %4816 = vmatpush.bf16.msrb.mxu1 %v8759_v32 }
 0xd49   : > { %v12567_v34 = vadd.f32 %v9049_v5, %v4544_v14 }
 0xd4b   : > { %14341 = vst [vmem:[#allocation83_spill] sm:$0xff] %v12567_v34  ;;  %v4574_v57 = vsel %vm2548_vm5, %v12567_v34, 0.0 }
 0xd4c   : > { %4575 = vadd.xlane.f32.xlu1 %v4574_v57 }
 0xd4e   : > { %v4532_v52 = vpop.f32.mrf.mxu0 }
 0xd4f   : > { %v4545_v7 = vadd.f32 %v9656_v3, %v4532_v52 }
 0xd51   : > { %v12572_v11 = vadd.f32 %v9049_v5, %v4545_v7  ;;  %v8758_v7 = vld [vmem:[%s10838_s5 + $0x8] sm:$0xff] }
 0xd52   : > { %4817 = vmatpush.bf16.msrb.mxu1 %v8758_v7 }
 0xd53   : > { %14342 = vst [vmem:[#allocation84_spill] sm:$0xff] %v12572_v11  ;;  %v4577_v18 = vsel %vm2548_vm5, %v12572_v11, 0.0 }
 0xd54   : > { %4578 = vadd.xlane.f32.xlu0 %v4577_v18 }
 0xd66   : > { %v4535_v28 = vpop.f32.mrf.mxu0 }
 0xd67   : > { %v4546_v50 = vadd.f32 %v9657_v45, %v4535_v28  ;;  %v4564_v17 = vpop.xlane.xlu2 %4563 }
 0xd68   : > { %v4586_v25 = vmul.f32 %v4564_v17, %v11283_v29 }
 0xd69   : > { %v12578_v6 = vadd.f32 %v9049_v5, %v4546_v50  ;;  %v8757_v50 = vld [vmem:[%s10838_s5] sm:$0xff]  ;;  %s14346_s5 = scalar_lea.vmem [#allocation16], %s10829_s24 }
 0xd6a   : > { %v12581_v20 = vsub.f32 %v12547_v0, %v4586_v25  ;;  %4818 = vmatpush.bf16.msrb.mxu1 %v8757_v50  ;;  %v12659_v7 = vld [vmem:[%s14346_s5] ss:$0 sm:$0xff] }
 0xd6b   : > { %14343 = vst [vmem:[#allocation85_spill] sm:$0xff] %v12578_v6  ;;  %v4580_v59 = vsel %vm2548_vm5, %v12578_v6, 0.0 }
 0xd6c   : > { %4581 = vadd.xlane.f32.xlu0 %v4580_v59  ;;  %v4602_v26 = vmul.f32 %v12581_v20, %v12581_v20 }
 0xd6e   : > { %v4537_v62 = vpop.f32.mrf.mxu0  ;;  %v4610_v53 = vsel %vm2548_vm5, %v4602_v26, 0.0 }
 0xd6f   : > { %v4547_v42 = vadd.f32 %v9658_v48, %v4537_v62  ;;  %v4567_v56 = vpop.xlane.xlu1 %4566  ;;  %4611 = vadd.xlane.f32.xlu2 %v4610_v53 }
 0xd70   : > { %v4587_v38 = vmul.f32 %v4567_v56, %v11283_v29 }
 0xd71   : > { %v12590_v10 = vadd.f32 %v9049_v5, %v4547_v42 }
 0xd72   : > { %v12593_v30 = vsub.f32 %v12552_v1, %v4587_v38 }
 0xd73   : > { %14344 = vst [vmem:[#allocation86_spill] sm:$0xff] %v12590_v10  ;;  %v4583_v40 = vsel %vm2548_vm5, %v12590_v10, 0.0 }
 0xd74   : > { %v4603_v27 = vmul.f32 %v12593_v30, %v12593_v30 }
 0xd76   : > { %v4613_v58 = vsel %vm2548_vm5, %v4603_v27, 0.0 }
 0xd77   : > { %v4570_v4 = vpop.xlane.xlu0 %4569  ;;  %4614 = vadd.xlane.f32.xlu1 %v4613_v58  ;;  %4584 = vadd.xlane.f32.xlu2 %v4583_v40 }
 0xd78   : > { %v4588_v8 = vmul.f32 %v4570_v4, %v11283_v29 }
 0xd7a   : > { %v12602_v35 = vsub.f32 %v12557_v61, %v4588_v8 }
 0xd7c   : > { %v4604_v24 = vmul.f32 %v12602_v35, %v12602_v35 }
 0xd7e   : > { %v4616_v5 = vsel %vm2548_vm5, %v4604_v24, 0.0 }
 0xd7f   : > { %4617 = vadd.xlane.f32.xlu1 %v4616_v5  ;;  %v4573_v37 = vpop.xlane.xlu2 %4572 }
 0xd80   : > { %v4589_v43 = vmul.f32 %v4573_v37, %v11283_v29 }
 0xd82   : > { %v12609_v63 = vsub.f32 %v12562_v60, %v4589_v43 }
 0xd84   : > { %v4605_v12 = vmul.f32 %v12609_v63, %v12609_v63 }
 0xd86   : > { %v4619_v13 = vsel %vm2548_vm5, %v4605_v12, 0.0 }
 0xd87   : > { %4620 = vadd.xlane.f32.xlu0 %v4619_v13 }
 0xdbf   : > { %v4576_v39 = vpop.xlane.xlu1 %4575 }
 0xdc0   : > { %v4590_v2 = vmul.f32 %v4576_v39, %v11283_v29 }
 0xdc2   : > { %v12616_v19 = vsub.f32 %v12567_v34, %v4590_v2 }
 0xdc4   : > { %v4606_v31 = vmul.f32 %v12616_v19, %v12616_v19 }
 0xdc6   : > { %v4622_v16 = vsel %vm2548_vm5, %v4606_v31, 0.0 }
 0xdc7   : > { %v4579_v23 = vpop.xlane.xlu0 %4578  ;;  %4623 = vadd.xlane.f32.xlu2 %v4622_v16 }
 0xdc8   : > { %v4591_v46 = vmul.f32 %v4579_v23, %v11283_v29 }
 0xdca   : > { %v12624_v41 = vsub.f32 %v12572_v11, %v4591_v46 }
 0xdcc   : > { %v4607_v21 = vmul.f32 %v12624_v41, %v12624_v41 }
 0xdce   : > { %v4625_v51 = vsel %vm2548_vm5, %v4607_v21, 0.0  ;;  %v12653_v21 = vld [vmem:[%s14345_s6] ss:$0 sm:$0xff] }
 0xdcf   : > { %4626 = vadd.xlane.f32.xlu1 %v4625_v51 }
 0xddf   : > { %v4582_v49 = vpop.xlane.xlu0 %4581 }
 0xde0   : > { %v4592_v14 = vmul.f32 %v4582_v49, %v11283_v29 }
 0xde2   : > { %v12632_v57 = vsub.f32 %v12578_v6, %v4592_v14  ;;  %v4612_v52 = vpop.xlane.xlu2 %4611 }
 0xde3   : > { %v4634_v3 = vmul.f32 %v4612_v52, %v11283_v29 }
 0xde4   : > { %v4608_v18 = vmul.f32 %v12632_v57, %v12632_v57 }
 0xde5   : > { %v4642_v28 = vadd.f32 1e-05, %v4634_v3 }
 0xde6   : > { %v4628_v45 = vsel %vm2548_vm5, %v4608_v18, 0.0 }
 0xde7   : > { %9330 = vrsqrt.f32 %v4642_v28  ;;  %4629 = vadd.xlane.f32.xlu0 %v4628_v45  ;;  %vm4656_vm1 = vweird.f32 %v4642_v28 }
 0xdea   : > { %v4615_v17 = vpop.xlane.xlu1 %4614  ;;  %v4585_v25 = vpop.xlane.xlu2 %4584 }
 0xdeb   : > { %v4635_v59 = vmul.f32 %v4615_v17, %v11283_v29  ;;  %v4593_v26 = vmul.f32 %v4585_v25, %v11283_v29 }
 0xded   : > { %v9331_v62 = vpop.eup %9330  ;;  %v4643_v53 = vadd.f32 1e-05, %v4635_v59  ;;  %v12643_v48 = vsub.f32 %v12590_v10, %v4593_v26 }
 0xdee   : > { %v4651_v42 = vmul.f32 %v9331_v62, %v4642_v28  ;;  %vm4657_vm0 = vweird.f32 %v9331_v62 }
 0xdef   : > { %9332 = vrsqrt.f32 %v4643_v53  ;;  %v4609_v56 = vmul.f32 %v12643_v48, %v12643_v48  ;;  %vm4658_vm2 = vmor %vm4656_vm1, %vm4657_vm0  ;;  %vm4666_vm4 = vweird.f32 %v4643_v53 }
 0xdf0   : > { %v4652_v38 = vmul.f32 %v9331_v62, %v4651_v42 }
 0xdf1   : > { %v4631_v27 = vsel %vm2548_vm5, %v4609_v56, 0.0 }
 0xdf2   : > { %v4653_v58 = vmul.f32 0.5, %v4652_v38  ;;  %v4618_v40 = vpop.xlane.xlu1 %4617  ;;  %4632 = vadd.xlane.f32.xlu2 %v4631_v27 }
 0xdf3   : > { %v4636_v4 = vmul.f32 %v4618_v40, %v11283_v29 }
 0xdf4   : > { %v4654_v8 = vsub.f32 1.5, %v4653_v58 }
 0xdf5   : > { %v9333_v24 = vpop.eup %9332  ;;  %v4644_v5 = vadd.f32 1e-05, %v4636_v4 }
 0xdf6   : > { %v4655_v37 = vmul.f32 %v9331_v62, %v4654_v8  ;;  %v4661_v43 = vmul.f32 %v9333_v24, %v4643_v53  ;;  %vm4667_vm3 = vweird.f32 %v9333_v24 }
 0xdf7   : > { %9334 = vrsqrt.f32 %v4644_v5  ;;  %vm4668_vm6 = vmor %vm4666_vm4, %vm4667_vm3  ;;  %vm4676_vm8 = vweird.f32 %v4644_v5 }
 0xdf8   : > { %v4662_v12 = vmul.f32 %v9333_v24, %v4661_v43  ;;  %v4659_v13 = vsel %vm4658_vm2, %v9331_v62, %v4655_v37 }
 0xdf9   : > { %v4730_v23 = vmul.f32 %v4659_v13, %v12581_v20 }
 0xdfa   : > { %v4663_v39 = vmul.f32 0.5, %v4662_v12  ;;  %v4621_v2 = vpop.xlane.xlu0 %4620 }
 0xdfb   : > { %v4637_v36 = vmul.f32 %v4621_v2, %v11283_v29  ;;  %v4741_v3 = vmul.f32 %v12653_v21, %v4730_v23 }
 0xdfc   : > { %v4664_v31 = vsub.f32 1.5, %v4663_v39 }
 0xdfd   : > { %v9335_v16 = vpop.eup %9334  ;;  %v4645_v46 = vadd.f32 1e-05, %v4637_v36  ;;  %v4752_v50 = vadd.f32 %v12659_v7, %v4741_v3 }
 0xdfe   : > { %v4665_v51 = vmul.f32 %v9333_v24, %v4664_v31  ;;  %v4671_v49 = vmul.f32 %v9335_v16, %v4644_v5  ;;  %vm4677_vm7 = vweird.f32 %v9335_v16 }
 0xdff   : > { %9336 = vrsqrt.f32 %v4645_v46  ;;  %vm4678_vm9 = vmor %vm4676_vm8, %vm4677_vm7  ;;  %vm4686_vm11 = vweird.f32 %v4645_v46 }
 0xe00   : > { %v4669_v32 = vsel %vm4668_vm6, %v9333_v24, %v4665_v51  ;;  %v4672_v14 = vmul.f32 %v9335_v16, %v4671_v49 }
 0xe01   : > { %v4731_v52 = vmul.f32 %v4669_v32, %v12593_v30  ;;  %v4762_v32 = vld [vmem:[%s4761_s18] sm:$0xff] }
 0xe02   : > { %v4673_v18 = vmul.f32 0.5, %v4672_v14  ;;  %v12675_v3 = vpack.c.bf16 %v4762_v32, %v4762_v32  ;;  %v9659_v32 = vld [vmem:[%s14334_s12] sm:$0xff] }
 0xe03   : > { %v4742_v20 = vmul.f32 %v12653_v21, %v4731_v52 }
 0xe04   : > { %v4674_v28 = vsub.f32 1.5, %v4673_v18 }
 0xe05   : > { %v9337_v45 = vpop.eup %9336  ;;  %v4753_v17 = vadd.f32 %v12659_v7, %v4742_v20  ;;  %v5034_v20 = vsel %vm2548_vm5, %v12675_v3, 0 }
 0xe06   : > { %v4675_v25 = vmul.f32 %v9335_v16, %v4674_v28  ;;  %v4681_v59 = vmul.f32 %v9337_v45, %v4645_v46  ;;  %vm4687_vm10 = vweird.f32 %v9337_v45  ;;  %5043 = vmatpush.bf16.xpose.msra.mxu0 %v5034_v20  ;;  %v9661_v20 = vld [vmem:[%s14334_s12 + $0x10] sm:$0xff] }
 0xe07   : > { %v4771_v26 = vpack.c.bf16 %v4753_v17, %v4752_v50  ;;  %vm4688_vm12 = vmor %vm4686_vm11, %vm4687_vm10  ;;  %vm5205_vm10 = vcmask 64512   ;;  %vm6041_vm11 = vcmask 1043456  }
 0xe08   : > { %v4682_v30 = vmul.f32 %v9337_v45, %v4681_v59  ;;  %v4679_v62 = vsel %vm4678_vm9, %v9335_v16, %v4675_v25 }
 0xe09   : > { %8383 = vmatmul.msk.bf16.vlgmr.msrb.gmra.mxu1 %vm2548_vm5, %v4771_v26  ;;  %v4732_v56 = vmul.f32 %v4679_v62, %v12602_v35 }
 0xe0a   : > { %v4683_v53 = vmul.f32 0.5, %v4682_v30 }
 0xe0b   : > { %v4743_v40 = vmul.f32 %v12653_v21, %v4732_v56 }
 0xe0c   : > { %v4684_v42 = vsub.f32 1.5, %v4683_v53 }
 0xe0d   : > { %v4754_v8 = vadd.f32 %v12659_v7, %v4743_v40 }
 0xe0e   : > { %v4685_v38 = vmul.f32 %v9337_v45, %v4684_v42 }
 0xe10   : > { %v4689_v27 = vsel %vm4688_vm12, %v9337_v45, %v4685_v38 }
 0xe11   : > { %v4733_v58 = vmul.f32 %v4689_v27, %v12609_v63 }
 0xe13   : > { %v4744_v4 = vmul.f32 %v12653_v21, %v4733_v58 }
 0xe15   : > { %v4755_v24 = vadd.f32 %v12659_v7, %v4744_v4 }
 0xe17   : > { %v4772_v5 = vpack.c.bf16 %v4755_v24, %v4754_v8 }
 0xe19   : > { %8384 = vmatmul.msk.bf16.gmra.mxu1 %vm2548_vm5, %v4772_v5 }
 0xe3a   : > { %v4624_v37 = vpop.xlane.xlu2 %4623 }
 0xe3b   : > { %v4638_v35 = vmul.f32 %v4624_v37, %v11283_v29 }
 0xe3d   : > { %v4646_v43 = vadd.f32 1e-05, %v4638_v35 }
 0xe3f   : > { %9338 = vrsqrt.f32 %v4646_v43  ;;  %vm4696_vm14 = vweird.f32 %v4646_v43 }
 0xe42   : > { %v4627_v12 = vpop.xlane.xlu1 %4626 }
 0xe43   : > { %v4639_v63 = vmul.f32 %v4627_v12, %v11283_v29 }
 0xe45   : > { %v9339_v13 = vpop.eup %9338  ;;  %v4647_v39 = vadd.f32 1e-05, %v4639_v63 }
 0xe46   : > { %v4691_v2 = vmul.f32 %v9339_v13, %v4646_v43  ;;  %vm4697_vm13 = vweird.f32 %v9339_v13 }
 0xe47   : > { %9340 = vrsqrt.f32 %v4647_v39  ;;  %vm4698_vm15 = vmor %vm4696_vm14, %vm4697_vm13  ;;  %vm4706_vm1 = vweird.f32 %v4647_v39 }
 0xe48   : > { %v4692_v36 = vmul.f32 %v9339_v13, %v4691_v2 }
 0xe4a   : > { %v4693_v31 = vmul.f32 0.5, %v4692_v36 }
 0xe4c   : > { %v4694_v16 = vsub.f32 1.5, %v4693_v31 }
 0xe4d   : > { %v9341_v23 = vpop.eup %9340 }
 0xe4e   : > { %v4695_v46 = vmul.f32 %v9339_v13, %v4694_v16  ;;  %v4701_v51 = vmul.f32 %v9341_v23, %v4647_v39  ;;  %vm4707_vm0 = vweird.f32 %v9341_v23 }
 0xe4f   : > { %vm4708_vm2 = vmor %vm4706_vm1, %vm4707_vm0 }
 0xe50   : > { %v4702_v49 = vmul.f32 %v9341_v23, %v4701_v51  ;;  %v4699_v14 = vsel %vm4698_vm15, %v9339_v13, %v4695_v46 }
 0xe51   : > { %v4734_v28 = vmul.f32 %v4699_v14, %v12616_v19  ;;  %v9660_v14 = vld [vmem:[%s14334_s12 + $0x8] sm:$0xff] }
 0xe52   : > { %v4703_v52 = vmul.f32 0.5, %v4702_v49 }
 0xe53   : > { %v4745_v25 = vmul.f32 %v12653_v21, %v4734_v28 }
 0xe54   : > { %v4704_v18 = vsub.f32 1.5, %v4703_v52 }
 0xe55   : > { %v4756_v53 = vadd.f32 %v12659_v7, %v4745_v25 }
 0xe56   : > { %v4705_v45 = vmul.f32 %v9341_v23, %v4704_v18 }
 0xe58   : > { %v4709_v50 = vsel %vm4708_vm2, %v9341_v23, %v4705_v45  ;;  %v9662_v45 = vld [vmem:[%s14334_s12 + $0x18] sm:$0xff] }
 0xe59   : > { %v4735_v17 = vmul.f32 %v4709_v50, %v12624_v41 }
 0xe5a   : > { %v4630_v59 = vpop.xlane.xlu0 %4629 }
 0xe5b   : > { %v4640_v26 = vmul.f32 %v4630_v59, %v11283_v29  ;;  %v4746_v30 = vmul.f32 %v12653_v21, %v4735_v17 }
 0xe5d   : > { %v4648_v62 = vadd.f32 1e-05, %v4640_v26  ;;  %v4757_v42 = vadd.f32 %v12659_v7, %v4746_v30  ;;  %v9663_v26 = vld [vmem:[%s14334_s12 + $0x20] sm:$0xff] }
 0xe5f   : > { %9342 = vrsqrt.f32 %v4648_v62  ;;  %v4773_v19 = vpack.c.bf16 %v4757_v42, %v4756_v53  ;;  %vm4716_vm4 = vweird.f32 %v4648_v62 }
 0xe61   : > { %8385 = vmatmul.msk.bf16.gmra.mxu1 %vm2548_vm5, %v4773_v19 }
 0xe65   : > { %v9343_v56 = vpop.eup %9342  ;;  %v4633_v38 = vpop.xlane.xlu2 %4632 }
 0xe66   : > { %v4711_v27 = vmul.f32 %v9343_v56, %v4648_v62  ;;  %v4641_v41 = vmul.f32 %v4633_v38, %v11283_v29  ;;  %vm4717_vm3 = vweird.f32 %v9343_v56  ;;  %v9664_v62 = vld [vmem:[%s14334_s12 + $0x28] sm:$0xff]  ;;  %v9665_v38 = vld [vmem:[%s14334_s12 + $0x30] sm:$0xff] }
 0xe67   : > { %vm4718_vm6 = vmor %vm4716_vm4, %vm4717_vm3 }
 0xe68   : > { %v4712_v58 = vmul.f32 %v9343_v56, %v4711_v27  ;;  %v4649_v40 = vadd.f32 1e-05, %v4641_v41  ;;  %v9666_v41 = vld [vmem:[%s14334_s12 + $0x38] sm:$0xff] }
 0xe6a   : > { %v4713_v4 = vmul.f32 0.5, %v4712_v58  ;;  %9344 = vrsqrt.f32 %v4649_v40  ;;  %vm4726_vm8 = vweird.f32 %v4649_v40 }
 0xe6c   : > { %v4714_v8 = vsub.f32 1.5, %v4713_v4 }
 0xe6e   : > { %v4715_v5 = vmul.f32 %v9343_v56, %v4714_v8 }
 0xe70   : > { %v9345_v24 = vpop.eup %9344  ;;  %v4719_v43 = vsel %vm4718_vm6, %v9343_v56, %v4715_v5  ;;  %v9667_v5 = vld [vmem:[%s14334_s12 + $0x48] sm:$0xff] }
 0xe71   : > { %v4721_v37 = vmul.f32 %v9345_v24, %v4649_v40  ;;  %vm4727_vm7 = vweird.f32 %v9345_v24  ;;  %v4736_v13 = vmul.f32 %v4719_v43, %v12632_v57  ;;  %v9668_v43 = vld [vmem:[%s14334_s12 + $0x40] sm:$0xff] }
 0xe72   : > { %vm4728_vm9 = vmor %vm4726_vm8, %vm4727_vm7 }
 0xe73   : > { %v4722_v35 = vmul.f32 %v9345_v24, %v4721_v37  ;;  %v4747_v31 = vmul.f32 %v12653_v21, %v4736_v13 }
 0xe75   : > { %v4723_v12 = vmul.f32 0.5, %v4722_v35  ;;  %v4758_v23 = vadd.f32 %v12659_v7, %v4747_v31 }
 0xe77   : > { %v4724_v63 = vsub.f32 1.5, %v4723_v12 }
 0xe79   : > { %v4725_v39 = vmul.f32 %v9345_v24, %v4724_v63 }
 0xe7b   : > { %v4729_v2 = vsel %vm4728_vm9, %v9345_v24, %v4725_v39 }
 0xe7c   : > { %v4737_v36 = vmul.f32 %v4729_v2, %v12643_v48 }
 0xe7e   : > { %v4748_v16 = vmul.f32 %v12653_v21, %v4737_v36  ;;  %v9669_v36 = vld [vmem:[%s14334_s12 + $0x58] sm:$0xff] }
 0xe80   : > { %v4759_v46 = vadd.f32 %v12659_v7, %v4748_v16 }
 0xe82   : > { %v4774_v51 = vpack.c.bf16 %v4759_v46, %v4758_v23  ;;  %v9670_v23 = vld [vmem:[%s14334_s12 + $0x50] sm:$0xff] }
 0xe84   : > { %8386 = vmatmul.msk.bf16.gmra.mxu1 %vm2548_vm5, %v4774_v51 }
 0xe86   : > { %v12695_v57 = vpop.f32.mrf.mxu1 }
 0xe87   : > { %v4840_v48 = vmul.f32 %v9659_v32, %v12695_v57  ;;  %v4848_v12 = vmul.f32 %v9668_v43, %v12695_v57  ;;  %v9671_v32 = vld [vmem:[%s14334_s12 + $0x68] sm:$0xff] }
 0xe88   : > { %v9679_v43 = vld [vmem:[%s14334_s12 + $0xa8] sm:$0xff] }
 0xe8e   : > { %v12697_v49 = vpop.f32.mrf.mxu1 }
 0xe8f   : > { %v4841_v21 = vmul.f32 %v9660_v14, %v12697_v49  ;;  %v4849_v37 = vmul.f32 %v9667_v5, %v12697_v49  ;;  %v9672_v14 = vld [vmem:[%s14334_s12 + $0x60] sm:$0xff] }
 0xe91   : > { %v4904_v52 = vpack.c.bf16 %v4841_v21, %v4840_v48  ;;  %v4908_v63 = vpack.c.bf16 %v4849_v37, %v4848_v12 }
 0xe93   : > { %8387 = vmatmul.msk.bf16.vlgmr.msra.gmra.mxu0 %vm2548_vm5, %v4904_v52 }
 0xe96   : > { %v12704_v18 = vpop.f32.mrf.mxu1 }
 0xe97   : > { %v4842_v28 = vmul.f32 %v9661_v20, %v12704_v18  ;;  %v4850_v46 = vmul.f32 %v9670_v23, %v12704_v18  ;;  %v9673_v20 = vld [vmem:[%s14334_s12 + $0x78] sm:$0xff] }
 0xe9e   : > { %v12706_v7 = vpop.f32.mrf.mxu1 }
 0xe9f   : > { %v4843_v50 = vmul.f32 %v9662_v45, %v12706_v7  ;;  %v4851_v31 = vmul.f32 %v9669_v36, %v12706_v7  ;;  %v9674_v45 = vld [vmem:[%s14334_s12 + $0x70] sm:$0xff] }
 0xea1   : > { %v4905_v17 = vpack.c.bf16 %v4843_v50, %v4842_v28  ;;  %v4909_v51 = vpack.c.bf16 %v4851_v31, %v4850_v46  ;;  %v9681_v46 = vld [vmem:[%s14334_s12 + $0xb8] sm:$0xff] }
 0xea3   : > { %8388 = vmatmul.msk.bf16.gmra.mxu0 %vm2548_vm5, %v4905_v17 }
 0xede   : > { %v12713_v25 = vpop.f32.mrf.mxu1 }
 0xedf   : > { %v4844_v30 = vmul.f32 %v9663_v26, %v12713_v25  ;;  %v4852_v21 = vmul.f32 %v9672_v14, %v12713_v25  ;;  %v9675_v26 = vld [vmem:[%s14334_s12 + $0x88] sm:$0xff] }
 0xee6   : > { %v12715_v59 = vpop.f32.mrf.mxu1 }
 0xee7   : > { %v4845_v53 = vmul.f32 %v9664_v62, %v12715_v59  ;;  %v4853_v48 = vmul.f32 %v9671_v32, %v12715_v59  ;;  %v9676_v62 = vld [vmem:[%s14334_s12 + $0x80] sm:$0xff]  ;;  %v4861_v12 = vmul.f32 %v9679_v43, %v12715_v59  ;;  %v9682_v32 = vld [vmem:[%s14334_s12 + $0xb0] sm:$0xff] }
 0xee9   : > { %v4906_v42 = vpack.c.bf16 %v4845_v53, %v4844_v30  ;;  %v4910_v52 = vpack.c.bf16 %v4853_v48, %v4852_v21  ;;  %v4857_v30 = vmul.f32 %v9675_v26, %v12697_v49  ;;  %v4856_v53 = vmul.f32 %v9676_v62, %v12695_v57 }
 0xeeb   : > { %8389 = vmatmul.msk.bf16.gmra.mxu0 %vm2548_vm5, %v4906_v42  ;;  %v4912_v42 = vpack.c.bf16 %v4857_v30, %v4856_v53 }
 0xf01   : > { %v12722_v19 = vpop.f32.mrf.mxu1 }
 0xf02   : > { %v4846_v27 = vmul.f32 %v9665_v38, %v12722_v19  ;;  %v4854_v50 = vmul.f32 %v9674_v45, %v12722_v19  ;;  %v4862_v48 = vmul.f32 %v9682_v32, %v12722_v19 }
 0xf09   : > { %v12724_v56 = vpop.f32.mrf.mxu1 }
 0xf0a   : > { %v4847_v58 = vmul.f32 %v9666_v41, %v12724_v56  ;;  %v4855_v28 = vmul.f32 %v9673_v20, %v12724_v56 }
 0xf0c   : > { %v4907_v40 = vpack.c.bf16 %v4847_v58, %v4846_v27  ;;  %v4911_v17 = vpack.c.bf16 %v4855_v28, %v4854_v50  ;;  %v9677_v27 = vld [vmem:[%s14334_s12 + $0x98] sm:$0xff] }
 0xf0d   : > { %v4859_v41 = vmul.f32 %v9677_v27, %v12706_v7 }
 0xf0e   : > { %8390 = vmatmul.msk.bf16.gmra.mxu0 %vm2548_vm5, %v4907_v40  ;;  %v9678_v40 = vld [vmem:[%s14334_s12 + $0x90] sm:$0xff] }
 0xf10   : > { %v5045_v4 = vpop.f32.mrf.mxu0 }
 0xf11   : > { %v5206_v8 = vsel %vm5205_vm10, %v5045_v4, -inf }
 0xf12   : > { %5207 = vmax.xlane.f32.xlu1 %v5206_v8  ;;  %v4858_v8 = vmul.f32 %v9678_v40, %v12704_v18 }
 0xf14   : > { %v4913_v5 = vpack.c.bf16 %v4859_v41, %v4858_v8 }
 0xf18   : > { %v12732_v24 = vpop.f32.mrf.mxu0 }
 0xf19   : > { %v5209_v35 = vsel %vm5205_vm10, %v12732_v24, -inf }
 0xf1a   : > { %5210 = vmax.xlane.f32.xlu0 %v5209_v35 }
 0xf1e   : > { %8391 = vmatmul.msk.bf16.gmra.mxu0 %vm2548_vm5, %v4908_v63  ;;  %v9680_v63 = vld [vmem:[%s14334_s12 + $0xa0] sm:$0xff] }
 0xf20   : > { %v12741_v13 = vpop.f32.mrf.mxu0 }
 0xf21   : > { %v5212_v39 = vsel %vm5205_vm10, %v12741_v13, -inf }
 0xf22   : > { %5213 = vmax.xlane.f32.xlu2 %v5212_v39  ;;  %v4860_v39 = vmul.f32 %v9680_v63, %v12713_v25 }
 0xf24   : > { %v4914_v36 = vpack.c.bf16 %v4861_v12, %v4860_v39 }
 0xf28   : > { %v12745_v2 = vpop.f32.mrf.mxu0 }
 0xf29   : > { %v5215_v16 = vsel %vm5205_vm10, %v12745_v2, -inf }
 0xf2a   : > { %5216 = vmax.xlane.f32.xlu1 %v5215_v16 }
 0xf2e   : > { %8392 = vmatmul.msk.bf16.gmra.mxu0 %vm2548_vm5, %v4909_v51  ;;  %v4863_v51 = vmul.f32 %v9681_v46, %v12724_v56  ;;  %v9686_v46 = vld [vmem:[%s14334_s12 + $0xd0] sm:$0xff] }
 0xf3e   : > { %8393 = vmatmul.msk.bf16.gmra.mxu0 %vm2548_vm5, %v4910_v52  ;;  %v4915_v52 = vpack.c.bf16 %v4863_v51, %v4862_v48  ;;  %v4866_v51 = vmul.f32 %v9686_v46, %v12704_v18 }
 0xf4e   : > { %8394 = vmatmul.msk.bf16.gmra.mxu0 %vm2548_vm5, %v4911_v17 }
 0xf5e   : > { %8395 = vmatmul.msk.bf16.gmra.mxu0 %vm2548_vm5, %v4912_v42  ;;  %v9683_v42 = vld [vmem:[%s14334_s12 + $0xc8] sm:$0xff] }
 0xf5f   : > { %v4865_v27 = vmul.f32 %v9683_v42, %v12697_v49 }
 0xf68   : > { %v12769_v38 = vpop.f32.mrf.mxu0 }
 0xf69   : > { %v5218_v58 = vsel %vm5205_vm10, %v12769_v38, -inf }
 0xf6a   : > { %5219 = vmax.xlane.f32.xlu0 %v5218_v58  ;;  %v9684_v58 = vld [vmem:[%s14334_s12 + $0xc0] sm:$0xff] }
 0xf6b   : > { %v4864_v40 = vmul.f32 %v9684_v58, %v12695_v57 }
 0xf6e   : > { %8396 = vmatmul.msk.bf16.gmra.mxu0 %vm2548_vm5, %v4913_v5  ;;  %v4916_v5 = vpack.c.bf16 %v4865_v27, %v4864_v40  ;;  %v9690_v27 = vld [vmem:[%s14334_s12 + $0xf0] sm:$0xff] }
 0xf70   : > { %v12778_v37 = vpop.f32.mrf.mxu0 }
 0xf71   : > { %v5221_v35 = vsel %vm5205_vm10, %v12778_v37, -inf }
 0xf72   : > { %5222 = vmax.xlane.f32.xlu2 %v5221_v35 }
 0xf7e   : > { %8397 = vmatmul.msk.bf16.gmra.mxu0 %vm2548_vm5, %v4914_v36 }
 0xf85   : > { %v5208_v31 = vpop.xlane.xlu1 %5207 }
 0xf86   : > { %v5398_v16 = vsub.f32 %v5045_v4, %v5208_v31 }
 0xf88   : > { %v5462_v23 = vmul.f32 1.442695, %v5398_v16  ;;  %v9685_v16 = vld [vmem:[%s14334_s12 + $0xd8] sm:$0xff] }
 0xf8a   : > { %9346 = vpow2.f32 %v5462_v23 }
 0xf8b   : > { %v12791_v14 = vpop.f32.mrf.mxu0 }
 0xf8c   : > { %v5224_v21 = vsel %vm5205_vm10, %v12791_v14, -inf }
 0xf8d   : > { %v5211_v20 = vpop.xlane.xlu0 %5210  ;;  %5225 = vmax.xlane.f32.xlu1 %v5224_v21 }
 0xf8e   : > { %v5399_v28 = vsub.f32 %v12732_v24, %v5211_v20  ;;  %8398 = vmatmul.msk.bf16.gmra.mxu0 %vm2548_vm5, %v4915_v52 }
 0xf90   : > { %v12797_v4 = vpop.eup %9346  ;;  %v5464_v45 = vmul.f32 1.442695, %v5399_v28 }
 0xf91   : > { %v5590_v50 = vsel %vm5205_vm10, %v12797_v4, 0.0 }
 0xf92   : > { %9348 = vpow2.f32 %v5464_v45  ;;  %5591 = vadd.xlane.f32.xlu2 %v5590_v50  ;;  %v9688_v45 = vld [vmem:[%s14334_s12 + $0xe0] sm:$0xff] }
 0xf93   : > { %v12801_v17 = vpop.f32.mrf.mxu0  ;;  %v4868_v50 = vmul.f32 %v9688_v45, %v12713_v25 }
 0xf94   : > { %v5227_v26 = vsel %vm5205_vm10, %v12801_v17, -inf }
 0xf95   : > { %5228 = vmax.xlane.f32.xlu0 %v5227_v26  ;;  %v5214_v30 = vpop.xlane.xlu2 %5213 }
 0xf96   : > { %v5400_v24 = vsub.f32 %v12741_v13, %v5214_v30 }
 0xf98   : > { %v12806_v62 = vpop.eup %9348  ;;  %v5466_v53 = vmul.f32 1.442695, %v5400_v24 }
 0xf99   : > { %v5593_v41 = vsel %vm5205_vm10, %v12806_v62, 0.0 }
 0xf9a   : > { %5594 = vadd.xlane.f32.xlu1 %v5593_v41  ;;  %9350 = vpow2.f32 %v5466_v53  ;;  %v9689_v53 = vld [vmem:[%s14334_s12 + $0xf8] sm:$0xff]  ;;  %v4870_v41 = vmul.f32 %v9690_v27, %v12722_v19 }
 0xf9b   : > { %v12814_v8 = vpop.f32.mrf.mxu0  ;;  %v4871_v42 = vmul.f32 %v9689_v53, %v12724_v56  ;;  %v9694_v53 = vld [vmem:[%s14334_s12 + $0x110] sm:$0xff] }
 0xf9c   : > { %v5230_v13 = vsel %vm5205_vm10, %v12814_v8, -inf }
 0xf9d   : > { %v5217_v35 = vpop.xlane.xlu1 %5216  ;;  %5231 = vmax.xlane.f32.xlu2 %v5230_v13  ;;  %v4919_v40 = vpack.c.bf16 %v4871_v42, %v4870_v41  ;;  %v4874_v42 = vmul.f32 %v9694_v53, %v12704_v18 }
 0xf9e   : > { %v5401_v43 = vsub.f32 %v12745_v2, %v5217_v35  ;;  %8399 = vmatmul.msk.bf16.gmra.mxu0 %vm2548_vm5, %v4916_v5  ;;  %v4867_v2 = vmul.f32 %v9685_v16, %v12706_v7  ;;  %v9691_v35 = vld [vmem:[%s14334_s12 + $0x108] sm:$0xff] }
 0xfa0   : > { %v5468_v12 = vmul.f32 1.442695, %v5401_v43  ;;  %v12820_v63 = vpop.eup %9350  ;;  %v4917_v52 = vpack.c.bf16 %v4867_v2, %v4866_v51  ;;  %v4873_v43 = vmul.f32 %v9691_v35, %v12697_v49 }
 0xfa1   : > { %v5596_v31 = vsel %vm5205_vm10, %v12820_v63, 0.0 }
 0xfa2   : > { %9352 = vpow2.f32 %v5468_v12  ;;  %v9692_v12 = vld [vmem:[%s14334_s12 + $0x100] sm:$0xff] }
 0xfa3   : > { %v12822_v39 = vpop.f32.mrf.mxu0 }
 0xfa4   : > { %v5233_v36 = vsel %vm5205_vm10, %v12822_v39, -inf }
 0xfa5   : > { %5234 = vmax.xlane.f32.xlu1 %v5233_v36  ;;  %5597 = vadd.xlane.f32.xlu2 %v5596_v31  ;;  %v4872_v36 = vmul.f32 %v9692_v12, %v12695_v57 }
 0xfa7   : > { %v4920_v16 = vpack.c.bf16 %v4873_v43, %v4872_v36  ;;  %v9695_v43 = vld [vmem:[%s14334_s12 + $0x128] sm:$0xff] }
 0xfa8   : > { %v12830_v23 = vpop.eup %9352  ;;  %v4877_v12 = vmul.f32 %v9695_v43, %v12715_v59 }
 0xfa9   : > { %5943 = vrot.lane.b32.xlu0 %v12675_v3, %s10345_s13  ;;  %v5599_v48 = vsel %vm5205_vm10, %v12830_v23, 0.0  ;;  %v9687_v3 = vld [vmem:[%s14334_s12 + $0xe8] sm:$0xff] }
 0xfaa   : > { %v4869_v28 = vmul.f32 %v9687_v3, %v12715_v59 }
 0xfab   : > { %v12836_v32 = vpop.f32.mrf.mxu0 }
 0xfac   : > { %v5236_v21 = vsel %vm5205_vm10, %v12836_v32, -inf  ;;  %v4918_v30 = vpack.c.bf16 %v4869_v28, %v4868_v50  ;;  %v9693_v50 = vld [vmem:[%s14334_s12 + $0x118] sm:$0xff] }
 0xfad   : > { %5600 = vadd.xlane.f32.xlu1 %v5599_v48  ;;  %5237 = vmax.xlane.f32.xlu2 %v5236_v21 }
 0xfae   : > { %8400 = vmatmul.msk.bf16.gmra.mxu0 %vm2548_vm5, %v4917_v52 }
 0xfb3   : > { %v12843_v20 = vpop.f32.mrf.mxu0 }
 0xfb4   : > { %v5239_v13 = vsel %vm5205_vm10, %v12843_v20, -inf }
 0xfbb   : > { %v12849_v26 = vpop.f32.mrf.mxu0 }
 0xfbe   : > { %8401 = vmatmul.msk.bf16.gmra.mxu0 %vm2548_vm5, %v4918_v30 }
 0xfc3   : > { %v12852_v24 = vpop.f32.mrf.mxu0 }
 0xfc4   : > { %v5245_v36 = vsel %vm5205_vm10, %v12852_v24, -inf }
 0xfcb   : > { %v12858_v58 = vpop.f32.mrf.mxu0 }
 0xfce   : > { %8402 = vmatmul.msk.bf16.gmra.mxu0 %vm2548_vm5, %v4919_v40 }
 0xfd3   : > { %5240 = vmax.xlane.f32.xlu0 %v5239_v13  ;;  %v12863_v5 = vpop.f32.mrf.mxu0  ;;  %v5242_v13 = vsel %vm5205_vm10, %v12849_v26, -inf }
 0xfdb   : > { %v12869_v31 = vpop.f32.mrf.mxu0 }
 0xfdd   : > { %v5220_v2 = vpop.xlane.xlu0 %5219 }
 0xfde   : > { %v5402_v46 = vsub.f32 %v12769_v38, %v5220_v2  ;;  %8403 = vmatmul.msk.bf16.gmra.mxu0 %vm2548_vm5, %v4920_v16  ;;  %v4875_v38 = vmul.f32 %v9693_v50, %v12706_v7  ;;  %v9696_v16 = vld [vmem:[%s14334_s12 + $0x120] sm:$0xff] }
 0xfdf   : > { %v4876_v2 = vmul.f32 %v9696_v16, %v12713_v25 }
 0xfe0   : > { %v5470_v51 = vmul.f32 1.442695, %v5402_v46  ;;  %v4921_v41 = vpack.c.bf16 %v4875_v38, %v4874_v42  ;;  %v9697_v38 = vld [vmem:[%s14334_s12 + $0x138] sm:$0xff]  ;;  %v9698_v42 = vld [vmem:[%s14334_s12 + $0x130] sm:$0xff] }
 0xfe1   : > { %v4922_v46 = vpack.c.bf16 %v4877_v12, %v4876_v2 }
 0xfe2   : > { %9354 = vpow2.f32 %v5470_v51 }
 0xfe3   : > { %v12873_v48 = vpop.f32.mrf.mxu0 }
 0xfe4   : > { %v5257_v21 = vsel %vm5205_vm10, %v12873_v48, -inf }
 0xfe5   : > { %5258 = vmax.xlane.f32.xlu0 %v5257_v21  ;;  %v5223_v52 = vpop.xlane.xlu2 %5222 }
 0xfe6   : > { %v5403_v3 = vsub.f32 %v12778_v37, %v5223_v52 }
 0xfe8   : > { %v12878_v28 = vpop.eup %9354  ;;  %v5472_v45 = vmul.f32 1.442695, %v5403_v3 }
 0xfe9   : > { %v5602_v30 = vsel %vm5205_vm10, %v12878_v28, 0.0 }
 0xfea   : > { %9356 = vpow2.f32 %v5472_v45  ;;  %5603 = vadd.xlane.f32.xlu1 %v5602_v30  ;;  %v4879_v30 = vmul.f32 %v9697_v38, %v12724_v56 }
 0xfeb   : > { %v12886_v27 = vpop.f32.mrf.mxu0 }
 0xfec   : > { %v5260_v37 = vsel %vm5205_vm10, %v12886_v27, -inf }
 0xfed   : > { %5261 = vmax.xlane.f32.xlu0 %v5260_v37  ;;  %v4878_v37 = vmul.f32 %v9698_v42, %v12722_v19  ;;  %v9700_v42 = vld [vmem:[%s14334_s12 + $0x140] sm:$0xff] }
 0xfee   : > { %8404 = vmatmul.msk.bf16.gmra.mxu0 %vm2548_vm5, %v4921_v41 }
 0xff0   : > { %v12891_v40 = vpop.eup %9356 }
 0xff1   : > { %v5605_v35 = vsel %vm5205_vm10, %v12891_v40, 0.0 }
 0xff2   : > { %5243 = vmax.xlane.f32.xlu1 %v5242_v13  ;;  %5606 = vadd.xlane.f32.xlu2 %v5605_v35  ;;  %v4923_v35 = vpack.c.bf16 %v4879_v30, %v4878_v37  ;;  %v4880_v37 = vmul.f32 %v9700_v42, %v12695_v57 }
 0xff3   : > { %v12905_v3 = vpop.f32.mrf.mxu0 }
 0xffa   : > { %5246 = vmax.xlane.f32.xlu2 %v5245_v36 }
 0xffb   : > { %v12917_v12 = vpop.f32.mrf.mxu0 }
 0xffe   : > { %8405 = vmatmul.msk.bf16.gmra.mxu0 %vm2548_vm5, %v4922_v46  ;;  %v5248_v46 = vsel %vm5205_vm10, %v12858_v58, -inf }
0x1000   : > { %v5226_v51 = vpop.xlane.xlu1 %5225 }
0x1001   : > { %v5404_v21 = vsub.f32 %v12791_v14, %v5226_v51 }
0x1003   : > { %v5474_v52 = vmul.f32 1.442695, %v5404_v21 }
0x1005   : > { %9358 = vpow2.f32 %v5474_v52  ;;  %v5592_v45 = vpop.xlane.xlu2 %5591  ;;  %v9699_v52 = vld [vmem:[%s14334_s12 + $0x148] sm:$0xff] }
0x1008   : > { %v5229_v50 = vpop.xlane.xlu0 %5228 }
0x1009   : > { %v5405_v53 = vsub.f32 %v12801_v17, %v5229_v50  ;;  %v4881_v50 = vmul.f32 %v9699_v52, %v12697_v49 }
0x100b   : > { %v12912_v41 = vpop.eup %9358  ;;  %v5476_v13 = vmul.f32 1.442695, %v5405_v53  ;;  %v12928_v53 = vpop.f32.mrf.mxu0 }
0x100c   : > { %v5608_v14 = vsel %vm5205_vm10, %v12912_v41, 0.0 }
0x100d   : > { %9360 = vpow2.f32 %v5476_v13  ;;  %5609 = vadd.xlane.f32.xlu1 %v5608_v14  ;;  %v5595_v43 = vpop.xlane.xlu1 %5594 }
0x100e   : > { %8406 = vmatmul.msk.bf16.gmra.mxu0 %vm2548_vm5, %v4923_v35  ;;  %9362 = vrcp.f32 %v5595_v43 }
0x100f   : > { %9364 = vrcp.f32 %v5592_v45 }
0x1010   : > { %v5232_v36 = vpop.xlane.xlu2 %5231 }
0x1011   : > { %v5406_v17 = vsub.f32 %v12814_v8, %v5232_v36  ;;  %v4924_v36 = vpack.c.bf16 %v4881_v50, %v4880_v37  ;;  %v9701_v37 = vld [vmem:[%s14334_s12 + $0x158] sm:$0xff] }
0x1013   : > { %v12920_v16 = vpop.eup %9360  ;;  %v5478_v2 = vmul.f32 1.442695, %v5406_v17  ;;  %v12946_v50 = vpop.f32.mrf.mxu0 }
0x1014   : > { %v5611_v51 = vsel %vm5205_vm10, %v12920_v16, 0.0  ;;  %v9363_v21 = vpop.eup %9362 }
0x1015   : > { %9366 = vpow2.f32 %v5478_v2  ;;  %5249 = vmax.xlane.f32.xlu1 %v5248_v46  ;;  %5612 = vadd.xlane.f32.xlu2 %v5611_v51  ;;  %v9365_v30 = vpop.eup %9364  ;;  %v5847_v13 = vmul.f32 %v9363_v21, %v12806_v62  ;;  %v5251_v46 = vsel %vm5205_vm10, %v12863_v5, -inf }
0x1016   : > { %v5846_v17 = vmul.f32 %v9365_v30, %v12797_v4 }
0x1018   : > { %v5235_v38 = vpop.xlane.xlu1 %5234  ;;  %v5598_v8 = vpop.xlane.xlu2 %5597  ;;  %v5910_v51 = vpack.c.bf16 %v5847_v13, %v5846_v17  ;;  %v4883_v13 = vmul.f32 %v9701_v37, %v12706_v7 }
0x1019   : > { %v5407_v45 = vsub.f32 %v12822_v39, %v5235_v38 }
0x101b   : > { %v12934_v14 = vpop.eup %9366  ;;  %v5480_v35 = vmul.f32 1.442695, %v5407_v45  ;;  %v5944_v43 = vpop.permute.xlu0 %5943  ;;  %v5254_v45 = vsel %vm5205_vm10, %v12869_v31, -inf }
0x101c   : > { %v6043_v2 = vsel %vm6041_vm11, %v5944_v43, 0  ;;  %v5614_v39 = vsel %vm5205_vm10, %v12934_v14, 0.0 }
0x101d   : > { %9368 = vpow2.f32 %v5480_v35  ;;  %6052 = vmatpush.bf16.msra.mxu1 %v6043_v2  ;;  %5252 = vmax.xlane.f32.xlu2 %v5251_v46  ;;  %v9702_v35 = vld [vmem:[%s14334_s12 + $0x150] sm:$0xff] }
0x101e   : > { %5615 = vadd.xlane.f32.xlu1 %v5614_v39  ;;  %8407 = vmatmul.msk.bf16.gmra.mxu0 %vm2548_vm5, %v4924_v36  ;;  %v4882_v43 = vmul.f32 %v9702_v35, %v12704_v18  ;;  %v12962_v39 = vpop.f32.mrf.mxu0 }
0x1020   : > { %v5601_v62 = vpop.xlane.xlu1 %5600  ;;  %8419 = vmatmul.msk.bf16.vlgmr.msra.gmra.mxu1 %vm5205_vm10, %v5910_v51  ;;  %v5238_v21 = vpop.xlane.xlu2 %5237  ;;  %v4925_v2 = vpack.c.bf16 %v4883_v13, %v4882_v43 }
0x1021   : > { %9370 = vrcp.f32 %v5601_v62  ;;  %v5408_v4 = vsub.f32 %v12836_v32, %v5238_v21  ;;  %v9703_v21 = vld [vmem:[%s14334_s12 + $0x168] sm:$0xff] }
0x1022   : > { %9372 = vrcp.f32 %v5598_v8 }
0x1023   : > { %v12944_v52 = vpop.eup %9368  ;;  %v5482_v38 = vmul.f32 1.442695, %v5408_v4  ;;  %v4885_v4 = vmul.f32 %v9703_v21, %v12715_v59  ;;  %v9707_v21 = vld [vmem:[%s14334_s12 + $0x188] sm:$0xff] }
0x1024   : > { %v5617_v30 = vsel %vm5205_vm10, %v12944_v52, 0.0 }
0x1025   : > { %9374 = vpow2.f32 %v5482_v38  ;;  %5618 = vadd.xlane.f32.xlu2 %v5617_v30  ;;  %v5266_v30 = vsel %vm5205_vm10, %v12917_v12, -inf }
0x1026   : > { %5255 = vmax.xlane.f32.xlu1 %v5254_v45  ;;  %v12968_v62 = vpop.f32.mrf.mxu0 }
0x1027   : > { %v9371_v42 = vpop.eup %9370 }
0x1028   : > { %v9373_v32 = vpop.eup %9372  ;;  %v5849_v8 = vmul.f32 %v9371_v42, %v12830_v23  ;;  %v5263_v23 = vsel %vm5205_vm10, %v12905_v3, -inf }
0x1029   : > { %v5848_v46 = vmul.f32 %v9373_v32, %v12820_v63  ;;  %v9704_v63 = vld [vmem:[%s14334_s12 + $0x160] sm:$0xff]  ;;  %v9705_v32 = vld [vmem:[%s14334_s12 + $0x178] sm:$0xff] }
0x102a   : > { %v4884_v38 = vmul.f32 %v9704_v63, %v12713_v25  ;;  %v4887_v35 = vmul.f32 %v9705_v32, %v12724_v56  ;;  %v9708_v63 = vld [vmem:[%s14334_s12 + $0x180] sm:$0xff] }
0x102b   : > { %v12957_v36 = vpop.eup %9374  ;;  %v5911_v51 = vpack.c.bf16 %v5849_v8, %v5848_v46  ;;  %v9706_v8 = vld [vmem:[%s14334_s12 + $0x170] sm:$0xff] }
0x102c   : > { %v5620_v17 = vsel %vm5205_vm10, %v12957_v36, 0.0  ;;  %v4926_v45 = vpack.c.bf16 %v4885_v4, %v4884_v38  ;;  %v4889_v4 = vmul.f32 %v9707_v21, %v12697_v49  ;;  %v4888_v38 = vmul.f32 %v9708_v63, %v12695_v57  ;;  %v9710_v21 = vld [vmem:[%s14334_s12 + $0x190] sm:$0xff] }
0x102d   : > { %5621 = vadd.xlane.f32.xlu2 %v5620_v17  ;;  %v4886_v17 = vmul.f32 %v9706_v8, %v12722_v19  ;;  %v9709_v8 = vld [vmem:[%s14334_s12 + $0x198] sm:$0xff] }
0x102e   : > { %8408 = vmatmul.msk.bf16.gmra.mxu0 %vm2548_vm5, %v4925_v2  ;;  %v12977_v42 = vpop.f32.mrf.mxu0 }
0x102f   : > { %v4927_v46 = vpack.c.bf16 %v4887_v35, %v4886_v17  ;;  %v4891_v17 = vmul.f32 %v9709_v8, %v12706_v7 }
0x1030   : > { %8420 = vmatmul.msk.bf16.gmra.mxu1 %vm5205_vm10, %v5911_v51 }
0x1035   : > { %5264 = vmax.xlane.f32.xlu2 %v5263_v23 }
0x1036   : > { %v12984_v2 = vpop.f32.mrf.mxu0 }
0x103d   : > { %5267 = vmax.xlane.f32.xlu2 %v5266_v30  ;;  %v4928_v30 = vpack.c.bf16 %v4889_v4, %v4888_v38  ;;  %v4890_v4 = vmul.f32 %v9710_v21, %v12704_v18 }
0x103e   : > { %8409 = vmatmul.msk.bf16.gmra.mxu0 %vm2548_vm5, %v4926_v45 }
0x103f   : > { %v4929_v38 = vpack.c.bf16 %v4891_v17, %v4890_v4  ;;  %v5269_v4 = vsel %vm5205_vm10, %v12928_v53, -inf }
0x1046   : > { %v5241_v37 = vpop.xlane.xlu0 %5240 }
0x1047   : > { %v5409_v13 = vsub.f32 %v12843_v20, %v5241_v37  ;;  %v12991_v20 = vpop.f32.mrf.mxu0 }
0x1049   : > { %v5484_v43 = vmul.f32 1.442695, %v5409_v13 }
0x104b   : > { %9376 = vpow2.f32 %v5484_v43 }
0x104e   : > { %8410 = vmatmul.msk.bf16.gmra.mxu0 %vm2548_vm5, %v4927_v46 }
0x104f   : > { %v12998_v37 = vpop.f32.mrf.mxu0 }
0x1051   : > { %v12987_v51 = vpop.eup %9376 }
0x1052   : > { %v5623_v23 = vsel %vm5205_vm10, %v12987_v51, 0.0 }
0x1053   : > { %5624 = vadd.xlane.f32.xlu1 %v5623_v23 }
0x1057   : > { %v13003_v46 = vpop.f32.mrf.mxu0 }
0x105d   : > { %v5604_v45 = vpop.xlane.xlu1 %5603 }
0x105e   : > { %8411 = vmatmul.msk.bf16.gmra.mxu0 %vm2548_vm5, %v4928_v30  ;;  %9378 = vrcp.f32 %v5604_v45 }
0x105f   : > { %v13016_v17 = vpop.f32.mrf.mxu0 }
0x1064   : > { %v9379_v23 = vpop.eup %9378 }
0x1065   : > { %v5244_v13 = vpop.xlane.xlu1 %5243  ;;  %v5607_v32 = vpop.xlane.xlu2 %5606  ;;  %v5850_v45 = vmul.f32 %v9379_v23, %v12878_v28  ;;  %v9711_v23 = vld [vmem:[%s14334_s12 + $0x1a8] sm:$0xff] }
0x1066   : > { %v5410_v35 = vsub.f32 %v12849_v26, %v5244_v13  ;;  %9380 = vrcp.f32 %v5607_v32  ;;  %v5259_v28 = vpop.xlane.xlu0 %5258  ;;  %v4893_v21 = vmul.f32 %v9711_v23, %v12715_v59 }
0x1068   : > { %v5486_v43 = vmul.f32 1.442695, %v5410_v35 }
0x106a   : > { %9382 = vpow2.f32 %v5486_v43 }
0x106c   : > { %v9381_v63 = vpop.eup %9380 }
0x106d   : > { %v5247_v30 = vpop.xlane.xlu2 %5246  ;;  %v5851_v26 = vmul.f32 %v9381_v63, %v12891_v40 }
0x106e   : > { %v5411_v13 = vsub.f32 %v12852_v24, %v5247_v30  ;;  %8412 = vmatmul.msk.bf16.gmra.mxu0 %vm2548_vm5, %v4929_v38  ;;  %v5415_v24 = vsub.f32 %v12873_v48, %v5259_v28  ;;  %v9712_v38 = vld [vmem:[%s14334_s12 + $0x1a0] sm:$0xff]  ;;  %v5262_v48 = vpop.xlane.xlu0 %5261 }
0x106f   : > { %v5912_v32 = vpack.c.bf16 %v5851_v26, %v5850_v45  ;;  %v4892_v30 = vmul.f32 %v9712_v38, %v12713_v25 }
0x1070   : > { %v13011_v35 = vpop.eup %9382  ;;  %v5488_v43 = vmul.f32 1.442695, %v5411_v13  ;;  %v5496_v45 = vmul.f32 1.442695, %v5415_v24  ;;  %v13029_v13 = vpop.f32.mrf.mxu0 }
0x1071   : > { %8421 = vmatmul.msk.bf16.gmra.mxu1 %vm5205_vm10, %v5912_v32  ;;  %v5626_v8 = vsel %vm5205_vm10, %v13011_v35, 0.0  ;;  %v4930_v26 = vpack.c.bf16 %v4893_v21, %v4892_v30  ;;  %v5416_v32 = vsub.f32 %v12886_v27, %v5262_v48 }
0x1072   : > { %9384 = vpow2.f32 %v5488_v43  ;;  %5627 = vadd.xlane.f32.xlu1 %v5626_v8  ;;  %v5272_v8 = vsel %vm5205_vm10, %v12946_v50, -inf }
0x1073   : > { %9386 = vpow2.f32 %v5496_v45  ;;  %v5498_v28 = vmul.f32 1.442695, %v5416_v32  ;;  %v9714_v45 = vld [vmem:[%s14334_s12 + $0x1b0] sm:$0xff] }
0x1078   : > { %v13018_v40 = vpop.eup %9384  ;;  %v13037_v24 = vpop.f32.mrf.mxu0 }
0x1079   : > { %v5629_v63 = vsel %vm5205_vm10, %v13018_v40, 0.0  ;;  %v13035_v23 = vpop.eup %9386 }
0x107a   : > { %5270 = vmax.xlane.f32.xlu1 %v5269_v4  ;;  %5630 = vadd.xlane.f32.xlu0 %v5629_v63  ;;  %v9713_v63 = vld [vmem:[%s14334_s12 + $0x1b8] sm:$0xff]  ;;  %v5641_v30 = vsel %vm5205_vm10, %v13035_v23, 0.0 }
0x107b   : > { %v4895_v38 = vmul.f32 %v9713_v63, %v12724_v56 }
0x107e   : > { %8413 = vmatmul.msk.bf16.gmra.mxu0 %vm2548_vm5, %v4930_v26  ;;  %v4894_v26 = vmul.f32 %v9714_v45, %v12722_v19 }
0x1080   : > { %v5610_v43 = vpop.xlane.xlu1 %5609  ;;  %v4931_v32 = vpack.c.bf16 %v4895_v38, %v4894_v26  ;;  %v13054_v38 = vpop.f32.mrf.mxu0 }
0x1081   : > { %9388 = vrcp.f32 %v5610_v43 }
0x1082   : > { %5273 = vmax.xlane.f32.xlu1 %v5272_v8  ;;  %9390 = vpow2.f32 %v5498_v28 }
0x1087   : > { %v9389_v8 = vpop.eup %9388 }
0x1088   : > { %v5250_v21 = vpop.xlane.xlu1 %5249  ;;  %v5613_v4 = vpop.xlane.xlu2 %5612 }
0x1089   : > { %v5412_v27 = vsub.f32 %v12858_v58, %v5250_v21  ;;  %9392 = vrcp.f32 %v5613_v4  ;;  %v13046_v43 = vpop.eup %9390  ;;  %v5852_v58 = vmul.f32 %v9389_v8, %v12912_v41 }
0x108a   : > { %5642 = vadd.xlane.f32.xlu1 %v5641_v30 }
0x108b   : > { %v5490_v48 = vmul.f32 1.442695, %v5412_v27  ;;  %v5644_v27 = vsel %vm5205_vm10, %v13046_v43, 0.0 }
0x108d   : > { %9394 = vpow2.f32 %v5490_v48 }
0x108e   : > { %8414 = vmatmul.msk.bf16.gmra.mxu0 %vm2548_vm5, %v4931_v32 }
0x108f   : > { %v9393_v28 = vpop.eup %9392 }
0x1090   : > { %v5253_v63 = vpop.xlane.xlu2 %5252  ;;  %v5853_v21 = vmul.f32 %v9393_v28, %v12920_v16  ;;  %v9715_v16 = vld [vmem:[%s14334_s12 + $0x1c8] sm:$0xff]  ;;  %v5287_v28 = vsel %vm5205_vm10, %v12991_v20, -inf }
0x1091   : > { %v5616_v4 = vpop.xlane.xlu1 %5615  ;;  %v5413_v30 = vsub.f32 %v12863_v5, %v5253_v63  ;;  %v4897_v32 = vmul.f32 %v9715_v16, %v12697_v49 }
0x1092   : > { %5645 = vadd.xlane.f32.xlu1 %v5644_v27  ;;  %v5913_v45 = vpack.c.bf16 %v5853_v21, %v5852_v58  ;;  %v9716_v58 = vld [vmem:[%s14334_s12 + $0x1c0] sm:$0xff]  ;;  %v13070_v27 = vpop.f32.mrf.mxu0 }
0x1093   : > { %v13056_v26 = vpop.eup %9394  ;;  %v5492_v48 = vmul.f32 1.442695, %v5413_v30  ;;  %v4896_v21 = vmul.f32 %v9716_v58, %v12695_v57 }
0x1094   : > { %8422 = vmatmul.msk.bf16.gmra.mxu1 %vm5205_vm10, %v5913_v45  ;;  %v5632_v41 = vsel %vm5205_vm10, %v13056_v26, 0.0  ;;  %v5275_v45 = vsel %vm5205_vm10, %v12962_v39, -inf }
0x1095   : > { %9396 = vpow2.f32 %v5492_v48  ;;  %5633 = vadd.xlane.f32.xlu0 %v5632_v41  ;;  %v4932_v48 = vpack.c.bf16 %v4897_v32, %v4896_v21  ;;  %v9717_v21 = vld [vmem:[%s14334_s12 + $0x1d8] sm:$0xff] }
0x1096   : > { %9398 = vrcp.f32 %v5616_v4 }
0x1098   : > { %v5619_v5 = vpop.xlane.xlu2 %5618 }
0x1099   : > { %v5256_v8 = vpop.xlane.xlu1 %5255  ;;  %9400 = vrcp.f32 %v5619_v5 }
0x109a   : > { %v5414_v63 = vsub.f32 %v12869_v31, %v5256_v8  ;;  %5288 = vmax.xlane.f32.xlu1 %v5287_v28  ;;  %v5290_v8 = vsel %vm5205_vm10, %v12998_v37, -inf }
0x109b   : > { %v13068_v30 = vpop.eup %9396 }
0x109c   : > { %v5494_v4 = vmul.f32 1.442695, %v5414_v63  ;;  %v5635_v49 = vsel %vm5205_vm10, %v13068_v30, 0.0  ;;  %v9399_v41 = vpop.eup %9398  ;;  %v5278_v63 = vsel %vm5205_vm10, %v12968_v62, -inf }
0x109d   : > { %5276 = vmax.xlane.f32.xlu0 %v5275_v45  ;;  %5636 = vadd.xlane.f32.xlu2 %v5635_v49  ;;  %v5854_v5 = vmul.f32 %v9399_v41, %v12934_v14  ;;  %v13088_v14 = vpop.f32.mrf.mxu0  ;;  %v9718_v49 = vld [vmem:[%s14334_s12 + $0x1d0] sm:$0xff] }
0x109e   : > { %9402 = vpow2.f32 %v5494_v4  ;;  %8415 = vmatmul.msk.bf16.gmra.mxu0 %vm2548_vm5, %v4932_v48  ;;  %v4899_v4 = vmul.f32 %v9717_v21, %v12706_v7  ;;  %v4898_v48 = vmul.f32 %v9718_v49, %v12704_v18 }
0x109f   : > { %v9401_v57 = vpop.eup %9400 }
0x10a0   : > { %v5622_v31 = vpop.xlane.xlu2 %5621  ;;  %v5855_v16 = vmul.f32 %v9401_v57, %v12944_v52  ;;  %v4933_v57 = vpack.c.bf16 %v4899_v4, %v4898_v48 }
0x10a2   : > { %5291 = vmax.xlane.f32.xlu1 %v5290_v8  ;;  %v5914_v28 = vpack.c.bf16 %v5855_v16, %v5854_v5  ;;  %v5281_v5 = vsel %vm5205_vm10, %v12977_v42, -inf }
0x10a4   : > { %v13081_v32 = vpop.eup %9402  ;;  %8423 = vmatmul.msk.bf16.gmra.mxu1 %vm5205_vm10, %v5914_v28 }
0x10a5   : > { %5279 = vmax.xlane.f32.xlu0 %v5278_v63  ;;  %v5638_v58 = vsel %vm5205_vm10, %v13081_v32, 0.0  ;;  %v13098_v16 = vpop.f32.mrf.mxu0  ;;  %v5284_v63 = vsel %vm5205_vm10, %v12984_v2, -inf }
0x10a6   : > { %5639 = vadd.xlane.f32.xlu2 %v5638_v58  ;;  %v9719_v58 = vld [vmem:[%s14334_s12 + $0x1e8] sm:$0xff] }
0x10a8   : > { %v5265_v52 = vpop.xlane.xlu2 %5264 }
0x10a9   : > { %v5417_v45 = vsub.f32 %v12905_v3, %v5265_v52  ;;  %v4901_v52 = vmul.f32 %v9719_v58, %v12715_v59  ;;  %v5293_v59 = vsel %vm5205_vm10, %v13003_v46, -inf }
0x10ab   : > { %v5500_v41 = vmul.f32 1.442695, %v5417_v45 }
0x10ad   : > { %9404 = vpow2.f32 %v5500_v41  ;;  %v13109_v21 = vpop.f32.mrf.mxu0 }
0x10ae   : > { %5282 = vmax.xlane.f32.xlu2 %v5281_v5  ;;  %8416 = vmatmul.msk.bf16.gmra.mxu0 %vm2548_vm5, %v4933_v57  ;;  %v9721_v5 = vld [vmem:[%s14334_s12 + $0x1f8] sm:$0xff] }
0x10b0   : > { %v5268_v8 = vpop.xlane.xlu2 %5267 }
0x10b1   : > { %v5418_v7 = vsub.f32 %v12917_v12, %v5268_v8  ;;  %v9720_v12 = vld [vmem:[%s14334_s12 + $0x1e0] sm:$0xff]  ;;  %v9722_v8 = vld [vmem:[%s14334_s12 + $0x1f0] sm:$0xff] }
0x10b2   : > { %v4900_v4 = vmul.f32 %v9720_v12, %v12713_v25  ;;  %v4903_v25 = vmul.f32 %v9721_v5, %v12724_v56  ;;  %v13134_v56 = vpop.f32.mrf.mxu1 }
0x10b3   : > { %v13101_v3 = vpop.eup %9404  ;;  %v5502_v28 = vmul.f32 1.442695, %v5418_v7  ;;  %v4902_v7 = vmul.f32 %v9722_v8, %v12722_v19 }
0x10b4   : > { %v5647_v18 = vsel %vm5205_vm10, %v13101_v3, 0.0  ;;  %v4934_v48 = vpack.c.bf16 %v4901_v52, %v4900_v4 }
0x10b5   : > { %9406 = vpow2.f32 %v5502_v28  ;;  %5648 = vadd.xlane.f32.xlu0 %v5647_v18  ;;  %v13118_v41 = vpop.f32.mrf.mxu0  ;;  %v5296_v18 = vsel %vm5205_vm10, %v13016_v17, -inf }
0x10b6   : > { %5285 = vmax.xlane.f32.xlu2 %v5284_v63  ;;  %9408 = vrcp.f32 %v5622_v31  ;;  %v4935_v63 = vpack.c.bf16 %v4903_v25, %v4902_v7 }
0x10ba   : > { %v13136_v19 = vpop.f32.mrf.mxu1 }
0x10bb   : > { %v13113_v45 = vpop.eup %9406 }
0x10bc   : > { %v5650_v49 = vsel %vm5205_vm10, %v13113_v45, 0.0  ;;  %v9409_v28 = vpop.eup %9408 }
0x10bd   : > { %5651 = vadd.xlane.f32.xlu0 %v5650_v49  ;;  %v13128_v52 = vpop.f32.mrf.mxu0  ;;  %v5856_v31 = vmul.f32 %v9409_v28, %v12957_v36 }
0x10be   : > { %8417 = vmatmul.msk.bf16.gmra.mxu0 %vm2548_vm5, %v4934_v48 }
0x10c2   : > { %v13138_v48 = vpop.f32.mrf.mxu1 }
0x10c5   : > { %5294 = vmax.xlane.f32.xlu0 %v5293_v59 }
0x10c6   : > { %v5625_v57 = vpop.xlane.xlu1 %5624 }
0x10c7   : > { %9410 = vrcp.f32 %v5625_v57 }
0x10cd   : > { %v9411_v58 = vpop.eup %9410  ;;  %5297 = vmax.xlane.f32.xlu0 %v5296_v18 }
0x10ce   : > { %v5857_v12 = vmul.f32 %v9411_v58, %v12987_v51  ;;  %8418 = vmatmul.msk.bf16.gmra.mxu0 %vm2548_vm5, %v4935_v63  ;;  %v13144_v63 = vpop.f32.mrf.mxu1 }
0x10d0   : > { %v5915_v4 = vpack.c.bf16 %v5857_v12, %v5856_v31 }
0x10d2   : > { %8424 = vmatmul.msk.bf16.gmra.mxu1 %vm5205_vm10, %v5915_v4 }
0x10e5   : > { %v5628_v49 = vpop.xlane.xlu1 %5627 }
0x10e6   : > { %9412 = vrcp.f32 %v5628_v49 }
0x10ec   : > { %v9413_v51 = vpop.eup %9412 }
0x10ed   : > { %v5271_v59 = vpop.xlane.xlu1 %5270  ;;  %v5631_v57 = vpop.xlane.xlu0 %5630  ;;  %v5858_v8 = vmul.f32 %v9413_v51, %v13011_v35 }
0x10ee   : > { %v5419_v5 = vsub.f32 %v12928_v53, %v5271_v59  ;;  %9414 = vrcp.f32 %v5631_v57  ;;  %v13151_v35 = vpop.f32.mrf.mxu1 }
0x10f0   : > { %v5504_v36 = vmul.f32 1.442695, %v5419_v5  ;;  %v5299_v5 = vsel %vm5205_vm10, %v13029_v13, -inf }
0x10f2   : > { %9416 = vpow2.f32 %v5504_v36 }
0x10f4   : > { %v9415_v25 = vpop.eup %9414 }
0x10f5   : > { %v5859_v7 = vmul.f32 %v9415_v25, %v13018_v40  ;;  %v5274_v28 = vpop.xlane.xlu1 %5273 }
0x10f6   : > { %v5420_v18 = vsub.f32 %v12946_v50, %v5274_v28  ;;  %v13159_v57 = vpop.f32.mrf.mxu1 }
0x10f7   : > { %v5916_v58 = vpack.c.bf16 %v5859_v7, %v5858_v8 }
0x10f8   : > { %v13146_v31 = vpop.eup %9416  ;;  %v5506_v12 = vmul.f32 1.442695, %v5420_v18 }
0x10f9   : > { %8425 = vmatmul.msk.bf16.gmra.mxu1 %vm5205_vm10, %v5916_v58  ;;  %v5653_v53 = vsel %vm5205_vm10, %v13146_v31, 0.0  ;;  %v5302_v58 = vsel %vm5205_vm10, %v13037_v24, -inf }
0x10fa   : > { %9418 = vpow2.f32 %v5506_v12  ;;  %5654 = vadd.xlane.f32.xlu2 %v5653_v53 }
0x10fd   : > { %v5643_v4 = vpop.xlane.xlu1 %5642 }
0x1100   : > { %v13153_v40 = vpop.eup %9418 }
0x1101   : > { %v5656_v50 = vsel %vm5205_vm10, %v13153_v40, 0.0 }
0x1102   : > { %5657 = vadd.xlane.f32.xlu2 %v5656_v50 }
0x1105   : > { %v13157_v49 = vpop.xlane.xlu1 %5645 }
0x1108   : > { %v5634_v59 = vpop.xlane.xlu0 %5633 }
0x1109   : > { %9420 = vrcp.f32 %v5634_v59 }
0x110a   : > { %5300 = vmax.xlane.f32.xlu2 %v5299_v5 }
0x110d   : > { %v5289_v36 = vpop.xlane.xlu1 %5288 }
0x110e   : > { %v5425_v51 = vsub.f32 %v12991_v20, %v5289_v36 }
0x110f   : > { %v9421_v53 = vpop.eup %9420 }
0x1110   : > { %v5516_v25 = vmul.f32 1.442695, %v5425_v51  ;;  %v5277_v8 = vpop.xlane.xlu0 %5276  ;;  %v5637_v7 = vpop.xlane.xlu2 %5636  ;;  %v5860_v36 = vmul.f32 %v9421_v53, %v13056_v26 }
0x1111   : > { %v5421_v28 = vsub.f32 %v12962_v39, %v5277_v8  ;;  %9422 = vrcp.f32 %v5637_v7  ;;  %v13165_v18 = vpop.f32.mrf.mxu1 }
0x1112   : > { %9424 = vpow2.f32 %v5516_v25  ;;  %5303 = vmax.xlane.f32.xlu2 %v5302_v58 }
0x1113   : > { %v5508_v12 = vmul.f32 1.442695, %v5421_v28 }
0x1115   : > { %9426 = vpow2.f32 %v5508_v12  ;;  %v5292_v50 = vpop.xlane.xlu1 %5291 }
0x1116   : > { %v5426_v20 = vsub.f32 %v12998_v37, %v5292_v50 }
0x1117   : > { %v9423_v59 = vpop.eup %9422 }
0x1118   : > { %v13170_v5 = vpop.eup %9424  ;;  %v5861_v39 = vmul.f32 %v9423_v59, %v13068_v30  ;;  %v5518_v51 = vmul.f32 1.442695, %v5426_v20  ;;  %v5280_v8 = vpop.xlane.xlu0 %5279  ;;  %v6214_v59 = vmul.f32 %v13134_v56, %v11968_v33 }
0x1119   : > { %v5422_v7 = vsub.f32 %v12968_v62, %v5280_v8  ;;  %v5640_v10 = vpop.xlane.xlu2 %5639  ;;  %v13175_v25 = vpop.f32.mrf.mxu1  ;;  %v5671_v28 = vsel %vm5205_vm10, %v13170_v5, 0.0 }
0x111a   : > { %9428 = vpow2.f32 %v5518_v51  ;;  %5672 = vadd.xlane.f32.xlu2 %v5671_v28  ;;  %v5917_v37 = vpack.c.bf16 %v5861_v39, %v5860_v36 }
0x111b   : > { %v13179_v58 = vpop.eup %9426  ;;  %v5510_v12 = vmul.f32 1.442695, %v5422_v7  ;;  %9430 = vrcp.f32 %v5640_v10 }
0x111c   : > { %8426 = vmatmul.msk.bf16.gmra.mxu1 %vm5205_vm10, %v5917_v37  ;;  %v5659_v26 = vsel %vm5205_vm10, %v13179_v58, 0.0 }
0x111d   : > { %9432 = vpow2.f32 %v5510_v12  ;;  %5660 = vadd.xlane.f32.xlu1 %v5659_v26  ;;  %v5317_v12 = vsel %vm5205_vm10, %v13109_v21, -inf }
0x111e   : > { %9434 = vrcp.f32 %v5643_v4 }
0x1120   : > { %v13184_v62 = vpop.eup %9428 }
0x1121   : > { %v5283_v30 = vpop.xlane.xlu2 %5282  ;;  %v6074_v53 = vpop.f32.mrf.mxu1  ;;  %v5674_v50 = vsel %vm5205_vm10, %v13184_v62, 0.0 }
0x1122   : > { %v9431_v20 = vpop.eup %9430  ;;  %v5423_v10 = vsub.f32 %v12977_v42, %v5283_v30  ;;  %v6222_v36 = vmul.f32 %v6074_v53, %v11971_v15  ;;  %5675 = vadd.xlane.f32.xlu2 %v5674_v50 }
0x1123   : > { %v13192_v39 = vpop.eup %9432  ;;  %v5862_v28 = vmul.f32 %v9431_v20, %v13081_v32  ;;  %v5305_v32 = vsel %vm5205_vm10, %v13054_v38, -inf  ;;  %v5320_v20 = vsel %vm5205_vm10, %v13118_v41, -inf }
0x1124   : > { %v5512_v51 = vmul.f32 1.442695, %v5423_v10  ;;  %v13194_v4 = vadd.f32 %v6222_v36, %v6214_v59  ;;  %v5662_v8 = vsel %vm5205_vm10, %v13192_v39, 0.0  ;;  %v9435_v7 = vpop.eup %9434  ;;  %v5308_v36 = vsel %vm5205_vm10, %v13070_v27, -inf }
0x1125   : > { %5663 = vadd.xlane.f32.xlu1 %v5662_v8  ;;  %v5863_v56 = vmul.f32 %v9435_v7, %v13035_v23 }
0x1126   : > { %9436 = vpow2.f32 %v5512_v51 }
0x1127   : > { %v5918_v30 = vpack.c.bf16 %v5863_v56, %v5862_v28 }
0x1128   : > { %v5649_v37 = vpop.xlane.xlu0 %5648 }
0x1129   : > { %v5286_v42 = vpop.xlane.xlu2 %5285  ;;  %9438 = vrcp.f32 %v5649_v37 }
0x112a   : > { %v5424_v26 = vsub.f32 %v12984_v2, %v5286_v42  ;;  %5318 = vmax.xlane.f32.xlu2 %v5317_v12  ;;  %v5311_v12 = vsel %vm5205_vm10, %v13088_v14, -inf }
0x112c   : > { %v13203_v53 = vpop.eup %9436  ;;  %v5514_v50 = vmul.f32 1.442695, %v5424_v26  ;;  %8427 = vmatmul.msk.bf16.gmra.mxu1 %vm5205_vm10, %v5918_v30 }
0x112d   : > { %5306 = vmax.xlane.f32.xlu1 %v5305_v32  ;;  %v5665_v23 = vsel %vm5205_vm10, %v13203_v53, 0.0  ;;  %v13232_v32 = vpop.f32.mrf.mxu1 }
0x112e   : > { %9440 = vpow2.f32 %v5514_v50  ;;  %5666 = vadd.xlane.f32.xlu0 %v5665_v23 }
0x112f   : > { %9442 = vrcp.f32 %v13157_v49  ;;  %v9439_v59 = vpop.eup %9438 }
0x1130   : > { %v5652_v2 = vpop.xlane.xlu0 %5651  ;;  %v5865_v7 = vmul.f32 %v9439_v59, %v13101_v3  ;;  %v6216_v59 = vmul.f32 %v13138_v48, %v11968_v33 }
0x1132   : > { %5321 = vmax.xlane.f32.xlu2 %v5320_v20 }
0x1134   : > { %v13213_v10 = vpop.eup %9440 }
0x1135   : > { %v9443_v51 = vpop.eup %9442  ;;  %5309 = vmax.xlane.f32.xlu1 %v5308_v36  ;;  %v5668_v8 = vsel %vm5205_vm10, %v13213_v10, 0.0 }
0x1136   : > { %5669 = vadd.xlane.f32.xlu0 %v5668_v8  ;;  %v5864_v49 = vmul.f32 %v9443_v51, %v13046_v43  ;;  %v5323_v8 = vsel %vm5205_vm10, %v13128_v52, -inf }
0x1138   : > { %v5295_v28 = vpop.xlane.xlu0 %5294  ;;  %v5919_v37 = vpack.c.bf16 %v5865_v7, %v5864_v49  ;;  %v13245_v7 = vpop.f32.mrf.mxu0 }
0x1139   : > { %v5427_v56 = vsub.f32 %v13003_v46, %v5295_v28  ;;  %v5314_v46 = vsel %vm5205_vm10, %v13098_v16, -inf  ;;  %v5326_v49 = vsel %vm5205_vm10, %v13245_v7, -inf }
0x113b   : > { %v5520_v42 = vmul.f32 1.442695, %v5427_v56 }
0x113c   : > { %8428 = vmatmul.msk.bf16.gmra.mxu1 %vm5205_vm10, %v5919_v37 }
0x113d   : > { %9444 = vpow2.f32 %v5520_v42 }
0x113e   : > { %5312 = vmax.xlane.f32.xlu0 %v5311_v12 }
0x1140   : > { %v5298_v26 = vpop.xlane.xlu0 %5297 }
0x1141   : > { %v5428_v30 = vsub.f32 %v13016_v17, %v5298_v26 }
0x1143   : > { %v13226_v50 = vpop.eup %9444  ;;  %v5522_v3 = vmul.f32 1.442695, %v5428_v30 }
0x1144   : > { %v5677_v43 = vsel %vm5205_vm10, %v13226_v50, 0.0 }
0x1145   : > { %9446 = vpow2.f32 %v5522_v3  ;;  %5678 = vadd.xlane.f32.xlu1 %v5677_v43  ;;  %v6218_v3 = vmul.f32 %v13151_v35, %v11968_v33 }
0x1146   : > { %5315 = vmax.xlane.f32.xlu0 %v5314_v46  ;;  %9448 = vrcp.f32 %v5652_v2 }
0x114b   : > { %v13234_v23 = vpop.eup %9446 }
0x114c   : > { %v5680_v20 = vsel %vm5205_vm10, %v13234_v23, 0.0  ;;  %v9449_v48 = vpop.eup %9448 }
0x114d   : > { %5681 = vadd.xlane.f32.xlu1 %v5680_v20  ;;  %v5866_v42 = vmul.f32 %v9449_v48, %v13113_v45  ;;  %v13256_v20 = vpop.f32.mrf.mxu0 }
0x114f   : > { %v6079_v17 = vpop.f32.mrf.mxu1 }
0x1150   : > { %v6224_v36 = vmul.f32 %v6079_v17, %v11971_v15 }
0x1152   : > { %v13241_v51 = vadd.f32 %v6224_v36, %v6216_v59 }
0x1155   : > { %5324 = vmax.xlane.f32.xlu1 %v5323_v8  ;;  %v13262_v36 = vpop.f32.mrf.mxu0 }
0x1157   : > { %v13249_v56 = vpop.f32.mrf.mxu1 }
0x115d   : > { %5327 = vmax.xlane.f32.xlu1 %v5326_v49  ;;  %v13269_v48 = vpop.f32.mrf.mxu0 }
0x116d   : > { %v5655_v28 = vpop.xlane.xlu2 %5654 }
0x116e   : > { %9450 = vrcp.f32 %v5655_v28 }
0x1174   : > { %v9451_v37 = vpop.eup %9450 }
0x1175   : > { %v5867_v12 = vmul.f32 %v9451_v37, %v13146_v31  ;;  %v5658_v26 = vpop.xlane.xlu2 %5657 }
0x1176   : > { %v6084_v30 = vpop.f32.mrf.mxu1 }
0x1177   : > { %v6226_v43 = vmul.f32 %v6084_v30, %v11971_v15  ;;  %v5920_v46 = vpack.c.bf16 %v5867_v12, %v5866_v42 }
0x1179   : > { %v13258_v2 = vadd.f32 %v6226_v43, %v6218_v3  ;;  %8429 = vmatmul.msk.bf16.gmra.mxu1 %vm5205_vm10, %v5920_v46  ;;  %v13281_v43 = vpop.f32.mrf.mxu0 }
0x117d   : > { %v5301_v17 = vpop.xlane.xlu2 %5300 }
0x117e   : > { %v5429_v59 = vsub.f32 %v13029_v13, %v5301_v17  ;;  %v13275_v12 = vpop.f32.mrf.mxu1 }
0x1180   : > { %v5524_v45 = vmul.f32 1.442695, %v5429_v59 }
0x1182   : > { %9452 = vpow2.f32 %v5524_v45 }
0x1185   : > { %v5304_v31 = vpop.xlane.xlu2 %5303 }
0x1186   : > { %v5430_v8 = vsub.f32 %v13037_v24, %v5304_v31  ;;  %v5329_v31 = vsel %vm5205_vm10, %v13256_v20, -inf }
0x1188   : > { %v13265_v35 = vpop.eup %9452  ;;  %v5526_v49 = vmul.f32 1.442695, %v5430_v8  ;;  %v6220_v8 = vmul.f32 %v13165_v18, %v11968_v33 }
0x1189   : > { %v5683_v28 = vsel %vm5205_vm10, %v13265_v35, 0.0 }
0x118a   : > { %9454 = vpow2.f32 %v5526_v49  ;;  %5684 = vadd.xlane.f32.xlu0 %v5683_v28 }
0x118b   : > { %9456 = vrcp.f32 %v5658_v26 }
0x118d   : > { %v13271_v37 = vpop.xlane.xlu2 %5672 }
0x1190   : > { %v13273_v13 = vpop.eup %9454  ;;  %v5661_v42 = vpop.xlane.xlu1 %5660 }
0x1191   : > { %9458 = vrcp.f32 %v5661_v42  ;;  %v5686_v24 = vsel %vm5205_vm10, %v13273_v13, 0.0  ;;  %v9457_v30 = vpop.eup %9456 }
0x1192   : > { %5687 = vadd.xlane.f32.xlu0 %v5686_v24  ;;  %v5868_v17 = vmul.f32 %v9457_v30, %v13153_v40 }
0x1195   : > { %v13279_v3 = vpop.xlane.xlu2 %5675 }
0x1197   : > { %v9459_v46 = vpop.eup %9458 }
0x1198   : > { %v5869_v26 = vmul.f32 %v9459_v46, %v13179_v58  ;;  %v5664_v59 = vpop.xlane.xlu1 %5663  ;;  %v13294_v58 = vpop.f32.mrf.mxu0 }
0x1199   : > { %v6089_v45 = vpop.f32.mrf.mxu1  ;;  %9460 = vrcp.f32 %v5664_v59 }
0x119a   : > { %v6228_v49 = vmul.f32 %v6089_v45, %v11971_v15  ;;  %5330 = vmax.xlane.f32.xlu0 %v5329_v31  ;;  %v5921_v28 = vpack.c.bf16 %v5869_v26, %v5868_v17  ;;  %v5332_v17 = vsel %vm5205_vm10, %v13262_v36, -inf }
0x119c   : > { %v13290_v42 = vadd.f32 %v6228_v49, %v6220_v8  ;;  %8430 = vmatmul.msk.bf16.gmra.mxu1 %vm5205_vm10, %v5921_v28 }
0x119d   : > { %v5319_v24 = vpop.xlane.xlu2 %5318 }
0x119e   : > { %v5435_v40 = vsub.f32 %v13109_v21, %v5319_v24 }
0x119f   : > { %v9461_v31 = vpop.eup %9460 }
0x11a0   : > { %v5536_v30 = vmul.f32 1.442695, %v5435_v40  ;;  %v5307_v46 = vpop.xlane.xlu1 %5306 }
0x11a1   : > { %v5431_v29 = vsub.f32 %v13054_v38, %v5307_v46  ;;  %v5667_v6 = vpop.xlane.xlu0 %5666  ;;  %v13297_v18 = vpop.f32.mrf.mxu1 }
0x11a2   : > { %9462 = vpow2.f32 %v5536_v30  ;;  %5333 = vmax.xlane.f32.xlu0 %v5332_v17  ;;  %v13307_v46 = vpop.f32.mrf.mxu0 }
0x11a3   : > { %v5528_v26 = vmul.f32 1.442695, %v5431_v29  ;;  %9464 = vrcp.f32 %v5667_v6  ;;  %v5870_v29 = vmul.f32 %v9461_v31, %v13192_v39 }
0x11a5   : > { %9466 = vpow2.f32 %v5528_v26  ;;  %v5322_v45 = vpop.xlane.xlu2 %5321 }
0x11a6   : > { %v5436_v21 = vsub.f32 %v13118_v41, %v5322_v45 }
0x11a8   : > { %v13302_v8 = vpop.eup %9462  ;;  %v5538_v59 = vmul.f32 1.442695, %v5436_v21  ;;  %v5310_v49 = vpop.xlane.xlu1 %5309 }
0x11a9   : > { %v9465_v38 = vpop.eup %9464  ;;  %v5432_v28 = vsub.f32 %v13070_v27, %v5310_v49  ;;  %v5670_v24 = vpop.xlane.xlu0 %5669  ;;  %v5701_v30 = vsel %vm5205_vm10, %v13302_v8, 0.0 }
0x11aa   : > { %v6094_v40 = vpop.f32.mrf.mxu1  ;;  %v5871_v6 = vmul.f32 %v9465_v38, %v13203_v53  ;;  %9468 = vpow2.f32 %v5538_v59  ;;  %5702 = vadd.xlane.f32.xlu0 %v5701_v30  ;;  %v13330_v38 = vpop.f32.mrf.mxu0 }
0x11ab   : > { %v6238_v41 = vmul.f32 %v6094_v40, %v12049_v47  ;;  %v13312_v17 = vpop.eup %9466  ;;  %v5530_v26 = vmul.f32 1.442695, %v5432_v28 }
0x11ac   : > { %v5922_v45 = vpack.c.bf16 %v5871_v6, %v5870_v29  ;;  %v5689_v21 = vsel %vm5205_vm10, %v13312_v17, 0.0 }
0x11ad   : > { %v13315_v27 = vadd.f32 %v6238_v41, %v13194_v4  ;;  %9470 = vpow2.f32 %v5530_v26  ;;  %5690 = vadd.xlane.f32.xlu2 %v5689_v21 }
0x11ae   : > { %8431 = vmatmul.msk.bf16.gmra.mxu1 %vm5205_vm10, %v5922_v45  ;;  %9472 = vrcp.f32 %v5670_v24 }
0x11af   : > { %9474 = vrcp.f32 %v13271_v37 }
0x11b0   : > { %v13320_v39 = vpop.eup %9468 }
0x11b1   : > { %v5313_v53 = vpop.xlane.xlu0 %5312  ;;  %v5704_v4 = vsel %vm5205_vm10, %v13320_v39, 0.0 }
0x11b2   : > { %v13323_v31 = vpop.f32.mrf.mxu1  ;;  %v5433_v59 = vsub.f32 %v13088_v14, %v5313_v53  ;;  %5705 = vadd.xlane.f32.xlu0 %v5704_v4  ;;  %v5347_v14 = vsel %vm5205_vm10, %v13330_v38, -inf }
0x11b3   : > { %v13328_v49 = vpop.eup %9470 }
0x11b4   : > { %v5532_v28 = vmul.f32 1.442695, %v5433_v59  ;;  %v5692_v24 = vsel %vm5205_vm10, %v13328_v49, 0.0  ;;  %v9473_v40 = vpop.eup %9472 }
0x11b5   : > { %5693 = vadd.xlane.f32.xlu2 %v5692_v24  ;;  %v9475_v37 = vpop.eup %9474  ;;  %v5872_v30 = vmul.f32 %v9473_v40, %v13213_v10 }
0x11b6   : > { %9476 = vpow2.f32 %v5532_v28  ;;  %v5873_v26 = vmul.f32 %v9475_v37, %v13170_v5  ;;  %v5335_v28 = vsel %vm5205_vm10, %v13269_v48, -inf  ;;  %v13349_v5 = vpop.f32.mrf.mxu0  ;;  %v5338_v37 = vsel %vm5205_vm10, %v13281_v43, -inf }
0x11b8   : > { %v5679_v29 = vpop.xlane.xlu1 %5678  ;;  %v5923_v10 = vpack.c.bf16 %v5873_v26, %v5872_v30 }
0x11b9   : > { %v5316_v6 = vpop.xlane.xlu0 %5315 }
0x11ba   : > { %v6099_v41 = vpop.f32.mrf.mxu1  ;;  %v5434_v45 = vsub.f32 %v13098_v16, %v5316_v6  ;;  %5348 = vmax.xlane.f32.xlu0 %v5347_v14 }
0x11bb   : > { %v6240_v21 = vmul.f32 %v6099_v41, %v12049_v47 }
0x11bc   : > { %v13340_v53 = vpop.eup %9476  ;;  %v5534_v4 = vmul.f32 1.442695, %v5434_v45 }
0x11bd   : > { %v13343_v59 = vadd.f32 %v6240_v21, %v13241_v51  ;;  %5336 = vmax.xlane.f32.xlu2 %v5335_v28  ;;  %v5695_v24 = vsel %vm5205_vm10, %v13340_v53, 0.0  ;;  %v5350_v51 = vsel %vm5205_vm10, %v13349_v5, -inf }
0x11be   : > { %9478 = vpow2.f32 %v5534_v4  ;;  %8432 = vmatmul.msk.bf16.gmra.mxu1 %vm5205_vm10, %v5923_v10  ;;  %5696 = vadd.xlane.f32.xlu1 %v5695_v24  ;;  %v5341_v4 = vsel %vm5205_vm10, %v13294_v58, -inf }
0x11bf   : > { %9480 = vrcp.f32 %v5679_v29 }
0x11c0   : > { %v5682_v16 = vpop.xlane.xlu1 %5681  ;;  %9482 = vrcp.f32 %v13279_v3 }
0x11c2   : > { %5351 = vmax.xlane.f32.xlu0 %v5350_v51 }
0x11c4   : > { %v13355_v40 = vpop.eup %9478 }
0x11c5   : > { %v9481_v30 = vpop.eup %9480  ;;  %5339 = vmax.xlane.f32.xlu2 %v5338_v37  ;;  %v5698_v6 = vsel %vm5205_vm10, %v13355_v40, 0.0 }
0x11c6   : > { %5699 = vadd.xlane.f32.xlu1 %v5698_v6  ;;  %v9483_v41 = vpop.eup %9482  ;;  %v5875_v29 = vmul.f32 %v9481_v30, %v13226_v50 }
0x11c7   : > { %v5874_v26 = vmul.f32 %v9483_v41, %v13184_v62  ;;  %v5344_v62 = vsel %vm5205_vm10, %v13307_v46, -inf }
0x11c8   : > { %v5325_v14 = vpop.xlane.xlu1 %5324 }
0x11c9   : > { %v5437_v3 = vsub.f32 %v13128_v52, %v5325_v14  ;;  %v5924_v21 = vpack.c.bf16 %v5875_v29, %v5874_v26  ;;  %v8764_v29 = vld [vmem:[%s10844_s0 + $0x18] sm:$0xff]  ;;  %v13387_v14 = vpop.f32.mrf.mxu1 }
0x11ca   : > { %6386 = vmatpush.bf16.msrb.mxu3 %v8764_v29 }
0x11cb   : > { %v5540_v45 = vmul.f32 1.442695, %v5437_v3 }
0x11cd   : > { %9484 = vpow2.f32 %v5540_v45 }
0x11ce   : > { %8433 = vmatmul.msk.bf16.gmra.mxu1 %vm5205_vm10, %v5924_v21  ;;  %5342 = vmax.xlane.f32.xlu1 %v5341_v4 }
0x11d0   : > { %v5328_v10 = vpop.xlane.xlu1 %5327 }
0x11d1   : > { %v5438_v28 = vsub.f32 %v13245_v7, %v5328_v10  ;;  %v13378_v7 = vpop.f32.mrf.mxu0 }
0x11d2   : > { %v5353_v30 = vsel %vm5205_vm10, %v13378_v7, -inf }
0x11d3   : > { %v13368_v24 = vpop.eup %9484  ;;  %v5542_v50 = vmul.f32 1.442695, %v5438_v28 }
0x11d4   : > { %v5707_v52 = vsel %vm5205_vm10, %v13368_v24, 0.0 }
0x11d5   : > { %9486 = vpow2.f32 %v5542_v50  ;;  %5708 = vadd.xlane.f32.xlu2 %v5707_v52 }
0x11d6   : > { %5345 = vmax.xlane.f32.xlu1 %v5344_v62  ;;  %9488 = vrcp.f32 %v5682_v16 }
0x11d9   : > { %v13382_v6 = vpop.f32.mrf.mxu0 }
0x11da   : > { %v5356_v41 = vsel %vm5205_vm10, %v13382_v6, -inf }
0x11db   : > { %v13374_v51 = vpop.eup %9486 }
0x11dc   : > { %v5710_v37 = vsel %vm5205_vm10, %v13374_v51, 0.0  ;;  %v9489_v4 = vpop.eup %9488 }
0x11dd   : > { %5711 = vadd.xlane.f32.xlu2 %v5710_v37  ;;  %v5876_v28 = vmul.f32 %v9489_v4, %v13234_v23 }
0x11e1   : > { %v13395_v37 = vpop.f32.mrf.mxu0 }
0x11e5   : > { %5354 = vmax.xlane.f32.xlu2 %v5353_v30 }
0x11e9   : > { %v13401_v16 = vpop.f32.mrf.mxu0 }
0x11ed   : > { %5357 = vmax.xlane.f32.xlu2 %v5356_v41 }
0x11f6   : > { %v6104_v3 = vpop.f32.mrf.mxu1 }
0x11f7   : > { %v6242_v26 = vmul.f32 %v6104_v3, %v12049_v47 }
0x11f9   : > { %v13391_v45 = vadd.f32 %v6242_v26, %v13258_v2 }
0x11fd   : > { %v5685_v21 = vpop.xlane.xlu0 %5684 }
0x11fe   : > { %9490 = vrcp.f32 %v5685_v21  ;;  %v13399_v29 = vpop.f32.mrf.mxu1 }
0x1204   : > { %v9491_v10 = vpop.eup %9490 }
0x1205   : > { %v5877_v50 = vmul.f32 %v9491_v10, %v13265_v35  ;;  %v5688_v52 = vpop.xlane.xlu0 %5687 }
0x1207   : > { %v5925_v62 = vpack.c.bf16 %v5877_v50, %v5876_v28 }
0x1209   : > { %8434 = vmatmul.msk.bf16.gmra.mxu1 %vm5205_vm10, %v5925_v62 }
0x120d   : > { %v5331_v30 = vpop.xlane.xlu0 %5330 }
0x120e   : > { %v5439_v41 = vsub.f32 %v13256_v20, %v5331_v30  ;;  %v13409_v20 = vpop.f32.mrf.mxu0 }
0x1210   : > { %v5544_v2 = vmul.f32 1.442695, %v5439_v41 }
0x1212   : > { %9492 = vpow2.f32 %v5544_v2 }
0x1215   : > { %v5334_v3 = vpop.xlane.xlu0 %5333 }
0x1216   : > { %v5440_v23 = vsub.f32 %v13262_v36, %v5334_v3 }
0x1218   : > { %v13404_v26 = vpop.eup %9492  ;;  %v5546_v35 = vmul.f32 1.442695, %v5440_v23  ;;  %v13424_v23 = vpop.f32.mrf.mxu0 }
0x1219   : > { %v6109_v21 = vpop.f32.mrf.mxu1  ;;  %v5713_v4 = vsel %vm5205_vm10, %v13404_v26, 0.0 }
0x121a   : > { %9494 = vpow2.f32 %v5546_v35  ;;  %v6244_v10 = vmul.f32 %v6109_v21, %v12049_v47  ;;  %5714 = vadd.xlane.f32.xlu1 %v5713_v4  ;;  %v5359_v4 = vsel %vm5205_vm10, %v13395_v37, -inf }
0x121b   : > { %9496 = vrcp.f32 %v5688_v52 }
0x121c   : > { %v13412_v28 = vadd.f32 %v6244_v10, %v13290_v42 }
0x121d   : > { %v13414_v50 = vpop.xlane.xlu0 %5702 }
0x1220   : > { %v13416_v36 = vpop.eup %9494  ;;  %v5691_v62 = vpop.xlane.xlu2 %5690 }
0x1221   : > { %9498 = vrcp.f32 %v5691_v62  ;;  %v13418_v30 = vpop.f32.mrf.mxu1  ;;  %v5716_v41 = vsel %vm5205_vm10, %v13416_v36, 0.0  ;;  %v9497_v2 = vpop.eup %9496 }
0x1222   : > { %5717 = vadd.xlane.f32.xlu1 %v5716_v41  ;;  %v5878_v35 = vmul.f32 %v9497_v2, %v13273_v13  ;;  %v13436_v13 = vpop.f32.mrf.mxu0 }
0x1225   : > { %v13422_v3 = vpop.xlane.xlu0 %5705 }
0x1227   : > { %v9499_v42 = vpop.eup %9498 }
0x1228   : > { %v5879_v52 = vmul.f32 %v9499_v42, %v13312_v17  ;;  %v5694_v21 = vpop.xlane.xlu2 %5693 }
0x1229   : > { %9500 = vrcp.f32 %v5694_v21 }
0x122a   : > { %5360 = vmax.xlane.f32.xlu1 %v5359_v4  ;;  %v5926_v10 = vpack.c.bf16 %v5879_v52, %v5878_v35  ;;  %v5362_v35 = vsel %vm5205_vm10, %v13401_v16, -inf }
0x122b   : > { %v6114_v62 = vpop.f32.mrf.mxu1 }
0x122c   : > { %v6254_v11 = vmul.f32 %v6114_v62, %v12160_v55  ;;  %8435 = vmatmul.msk.bf16.gmra.mxu1 %vm5205_vm10, %v5926_v10 }
0x122d   : > { %v5349_v41 = vpop.xlane.xlu0 %5348 }
0x122e   : > { %v13433_v34 = vadd.f32 %v6254_v11, %v13315_v27  ;;  %v5445_v60 = vsub.f32 %v13330_v38, %v5349_v41 }
0x122f   : > { %v9501_v38 = vpop.eup %9500 }
0x1230   : > { %v5556_v17 = vmul.f32 1.442695, %v5445_v60  ;;  %v5337_v2 = vpop.xlane.xlu2 %5336 }
0x1231   : > { %v5697_v42 = vpop.xlane.xlu1 %5696  ;;  %v5441_v4 = vsub.f32 %v13269_v48, %v5337_v2 }
0x1232   : > { %9502 = vpow2.f32 %v5556_v17  ;;  %5363 = vmax.xlane.f32.xlu1 %v5362_v35 }
0x1233   : > { %9504 = vrcp.f32 %v5697_v42  ;;  %v5548_v52 = vmul.f32 1.442695, %v5441_v4  ;;  %v13441_v10 = vpop.f32.mrf.mxu1  ;;  %v13449_v42 = vpop.f32.mrf.mxu0  ;;  %v5880_v4 = vmul.f32 %v9501_v38, %v13328_v49 }
0x1235   : > { %9506 = vpow2.f32 %v5548_v52  ;;  %v5352_v11 = vpop.xlane.xlu0 %5351 }
0x1236   : > { %v5446_v27 = vsub.f32 %v13349_v5, %v5352_v11 }
0x1238   : > { %v13444_v60 = vpop.eup %9502  ;;  %v5558_v21 = vmul.f32 1.442695, %v5446_v27  ;;  %v5340_v62 = vpop.xlane.xlu2 %5339 }
0x1239   : > { %v9505_v41 = vpop.eup %9504  ;;  %v5700_v48 = vpop.xlane.xlu1 %5699  ;;  %v5442_v2 = vsub.f32 %v13281_v43, %v5340_v62  ;;  %v5731_v17 = vsel %vm5205_vm10, %v13444_v60, 0.0 }
0x123a   : > { %v5881_v35 = vmul.f32 %v9505_v41, %v13340_v53  ;;  %9508 = vpow2.f32 %v5558_v21  ;;  %5732 = vadd.xlane.f32.xlu1 %v5731_v17 }
0x123b   : > { %v13453_v5 = vpop.eup %9506  ;;  %v5550_v52 = vmul.f32 1.442695, %v5442_v2  ;;  %v6119_v11 = vpop.f32.mrf.mxu1 }
0x123c   : > { %v6256_v27 = vmul.f32 %v6119_v11, %v12160_v55  ;;  %v5927_v61 = vpack.c.bf16 %v5881_v35, %v5880_v4  ;;  %v5719_v43 = vsel %vm5205_vm10, %v13453_v5, 0.0 }
0x123d   : > { %9510 = vpow2.f32 %v5550_v52  ;;  %5720 = vadd.xlane.f32.xlu0 %v5719_v43 }
0x123e   : > { %v13459_v62 = vadd.f32 %v6256_v27, %v13343_v59  ;;  %8436 = vmatmul.msk.bf16.gmra.mxu1 %vm5205_vm10, %v5927_v61  ;;  %9512 = vrcp.f32 %v5700_v48  ;;  %v13472_v59 = vpop.f32.mrf.mxu0 }
0x123f   : > { %9514 = vrcp.f32 %v13414_v50 }
0x1240   : > { %v13462_v49 = vpop.eup %9508 }
0x1241   : > { %v5343_v53 = vpop.xlane.xlu1 %5342  ;;  %v5734_v38 = vsel %vm5205_vm10, %v13462_v49, 0.0 }
0x1242   : > { %v5443_v21 = vsub.f32 %v13294_v58, %v5343_v53  ;;  %5735 = vadd.xlane.f32.xlu1 %v5734_v38  ;;  %v5377_v58 = vsel %vm5205_vm10, %v13472_v59, -inf }
0x1243   : > { %v13468_v41 = vpop.eup %9510  ;;  %v13470_v2 = vpop.f32.mrf.mxu1 }
0x1244   : > { %v5552_v17 = vmul.f32 1.442695, %v5443_v21  ;;  %v5722_v61 = vsel %vm5205_vm10, %v13468_v41, 0.0  ;;  %v9513_v48 = vpop.eup %9512 }
0x1245   : > { %5723 = vadd.xlane.f32.xlu0 %v5722_v61  ;;  %v9515_v50 = vpop.eup %9514  ;;  %v5882_v4 = vmul.f32 %v9513_v48, %v13355_v40  ;;  %v5365_v40 = vsel %vm5205_vm10, %v13409_v20, -inf }
0x1246   : > { %9516 = vpow2.f32 %v5552_v17  ;;  %v5883_v11 = vmul.f32 %v9515_v50, %v13302_v8  ;;  %v13488_v48 = vpop.f32.mrf.mxu0 }
0x1247   : > { %v5380_v50 = vsel %vm5205_vm10, %v13488_v48, -inf }
0x1248   : > { %v5709_v35 = vpop.xlane.xlu2 %5708  ;;  %v5928_v17 = vpack.c.bf16 %v5883_v11, %v5882_v4 }
0x1249   : > { %v5346_v52 = vpop.xlane.xlu1 %5345 }
0x124a   : > { %v5444_v27 = vsub.f32 %v13307_v46, %v5346_v52  ;;  %5378 = vmax.xlane.f32.xlu1 %v5377_v58  ;;  %v5368_v52 = vsel %vm5205_vm10, %v13424_v23, -inf }
0x124b   : > { %v6124_v43 = vpop.f32.mrf.mxu1 }
0x124c   : > { %v13481_v53 = vpop.eup %9516  ;;  %v5554_v38 = vmul.f32 1.442695, %v5444_v27  ;;  %v6258_v21 = vmul.f32 %v6124_v43, %v12160_v55 }
0x124d   : > { %v5725_v61 = vsel %vm5205_vm10, %v13481_v53, 0.0  ;;  %5366 = vmax.xlane.f32.xlu0 %v5365_v40 }
0x124e   : > { %9518 = vpow2.f32 %v5554_v38  ;;  %v13491_v8 = vadd.f32 %v6258_v21, %v13391_v45  ;;  %8437 = vmatmul.msk.bf16.gmra.mxu1 %vm5205_vm10, %v5928_v17  ;;  %5726 = vadd.xlane.f32.xlu2 %v5725_v61  ;;  %v5371_v17 = vsel %vm5205_vm10, %v13436_v13, -inf }
0x124f   : > { %9520 = vrcp.f32 %v5709_v35 }
0x1250   : > { %v5712_v46 = vpop.xlane.xlu2 %5711  ;;  %9522 = vrcp.f32 %v13422_v3 }
0x1252   : > { %5381 = vmax.xlane.f32.xlu1 %v5380_v50 }
0x1254   : > { %v13497_v4 = vpop.eup %9518 }
0x1255   : > { %v9521_v58 = vpop.eup %9520  ;;  %v5728_v45 = vsel %vm5205_vm10, %v13497_v4, 0.0  ;;  %5369 = vmax.xlane.f32.xlu0 %v5368_v52  ;;  %v8763_v52 = vld [vmem:[%s10844_s0 + $0x10] sm:$0xff] }
0x1256   : > { %5729 = vadd.xlane.f32.xlu2 %v5728_v45  ;;  %v9523_v11 = vpop.eup %9522  ;;  %v5885_v35 = vmul.f32 %v9521_v58, %v13368_v24  ;;  %6387 = vmatpush.bf16.msrb.mxu3 %v8763_v52 }
0x1257   : > { %v5884_v43 = vmul.f32 %v9523_v11, %v13320_v39  ;;  %v5374_v39 = vsel %vm5205_vm10, %v13449_v42, -inf }
0x1258   : > { %v5355_v27 = vpop.xlane.xlu2 %5354 }
0x1259   : > { %v5447_v3 = vsub.f32 %v13378_v7, %v5355_v27  ;;  %v5929_v21 = vpack.c.bf16 %v5885_v35, %v5884_v43 }
0x125b   : > { %v5560_v38 = vmul.f32 1.442695, %v5447_v3  ;;  %v13529_v3 = vpop.f32.mrf.mxu1 }
0x125d   : > { %9524 = vpow2.f32 %v5560_v38 }
0x125e   : > { %8438 = vmatmul.msk.bf16.gmra.mxu1 %vm5205_vm10, %v5929_v21  ;;  %5372 = vmax.xlane.f32.xlu2 %v5371_v17 }
0x1260   : > { %v5358_v40 = vpop.xlane.xlu2 %5357 }
0x1261   : > { %v5448_v61 = vsub.f32 %v13382_v6, %v5358_v40  ;;  %v13521_v6 = vpop.f32.mrf.mxu0 }
0x1262   : > { %v5383_v11 = vsel %vm5205_vm10, %v13521_v6, -inf }
0x1263   : > { %v13510_v50 = vpop.eup %9524  ;;  %v5562_v24 = vmul.f32 1.442695, %v5448_v61 }
0x1264   : > { %v5737_v7 = vsel %vm5205_vm10, %v13510_v50, 0.0 }
0x1265   : > { %9526 = vpow2.f32 %v5562_v24  ;;  %5738 = vadd.xlane.f32.xlu0 %v5737_v7 }
0x1266   : > { %5375 = vmax.xlane.f32.xlu2 %v5374_v39  ;;  %9528 = vrcp.f32 %v5712_v46 }
0x1269   : > { %v13525_v35 = vpop.f32.mrf.mxu0 }
0x126a   : > { %v5386_v27 = vsel %vm5205_vm10, %v13525_v35, -inf }
0x126b   : > { %v13517_v58 = vpop.eup %9526 }
0x126c   : > { %v5740_v45 = vsel %vm5205_vm10, %v13517_v58, 0.0  ;;  %v9529_v40 = vpop.eup %9528 }
0x126d   : > { %5741 = vadd.xlane.f32.xlu0 %v5740_v45  ;;  %v5886_v24 = vmul.f32 %v9529_v40, %v13374_v51 }
0x1275   : > { %5384 = vmax.xlane.f32.xlu0 %v5383_v11 }
0x127d   : > { %5387 = vmax.xlane.f32.xlu0 %v5386_v27 }
0x1286   : > { %v6129_v43 = vpop.f32.mrf.mxu1 }
0x1287   : > { %v6260_v38 = vmul.f32 %v6129_v43, %v12160_v55 }
0x1289   : > { %v13533_v21 = vadd.f32 %v6260_v38, %v13412_v28 }
0x128d   : > { %v5715_v17 = vpop.xlane.xlu1 %5714 }
0x128e   : > { %9530 = vrcp.f32 %v5715_v17  ;;  %v13539_v43 = vpop.f32.mrf.mxu1 }
0x1294   : > { %v9531_v61 = vpop.eup %9530 }
0x1295   : > { %v5887_v7 = vmul.f32 %v9531_v61, %v13404_v26  ;;  %v5718_v39 = vpop.xlane.xlu1 %5717 }
0x1297   : > { %v5930_v52 = vpack.c.bf16 %v5887_v7, %v5886_v24 }
0x1299   : > { %8439 = vmatmul.msk.bf16.gmra.mxu1 %vm5205_vm10, %v5930_v52 }
0x129d   : > { %v5361_v45 = vpop.xlane.xlu1 %5360 }
0x129e   : > { %v5449_v11 = vsub.f32 %v13395_v37, %v5361_v45  ;;  %v13556_v45 = vpop.f32.mrf.mxu0 }
0x12a0   : > { %v5564_v27 = vmul.f32 1.442695, %v5449_v11 }
0x12a2   : > { %9532 = vpow2.f32 %v5564_v27 }
0x12a5   : > { %v5364_v28 = vpop.xlane.xlu1 %5363 }
0x12a6   : > { %v5450_v46 = vsub.f32 %v13401_v16, %v5364_v28 }
0x12a8   : > { %v13542_v38 = vpop.eup %9532  ;;  %v5566_v17 = vmul.f32 1.442695, %v5450_v46 }
0x12a9   : > { %v6134_v51 = vpop.f32.mrf.mxu1  ;;  %v5743_v26 = vsel %vm5205_vm10, %v13542_v38, 0.0 }
0x12aa   : > { %9534 = vpow2.f32 %v5566_v17  ;;  %v6270_v40 = vmul.f32 %v6134_v51, %v12273_v54  ;;  %5744 = vadd.xlane.f32.xlu2 %v5743_v26  ;;  %v5389_v17 = vsel %vm5205_vm10, %v13556_v45, -inf }
0x12ab   : > { %9536 = vrcp.f32 %v5718_v39 }
0x12ac   : > { %v13548_v37 = vadd.f32 %v6270_v40, %v13433_v34 }
0x12ad   : > { %v5733_v61 = vpop.xlane.xlu1 %5732 }
0x12b0   : > { %v13550_v24 = vpop.eup %9534  ;;  %v5721_v7 = vpop.xlane.xlu0 %5720 }
0x12b1   : > { %9538 = vrcp.f32 %v5721_v7  ;;  %v13552_v16 = vpop.f32.mrf.mxu1  ;;  %v5746_v52 = vsel %vm5205_vm10, %v13550_v24, 0.0  ;;  %v9537_v11 = vpop.eup %9536 }
0x12b2   : > { %5747 = vadd.xlane.f32.xlu2 %v5746_v52  ;;  %v5888_v34 = vmul.f32 %v9537_v11, %v13416_v36  ;;  %v13566_v52 = vpop.f32.mrf.mxu0 }
0x12b5   : > { %v13558_v27 = vpop.xlane.xlu1 %5735 }
0x12b7   : > { %v9539_v28 = vpop.eup %9538 }
0x12b8   : > { %v5889_v39 = vmul.f32 %v9539_v28, %v13453_v5  ;;  %v5724_v46 = vpop.xlane.xlu0 %5723 }
0x12b9   : > { %9540 = vrcp.f32 %v5724_v46 }
0x12ba   : > { %5390 = vmax.xlane.f32.xlu2 %v5389_v17  ;;  %v5931_v51 = vpack.c.bf16 %v5889_v39, %v5888_v34  ;;  %v5392_v34 = vsel %vm5205_vm10, %v13566_v52, -inf }
0x12bb   : > { %v6139_v26 = vpop.f32.mrf.mxu1 }
0x12bc   : > { %v6272_v40 = vmul.f32 %v6139_v26, %v12273_v54  ;;  %8440 = vmatmul.msk.bf16.gmra.mxu1 %vm5205_vm10, %v5931_v51 }
0x12bd   : > { %v5379_v7 = vpop.xlane.xlu1 %5378 }
0x12be   : > { %v13569_v1 = vadd.f32 %v6272_v40, %v13459_v62  ;;  %v5455_v36 = vsub.f32 %v13472_v59, %v5379_v7 }
0x12bf   : > { %v9541_v62 = vpop.eup %9540 }
0x12c0   : > { %v5576_v5 = vmul.f32 1.442695, %v5455_v36  ;;  %v5367_v11 = vpop.xlane.xlu0 %5366  ;;  %v5890_v36 = vmul.f32 %v9541_v62, %v13468_v41 }
0x12c1   : > { %v5451_v28 = vsub.f32 %v13409_v20, %v5367_v11  ;;  %v5727_v17 = vpop.xlane.xlu2 %5726 }
0x12c2   : > { %9542 = vpow2.f32 %v5576_v5  ;;  %5393 = vmax.xlane.f32.xlu2 %v5392_v34 }
0x12c3   : > { %v5568_v39 = vmul.f32 1.442695, %v5451_v28  ;;  %9544 = vrcp.f32 %v5727_v17  ;;  %v13575_v51 = vpop.f32.mrf.mxu1 }
0x12c5   : > { %9546 = vpow2.f32 %v5568_v39  ;;  %v5382_v41 = vpop.xlane.xlu1 %5381 }
0x12c8   : > { %v13577_v26 = vpop.eup %9542  ;;  %v5370_v59 = vpop.xlane.xlu0 %5369 }
0x12c9   : > { %v9545_v40 = vpop.eup %9544  ;;  %v5452_v46 = vsub.f32 %v13424_v23, %v5370_v59  ;;  %v5730_v7 = vpop.xlane.xlu2 %5729  ;;  %v5761_v20 = vsel %vm5205_vm10, %v13577_v26, 0.0 }
0x12ca   : > { %v5891_v5 = vmul.f32 %v9545_v40, %v13481_v53  ;;  %5762 = vadd.xlane.f32.xlu2 %v5761_v20  ;;  %v5456_v40 = vsub.f32 %v13488_v48, %v5382_v41 }
0x12cb   : > { %v13584_v11 = vpop.eup %9546  ;;  %v5570_v28 = vmul.f32 1.442695, %v5452_v46  ;;  %v6144_v17 = vpop.f32.mrf.mxu1 }
0x12cc   : > { %v6274_v34 = vmul.f32 %v6144_v17, %v12273_v54  ;;  %v5932_v39 = vpack.c.bf16 %v5891_v5, %v5890_v36  ;;  %v5749_v0 = vsel %vm5205_vm10, %v13584_v11, 0.0 }
0x12cd   : > { %9548 = vpow2.f32 %v5570_v28  ;;  %5750 = vadd.xlane.f32.xlu1 %v5749_v0 }
0x12ce   : > { %v13590_v23 = vadd.f32 %v6274_v34, %v13491_v8  ;;  %8441 = vmatmul.msk.bf16.gmra.mxu1 %vm5205_vm10, %v5932_v39  ;;  %9550 = vrcp.f32 %v5730_v7  ;;  %v5578_v7 = vmul.f32 1.442695, %v5456_v40 }
0x12cf   : > { %9552 = vrcp.f32 %v5733_v61 }
0x12d1   : > { %v5373_v53 = vpop.xlane.xlu2 %5372 }
0x12d2   : > { %v5453_v62 = vsub.f32 %v13436_v13, %v5373_v53  ;;  %v13602_v13 = vpop.f32.mrf.mxu0 }
0x12d3   : > { %v13594_v59 = vpop.eup %9548  ;;  %v13597_v46 = vpop.f32.mrf.mxu1  ;;  %v5395_v40 = vsel %vm5205_vm10, %v13602_v13, -inf }
0x12d4   : > { %v5572_v20 = vmul.f32 1.442695, %v5453_v62  ;;  %v5752_v0 = vsel %vm5205_vm10, %v13594_v59, 0.0  ;;  %v9551_v8 = vpop.eup %9550 }
0x12d5   : > { %5753 = vadd.xlane.f32.xlu1 %v5752_v0  ;;  %v9553_v36 = vpop.eup %9552  ;;  %v5892_v61 = vmul.f32 %v9551_v8, %v13497_v4 }
0x12d6   : > { %9554 = vpow2.f32 %v5572_v20  ;;  %v5893_v48 = vmul.f32 %v9553_v36, %v13444_v60  ;;  %v8762_v20 = vld [vmem:[%s10844_s0 + $0x8] sm:$0xff] }
0x12d7   : > { %9556 = vpow2.f32 %v5578_v7  ;;  %6388 = vmatpush.bf16.msrb.mxu3 %v8762_v20 }
0x12d8   : > { %v5739_v5 = vpop.xlane.xlu0 %5738  ;;  %v5933_v62 = vpack.c.bf16 %v5893_v48, %v5892_v61 }
0x12d9   : > { %v5376_v28 = vpop.xlane.xlu2 %5375 }
0x12da   : > { %v5454_v17 = vsub.f32 %v13449_v42, %v5376_v28 }
0x12db   : > { %v6149_v34 = vpop.f32.mrf.mxu1 }
0x12dc   : > { %v13606_v39 = vpop.eup %9554  ;;  %v5574_v41 = vmul.f32 1.442695, %v5454_v17  ;;  %v6276_v53 = vmul.f32 %v6149_v34, %v12273_v54 }
0x12dd   : > { %5396 = vmax.xlane.f32.xlu1 %v5395_v40  ;;  %v5755_v4 = vsel %vm5205_vm10, %v13606_v39, 0.0  ;;  %v13618_v0 = vpop.eup %9556 }
0x12de   : > { %9558 = vpow2.f32 %v5574_v41  ;;  %v13615_v60 = vadd.f32 %v6276_v53, %v13533_v21  ;;  %8442 = vmatmul.msk.bf16.gmra.mxu1 %vm5205_vm10, %v5933_v62  ;;  %5756 = vadd.xlane.f32.xlu0 %v5755_v4  ;;  %v5764_v36 = vsel %vm5205_vm10, %v13618_v0, 0.0 }
0x12df   : > { %9560 = vrcp.f32 %v5739_v5 }
0x12e0   : > { %v5742_v42 = vpop.xlane.xlu0 %5741  ;;  %9562 = vrcp.f32 %v13558_v27 }
0x12e4   : > { %v13621_v8 = vpop.eup %9558 }
0x12e5   : > { %v9561_v7 = vpop.eup %9560  ;;  %5765 = vadd.xlane.f32.xlu1 %v5764_v36  ;;  %v5758_v21 = vsel %vm5205_vm10, %v13621_v8, 0.0 }
0x12e6   : > { %5759 = vadd.xlane.f32.xlu0 %v5758_v21  ;;  %v9563_v61 = vpop.eup %9562  ;;  %v5895_v5 = vmul.f32 %v9561_v7, %v13510_v50 }
0x12e7   : > { %v5894_v17 = vmul.f32 %v9563_v61, %v13462_v49 }
0x12e8   : > { %v5385_v28 = vpop.xlane.xlu0 %5384 }
0x12e9   : > { %v5457_v48 = vsub.f32 %v13521_v6, %v5385_v28  ;;  %v5934_v34 = vpack.c.bf16 %v5895_v5, %v5894_v17  ;;  %v13640_v6 = vpop.f32.mrf.mxu1 }
0x12eb   : > { %v5580_v27 = vmul.f32 1.442695, %v5457_v48 }
0x12ed   : > { %9564 = vpow2.f32 %v5580_v27 }
0x12ee   : > { %8443 = vmatmul.msk.bf16.gmra.mxu1 %vm5205_vm10, %v5934_v34 }
0x12f0   : > { %v5388_v41 = vpop.xlane.xlu0 %5387 }
0x12f1   : > { %v5458_v53 = vsub.f32 %v13525_v35, %v5388_v41 }
0x12f3   : > { %v13632_v62 = vpop.eup %9564  ;;  %v5582_v40 = vmul.f32 1.442695, %v5458_v53 }
0x12f4   : > { %v5767_v4 = vsel %vm5205_vm10, %v13632_v62, 0.0 }
0x12f5   : > { %9566 = vpow2.f32 %v5582_v40  ;;  %5768 = vadd.xlane.f32.xlu0 %v5767_v4 }
0x12f6   : > { %9568 = vrcp.f32 %v5742_v42 }
0x12fb   : > { %v13636_v50 = vpop.eup %9566 }
0x12fc   : > { %v5770_v49 = vsel %vm5205_vm10, %v13636_v50, 0.0  ;;  %v9569_v21 = vpop.eup %9568 }
0x12fd   : > { %5771 = vadd.xlane.f32.xlu2 %v5770_v49  ;;  %v5896_v5 = vmul.f32 %v9569_v21, %v13517_v58 }
0x1316   : > { %v6154_v20 = vpop.f32.mrf.mxu1 }
0x1317   : > { %v6286_v36 = vmul.f32 %v6154_v20, %v12379_v22 }
0x1319   : > { %v13644_v35 = vadd.f32 %v6286_v36, %v13548_v37 }
0x131d   : > { %v5745_v7 = vpop.xlane.xlu2 %5744 }
0x131e   : > { %9570 = vrcp.f32 %v5745_v7  ;;  %v13650_v53 = vpop.f32.mrf.mxu1 }
0x1324   : > { %v9571_v61 = vpop.eup %9570 }
0x1325   : > { %v5897_v28 = vmul.f32 %v9571_v61, %v13542_v38  ;;  %v5748_v48 = vpop.xlane.xlu2 %5747 }
0x1327   : > { %v5935_v17 = vpack.c.bf16 %v5897_v28, %v5896_v5 }
0x1329   : > { %8444 = vmatmul.msk.bf16.gmra.mxu1 %vm5205_vm10, %v5935_v17 }
0x132d   : > { %v5391_v27 = vpop.xlane.xlu2 %5390 }
0x132e   : > { %v5459_v34 = vsub.f32 %v13556_v45, %v5391_v27 }
0x1330   : > { %v5584_v41 = vmul.f32 1.442695, %v5459_v34 }
0x1332   : > { %9572 = vpow2.f32 %v5584_v41 }
0x1335   : > { %v5394_v37 = vpop.xlane.xlu2 %5393 }
0x1336   : > { %v5460_v42 = vsub.f32 %v13566_v52, %v5394_v37 }
0x1338   : > { %v13653_v40 = vpop.eup %9572  ;;  %v5586_v4 = vmul.f32 1.442695, %v5460_v42 }
0x1339   : > { %v6159_v58 = vpop.f32.mrf.mxu1  ;;  %v5773_v38 = vsel %vm5205_vm10, %v13653_v40, 0.0 }
0x133a   : > { %9574 = vpow2.f32 %v5586_v4  ;;  %v6288_v49 = vmul.f32 %v6159_v58, %v12379_v22  ;;  %5774 = vadd.xlane.f32.xlu1 %v5773_v38 }
0x133b   : > { %9576 = vrcp.f32 %v5748_v48 }
0x133c   : > { %v13659_v45 = vadd.f32 %v6288_v49, %v13569_v1 }
0x1340   : > { %v13661_v20 = vpop.eup %9574  ;;  %v5751_v36 = vpop.xlane.xlu1 %5750 }
0x1341   : > { %9578 = vrcp.f32 %v5751_v36  ;;  %v13663_v52 = vpop.f32.mrf.mxu1  ;;  %v5776_v7 = vsel %vm5205_vm10, %v13661_v20, 0.0  ;;  %v9577_v21 = vpop.eup %9576 }
0x1342   : > { %5777 = vadd.xlane.f32.xlu0 %v5776_v7  ;;  %v5898_v5 = vmul.f32 %v9577_v21, %v13550_v24 }
0x1347   : > { %v9579_v61 = vpop.eup %9578 }
0x1348   : > { %v5899_v28 = vmul.f32 %v9579_v61, %v13584_v11  ;;  %v5754_v17 = vpop.xlane.xlu1 %5753 }
0x1349   : > { %9580 = vrcp.f32 %v5754_v17 }
0x134a   : > { %v5936_v1 = vpack.c.bf16 %v5899_v28, %v5898_v5  ;;  %v5763_v5 = vpop.xlane.xlu2 %5762  ;;  %v8761_v28 = vld [vmem:[%s10844_s0] sm:$0xff]  ;;  %s14348_s0 = scalar_lea.vmem [#allocation20], %s10829_s24 }
0x134b   : > { %v6164_v27 = vpop.f32.mrf.mxu1  ;;  %6389 = vmatpush.bf16.msrb.mxu3 %v8761_v28 }
0x134c   : > { %v6290_v48 = vmul.f32 %v6164_v27, %v12379_v22  ;;  %8445 = vmatmul.msk.bf16.gmra.mxu1 %vm5205_vm10, %v5936_v1 }
0x134e   : > { %v13672_v34 = vadd.f32 %v6290_v48, %v13590_v23 }
0x134f   : > { %v9581_v11 = vpop.eup %9580 }
0x1350   : > { %v5397_v41 = vpop.xlane.xlu1 %5396  ;;  %v5900_v38 = vmul.f32 %v9581_v11, %v13594_v59 }
0x1351   : > { %v5461_v37 = vsub.f32 %v13602_v13, %v5397_v41  ;;  %v5757_v42 = vpop.xlane.xlu0 %5756 }
0x1352   : > { %9582 = vrcp.f32 %v5757_v42 }
0x1353   : > { %v5588_v4 = vmul.f32 1.442695, %v5461_v37  ;;  %v13675_v24 = vpop.f32.mrf.mxu1 }
0x1355   : > { %9584 = vpow2.f32 %v5588_v4 }
0x1358   : > { %v9583_v58 = vpop.eup %9582  ;;  %v5766_v11 = vpop.xlane.xlu1 %5765 }
0x1359   : > { %v5901_v49 = vmul.f32 %v9583_v58, %v13606_v39  ;;  %v5760_v23 = vpop.xlane.xlu0 %5759 }
0x135a   : > { %9586 = vrcp.f32 %v5760_v23 }
0x135b   : > { %v13679_v36 = vpop.eup %9584  ;;  %v6169_v7 = vpop.f32.mrf.mxu1  ;;  %v5937_v21 = vpack.c.bf16 %v5901_v49, %v5900_v38  ;;  %9588 = vrcp.f32 %v5763_v5 }
0x135c   : > { %v6292_v13 = vmul.f32 %v6169_v7, %v12379_v22  ;;  %v5779_v61 = vsel %vm5205_vm10, %v13679_v36, 0.0 }
0x135d   : > { %8446 = vmatmul.msk.bf16.gmra.mxu1 %vm5205_vm10, %v5937_v21  ;;  %5780 = vadd.xlane.f32.xlu2 %v5779_v61 }
0x135e   : > { %v6300_v59 = vadd.f32 %v6292_v13, %v13615_v60 }
0x1360   : > { %v9587_v17 = vpop.eup %9586 }
0x1361   : > { %v9589_v1 = vpop.eup %9588  ;;  %v5902_v27 = vmul.f32 %v9587_v17, %v13621_v8 }
0x1362   : > { %v5903_v48 = vmul.f32 %v9589_v1, %v13577_v26 }
0x1363   : > { %v13687_v39 = vpop.f32.mrf.mxu1 }
0x1364   : > { %v5938_v42 = vpack.c.bf16 %v5903_v48, %v5902_v27  ;;  %v8521_v27 = vld [vmem:[%s10898_s1 + $0x60] sm:$0xf]  ;;  %v8779_v48 = vld [vmem:[%s10898_s1 + $0x6c] sm:$0xf0] }
0x1368   : > { %v5769_v41 = vpop.xlane.xlu0 %5768 }
0x1369   : > { %9590 = vrcp.f32 %v5769_v41  ;;  %v8522_v41 = vor.u32 %v8779_v48, %v8521_v27  ;;  %v6271_v27 = vmul.f32 %v13552_v16, %v12273_v54 }
0x136a   : > { %9592 = vrcp.f32 %v5766_v11 }
0x136b   : > { %v6174_v37 = vpop.f32.mrf.mxu1  ;;  %6757 = vmatpush.bf16.msra.mxu2 %v8522_v41 }
0x136c   : > { %v6302_v4 = vmul.f32 %v6174_v37, %v12429_v9 }
0x136d   : > { %8447 = vmatmul.msk.bf16.gmra.mxu1 %vm5205_vm10, %v5938_v42 }
0x136e   : > { %v13694_v60 = vadd.f32 %v6302_v4, %v13644_v35 }
0x136f   : > { %v9591_v58 = vpop.eup %9590 }
0x1370   : > { %v9593_v38 = vpop.eup %9592  ;;  %v5905_v49 = vmul.f32 %v9591_v58, %v13632_v62  ;;  %v5772_v13 = vpop.xlane.xlu2 %5771 }
0x1371   : > { %v5904_v8 = vmul.f32 %v9593_v38, %v13618_v0  ;;  %9594 = vrcp.f32 %v5772_v13  ;;  %v6223_v13 = vmul.f32 %v13232_v32, %v11971_v15 }
0x1373   : > { %v5939_v26 = vpack.c.bf16 %v5905_v49, %v5904_v8  ;;  %v6176_v23 = vpop.f32.mrf.mxu1 }
0x1377   : > { %v9595_v5 = vpop.eup %9594 }
0x1378   : > { %v5906_v0 = vmul.f32 %v9595_v5, %v13636_v50  ;;  %v6255_v5 = vmul.f32 %v13441_v10, %v12160_v55 }
0x137d   : > { %8448 = vmatmul.msk.bf16.gmra.mxu1 %vm5205_vm10, %v5939_v26 }
0x13a6   : > { %v6179_v7 = vpop.f32.mrf.mxu1 }
0x13a7   : > { %v6304_v21 = vmul.f32 %v6179_v7, %v12429_v9 }
0x13a9   : > { %v13701_v35 = vadd.f32 %v6304_v21, %v13659_v45 }
0x13ad   : > { %v5775_v61 = vpop.xlane.xlu1 %5774 }
0x13ae   : > { %9596 = vrcp.f32 %v5775_v61  ;;  %v6181_v1 = vpop.f32.mrf.mxu1  ;;  %v6215_v61 = vmul.f32 %v13136_v19, %v11968_v33  ;;  %v6287_v19 = vmul.f32 %v13650_v53, %v12379_v22  ;;  %v6241_v53 = vmul.f32 %v13387_v14, %v12049_v47 }
0x13b4   : > { %v9597_v62 = vpop.eup %9596 }
0x13b5   : > { %v5907_v28 = vmul.f32 %v9597_v62, %v13653_v40  ;;  %v5778_v42 = vpop.xlane.xlu0 %5777  ;;  %v8778_v62 = vld [vmem:[%s10898_s1 + $0x6c] sm:$0xf] }
0x13b6   : > { %9598 = vrcp.f32 %v5778_v42 }
0x13b7   : > { %v5940_v17 = vpack.c.bf16 %v5907_v28, %v5906_v0  ;;  %v8531_v0 = vld [vmem:[%s10898_s1 + $0x78] sm:$0xf0] }
0x13b9   : > { %8449 = vmatmul.msk.bf16.gmra.mxu1 %vm5205_vm10, %v5940_v17 }
0x13bc   : > { %v9599_v40 = vpop.eup %9598 }
0x13bd   : > { %v5908_v38 = vmul.f32 %v9599_v40, %v13661_v20  ;;  %v6239_v20 = vmul.f32 %v13323_v31, %v12049_v47  ;;  %v6303_v31 = vmul.f32 %v6176_v23, %v12429_v9 }
0x13c9   : > { %v6184_v37 = vpop.f32.mrf.mxu1 }
0x13ca   : > { %v6306_v45 = vmul.f32 %v6184_v37, %v12429_v9 }
0x13cc   : > { %v13710_v4 = vadd.f32 %v6306_v45, %v13672_v34 }
0x13d0   : > { %v5781_v11 = vpop.xlane.xlu2 %5780 }
0x13d1   : > { %9600 = vrcp.f32 %v5781_v11  ;;  %v13712_v50 = vpop.f32.mrf.mxu1  ;;  %v6225_v11 = vmul.f32 %v13249_v56, %v11971_v15  ;;  %v6273_v56 = vmul.f32 %v13575_v51, %v12273_v54  ;;  %v6227_v51 = vmul.f32 %v13275_v12, %v11971_v15 }
0x13d2   : > { %v6291_v12 = vmul.f32 %v13675_v24, %v12379_v22 }
0x13d7   : > { %v9601_v58 = vpop.eup %9600 }
0x13d8   : > { %v5909_v49 = vmul.f32 %v9601_v58, %v13679_v36  ;;  %v6231_v36 = vadd.f32 %v6223_v13, %v6215_v61  ;;  %v6217_v58 = vmul.f32 %v13144_v63, %v11968_v33  ;;  %v6305_v13 = vmul.f32 %v6181_v1, %v12429_v9 }
0x13d9   : > { %v6243_v1 = vmul.f32 %v13399_v29, %v12049_v47 }
0x13da   : > { %v6189_v8 = vpop.f32.mrf.mxu1  ;;  %v5941_v26 = vpack.c.bf16 %v5909_v49, %v5908_v38  ;;  %v6247_v17 = vadd.f32 %v6239_v20, %v6231_v36  ;;  %v6233_v38 = vadd.f32 %v6225_v11, %v6217_v58  ;;  %v6257_v49 = vmul.f32 %v13470_v2, %v12160_v55 }
0x13db   : > { %v6308_v7 = vmul.f32 %v6189_v8, %v12429_v9  ;;  %v6221_v11 = vmul.f32 %v13175_v25, %v11968_v33 }
0x13dc   : > { %8450 = vmatmul.msk.bf16.gmra.mxu1 %vm5205_vm10, %v5941_v26  ;;  %v6263_v32 = vadd.f32 %v6255_v5, %v6247_v17  ;;  %v6249_v26 = vadd.f32 %v6241_v53, %v6233_v38 }
0x13dd   : > { %v13718_v34 = vadd.f32 %v6308_v7, %v6300_v59  ;;  %v8534_v59 = vor.u32 %v8778_v62, %v8531_v0  ;;  %v6289_v7 = vmul.f32 %v13663_v52, %v12379_v22  ;;  %v6219_v52 = vmul.f32 %v13159_v57, %v11968_v33 }
0x13de   : > { %v6279_v48 = vadd.f32 %v6271_v27, %v6263_v32  ;;  %v6275_v27 = vmul.f32 %v13597_v46, %v12273_v54  ;;  %v6307_v57 = vmul.f32 %v13712_v50, %v12429_v9  ;;  %v8505_v46 = vld [vmem:[%s10898_s1 + $0x40] sm:$0xf]  ;;  %v6229_v50 = vmul.f32 %v13297_v18, %v11971_v15 }
0x13df   : > { %6844 = vmatpush.bf16.msrb.mxu0 %v8534_v59  ;;  %v6259_v59 = vmul.f32 %v13529_v3, %v12160_v55  ;;  %v6293_v15 = vmul.f32 %v13687_v39, %v12379_v22  ;;  %v9052_v22 = vld [vmem:[%s14348_s0] ss:$0 sm:$0xff] }
0x13e0   : > { %v6295_v41 = vadd.f32 %v6287_v19, %v6279_v48 }
0x13e2   : > { %v13720_v21 = vpop.f32.mrf.mxu1  ;;  %v6311_v45 = vadd.f32 %v6303_v31, %v6295_v41 }
0x13ea   : > { %v6194_v28 = vpop.f32.mrf.mxu1 }
0x13eb   : > { %v6318_v37 = vmul.f32 %v6194_v28, %v12482_v44  ;;  %v6235_v28 = vadd.f32 %v6227_v51, %v6219_v52 }
0x13ed   : > { %v6326_v16 = vadd.f32 %v6318_v37, %v13694_v60  ;;  %v6265_v60 = vadd.f32 %v6257_v49, %v6249_v26  ;;  %v8515_v26 = vld [vmem:[%s10898_s1 + $0x58] sm:$0xf0] }
0x13ef   : > { %v6281_v63 = vadd.f32 %v6273_v56, %v6265_v60 }
0x13f1   : > { %v6297_v14 = vadd.f32 %v6289_v7, %v6281_v63  ;;  %v14350_v7 = vld [vmem:[#allocation80_spill] sm:$0xff] }
0x13f2   : > { %v6196_v10 = vpop.f32.mrf.mxu1 }
0x13f3   : > { %v6319_v42 = vmul.f32 %v6196_v10, %v12482_v44  ;;  %v6313_v36 = vadd.f32 %v6305_v13, %v6297_v14 }
0x13f5   : > { %v6327_v40 = vadd.f32 %v6319_v42, %v6311_v45  ;;  %v8775_v42 = vld [vmem:[%s10898_s1 + $0x4c] sm:$0xf0] }
0x13f6   : > { %v8506_v24 = vor.u32 %v8775_v42, %v8505_v46 }
0x13f7   : > { %v6342_v23 = vpack.c.bf16 %v6327_v40, %v6326_v16  ;;  %v6245_v16 = vmul.f32 %v13418_v30, %v12049_v47  ;;  %v6237_v40 = vadd.f32 %v6229_v50, %v6221_v11  ;;  %v6309_v47 = vmul.f32 %v13720_v21, %v12429_v9  ;;  %v14349_v9 = vld [vmem:[#allocation79_spill] sm:$0xff]  ;;  %v8770_v11 = vld [vmem:[%s10898_s1 + $0x2c] sm:$0xf] }
0x13f8   : > { %6758 = vmatpush.bf16.msra.mxu2 %v8506_v24  ;;  %v8787_v24 = vld [vmem:[%s10901_s19 + $0x30] sm:$0xff] }
0x13f9   : > { %8467 = vmatmul.msk.bf16.vlgmr.msrb.gmra.mxu3 %vm2548_vm5, %v6342_v23  ;;  %v6253_v53 = vadd.f32 %v6245_v16, %v6237_v40  ;;  %v6277_v23 = vmul.f32 %v13640_v6, %v12273_v54  ;;  %v8774_v6 = vld [vmem:[%s10898_s1 + $0x4c] sm:$0xf]  ;;  %v8499_v16 = vld [vmem:[%s10898_s1 + $0x38] sm:$0xf0] }
0x13fa   : > { %v6199_v8 = vpop.f32.mrf.mxu1  ;;  %v8518_v39 = vor.u32 %v8774_v6, %v8515_v26  ;;  %v14356_v40 = vld [vmem:[#allocation78_spill] sm:$0xff] }
0x13fb   : > { %v6320_v61 = vmul.f32 %v6199_v8, %v12482_v44 }
0x13fc   : > { %6845 = vmatpush.bf16.msrb.mxu0 %v8518_v39 }
0x13fd   : > { %v6328_v5 = vadd.f32 %v6320_v61, %v13701_v35  ;;  %v6251_v35 = vadd.f32 %v6243_v1, %v6235_v28  ;;  %v8788_v28 = vld [vmem:[%s10901_s19 + $0x38] sm:$0xff] }
0x13fe   : > { %7165 = vmatpush.bf16.msrb.mxu1 %v8788_v28 }
0x13ff   : > { %v6267_v32 = vadd.f32 %v6259_v59, %v6251_v35  ;;  %v8489_v59 = vld [vmem:[%s10898_s1 + $0x20] sm:$0xf] }
0x1401   : > { %v6283_v19 = vadd.f32 %v6275_v27, %v6267_v32  ;;  %v14353_v32 = vld [vmem:[#allocation83_spill] sm:$0xff] }
0x1402   : > { %v6201_v20 = vpop.f32.mrf.mxu1  ;;  %7166 = vmatpush.bf16.msrb.mxu1 %v8787_v24 }
0x1403   : > { %v6321_v2 = vmul.f32 %v6201_v20, %v12482_v44  ;;  %v6299_v29 = vadd.f32 %v6291_v12, %v6283_v19  ;;  %v14351_v20 = vld [vmem:[#allocation81_spill] sm:$0xff] }
0x1405   : > { %v6329_v62 = vadd.f32 %v6321_v2, %v6313_v36  ;;  %v6315_v3 = vadd.f32 %v6307_v57, %v6299_v29 }
0x1407   : > { %v6343_v0 = vpack.c.bf16 %v6329_v62, %v6328_v5 }
0x1409   : > { %8468 = vmatmul.msk.bf16.gmra.mxu3 %vm2548_vm5, %v6343_v0  ;;  %v14352_v0 = vld [vmem:[#allocation82_spill] sm:$0xff] }
0x1436   : > { %v6204_v17 = vpop.f32.mrf.mxu1 }
0x1437   : > { %v6322_v48 = vmul.f32 %v6204_v17, %v12482_v44  ;;  %v8771_v17 = vld [vmem:[%s10898_s1 + $0x2c] sm:$0xf0] }
0x1438   : > { %v8490_v35 = vor.u32 %v8771_v17, %v8489_v59 }
0x1439   : > { %v6330_v37 = vadd.f32 %v6322_v48, %v13710_v4  ;;  %v6261_v4 = vmul.f32 %v13539_v43, %v12160_v55  ;;  %v14354_v48 = vld [vmem:[#allocation84_spill] sm:$0xff] }
0x143a   : > { %6759 = vmatpush.bf16.msra.mxu2 %v8490_v35 }
0x143b   : > { %v6269_v38 = vadd.f32 %v6261_v4, %v6253_v53 }
0x143d   : > { %v6285_v33 = vadd.f32 %v6277_v23, %v6269_v38 }
0x143e   : > { %v6206_v31 = vpop.f32.mrf.mxu1 }
0x143f   : > { %v6323_v41 = vmul.f32 %v6206_v31, %v12482_v44  ;;  %v6301_v25 = vadd.f32 %v6293_v15, %v6285_v33  ;;  %v14357_v15 = vld [vmem:[#allocation86_spill] sm:$0xff] }
0x1441   : > { %v6331_v10 = vadd.f32 %v6323_v41, %v6315_v3  ;;  %v6317_v30 = vadd.f32 %v6309_v47, %v6301_v25 }
0x1443   : > { %v6344_v45 = vpack.c.bf16 %v6331_v10, %v6330_v37  ;;  %v14355_v10 = vld [vmem:[#allocation85_spill] sm:$0xff] }
0x1445   : > { %8469 = vmatmul.msk.bf16.gmra.mxu3 %vm2548_vm5, %v6344_v45 }
0x1459   : > { %v6209_v58 = vpop.f32.mrf.mxu1 }
0x145a   : > { %v6324_v18 = vmul.f32 %v6209_v58, %v12482_v44  ;;  %v8502_v58 = vor.u32 %v8770_v11, %v8499_v16 }
0x145c   : > { %v6332_v49 = vadd.f32 %v6324_v18, %v13718_v34  ;;  %6846 = vmatpush.bf16.msrb.mxu0 %v8502_v58  ;;  %v8475_v58 = vld [vmem:[%s10898_s1 + $0x10] sm:$0xf0] }
0x1461   : > { %v6211_v55 = vpop.f32.mrf.mxu1 }
0x1462   : > { %v6325_v43 = vmul.f32 %v6211_v55, %v12482_v44 }
0x1464   : > { %v6333_v8 = vadd.f32 %v6325_v43, %v6317_v30 }
0x1466   : > { %v6345_v54 = vpack.c.bf16 %v6333_v8, %v6332_v49 }
0x1468   : > { %8470 = vmatmul.msk.bf16.gmra.mxu3 %vm2548_vm5, %v6345_v54 }
0x147c   : > { %v6391_v56 = vpop.f32.mrf.mxu3 }
0x147d   : > { %v6411_v21 = vadd.f32 %v6391_v56, %v14349_v9 }
0x147f   : > { %v13801_v60 = vadd.f32 %v9052_v22, %v6411_v21 }
0x1481   : > { %v6433_v44 = vsel %vm2548_vm5, %v13801_v60, 0.0 }
0x1482   : > { %6434 = vadd.xlane.f32.xlu1 %v6433_v44 }
0x1484   : > { %v6393_v34 = vpop.f32.mrf.mxu3 }
0x1485   : > { %v6412_v63 = vadd.f32 %v6393_v34, %v14350_v7  ;;  %v8786_v7 = vld [vmem:[%s10901_s19 + $0x28] sm:$0xff] }
0x1486   : > { %7167 = vmatpush.bf16.msrb.mxu1 %v8786_v7 }
0x1487   : > { %v13806_v13 = vadd.f32 %v9052_v22, %v6412_v63 }
0x1489   : > { %v6436_v14 = vsel %vm2548_vm5, %v13806_v13, 0.0 }
0x148a   : > { %6437 = vadd.xlane.f32.xlu0 %v6436_v14 }
0x148c   : > { %v6396_v61 = vpop.f32.mrf.mxu3 }
0x148d   : > { %v6413_v36 = vadd.f32 %v6396_v61, %v14351_v20 }
0x148f   : > { %v13811_v2 = vadd.f32 %v9052_v22, %v6413_v36  ;;  %v8473_v36 = vld [vmem:[%s10898_s1] sm:$0xf] }
0x1491   : > { %v6439_v5 = vsel %vm2548_vm5, %v13811_v2, 0.0 }
0x1492   : > { %6440 = vadd.xlane.f32.xlu2 %v6439_v5  ;;  %v8767_v5 = vld [vmem:[%s10898_s1 + $0xc] sm:$0xf0] }
0x1494   : > { %v6398_v62 = vpop.f32.mrf.mxu3 }
0x1495   : > { %v6414_v51 = vadd.f32 %v6398_v62, %v14352_v0  ;;  %v8474_v0 = vor.u32 %v8767_v5, %v8473_v36 }
0x1497   : > { %v13816_v52 = vadd.f32 %v9052_v22, %v6414_v51  ;;  %6760 = vmatpush.bf16.msra.mxu2 %v8474_v0 }
0x1499   : > { %v6442_v1 = vsel %vm2548_vm5, %v13816_v52, 0.0 }
0x149a   : > { %6443 = vadd.xlane.f32.xlu1 %v6442_v1 }
0x14c8   : > { %v6401_v27 = vpop.f32.mrf.mxu3 }
0x14c9   : > { %v6415_v12 = vadd.f32 %v6401_v27, %v14353_v32 }
0x14cb   : > { %v13824_v19 = vadd.f32 %v9052_v22, %v6415_v12  ;;  %v8777_v12 = vld [vmem:[%s10898_s1 + $0x64] sm:$0xf] }
0x14cd   : > { %v6445_v57 = vsel %vm2548_vm5, %v13824_v19, 0.0 }
0x14ce   : > { %6446 = vadd.xlane.f32.xlu0 %v6445_v57  ;;  %v8523_v57 = vld [vmem:[%s10898_s1 + $0x70] sm:$0xf0] }
0x14d0   : > { %v6403_v29 = vpop.f32.mrf.mxu3 }
0x14d1   : > { %v6416_v31 = vadd.f32 %v6403_v29, %v14354_v48  ;;  %v8526_v29 = vor.u32 %v8777_v12, %v8523_v57 }
0x14d3   : > { %v13829_v3 = vadd.f32 %v9052_v22, %v6416_v31  ;;  %6786 = vmatpush.bf16.msra.mxu3 %v8526_v29 }
0x14d5   : > { %v6448_v41 = vsel %vm2548_vm5, %v13829_v3, 0.0 }
0x14d6   : > { %6449 = vadd.xlane.f32.xlu2 %v6448_v41  ;;  %v8773_v41 = vld [vmem:[%s10898_s1 + $0x44] sm:$0xf] }
0x14eb   : > { %v6406_v37 = vpop.f32.mrf.mxu3 }
0x14ec   : > { %v6417_v45 = vadd.f32 %v6406_v37, %v14355_v10  ;;  %v8507_v37 = vld [vmem:[%s10898_s1 + $0x50] sm:$0xf0] }
0x14ed   : > { %v8510_v10 = vor.u32 %v8773_v41, %v8507_v37  ;;  %v13927_v37 = vld [vmem:[%s14359_s15] ss:$0 sm:$0xff] }
0x14ee   : > { %v13834_v46 = vadd.f32 %v9052_v22, %v6417_v45  ;;  %v8769_v45 = vld [vmem:[%s10898_s1 + $0x24] sm:$0xf] }
0x14ef   : > { %6787 = vmatpush.bf16.msra.mxu3 %v8510_v10 }
0x14f0   : > { %v6451_v42 = vsel %vm2548_vm5, %v13834_v46, 0.0 }
0x14f1   : > { %6452 = vadd.xlane.f32.xlu2 %v6451_v42  ;;  %v8491_v42 = vld [vmem:[%s10898_s1 + $0x30] sm:$0xf0] }
0x14f3   : > { %v6408_v23 = vpop.f32.mrf.mxu3 }
0x14f4   : > { %v6418_v33 = vadd.f32 %v6408_v23, %v14357_v15  ;;  %v8483_v15 = vld [vmem:[%s10898_s1 + $0x18] sm:$0xf0] }
0x14f5   : > { %v6435_v50 = vpop.xlane.xlu1 %6434 }
0x14f6   : > { %v6457_v4 = vmul.f32 %v6435_v50, %v14356_v40  ;;  %v13850_v55 = vadd.f32 %v9052_v22, %v6418_v33  ;;  %v8494_v50 = vor.u32 %v8769_v45, %v8491_v42 }
0x14f8   : > { %v13843_v53 = vsub.f32 %v13801_v60, %v6457_v4  ;;  %v6454_v8 = vsel %vm2548_vm5, %v13850_v55, 0.0  ;;  %6788 = vmatpush.bf16.msra.mxu3 %v8494_v50  ;;  %v8765_v4 = vld [vmem:[%s10898_s1 + $0x4] sm:$0xf] }
0x14f9   : > { %v8478_v23 = vor.u32 %v8765_v4, %v8475_v58 }
0x14fa   : > { %v6473_v38 = vmul.f32 %v13843_v53, %v13843_v53 }
0x14fc   : > { %v6481_v47 = vsel %vm2548_vm5, %v6473_v38, 0.0  ;;  %v8766_v38 = vld [vmem:[%s10898_s1 + $0xc] sm:$0xf]  ;;  %6789 = vmatpush.bf16.msra.mxu3 %v8478_v23 }
0x14fd   : > { %v6438_v25 = vpop.xlane.xlu0 %6437  ;;  %6482 = vadd.xlane.f32.xlu1 %v6481_v47  ;;  %v8486_v33 = vor.u32 %v8766_v38, %v8483_v15 }
0x14fe   : > { %v6458_v18 = vmul.f32 %v6438_v25, %v14356_v40 }
0x14ff   : > { %6847 = vmatpush.bf16.msrb.mxu0 %v8486_v33 }
0x1500   : > { %v13853_v30 = vsub.f32 %v13806_v13, %v6458_v18 }
0x1502   : > { %v6474_v43 = vmul.f32 %v13853_v30, %v13853_v30 }
0x1504   : > { %v6484_v49 = vsel %vm2548_vm5, %v6474_v43, 0.0 }
0x1505   : > { %6485 = vadd.xlane.f32.xlu0 %v6484_v49  ;;  %6455 = vadd.xlane.f32.xlu1 %v6454_v8  ;;  %v6441_v54 = vpop.xlane.xlu2 %6440 }
0x1506   : > { %v6459_v6 = vmul.f32 %v6441_v54, %v14356_v40 }
0x1508   : > { %v13862_v26 = vsub.f32 %v13811_v2, %v6459_v6 }
0x150a   : > { %v6475_v22 = vmul.f32 %v13862_v26, %v13862_v26 }
0x150c   : > { %v6487_v39 = vsel %vm2548_vm5, %v6475_v22, 0.0 }
0x150d   : > { %v6444_v56 = vpop.xlane.xlu1 %6443  ;;  %6488 = vadd.xlane.f32.xlu0 %v6487_v39 }
0x150e   : > { %v6460_v9 = vmul.f32 %v6444_v56, %v14356_v40 }
0x1510   : > { %v13869_v21 = vsub.f32 %v13816_v52, %v6460_v9  ;;  %v8785_v9 = vld [vmem:[%s10901_s19 + $0x20] sm:$0xff] }
0x1511   : > { %7168 = vmatpush.bf16.msrb.mxu1 %v8785_v9 }
0x1512   : > { %v6476_v44 = vmul.f32 %v13869_v21, %v13869_v21 }
0x1514   : > { %v6490_v34 = vsel %vm2548_vm5, %v6476_v44, 0.0 }
0x1515   : > { %6491 = vadd.xlane.f32.xlu2 %v6490_v34 }
0x1541   : > { %v6447_v63 = vpop.xlane.xlu0 %6446 }
0x1542   : > { %v6461_v14 = vmul.f32 %v6447_v63, %v14356_v40 }
0x1544   : > { %v13877_v61 = vsub.f32 %v13824_v19, %v6461_v14 }
0x1546   : > { %v6477_v20 = vmul.f32 %v13877_v61, %v13877_v61 }
0x1548   : > { %v6493_v62 = vsel %vm2548_vm5, %v6477_v20, 0.0 }
0x1549   : > { %6494 = vadd.xlane.f32.xlu1 %v6493_v62  ;;  %v6450_v51 = vpop.xlane.xlu2 %6449 }
0x154a   : > { %v6462_v1 = vmul.f32 %v6450_v51, %v14356_v40 }
0x154c   : > { %v13886_v28 = vsub.f32 %v13829_v3, %v6462_v1 }
0x154e   : > { %v6478_v59 = vmul.f32 %v13886_v28, %v13886_v28 }
0x1550   : > { %v6496_v17 = vsel %vm2548_vm5, %v6478_v59, 0.0 }
0x1551   : > { %6497 = vadd.xlane.f32.xlu0 %v6496_v17 }
0x1564   : > { %v6453_v35 = vpop.xlane.xlu2 %6452 }
0x1565   : > { %v6463_v27 = vmul.f32 %v6453_v35, %v14356_v40 }
0x1567   : > { %v13893_v32 = vsub.f32 %v13834_v46, %v6463_v27  ;;  %v13922_v27 = vld [vmem:[%s14358_s21] ss:$0 sm:$0xff] }
0x1569   : > { %v6479_v48 = vmul.f32 %v13893_v32, %v13893_v32 }
0x156b   : > { %v6499_v31 = vsel %vm2548_vm5, %v6479_v48, 0.0 }
0x156c   : > { %6500 = vadd.xlane.f32.xlu2 %v6499_v31 }
0x1570   : > { %v6483_v24 = vpop.xlane.xlu1 %6482 }
0x1571   : > { %v6505_v11 = vmul.f32 %v6483_v24, %v14356_v40 }
0x1573   : > { %v6513_v16 = vadd.f32 1e-05, %v6505_v11 }
0x1575   : > { %9602 = vrsqrt.f32 %v6513_v16  ;;  %vm6527_vm13 = vweird.f32 %v6513_v16 }
0x1578   : > { %v6486_v47 = vpop.xlane.xlu0 %6485  ;;  %v6456_v25 = vpop.xlane.xlu1 %6455 }
0x1579   : > { %v6506_v18 = vmul.f32 %v6486_v47, %v14356_v40  ;;  %v6464_v43 = vmul.f32 %v6456_v25, %v14356_v40 }
0x157b   : > { %v9603_v49 = vpop.eup %9602  ;;  %v6514_v8 = vadd.f32 1e-05, %v6506_v18  ;;  %v13912_v54 = vsub.f32 %v13850_v55, %v6464_v43 }
0x157c   : > { %v6522_v6 = vmul.f32 %v9603_v49, %v6513_v16  ;;  %vm6528_vm12 = vweird.f32 %v9603_v49 }
0x157d   : > { %9604 = vrsqrt.f32 %v6514_v8  ;;  %v6480_v22 = vmul.f32 %v13912_v54, %v13912_v54  ;;  %vm6529_vm14 = vmor %vm6527_vm13, %vm6528_vm12  ;;  %vm6537_vm0 = vweird.f32 %v6514_v8 }
0x157e   : > { %v6523_v39 = vmul.f32 %v9603_v49, %v6522_v6 }
0x157f   : > { %v6502_v56 = vsel %vm2548_vm5, %v6480_v22, 0.0 }
0x1580   : > { %v6524_v44 = vmul.f32 0.5, %v6523_v39  ;;  %6503 = vadd.xlane.f32.xlu1 %v6502_v56  ;;  %v6489_v34 = vpop.xlane.xlu0 %6488 }
0x1581   : > { %v6507_v7 = vmul.f32 %v6489_v34, %v14356_v40 }
0x1582   : > { %v6525_v63 = vsub.f32 1.5, %v6524_v44 }
0x1583   : > { %v9605_v14 = vpop.eup %9604  ;;  %v6515_v20 = vadd.f32 1e-05, %v6507_v7 }
0x1584   : > { %v6526_v36 = vmul.f32 %v9603_v49, %v6525_v63  ;;  %v6532_v5 = vmul.f32 %v9605_v14, %v6514_v8  ;;  %vm6538_vm15 = vweird.f32 %v9605_v14 }
0x1585   : > { %9606 = vrsqrt.f32 %v6515_v20  ;;  %vm6539_vm1 = vmor %vm6537_vm0, %vm6538_vm15  ;;  %vm6547_vm3 = vweird.f32 %v6515_v20 }
0x1586   : > { %v6533_v62 = vmul.f32 %v9605_v14, %v6532_v5  ;;  %v6530_v0 = vsel %vm6529_vm14, %v9603_v49, %v6526_v36 }
0x1587   : > { %v6601_v12 = vmul.f32 %v6530_v0, %v13843_v53 }
0x1588   : > { %v6534_v51 = vmul.f32 0.5, %v6533_v62  ;;  %v6492_v1 = vpop.xlane.xlu2 %6491 }
0x1589   : > { %v6508_v59 = vmul.f32 %v6492_v1, %v14356_v40  ;;  %v6612_v10 = vmul.f32 %v13922_v27, %v6601_v12  ;;  %v8529_v12 = vld [vmem:[%s10898_s1 + $0x68] sm:$0xf] }
0x158a   : > { %v6535_v17 = vsub.f32 1.5, %v6534_v51 }
0x158b   : > { %v9607_v35 = vpop.eup %9606  ;;  %v6516_v57 = vadd.f32 1e-05, %v6508_v59  ;;  %v6623_v11 = vadd.f32 %v13927_v37, %v6612_v10 }
0x158c   : > { %v6536_v29 = vmul.f32 %v9605_v14, %v6535_v17  ;;  %v6542_v48 = vmul.f32 %v9607_v35, %v6515_v20  ;;  %vm6548_vm2 = vweird.f32 %v9607_v35 }
0x158d   : > { %9608 = vrsqrt.f32 %v6516_v57  ;;  %vm6549_vm4 = vmor %vm6547_vm3, %vm6548_vm2  ;;  %vm6557_vm7 = vweird.f32 %v6516_v57 }
0x158e   : > { %v6540_v31 = vsel %vm6539_vm1, %v9605_v14, %v6536_v29  ;;  %v6543_v41 = vmul.f32 %v9607_v35, %v6542_v48 }
0x158f   : > { %v6602_v45 = vmul.f32 %v6540_v31, %v13853_v30 }
0x1590   : > { %v6544_v42 = vmul.f32 0.5, %v6543_v41 }
0x1591   : > { %v6613_v24 = vmul.f32 %v13922_v27, %v6602_v45 }
0x1592   : > { %v6545_v50 = vsub.f32 1.5, %v6544_v42 }
0x1593   : > { %v9609_v53 = vpop.eup %9608  ;;  %v6624_v16 = vadd.f32 %v13927_v37, %v6613_v24 }
0x1594   : > { %v6546_v4 = vmul.f32 %v9607_v35, %v6545_v50  ;;  %v6552_v58 = vmul.f32 %v9609_v53, %v6516_v57  ;;  %vm6558_vm6 = vweird.f32 %v9609_v53  ;;  %v8780_v57 = vld [vmem:[%s10898_s1 + $0x74] sm:$0xf0] }
0x1595   : > { %v13934_v23 = vpack.c.bf16 %v6624_v16, %v6623_v11  ;;  %vm6559_vm8 = vmor %vm6557_vm7, %vm6558_vm6  ;;  %v8530_v48 = vor.u32 %v8780_v57, %v8529_v12  ;;  %v8791_v57 = vld [vmem:[%s10901_s19 + $0x50] sm:$0xff] }
0x1596   : > { %v6553_v38 = vmul.f32 %v9609_v53, %v6552_v58  ;;  %v6550_v30 = vsel %vm6549_vm4, %v9607_v35, %v6546_v4  ;;  %v8776_v4 = vld [vmem:[%s10898_s1 + $0x54] sm:$0xf0]  ;;  %v8497_v58 = vld [vmem:[%s10898_s1 + $0x28] sm:$0xf] }
0x1597   : > { %8535 = vmatmul.msk.bf16.vlgmr.msra.gmra.mxu2 %vm2548_vm5, %v13934_v23  ;;  %8539 = vmatmul.msk.bf16.vlgmr.msra.gmra.mxu3 %vm2548_vm5, %v13934_v23  ;;  %v6603_v47 = vmul.f32 %v6550_v30, %v13862_v26  ;;  %v8784_v26 = vld [vmem:[%s10901_s19 + $0x18] sm:$0xff] }
0x1598   : > { %v6554_v15 = vmul.f32 0.5, %v6553_v38  ;;  %8547 = vmatmul.msk.bf16.vlgmr.msrb.gmra.mxu0 %vm2548_vm5, %v13934_v23  ;;  %7169 = vmatpush.bf16.msrb.mxu1 %v8784_v26  ;;  %v8772_v30 = vld [vmem:[%s10898_s1 + $0x34] sm:$0xf0]  ;;  %v8481_v26 = vld [vmem:[%s10898_s1 + $0x8] sm:$0xf] }
0x1599   : > { %v6614_v49 = vmul.f32 %v13922_v27, %v6603_v47  ;;  %6815 = vmatpush.bf16.msrb.mxu2 %v8530_v48  ;;  %v8498_v47 = vor.u32 %v8772_v30, %v8497_v58  ;;  %v13997_v48 = vld [vmem:[%s10858_s9] sm:$0xf] }
0x159a   : > { %v6555_v33 = vsub.f32 1.5, %v6554_v15  ;;  %v8783_v15 = vld [vmem:[%s10901_s19 + $0x10] sm:$0xff] }
0x159b   : > { %v6625_v6 = vadd.f32 %v13927_v37, %v6614_v49 }
0x159c   : > { %v6556_v25 = vmul.f32 %v9609_v53, %v6555_v33  ;;  %7170 = vmatpush.bf16.msrb.mxu1 %v8783_v15 }
0x159e   : > { %v6560_v18 = vsel %vm6559_vm8, %v9609_v53, %v6556_v25 }
0x159f   : > { %v6604_v43 = vmul.f32 %v6560_v18, %v13869_v21 }
0x15a1   : > { %v6615_v8 = vmul.f32 %v13922_v27, %v6604_v43 }
0x15a3   : > { %v6626_v22 = vadd.f32 %v13927_v37, %v6615_v8 }
0x15a5   : > { %v13948_v39 = vpack.c.bf16 %v6626_v22, %v6625_v6  ;;  %v8796_v22 = vld [vmem:[%s10901_s19 + $0x78] sm:$0xff] }
0x15a6   : > { %7194 = vmatpush.bf16.msrb.mxu3 %v8796_v22 }
0x15a7   : > { %8536 = vmatmul.msk.bf16.gmra.mxu2 %vm2548_vm5, %v13948_v39  ;;  %8540 = vmatmul.msk.bf16.gmra.mxu3 %vm2548_vm5, %v13948_v39 }
0x15a8   : > { %8548 = vmatmul.msk.bf16.gmra.mxu0 %vm2548_vm5, %v13948_v39 }
0x15bc   : > { %v6495_v21 = vpop.xlane.xlu1 %6494 }
0x15bd   : > { %v6509_v56 = vmul.f32 %v6495_v21, %v14356_v40  ;;  %v8768_v21 = vld [vmem:[%s10898_s1 + $0x14] sm:$0xf0] }
0x15bf   : > { %v6517_v9 = vadd.f32 1e-05, %v6509_v56 }
0x15c1   : > { %9610 = vrsqrt.f32 %v6517_v9  ;;  %vm6567_vm10 = vweird.f32 %v6517_v9 }
0x15c4   : > { %v6498_v44 = vpop.xlane.xlu0 %6497 }
0x15c5   : > { %v6510_v34 = vmul.f32 %v6498_v44, %v14356_v40  ;;  %v8795_v44 = vld [vmem:[%s10901_s19 + $0x70] sm:$0xff] }
0x15c6   : > { %7195 = vmatpush.bf16.msrb.mxu3 %v8795_v44 }
0x15c7   : > { %v9611_v7 = vpop.eup %9610  ;;  %v6518_v63 = vadd.f32 1e-05, %v6510_v34 }
0x15c8   : > { %v6562_v14 = vmul.f32 %v9611_v7, %v6517_v9  ;;  %vm6568_vm9 = vweird.f32 %v9611_v7  ;;  %v8482_v9 = vor.u32 %v8768_v21, %v8481_v26 }
0x15c9   : > { %9612 = vrsqrt.f32 %v6518_v63  ;;  %vm6569_vm11 = vmor %vm6567_vm10, %vm6568_vm9  ;;  %vm6577_vm13 = vweird.f32 %v6518_v63 }
0x15ca   : > { %v6563_v20 = vmul.f32 %v9611_v7, %v6562_v14  ;;  %v8794_v14 = vld [vmem:[%s10901_s19 + $0x68] sm:$0xff] }
0x15cb   : > { %7196 = vmatpush.bf16.msrb.mxu3 %v8794_v14 }
0x15cc   : > { %v6564_v36 = vmul.f32 0.5, %v6563_v20 }
0x15ce   : > { %v6565_v5 = vsub.f32 1.5, %v6564_v36 }
0x15cf   : > { %v9613_v62 = vpop.eup %9612 }
0x15d0   : > { %v6566_v0 = vmul.f32 %v9611_v7, %v6565_v5  ;;  %v6572_v51 = vmul.f32 %v9613_v62, %v6518_v63  ;;  %vm6578_vm12 = vweird.f32 %v9613_v62 }
0x15d1   : > { %vm6579_vm14 = vmor %vm6577_vm13, %vm6578_vm12 }
0x15d2   : > { %v6573_v1 = vmul.f32 %v9613_v62, %v6572_v51  ;;  %v6570_v59 = vsel %vm6569_vm11, %v9611_v7, %v6566_v0 }
0x15d3   : > { %v6605_v29 = vmul.f32 %v6570_v59, %v13877_v61  ;;  %v8792_v59 = vld [vmem:[%s10901_s19 + $0x58] sm:$0xff] }
0x15d4   : > { %v6574_v17 = vmul.f32 0.5, %v6573_v1 }
0x15d5   : > { %v6616_v45 = vmul.f32 %v13922_v27, %v6605_v29 }
0x15d6   : > { %v6575_v35 = vsub.f32 1.5, %v6574_v17 }
0x15d7   : > { %v6627_v61 = vadd.f32 %v13927_v37, %v6616_v45 }
0x15d8   : > { %v6576_v31 = vmul.f32 %v9613_v62, %v6575_v35 }
0x15da   : > { %v6580_v41 = vsel %vm6579_vm14, %v9613_v62, %v6576_v31  ;;  %v8793_v62 = vld [vmem:[%s10901_s19 + $0x60] sm:$0xff] }
0x15db   : > { %v6606_v10 = vmul.f32 %v6580_v41, %v13886_v28  ;;  %v8513_v28 = vld [vmem:[%s10898_s1 + $0x48] sm:$0xf]  ;;  %7197 = vmatpush.bf16.msrb.mxu3 %v8793_v62 }
0x15dc   : > { %v8514_v38 = vor.u32 %v8776_v4, %v8513_v28  ;;  %v8790_v41 = vld [vmem:[%s10901_s19 + $0x48] sm:$0xff] }
0x15dd   : > { %v6617_v42 = vmul.f32 %v13922_v27, %v6606_v10 }
0x15de   : > { %6816 = vmatpush.bf16.msrb.mxu2 %v8514_v38 }
0x15df   : > { %v6501_v24 = vpop.xlane.xlu2 %6500  ;;  %v6628_v50 = vadd.f32 %v13927_v37, %v6617_v42  ;;  %7198 = vmatpush.bf16.msrb.mxu3 %v8792_v59 }
0x15e0   : > { %v6511_v53 = vmul.f32 %v6501_v24, %v14356_v40 }
0x15e1   : > { %v13968_v11 = vpack.c.bf16 %v6628_v50, %v6627_v61 }
0x15e2   : > { %v6519_v16 = vadd.f32 1e-05, %v6511_v53  ;;  %6817 = vmatpush.bf16.msrb.mxu2 %v8498_v47 }
0x15e3   : > { %8537 = vmatmul.msk.bf16.gmra.mxu2 %vm2548_vm5, %v13968_v11  ;;  %8541 = vmatmul.msk.bf16.gmra.mxu3 %vm2548_vm5, %v13968_v11 }
0x15e4   : > { %8549 = vmatmul.msk.bf16.gmra.mxu0 %vm2548_vm5, %v13968_v11  ;;  %9614 = vrsqrt.f32 %v6519_v16  ;;  %vm6587_vm0 = vweird.f32 %v6519_v16  ;;  %7199 = vmatpush.bf16.msrb.mxu3 %v8791_v57 }
0x15e6   : > { %6818 = vmatpush.bf16.msrb.mxu2 %v8482_v9 }
0x15e8   : > { %7200 = vmatpush.bf16.msrb.mxu3 %v8790_v41 }
0x15ea   : > { %v9615_v33 = vpop.eup %9614 }
0x15eb   : > { %v6582_v25 = vmul.f32 %v9615_v33, %v6519_v16  ;;  %vm6588_vm15 = vweird.f32 %v9615_v33 }
0x15ec   : > { %vm6589_vm1 = vmor %vm6587_vm0, %vm6588_vm15 }
0x15ed   : > { %v6583_v18 = vmul.f32 %v9615_v33, %v6582_v25 }
0x15ef   : > { %v6584_v6 = vmul.f32 0.5, %v6583_v18  ;;  %v8782_v18 = vld [vmem:[%s10901_s19 + $0x8] sm:$0xff] }
0x15f0   : > { %7171 = vmatpush.bf16.msrb.mxu1 %v8782_v18 }
0x15f1   : > { %v6585_v56 = vsub.f32 1.5, %v6584_v6 }
0x15f3   : > { %v6504_v43 = vpop.xlane.xlu1 %6503  ;;  %v6586_v7 = vmul.f32 %v9615_v33, %v6585_v56  ;;  %v14020_v56 = vperm.slane %v13997_v48, 1 }
0x15f4   : > { %v6512_v49 = vmul.f32 %v6504_v43, %v14356_v40 }
0x15f5   : > { %v6590_v20 = vsel %vm6589_vm1, %v9615_v33, %v6586_v7 }
0x15f6   : > { %v6520_v8 = vadd.f32 1e-05, %v6512_v49  ;;  %v6607_v0 = vmul.f32 %v6590_v20, %v13893_v32 }
0x15f8   : > { %9616 = vrsqrt.f32 %v6520_v8  ;;  %vm6597_vm3 = vweird.f32 %v6520_v8  ;;  %v6618_v35 = vmul.f32 %v13922_v27, %v6607_v0 }
0x15fa   : > { %v6629_v29 = vadd.f32 %v13927_v37, %v6618_v35 }
0x15fe   : > { %v9617_v34 = vpop.eup %9616 }
0x15ff   : > { %v6592_v63 = vmul.f32 %v9617_v34, %v6520_v8  ;;  %vm6598_vm2 = vweird.f32 %v9617_v34 }
0x1600   : > { %vm6599_vm4 = vmor %vm6597_vm3, %vm6598_vm2 }
0x1601   : > { %v6593_v40 = vmul.f32 %v9617_v34, %v6592_v63 }
0x1603   : > { %v6594_v36 = vmul.f32 0.5, %v6593_v40 }
0x1605   : > { %v6595_v5 = vsub.f32 1.5, %v6594_v36 }
0x1607   : > { %v6596_v51 = vmul.f32 %v9617_v34, %v6595_v5 }
0x1609   : > { %v6600_v1 = vsel %vm6599_vm4, %v9617_v34, %v6596_v51 }
0x160a   : > { %v6608_v17 = vmul.f32 %v6600_v1, %v13912_v54  ;;  %v14007_v54 = vperm.slane %v13997_v48, 3 }
0x160c   : > { %v6619_v12 = vmul.f32 %v13922_v27, %v6608_v17 }
0x160e   : > { %v6630_v32 = vadd.f32 %v13927_v37, %v6619_v12  ;;  %v8789_v37 = vld [vmem:[%s10901_s19 + $0x40] sm:$0xff] }
0x160f   : > { %7201 = vmatpush.bf16.msrb.mxu3 %v8789_v37 }
0x1610   : > { %v13999_v31 = vpack.c.bf16 %v6630_v32, %v6629_v29 }
0x1612   : > { %8538 = vmatmul.msk.bf16.gmra.mxu2 %vm2548_vm5, %v13999_v31  ;;  %8542 = vmatmul.msk.bf16.gmra.mxu3 %vm2548_vm5, %v13999_v31 }
0x1613   : > { %8550 = vmatmul.msk.bf16.gmra.mxu0 %vm2548_vm5, %v13999_v31 }
0x1615   : > { %v6849_v27 = vpop.f32.mrf.mxu0 }
0x1616   : > { %v6850_v10 = vadd.f32 %v6849_v27, %v14007_v54 }
0x1618   : > { %v6886_v45 = vmul.f32 0.044715, %v6850_v10  ;;  %v6870_v9 = vmul.f32 0.5, %v6850_v10 }
0x161a   : > { %v6902_v42 = vmul.f32 %v6886_v45, %v6850_v10  ;;  %v6791_v4 = vpop.f32.mrf.mxu3 }
0x161b   : > { %v6792_v36 = vadd.f32 %v6791_v4, %v14020_v56 }
0x161c   : > { %v6918_v24 = vmul.f32 %v6902_v42, %v6850_v10 }
0x161d   : > { %v6851_v61 = vpop.f32.mrf.mxu0 }
0x161e   : > { %v6934_v50 = vadd.f32 %v6918_v24, %v6850_v10  ;;  %v6852_v53 = vadd.f32 %v6851_v61, %v14007_v54 }
0x1620   : > { %v6950_v16 = vmul.f32 0.7978846, %v6934_v50  ;;  %v6888_v28 = vmul.f32 0.044715, %v6852_v53  ;;  %v6872_v40 = vmul.f32 0.5, %v6852_v53 }
0x1622   : > { %v6904_v58 = vmul.f32 %v6888_v28, %v6852_v53  ;;  %8543 = vmatmul.msk.bf16.vlgmr.msrb.gmra.mxu2 %vm2548_vm5, %v13934_v23  ;;  %9618 = vtanh.f32 %v6950_v16  ;;  %v6793_v8 = vpop.f32.mrf.mxu3  ;;  %v14032_v16 = vpop.f32.mrf.mxu2 }
0x1623   : > { %v6794_v5 = vadd.f32 %v6793_v8, %v14020_v56 }
0x1624   : > { %v6920_v38 = vmul.f32 %v6904_v58, %v6852_v53 }
0x1625   : > { %v6854_v30 = vpop.f32.mrf.mxu0 }
0x1626   : > { %v6936_v15 = vadd.f32 %v6920_v38, %v6852_v53  ;;  %v6855_v33 = vadd.f32 %v6854_v30, %v14007_v54  ;;  %v8781_v38 = vld [vmem:[%s10901_s19] sm:$0xff]  ;;  %s14360_s19 = scalar_lea.vmem [#allocation26], %s10829_s24 }
0x1627   : > { %7172 = vmatpush.bf16.msrb.mxu1 %v8781_v38 }
0x1628   : > { %v6952_v47 = vmul.f32 0.7978846, %v6936_v15  ;;  %v6890_v25 = vmul.f32 0.044715, %v6855_v33  ;;  %v9619_v43 = vpop.eup %9618  ;;  %v6874_v32 = vmul.f32 0.5, %v6855_v33 }
0x1629   : > { %v6982_v22 = vadd.f32 1.0, %v9619_v43 }
0x162a   : > { %9620 = vtanh.f32 %v6952_v47  ;;  %v6906_v49 = vmul.f32 %v6890_v25, %v6855_v33  ;;  %v6796_v59 = vpop.f32.mrf.mxu3  ;;  %v14036_v30 = vpop.f32.mrf.mxu2 }
0x162b   : > { %v6998_v63 = vmul.f32 %v6982_v22, %v6870_v9  ;;  %v6797_v45 = vadd.f32 %v6796_v59, %v14020_v56 }
0x162c   : > { %v6922_v6 = vmul.f32 %v6906_v49, %v6855_v33 }
0x162d   : > { %v6856_v26 = vpop.f32.mrf.mxu0  ;;  %v7014_v51 = vmul.f32 %v6998_v63, %v6792_v36 }
0x162e   : > { %v6938_v21 = vadd.f32 %v6922_v6, %v6855_v33  ;;  %v6857_v23 = vadd.f32 %v6856_v26, %v14007_v54 }
0x1630   : > { %v9621_v44 = vpop.eup %9620  ;;  %v6954_v34 = vmul.f32 0.7978846, %v6938_v21  ;;  %v6892_v7 = vmul.f32 0.044715, %v6857_v23  ;;  %v6876_v37 = vmul.f32 0.5, %v6857_v23 }
0x1631   : > { %v6984_v14 = vadd.f32 1.0, %v9621_v44 }
0x1632   : > { %v6908_v20 = vmul.f32 %v6892_v7, %v6857_v23  ;;  %8544 = vmatmul.msk.bf16.gmra.mxu2 %vm2548_vm5, %v13948_v39  ;;  %9622 = vtanh.f32 %v6954_v34  ;;  %v6798_v39 = vpop.f32.mrf.mxu3  ;;  %v14039_v8 = vpop.f32.mrf.mxu2 }
0x1633   : > { %v7000_v62 = vmul.f32 %v6984_v14, %v6872_v40  ;;  %v6799_v42 = vadd.f32 %v6798_v39, %v14020_v56 }
0x1634   : > { %v6924_v0 = vmul.f32 %v6908_v20, %v6857_v23 }
0x1635   : > { %v7016_v1 = vmul.f32 %v7000_v62, %v6794_v5 }
0x1636   : > { %v6940_v17 = vadd.f32 %v6924_v0, %v6857_v23 }
0x1637   : > { %v7062_v35 = vpack.c.bf16 %v7016_v1, %v7014_v51 }
0x1638   : > { %v6956_v12 = vmul.f32 0.7978846, %v6940_v17  ;;  %v9623_v57 = vpop.eup %9622 }
0x1639   : > { %7202 = vmatmul.bf16.vlgmr.msrb.gmra.mxu3 %v7062_v35  ;;  %v6986_v29 = vadd.f32 1.0, %v9623_v57 }
0x163a   : > { %9624 = vtanh.f32 %v6956_v12  ;;  %v14041_v9 = vpop.f32.mrf.mxu2 }
0x163b   : > { %v7002_v27 = vmul.f32 %v6986_v29, %v6874_v32 }
0x163d   : > { %v7018_v61 = vmul.f32 %v7002_v27, %v6797_v45 }
0x1640   : > { %v9625_v41 = vpop.eup %9624 }
0x1641   : > { %v6988_v10 = vadd.f32 1.0, %v9625_v41 }
0x1642   : > { %8545 = vmatmul.msk.bf16.gmra.mxu2 %vm2548_vm5, %v13968_v11 }
0x1643   : > { %v7004_v24 = vmul.f32 %v6988_v10, %v6876_v37 }
0x1645   : > { %v7020_v50 = vmul.f32 %v7004_v24, %v6799_v42 }
0x1647   : > { %v7064_v53 = vpack.c.bf16 %v7020_v50, %v7018_v61 }
0x1649   : > { %7207 = vmatmul.bf16.gmra.mxu3 %v7064_v53  ;;  %v14056_v53 = vperm.slane %v13997_v48, 2 }
0x1652   : > { %8546 = vmatmul.msk.bf16.gmra.mxu2 %vm2548_vm5, %v13999_v31 }
0x1661   : > { %v6859_v28 = vpop.f32.mrf.mxu0 }
0x1662   : > { %v6860_v4 = vadd.f32 %v6859_v28, %v14007_v54 }
0x1664   : > { %v6894_v58 = vmul.f32 0.044715, %v6860_v4  ;;  %v6878_v44 = vmul.f32 0.5, %v6860_v4 }
0x1666   : > { %v6910_v11 = vmul.f32 %v6894_v58, %v6860_v4  ;;  %v6801_v6 = vpop.f32.mrf.mxu3  ;;  %v14045_v51 = vpop.f32.mrf.mxu2 }
0x1667   : > { %v6802_v20 = vadd.f32 %v6801_v6, %v14020_v56 }
0x1668   : > { %v6926_v15 = vmul.f32 %v6910_v11, %v6860_v4 }
0x1669   : > { %v6861_v33 = vpop.f32.mrf.mxu0 }
0x166a   : > { %v6942_v47 = vadd.f32 %v6926_v15, %v6860_v4  ;;  %v6862_v25 = vadd.f32 %v6861_v33, %v14007_v54 }
0x166c   : > { %v6958_v18 = vmul.f32 0.7978846, %v6942_v47  ;;  %v6896_v43 = vmul.f32 0.044715, %v6862_v25  ;;  %v6880_v40 = vmul.f32 0.5, %v6862_v25 }
0x166e   : > { %v6912_v49 = vmul.f32 %v6896_v43, %v6862_v25  ;;  %9626 = vtanh.f32 %v6958_v18  ;;  %v6803_v7 = vpop.f32.mrf.mxu3  ;;  %v14047_v59 = vpop.f32.mrf.mxu2 }
0x166f   : > { %v6804_v36 = vadd.f32 %v6803_v7, %v14020_v56 }
0x1670   : > { %v6928_v31 = vmul.f32 %v6912_v49, %v6862_v25 }
0x1672   : > { %v6944_v22 = vadd.f32 %v6928_v31, %v6862_v25 }
0x1674   : > { %v6960_v26 = vmul.f32 0.7978846, %v6944_v22  ;;  %v9627_v21 = vpop.eup %9626 }
0x1675   : > { %v6990_v23 = vadd.f32 1.0, %v9627_v21 }
0x1676   : > { %9628 = vtanh.f32 %v6960_v26 }
0x1677   : > { %v7006_v63 = vmul.f32 %v6990_v23, %v6878_v44 }
0x1679   : > { %v7022_v62 = vmul.f32 %v7006_v63, %v6802_v20 }
0x167c   : > { %v9629_v34 = vpop.eup %9628 }
0x167d   : > { %v6992_v14 = vadd.f32 1.0, %v9629_v34 }
0x167f   : > { %v7008_v5 = vmul.f32 %v6992_v14, %v6880_v40 }
0x1681   : > { %v7024_v0 = vmul.f32 %v7008_v5, %v6804_v36 }
0x1683   : > { %v7066_v1 = vpack.c.bf16 %v7024_v0, %v7022_v62 }
0x1685   : > { %7212 = vmatmul.bf16.gmra.mxu3 %v7066_v1 }
0x1690   : > { %v6864_v17 = vpop.f32.mrf.mxu0 }
0x1691   : > { %v6865_v35 = vadd.f32 %v6864_v17, %v14007_v54 }
0x1693   : > { %v6898_v12 = vmul.f32 0.044715, %v6865_v35  ;;  %v6882_v15 = vmul.f32 0.5, %v6865_v35 }
0x1695   : > { %v6914_v57 = vmul.f32 %v6898_v12, %v6865_v35  ;;  %v14050_v29 = vpop.f32.mrf.mxu2  ;;  %v6806_v61 = vpop.f32.mrf.mxu3 }
0x1696   : > { %v6807_v6 = vadd.f32 %v6806_v61, %v14020_v56 }
0x1697   : > { %v6930_v32 = vmul.f32 %v6914_v57, %v6865_v35 }
0x1698   : > { %v6866_v41 = vpop.f32.mrf.mxu0 }
0x1699   : > { %v6946_v39 = vadd.f32 %v6930_v32, %v6865_v35  ;;  %v6867_v27 = vadd.f32 %v6866_v41, %v14007_v54 }
0x169b   : > { %v6962_v37 = vmul.f32 0.7978846, %v6946_v39  ;;  %v6900_v10 = vmul.f32 0.044715, %v6867_v27  ;;  %v6884_v43 = vmul.f32 0.5, %v6867_v27 }
0x169d   : > { %v6916_v45 = vmul.f32 %v6900_v10, %v6867_v27  ;;  %v14053_v42 = vpop.f32.mrf.mxu2  ;;  %9630 = vtanh.f32 %v6962_v37  ;;  %v6808_v25 = vpop.f32.mrf.mxu3 }
0x169e   : > { %v6809_v26 = vadd.f32 %v6808_v25, %v14020_v56 }
0x169f   : > { %v6932_v24 = vmul.f32 %v6916_v45, %v6867_v27 }
0x16a1   : > { %v6948_v50 = vadd.f32 %v6932_v24, %v6867_v27  ;;  %v14065_v27 = vperm.slane %v13997_v48, 0 }
0x16a3   : > { %v6964_v28 = vmul.f32 0.7978846, %v6948_v50  ;;  %v9631_v4 = vpop.eup %9630 }
0x16a4   : > { %v6994_v11 = vadd.f32 1.0, %v9631_v4 }
0x16a5   : > { %9632 = vtanh.f32 %v6964_v28  ;;  %v6820_v58 = vpop.f32.mrf.mxu2 }
0x16a6   : > { %v6821_v38 = vadd.f32 %v6820_v58, %v14056_v53  ;;  %v7010_v18 = vmul.f32 %v6994_v11, %v6882_v15  ;;  %v6763_v58 = vadd.f32 %v14032_v16, %v14065_v27  ;;  %v6765_v11 = vadd.f32 %v14036_v30, %v14065_v27 }
0x16a8   : > { %v6885_v54 = vmul.f32 0.044715, %v6821_v38  ;;  %v7026_v34 = vmul.f32 %v7010_v18, %v6807_v6  ;;  %v6869_v37 = vmul.f32 0.5, %v6821_v38 }
0x16aa   : > { %v6901_v33 = vmul.f32 %v6885_v54, %v6821_v38 }
0x16ab   : > { %v9633_v47 = vpop.eup %9632 }
0x16ac   : > { %v6996_v49 = vadd.f32 1.0, %v9633_v47  ;;  %v6917_v31 = vmul.f32 %v6901_v33, %v6821_v38 }
0x16ad   : > { %v6822_v22 = vpop.f32.mrf.mxu2 }
0x16ae   : > { %v7012_v21 = vmul.f32 %v6996_v49, %v6884_v43  ;;  %v6933_v23 = vadd.f32 %v6917_v31, %v6821_v38  ;;  %v6823_v44 = vadd.f32 %v6822_v22, %v14056_v53 }
0x16b0   : > { %v7028_v7 = vmul.f32 %v7012_v21, %v6809_v26  ;;  %v6949_v63 = vmul.f32 0.7978846, %v6933_v23  ;;  %v6887_v40 = vmul.f32 0.044715, %v6823_v44  ;;  %v6871_v50 = vmul.f32 0.5, %v6823_v44 }
0x16b2   : > { %v6903_v14 = vmul.f32 %v6887_v40, %v6823_v44  ;;  %v7068_v20 = vpack.c.bf16 %v7028_v7, %v7026_v34  ;;  %9634 = vtanh.f32 %v6949_v63 }
0x16b4   : > { %v6919_v36 = vmul.f32 %v6903_v14, %v6823_v44  ;;  %7217 = vmatmul.bf16.gmra.mxu3 %v7068_v20 }
0x16b5   : > { %v6825_v5 = vpop.f32.mrf.mxu2 }
0x16b6   : > { %v6935_v62 = vadd.f32 %v6919_v36, %v6823_v44  ;;  %v6826_v0 = vadd.f32 %v6825_v5, %v14056_v53  ;;  %v6768_v36 = vadd.f32 %v14039_v8, %v14065_v27  ;;  %v6770_v5 = vadd.f32 %v14041_v9, %v14065_v27 }
0x16b8   : > { %v6951_v1 = vmul.f32 0.7978846, %v6935_v62  ;;  %v6889_v17 = vmul.f32 0.044715, %v6826_v0  ;;  %v9635_v56 = vpop.eup %9634  ;;  %v6873_v23 = vmul.f32 0.5, %v6826_v0 }
0x16b9   : > { %v6981_v57 = vadd.f32 1.0, %v9635_v56 }
0x16ba   : > { %9636 = vtanh.f32 %v6951_v1  ;;  %v6905_v35 = vmul.f32 %v6889_v17, %v6826_v0 }
0x16bb   : > { %v6997_v61 = vmul.f32 %v6981_v57, %v6869_v37 }
0x16bc   : > { %v6921_v12 = vmul.f32 %v6905_v35, %v6826_v0 }
0x16bd   : > { %v6827_v32 = vpop.f32.mrf.mxu2  ;;  %v7013_v48 = vmul.f32 %v6997_v61, %v6763_v58 }
0x16be   : > { %v6828_v41 = vadd.f32 %v6827_v32, %v14056_v53  ;;  %v6937_v39 = vadd.f32 %v6921_v12, %v6826_v0 }
0x16c0   : > { %v9637_v10 = vpop.eup %9636  ;;  %v6891_v45 = vmul.f32 0.044715, %v6828_v41  ;;  %v6953_v24 = vmul.f32 0.7978846, %v6937_v39  ;;  %v6875_v63 = vmul.f32 0.5, %v6828_v41 }
0x16c1   : > { %v6983_v28 = vadd.f32 1.0, %v9637_v10 }
0x16c2   : > { %v6907_v4 = vmul.f32 %v6891_v45, %v6828_v41  ;;  %9638 = vtanh.f32 %v6953_v24 }
0x16c3   : > { %v6999_v54 = vmul.f32 %v6983_v28, %v6871_v50 }
0x16c4   : > { %v6923_v15 = vmul.f32 %v6907_v4, %v6828_v41 }
0x16c5   : > { %v6830_v33 = vpop.f32.mrf.mxu2  ;;  %v7015_v47 = vmul.f32 %v6999_v54, %v6765_v11 }
0x16c6   : > { %v6831_v38 = vadd.f32 %v6830_v33, %v14056_v53  ;;  %v6939_v25 = vadd.f32 %v6923_v15, %v6828_v41  ;;  %v6773_v33 = vadd.f32 %v14045_v51, %v14065_v27 }
0x16c7   : > { %v7061_v18 = vpack.c.bf16 %v7015_v47, %v7013_v48  ;;  %v6775_v48 = vadd.f32 %v14047_v59, %v14065_v27  ;;  %v6778_v59 = vadd.f32 %v14050_v29, %v14065_v27 }
0x16c8   : > { %v6893_v43 = vmul.f32 0.044715, %v6831_v38  ;;  %v6955_v49 = vmul.f32 0.7978846, %v6939_v25  ;;  %v9639_v31 = vpop.eup %9638  ;;  %v6877_v61 = vmul.f32 0.5, %v6831_v38 }
0x16c9   : > { %7173 = vmatmul.bf16.vlgmr.msrb.gmra.mxu1 %v7061_v18  ;;  %v6985_v26 = vadd.f32 1.0, %v9639_v31 }
0x16ca   : > { %v6909_v6 = vmul.f32 %v6893_v43, %v6831_v38  ;;  %9640 = vtanh.f32 %v6955_v49 }
0x16cb   : > { %v7001_v14 = vmul.f32 %v6985_v26, %v6873_v23 }
0x16cc   : > { %v6925_v16 = vmul.f32 %v6909_v6, %v6831_v38 }
0x16cd   : > { %v6832_v22 = vpop.f32.mrf.mxu2  ;;  %v7017_v56 = vmul.f32 %v7001_v14, %v6768_v36  ;;  %v9055_v36 = vld [vmem:[%s14360_s19] ss:$0 sm:$0xff] }
0x16ce   : > { %v6833_v30 = vadd.f32 %v6832_v22, %v14056_v53  ;;  %v6941_v21 = vadd.f32 %v6925_v16, %v6831_v38 }
0x16d0   : > { %v9641_v44 = vpop.eup %9640  ;;  %v6895_v34 = vmul.f32 0.044715, %v6833_v30  ;;  %v6957_v7 = vmul.f32 0.7978846, %v6941_v21  ;;  %v6879_v58 = vmul.f32 0.5, %v6833_v30  ;;  %v6780_v21 = vadd.f32 %v14053_v42, %v14065_v27 }
0x16d1   : > { %v6987_v40 = vadd.f32 1.0, %v9641_v44 }
0x16d2   : > { %v6911_v20 = vmul.f32 %v6895_v34, %v6833_v30  ;;  %9642 = vtanh.f32 %v6957_v7 }
0x16d3   : > { %v7003_v62 = vmul.f32 %v6987_v40, %v6875_v63  ;;  %v7203_v63 = vpop.f32.mrf.mxu3 }
0x16d4   : > { %v6927_v1 = vmul.f32 %v6911_v20, %v6833_v30 }
0x16d5   : > { %v6835_v17 = vpop.f32.mrf.mxu2  ;;  %v7019_v35 = vmul.f32 %v7003_v62, %v6770_v5 }
0x16d6   : > { %v6836_v0 = vadd.f32 %v6835_v17, %v14056_v53  ;;  %v6943_v12 = vadd.f32 %v6927_v1, %v6833_v30 }
0x16d7   : > { %v7063_v57 = vpack.c.bf16 %v7019_v35, %v7017_v56 }
0x16d8   : > { %v6897_v32 = vmul.f32 0.044715, %v6836_v0  ;;  %v6959_v41 = vmul.f32 0.7978846, %v6943_v12  ;;  %v9643_v39 = vpop.eup %9642  ;;  %v6881_v16 = vmul.f32 0.5, %v6836_v0 }
0x16d9   : > { %7178 = vmatmul.bf16.gmra.mxu1 %v7063_v57  ;;  %v6989_v45 = vadd.f32 1.0, %v9643_v39 }
0x16da   : > { %v6913_v37 = vmul.f32 %v6897_v32, %v6836_v0  ;;  %9644 = vtanh.f32 %v6959_v41 }
0x16db   : > { %v7005_v54 = vmul.f32 %v6989_v45, %v6877_v61  ;;  %v7205_v40 = vpop.f32.mrf.mxu3 }
0x16dc   : > { %v6929_v8 = vmul.f32 %v6913_v37, %v6836_v0 }
0x16dd   : > { %v6837_v10 = vpop.f32.mrf.mxu2  ;;  %v7021_v18 = vmul.f32 %v7005_v54, %v6773_v33 }
0x16de   : > { %v6838_v9 = vadd.f32 %v6837_v10, %v14056_v53  ;;  %v6945_v24 = vadd.f32 %v6929_v8, %v6836_v0 }
0x16e0   : > { %v9645_v50 = vpop.eup %9644  ;;  %v6899_v28 = vmul.f32 0.044715, %v6838_v9  ;;  %v6961_v4 = vmul.f32 0.7978846, %v6945_v24  ;;  %v6883_v26 = vmul.f32 0.5, %v6838_v9 }
0x16e1   : > { %v6991_v11 = vadd.f32 1.0, %v9645_v50 }
0x16e2   : > { %v6915_v15 = vmul.f32 %v6899_v28, %v6838_v9  ;;  %9646 = vtanh.f32 %v6961_v4 }
0x16e3   : > { %v7007_v47 = vmul.f32 %v6991_v11, %v6879_v58  ;;  %v7208_v17 = vpop.f32.mrf.mxu3 }
0x16e4   : > { %v6931_v25 = vmul.f32 %v6915_v15, %v6838_v9 }
0x16e5   : > { %v7023_v53 = vmul.f32 %v7007_v47, %v6775_v48 }
0x16e6   : > { %v6947_v43 = vadd.f32 %v6931_v25, %v6838_v9 }
0x16e7   : > { %v7065_v38 = vpack.c.bf16 %v7023_v53, %v7021_v18 }
0x16e8   : > { %v6963_v49 = vmul.f32 0.7978846, %v6947_v43  ;;  %v9647_v31 = vpop.eup %9646 }
0x16e9   : > { %7183 = vmatmul.bf16.gmra.mxu1 %v7065_v38  ;;  %v6993_v6 = vadd.f32 1.0, %v9647_v31 }
0x16ea   : > { %9648 = vtanh.f32 %v6963_v49 }
0x16eb   : > { %v7009_v30 = vmul.f32 %v6993_v6, %v6881_v16  ;;  %v7210_v12 = vpop.f32.mrf.mxu3 }
0x16ed   : > { %v7025_v44 = vmul.f32 %v7009_v30, %v6778_v59 }
0x16f0   : > { %v9649_v22 = vpop.eup %9648 }
0x16f1   : > { %v6995_v51 = vadd.f32 1.0, %v9649_v22 }
0x16f3   : > { %v7011_v23 = vmul.f32 %v6995_v51, %v6883_v26 }
0x16f5   : > { %v7027_v34 = vmul.f32 %v7011_v23, %v6780_v21 }
0x16f7   : > { %v7067_v7 = vpack.c.bf16 %v7027_v34, %v7025_v44 }
0x16f9   : > { %7188 = vmatmul.bf16.gmra.mxu1 %v7067_v7 }
0x1708   : > { %v7213_v39 = vpop.f32.mrf.mxu3 }
0x1710   : > { %v7215_v9 = vpop.f32.mrf.mxu3 }
0x1737   : > { %v7218_v28 = vpop.f32.mrf.mxu3 }
0x1746   : > { %v7174_v14 = vpop.f32.mrf.mxu1 }
0x1747   : > { %v7204_v20 = vadd.f32 %v7203_v63, %v7174_v14 }
0x1749   : > { %v7223_v5 = vadd.f32 %v7204_v20, %v13801_v60 }
0x174b   : > { %v14090_v62 = vadd.f32 %v9055_v36, %v7223_v5 }
0x174e   : > { %v7176_v1 = vpop.f32.mrf.mxu1 }
0x174f   : > { %v7206_v29 = vadd.f32 %v7205_v40, %v7176_v1 }
0x1751   : > { %v7224_v42 = vadd.f32 %v7206_v29, %v13806_v13 }
0x1753   : > { %v14093_v27 = vadd.f32 %v9055_v36, %v7224_v42 }
0x1756   : > { %v7179_v56 = vpop.f32.mrf.mxu1 }
0x1757   : > { %v7209_v35 = vadd.f32 %v7208_v17, %v7179_v56 }
0x1759   : > { %v7225_v0 = vadd.f32 %v7209_v35, %v13811_v2 }
0x175b   : > { %v14096_v57 = vadd.f32 %v9055_v36, %v7225_v0 }
0x175e   : > { %v7181_v32 = vpop.f32.mrf.mxu1 }
0x175f   : > { %v7211_v41 = vadd.f32 %v7210_v12, %v7181_v32 }
0x1761   : > { %v7226_v60 = vadd.f32 %v7211_v41, %v13816_v52  ;;  %v7220_v52 = vpop.f32.mrf.mxu3 }
0x1763   : > { %v7238_v37 = vadd.f32 %v9055_v36, %v7226_v60 }
0x1766   : > { %v7184_v8 = vpop.f32.mrf.mxu1 }
0x1767   : > { %v7214_v10 = vadd.f32 %v7213_v39, %v7184_v8 }
0x1769   : > { %v7227_v45 = vadd.f32 %v7214_v10, %v13824_v19 }
0x176b   : > { %v7239_v13 = vadd.f32 %v9055_v36, %v7227_v45 }
0x176e   : > { %v7186_v24 = vpop.f32.mrf.mxu1 }
0x176f   : > { %v7216_v61 = vadd.f32 %v7215_v9, %v7186_v24 }
0x1771   : > { %v7228_v50 = vadd.f32 %v7216_v61, %v13829_v3 }
0x1773   : > { %v7240_v2 = vadd.f32 %v9055_v36, %v7228_v50 }
0x1776   : > { %v7189_v4 = vpop.f32.mrf.mxu1 }
0x1777   : > { %v7219_v58 = vadd.f32 %v7218_v28, %v7189_v4 }
0x1779   : > { %v7229_v11 = vadd.f32 %v7219_v58, %v13834_v46 }
0x177b   : > { %v7241_v54 = vadd.f32 %v9055_v36, %v7229_v11 }
0x177e   : > { %v7191_v15 = vpop.f32.mrf.mxu1 }
0x177f   : > { %v7221_v33 = vadd.f32 %v7220_v52, %v7191_v15  ;;  %7246 = sbr.rel (%p8615_p9) target bundleno = 6028 (0x178c), region = 208 }
0x1781   : > { %v7230_v48 = vadd.f32 %v7221_v33, %v13850_v55 }
0x1783   : > { %v7242_v47 = vadd.f32 %v9055_v36, %v7230_v48 }
0x1784   : > { %7247 = vst.msk [vmem:[%s10880_s8] sm:$0xff] %vm2548_vm5, %v14090_v62 }
0x1785   : > { %7248 = vst.msk [vmem:[%s10880_s8 + $0x8] sm:$0xff] %vm2548_vm5, %v14093_v27 }
0x1786   : > { %7249 = vst.msk [vmem:[%s10880_s8 + $0x10] sm:$0xff] %vm2548_vm5, %v14096_v57 }
0x1787   : > { %7250 = vst.msk [vmem:[%s10880_s8 + $0x18] sm:$0xff] %vm2548_vm5, %v7238_v37 }
0x1788   : > { %7251 = vst.msk [vmem:[%s10880_s8 + $0x20] sm:$0xff] %vm2548_vm5, %v7239_v13 }
0x1789   : > { %7252 = vst.msk [vmem:[%s10880_s8 + $0x28] sm:$0xff] %vm2548_vm5, %v7240_v2 }
0x178a   : > { %7253 = vst.msk [vmem:[%s10880_s8 + $0x30] sm:$0xff] %vm2548_vm5, %v7241_v54 }
0x178b   : > { %7254 = vst.msk [vmem:[%s10880_s8 + $0x38] sm:$0xff] %vm2548_vm5, %v7242_v47 }
0x178c PF: > { %s14361_s24 = sld [smem:[#allocation68_spill]] }
0x1792   : > { %p8616_p4 = scmp.ne.s32.totalorder %s14361_s24, 1 }
0x1794   : > { %7258 = sbr.rel (%p8616_p4) target bundleno = 6204 (0x183c), region = 212 }
0x1799   : > { %v8800_v19 = vld [vmem:[#allocation11 + $0x18] sm:$0xff]  ;;  %v8799_v3 = vld [vmem:[#allocation11 + $0x10] sm:$0xff]  ;;  %v8798_v46 = vld [vmem:[#allocation11 + $0x8] sm:$0xff]  ;;  %v7267_v25 = vpack.c.bf16 %v14093_v27, %v14090_v62  ;;  %v7268_v18 = vpack.c.bf16 %v7238_v37, %v14096_v57  ;;  %v7269_v53 = vpack.c.bf16 %v7240_v2, %v7239_v13  ;;  %v7270_v43 = vpack.c.bf16 %v7242_v47, %v7241_v54 }
0x179a   : > { %7315 = vmatpush.bf16.msra.mxu0 %v8800_v19  ;;  %8813 = vmatpush.bf16.msra.mxu1 %v8800_v19  ;;  %v8797_v55 = vld [vmem:[#allocation11] sm:$0xff]  ;;  %v7340_v31 = vld [vmem:[%s10871_s3] sm:$0xff]  ;;  %v7341_v40 = vld [vmem:[%s10871_s3 + $0x8] sm:$0xff] }
0x179b   : > { %8814 = vmatpush.bf16.msra.mxu2 %v8800_v19  ;;  %8815 = vmatpush.bf16.msra.mxu3 %v8800_v19  ;;  %v9723_v38 = vld [vmem:[#allocation13] ss:$0 sm:$0xff]  ;;  %v7344_v21 = vld [vmem:[%s10871_s3 + $0x20] sm:$0xff]  ;;  %v7343_v20 = vld [vmem:[%s10871_s3 + $0x18] sm:$0xff] }
0x179c   : > { %v7342_v16 = vld [vmem:[%s10871_s3 + $0x10] sm:$0xff]  ;;  %v7345_v27 = vld [vmem:[%s10871_s3 + $0x28] sm:$0xff]  ;;  %v7347_v35 = vld [vmem:[%s10871_s3 + $0x38] sm:$0xff] }
0x179d   : > { %v7346_v44 = vld [vmem:[%s10871_s3 + $0x30] sm:$0xff] }
0x179e   : > { %7316 = vmatpush.bf16.msra.mxu0 %v8799_v3  ;;  %8816 = vmatpush.bf16.msra.mxu1 %v8799_v3 }
0x179f   : > { %8817 = vmatpush.bf16.msra.mxu2 %v8799_v3  ;;  %8818 = vmatpush.bf16.msra.mxu3 %v8799_v3 }
0x17a2   : > { %7317 = vmatpush.bf16.msra.mxu0 %v8798_v46  ;;  %8819 = vmatpush.bf16.msra.mxu1 %v8798_v46 }
0x17a3   : > { %8820 = vmatpush.bf16.msra.mxu2 %v8798_v46  ;;  %8821 = vmatpush.bf16.msra.mxu3 %v8798_v46 }
0x17a6   : > { %7318 = vmatpush.bf16.msra.mxu0 %v8797_v55  ;;  %8822 = vmatpush.bf16.msra.mxu1 %v8797_v55 }
0x17a7   : > { %8823 = vmatpush.bf16.msra.mxu2 %v8797_v55  ;;  %8824 = vmatpush.bf16.msra.mxu3 %v8797_v55 }
0x17a9   : > { %8633 = vmatmul.msk.bf16.vlgmr.msra.gmra.mxu0 %vm2548_vm5, %v7267_v25  ;;  %8634 = vmatmul.msk.bf16.vlgmr.msra.gmra.mxu1 %vm2548_vm5, %v7268_v18 }
0x17aa   : > { %8635 = vmatmul.msk.bf16.vlgmr.msra.gmra.mxu2 %vm2548_vm5, %v7269_v53  ;;  %8636 = vmatmul.msk.bf16.vlgmr.msra.gmra.mxu3 %vm2548_vm5, %v7270_v43 }
0x1826   : > { %v7320_v49 = vpop.f32.mrf.mxu0  ;;  %v7325_v6 = vpop.f32.mrf.mxu1 }
0x1827   : > { %v7321_v22 = vadd.f32 %v9723_v38, %v7320_v49  ;;  %v7326_v26 = vadd.f32 %v9723_v38, %v7325_v6 }
0x1829   : > { %v7348_v51 = vadd.f32 %v7340_v31, %v7321_v22  ;;  %v7350_v30 = vadd.f32 %v7342_v16, %v7326_v26 }
0x182b   : > { %7356 = vst.msk [vmem:[%s10880_s8] sm:$0xff] %vm2548_vm5, %v7348_v51 }
0x182c   : > { %7358 = vst.msk [vmem:[%s10880_s8 + $0x10] sm:$0xff] %vm2548_vm5, %v7350_v30 }
0x182d   : > { %v7330_v59 = vpop.f32.mrf.mxu2  ;;  %v7335_v23 = vpop.f32.mrf.mxu3 }
0x182e   : > { %v7331_v34 = vadd.f32 %v9723_v38, %v7330_v59  ;;  %v7336_v7 = vadd.f32 %v9723_v38, %v7335_v23  ;;  %v7322_v63 = vpop.f32.mrf.mxu0  ;;  %v7327_v14 = vpop.f32.mrf.mxu1 }
0x182f   : > { %v7323_v36 = vadd.f32 %v9723_v38, %v7322_v63  ;;  %v7328_v5 = vadd.f32 %v9723_v38, %v7327_v14 }
0x1830   : > { %v7352_v62 = vadd.f32 %v7344_v21, %v7331_v34  ;;  %v7354_v1 = vadd.f32 %v7346_v44, %v7336_v7 }
0x1831   : > { %v7349_v29 = vadd.f32 %v7341_v40, %v7323_v36  ;;  %v7351_v17 = vadd.f32 %v7343_v20, %v7328_v5 }
0x1832   : > { %7360 = vst.msk [vmem:[%s10880_s8 + $0x20] sm:$0xff] %vm2548_vm5, %v7352_v62 }
0x1833   : > { %7362 = vst.msk [vmem:[%s10880_s8 + $0x30] sm:$0xff] %vm2548_vm5, %v7354_v1 }
0x1834   : > { %7357 = vst.msk [vmem:[%s10880_s8 + $0x8] sm:$0xff] %vm2548_vm5, %v7349_v29 }
0x1835   : > { %7359 = vst.msk [vmem:[%s10880_s8 + $0x18] sm:$0xff] %vm2548_vm5, %v7351_v17  ;;  %v7332_v42 = vpop.f32.mrf.mxu2  ;;  %v7337_v56 = vpop.f32.mrf.mxu3 }
0x1836   : > { %v7333_v0 = vadd.f32 %v9723_v38, %v7332_v42  ;;  %v7338_v12 = vadd.f32 %v9723_v38, %v7337_v56 }
0x1838   : > { %v7353_v57 = vadd.f32 %v7345_v27, %v7333_v0  ;;  %v7355_v32 = vadd.f32 %v7347_v35, %v7338_v12 }
0x183a   : > { %7361 = vst.msk [vmem:[%s10880_s8 + $0x28] sm:$0xff] %vm2548_vm5, %v7353_v57 }
0x183b   : > { %7363 = vst.msk [vmem:[%s10880_s8 + $0x38] sm:$0xff] %vm2548_vm5, %v7355_v32 }
0x183c PF: > { %s14362_s9 = sld [smem:[#allocation71_spill]]  ;;  %s14369_s11 = smov %s10294_s16 }
0x183d   : > { %s14363_s7 = sld [smem:[#allocation66_spill]] }
0x183e   : > { %s14364_s10 = sld [smem:[#allocation67_spill]] }
0x183f   : > { %s14365_s0 = sld [smem:[#allocation77_spill]] }
0x1840   : > { %s14366_s15 = sld [smem:[#allocation70_spill]] }
0x1841   : > { %s14367_s2 = sld [smem:[#allocation75_spill]] }
0x1842   : > { %s88_s22 = sadd.s32 1, %s14362_s9   ;;  %s14368_s18 = sld [smem:[#allocation76_spill]] }
0x1843   : > { %p85_p7 = scmp.ge.s32.totalorder %s88_s22, 6  }
0x1845   :  { %87 = sbr.rel (!%p85_p7) target bundleno = 83 (0x53), region = 371 }
0x1847   : > { %s14370_s16 = smov %s14367_s2 }
0x184a   :  { %7386 = vsyncpa [#allocation4], 1 }
0x184b   :  { %7388 = vsyncpa [#allocation4 + $0x1], 1 }
0x184c   :  { %7389 = vsyncpa [#allocation6], 1 }
0x184d   :  { %7390 = vsyncpa [#allocation9], 1 }
0x184e   :  { %7391 = vsyncpa [#allocation12], 1 }
0x184f   :  { %7392 = vsyncpa [#allocation15], 1 }
0x1850   :  { %7394 = vsyncpa [#allocation15 + $0x1], 1 }
0x1851   :  { %7395 = vsyncpa [#allocation18], 1 }
0x1852   :  { %7397 = vsyncpa [#allocation18 + $0x1], 1 }
0x1853   :  { %7398 = vsyncpa [#allocation21], 1 }
0x1854   :  { %7400 = vsyncpa [#allocation21 + $0x1], 1 }
0x1855   :  { %7401 = vsyncpa [#allocation24], 1 }
0x1856   :  { %7403 = vsyncpa [#allocation24 + $0x1], 1 }
0x1857   :  { %7404 = vsyncpa [#allocation27], 1 }
0x1858   :  { %7406 = vsyncpa [#allocation27 + $0x1], 1 }

</bundles_post_ra>
